<compile_context>
chip_gen: v6e
topology: v6e:2x2x1
jax: 0.10.0
libtpu: 0.0.40
codegen_flags: <defaults>
</compile_context>

<pallas_src>
import functools

import jax
import jax.numpy as jnp
from jax.experimental import pallas as pl
from jax.experimental.pallas import tpu as pltpu


def _round_up(x, m):
    return (x + m - 1) // m * m


# ---------------------------------------------------------------------------
# Fused whole-encoder kernel.
# ---------------------------------------------------------------------------
def _encoder_kernel(x_ref, w3_ref, w4_ref, w1_ref, b_ref, o_ref, xbuf, pbuf,
                    *, dilations, stride_t):
    B, t0, CP = x_ref.shape
    f32, bf16 = jnp.float32, jnp.bfloat16

    def fill_pbuf(vals_f32, t_in, pad):
        # Stage a zero-padded (and, for pre-relu convs, already rectified)
        # copy of the activation ONCE per conv; all K tap slices below read
        # from it.  Padding is handled here in VMEM, never in HBM.
        if pad > 0:
            z = jnp.zeros((B, pad, CP), f32)
            pbuf[:, 0:pad, :] = z
            pbuf[:, pad + t_in:pad + t_in + pad, :] = z
        pbuf[:, pad:pad + t_in, :] = vals_f32

    def conv_from_pbuf(get_w, k, dil, stride, t_out, b_i):
        # out[:, t, :] = sum_k x_pad[:, stride*t + k*dil, :] @ W[k] + b
        # (batch, time) rows flattened into one fat M dim; bf16 MXU operands,
        # f32 accumulation.
        acc = jnp.zeros((B * t_out, CP), f32)
        for kk in range(k):
            start = kk * dil
            if stride == 1:
                xk = pbuf[:, start:start + t_out, :]
            else:
                xk = pbuf[:, pl.ds(start, t_out, stride=stride), :]
            xk = xk.reshape(B * t_out, CP).astype(bf16)
            acc = acc + jnp.dot(xk, get_w(kk), preferred_element_type=f32)
        return acc + b_ref[b_i]                       # bias: (1, CP) f32

    w3_i = w4_i = w1_i = b_i = 0
    t = t0

    # --- conv1 (k3, s1, p1) + relu ------------------------------------------
    fill_pbuf(x_ref[...], t, 1)
    acc = conv_from_pbuf(lambda kk, i=w3_i: w3_ref[i, kk], 3, 1, 1, t, b_i)
    xbuf[:, 0:t, :] = jnp.maximum(acc, 0.0).reshape(B, t, CP)
    w3_i += 1
    b_i += 1

    for blk_dils in dilations:                        # down_t stages
        # --- down conv (k=2*stride_t, stride=stride_t, pad=stride_t//2) ------
        k_dn = 2 * stride_t
        pad = stride_t // 2
        t_out = (t + 2 * pad - k_dn) // stride_t + 1
        fill_pbuf(xbuf[:, 0:t, :], t, pad)
        acc = conv_from_pbuf(lambda kk, i=w4_i: w4_ref[i, kk], k_dn, 1,
                             stride_t, t_out, b_i)
        xbuf[:, 0:t_out, :] = acc.reshape(B, t_out, CP)
        w4_i += 1
        b_i += 1
        t = t_out

        # --- Resnet1D blocks: x = x + conv1x1(relu(conv3_dil(relu(x)))) ------
        for dil in blk_dils:
            # conv A: dilated k3, pad=dil; pre-relu hoisted into the staging copy
            fill_pbuf(jnp.maximum(xbuf[:, 0:t, :], 0.0), t, dil)
            h = conv_from_pbuf(lambda kk, i=w3_i: w3_ref[i, kk], 3, dil, 1,
                               t, b_i)
            w3_i += 1
            b_i += 1
            # relu(h) feeds the 1x1 conv; stage it in pbuf so xbuf still holds
            # the residual input x.
            pbuf[:, 0:t, :] = jnp.maximum(h, 0.0).reshape(B, t, CP)
            # conv B: 1x1 + bias + residual (residual add in f32)
            acc = conv_from_pbuf(lambda kk, i=w1_i: w1_ref[i], 1, 1, 1, t, b_i)
            acc = acc + xbuf[:, 0:t, :].reshape(B * t, CP)
            xbuf[:, 0:t, :] = acc.reshape(B, t, CP)
            w1_i += 1
            b_i += 1

    # --- conv2 (k3, s1, p1) ---------------------------------------------------
    fill_pbuf(xbuf[:, 0:t, :], t, 1)
    acc = conv_from_pbuf(lambda kk, i=w3_i: w3_ref[i, kk], 3, 1, 1, t, b_i)
    o_ref[...] = acc.reshape(B, t, CP).astype(o_ref.dtype)


# ---------------------------------------------------------------------------
# Wrapper: layout / weight packing (parameter prep only; all conv compute,
# padding and down-sampling happen inside the single fused kernel).
# ---------------------------------------------------------------------------
def encoder_forward_pallas(x_ncl, params, *, batch_block=None):
    n, c_in, t0 = x_ncl.shape
    w_c1, b_c1 = params["conv1"]
    w_c2, b_c2 = params["conv2"]
    layers = params["layers"]
    width = w_c1.shape[0]
    c_out = w_c2.shape[0]
    down_t = len(layers)
    # filter_t = 2*stride_t in the original module, so stride_t is recoverable
    # from the down-conv weight shape (no hard-coded stride).
    stride_t = (layers[0]["down"][0].shape[2] // 2) if down_t else 2

    cp = _round_up(max(c_in, width, c_out), 128)      # lane-dense channel dim

    def prep_w(w):                         # (Cout, Cin, K) -> (K, CP, CP) bf16
        wt = jnp.transpose(w, (2, 1, 0))
        wt = jnp.pad(wt, ((0, 0), (0, cp - wt.shape[1]), (0, cp - wt.shape[2])))
        return wt.astype(jnp.bfloat16)

    def prep_b(b):                         # (Cout,) -> (1, CP) f32
        return jnp.pad(b, (0, cp - b.shape[0])).astype(jnp.float32)[None, :]

    # Pack weights/biases in execution order into stacked, VMEM-resident tensors.
    w3_list, w4_list, w1_list, b_list = [], [], [], []
    dilations = []
    w3_list.append(prep_w(w_c1))
    b_list.append(prep_b(b_c1))
    for layer in layers:
        wd, bd = layer["down"]
        w4_list.append(prep_w(wd))
        b_list.append(prep_b(bd))
        dils = []
        for (w1, b1, dil), (w2, b2) in layer["blocks"]:
            w3_list.append(prep_w(w1))
            b_list.append(prep_b(b1))
            w1_list.append(prep_w(w2)[0])
            b_list.append(prep_b(b2))
            dils.append(int(dil))
        dilations.append(tuple(dils))
    w3_list.append(prep_w(w_c2))
    b_list.append(prep_b(b_c2))

    w3 = jnp.stack(w3_list)                                    # (n3, 3, CP, CP)
    w4 = (jnp.stack(w4_list) if w4_list
          else jnp.zeros((1, 2 * stride_t, cp, cp), jnp.bfloat16))
    w1 = (jnp.stack(w1_list) if w1_list
          else jnp.zeros((1, cp, cp), jnp.bfloat16))
    bias = jnp.stack(b_list)                                   # (n_convs, 1, CP)

    # Output length after the down-sampling stack + largest time pad needed.
    t = t0
    pad_max = 1
    for dils in dilations:
        pad_max = max(pad_max, stride_t // 2, *dils)
        t = (t + 2 * (stride_t // 2) - 2 * stride_t) // stride_t + 1
    t_final = t

    # NCL -> NLC, pad channels to CP (padded lanes stay exactly zero end-to-end).
    x_nlc = jnp.transpose(x_ncl, (0, 2, 1))
    x_nlc = jnp.pad(x_nlc, ((0, 0), (0, 0), (0, cp - c_in))).astype(jnp.float32)

    b_blk = n if batch_block is None else batch_block
    assert n % b_blk == 0, (n, b_blk)

    kernel = functools.partial(_encoder_kernel, dilations=tuple(dilations),
                               stride_t=stride_t)

    out = pl.pallas_call(
        kernel,
        out_shape=jax.ShapeDtypeStruct((n, t_final, cp), jnp.float32),
        grid=(n // b_blk,),
        in_specs=[
            pl.BlockSpec((b_blk, t0, cp), lambda i: (i, 0, 0)),
            pl.BlockSpec(w3.shape, lambda i: (0, 0, 0, 0)),
            pl.BlockSpec(w4.shape, lambda i: (0, 0, 0, 0)),
            pl.BlockSpec(w1.shape, lambda i: (0, 0, 0)),
            pl.BlockSpec(bias.shape, lambda i: (0, 0, 0)),
        ],
        out_specs=pl.BlockSpec((b_blk, t_final, cp), lambda i: (i, 0, 0)),
        scratch_shapes=[
            pltpu.VMEM((b_blk, t0, cp), jnp.float32),                  # activation x
            pltpu.VMEM((b_blk, t0 + 2 * pad_max, cp), jnp.float32),    # padded taps
        ],
        compiler_params=pltpu.CompilerParams(
            dimension_semantics=("parallel",),
            vmem_limit_bytes=48 * 1024 * 1024),
    )(x_nlc, w3, w4, w1, bias)

    out = out[:, :, :c_out]                        # drop channel (lane) padding
    return jnp.transpose(out, (0, 2, 1))           # NLC -> NCL


# ---------------------------------------------------------------------------
# Pure-JAX reference (NCL, mirrors the PyTorch module exactly, all f32)
# ---------------------------------------------------------------------------
def _conv1d_ref(x, w, b, stride=1, padding=0, dilation=1):
    out = jax.lax.conv_general_dilated(
        x, w, window_strides=(stride,), padding=[(padding, padding)],
        rhs_dilation=(dilation,), dimension_numbers=("NCH", "OIH", "NCH"))
    return out + b[None, :, None]


def encoder_forward_ref(x, params):
    w, b = params["conv1"]
    x = jax.nn.relu(_conv1d_ref(x, w, b, stride=1, padding=1))
    for layer in params["layers"]:
        w, b = layer["down"]
        st = w.shape[2] // 2
        x = _conv1d_ref(x, w, b, stride=st, padding=st // 2)
        for (w1, b1, dil), (w2, b2) in layer["blocks"]:
            h = _conv1d_ref(jax.nn.relu(x), w1, b1, 1, dil, dil)
            x = x + _conv1d_ref(jax.nn.relu(h), w2, b2, 1, 0, 1)
    w, b = params["conv2"]
    return _conv1d_ref(x, w, b, stride=1, padding=1)


# ---------------------------------------------------------------------------
# Deterministic parameter init (shapes follow nn.Conv1d in the module)
# ---------------------------------------------------------------------------
def _init_conv(key, c_out, c_in, k):
    kw, kb = jax.random.split(key)
    scale = 1.0 / (c_in * k) ** 0.5
    w = jax.random.normal(kw, (c_out, c_in, k), jnp.float32) * scale
    b = jax.random.normal(kb, (c_out,), jnp.float32) * 0.05
    return w, b


def make_encoder_params(key, input_emb_width, output_emb_width, down_t,
                        stride_t, width, depth, dilation_growth_rate):
    keys = iter(jax.random.split(key, 4 + down_t * (1 + 2 * depth)))
    params = {"conv1": _init_conv(next(keys), width, input_emb_width, 3),
              "layers": []}
    filter_t = stride_t * 2
    for _ in range(down_t):
        layer = {"down": _init_conv(next(keys), width, width, filter_t),
                 "blocks": []}
        # Resnet1D: dilations g**d for d in range(depth), reverse_dilation=True
        dilations = [dilation_growth_rate ** d for d in range(depth)][::-1]
        for dil in dilations:
            w1, b1 = _init_conv(next(keys), width, width, 3)
            w2, b2 = _init_conv(next(keys), width, width, 1)
            layer["blocks"].append(((w1, b1, dil), (w2, b2)))
        params["layers"].append(layer)
    params["conv2"] = _init_conv(next(keys), output_emb_width, width, 3)
    return params


if __name__ == "__main__":
    # Small config consistent with the module's defaults (down_t=3, depth=3,
    # g=3, stride_t=2) but with reduced channel widths / sequence length.
    N, C_IN, T = 2, 4, 64
    WIDTH, C_OUT = 32, 32
    DOWN_T, STRIDE_T, DEPTH, GROWTH = 3, 2, 3, 3

    root = jax.random.PRNGKey(0)
    k_param, k_x = jax.random.split(root)
    params = make_encoder_params(k_param, C_IN, C_OUT, DOWN_T, STRIDE_T,
                                 WIDTH, DEPTH, GROWTH)
    x = jax.random.normal(k_x, (N, C_IN, T), jnp.float32)   # NCL, like PyTorch

    out = jax.block_until_ready(encoder_forward_pallas(x, params))
    ref = jax.block_until_ready(encoder_forward_ref(x, params))

    assert out.shape == (N, C_OUT, T // (STRIDE_T ** DOWN_T)), out.shape
    scale = float(jnp.max(jnp.abs(ref)))
    max_err = float(jnp.max(jnp.abs(out - ref)))
    # bf16 MXU operands with f32 accumulation, compared against an all-f32 ref.
    assert max_err <= 0.08 * scale + 1e-3, (max_err, scale)

    print("KERNEL_OK")
</pallas_src>

<mosaic_0001>
module attributes {stable_mosaic.version = 11 : i64} {
  func.func @_encoder_kernel(%arg0: i32, %arg1: memref<2x64x128xf32, #tpu.memory_space<vmem>>, %arg2: memref<11x3x128x128xbf16, #tpu.memory_space<vmem>>, %arg3: memref<3x4x128x128xbf16, #tpu.memory_space<vmem>>, %arg4: memref<9x128x128xbf16, #tpu.memory_space<vmem>>, %arg5: memref<23x1x128xf32, #tpu.memory_space<vmem>>, %arg6: memref<2x8x128xf32, #tpu.memory_space<vmem>>, %arg7: memref<2x64x128xf32, #tpu.memory_space<vmem>>, %arg8: memref<2x82x128xf32, #tpu.memory_space<vmem>>) attributes {dimension_semantics = [#tpu.dimension_semantics<parallel>], iteration_bounds = array<i64: 1>, scalar_prefetch = 0 : i64, scratch_operands = 2 : i64, tpu.core_type = #tpu.core_type<tc>, window_params = [{transform_indices = @transform_0, window_bounds = array<i64: 2, 64, 128>}, {pipeline_mode = #tpu.pipeline_mode<synchronous>, transform_indices = @transform_1, window_bounds = array<i64: 11, 3, 128, 128>}, {pipeline_mode = #tpu.pipeline_mode<synchronous>, transform_indices = @transform_2, window_bounds = array<i64: 3, 4, 128, 128>}, {pipeline_mode = #tpu.pipeline_mode<synchronous>, transform_indices = @transform_3, window_bounds = array<i64: 9, 128, 128>}, {pipeline_mode = #tpu.pipeline_mode<synchronous>, transform_indices = @transform_4, window_bounds = array<i64: 23, 1, 128>}, {transform_indices = @transform_5, window_bounds = array<i64: 2, 8, 128>}]} {
    %c0 = arith.constant 0 : index
    %c0_0 = arith.constant 0 : index
    %c0_1 = arith.constant 0 : index
    %0 = vector.load %arg1[%c0, %c0_0, %c0_1] : memref<2x64x128xf32, #tpu.memory_space<vmem>>, vector<2x64x128xf32>
    %cst = arith.constant 0.000000e+00 : f32
    %1 = vector.broadcast %cst : f32 to vector<2x1x128xf32>
    %c0_2 = arith.constant 0 : index
    %c0_3 = arith.constant 0 : index
    %c0_4 = arith.constant 0 : index
    %2 = vector.load %arg8[%c0_2, %c0_3, %c0_4] : memref<2x82x128xf32, #tpu.memory_space<vmem>>, vector<2x1x128xf32>
    tpu.vector_store %arg8[%c0_2, %c0_3, %c0_4], %1 {strides = array<i32>} : memref<2x82x128xf32, #tpu.memory_space<vmem>>, vector<2x1x128xf32>,
    %c0_5 = arith.constant 0 : index
    %c65 = arith.constant 65 : index
    %c0_6 = arith.constant 0 : index
    %3 = vector.load %arg8[%c0_5, %c65, %c0_6] : memref<2x82x128xf32, #tpu.memory_space<vmem>>, vector<2x1x128xf32>
    tpu.vector_store %arg8[%c0_5, %c65, %c0_6], %1 {strides = array<i32>} : memref<2x82x128xf32, #tpu.memory_space<vmem>>, vector<2x1x128xf32>,
    %c0_7 = arith.constant 0 : index
    %c1 = arith.constant 1 : index
    %c0_8 = arith.constant 0 : index
    %4 = vector.load %arg8[%c0_7, %c1, %c0_8] : memref<2x82x128xf32, #tpu.memory_space<vmem>>, vector<2x64x128xf32>
    tpu.vector_store %arg8[%c0_7, %c1, %c0_8], %0 {strides = array<i32>} : memref<2x82x128xf32, #tpu.memory_space<vmem>>, vector<2x64x128xf32>,
    %cst_9 = arith.constant 0.000000e+00 : f32
    %5 = vector.broadcast %cst_9 : f32 to vector<128x128xf32>
    %c0_10 = arith.constant 0 : index
    %c0_11 = arith.constant 0 : index
    %c0_12 = arith.constant 0 : index
    %6 = vector.load %arg8[%c0_10, %c0_11, %c0_12] : memref<2x82x128xf32, #tpu.memory_space<vmem>>, vector<2x64x128xf32>
    %7 = vector.shape_cast %6 : vector<2x64x128xf32> to vector<128x128xf32>
    %8 = arith.truncf %7 : vector<128x128xf32> to vector<128x128xbf16>
    %c0_13 = arith.constant 0 : index
    %c0_14 = arith.constant 0 : index
    %c0_15 = arith.constant 0 : index
    %c0_16 = arith.constant 0 : index
    %9 = vector.load %arg2[%c0_13, %c0_14, %c0_15, %c0_16] : memref<11x3x128x128xbf16, #tpu.memory_space<vmem>>, vector<1x1x128x128xbf16>
    %10 = vector.shape_cast %9 : vector<1x1x128x128xbf16> to vector<128x128xbf16>
    %cst_17 = arith.constant dense<0.000000e+00> : vector<128x128xf32>
    %11 = tpu.matmul %8, %10, %cst_17 {dimension_numbers = #tpu.dot_dimension_numbers<[1], [0], [0], [1], [0, 0, 1, 1], [], []>} : vector<128x128xbf16>, vector<128x128xbf16>, vector<128x128xf32> -> vector<128x128xf32>
    %12 = arith.addf %5, %11 : vector<128x128xf32>
    %c0_18 = arith.constant 0 : index
    %c1_19 = arith.constant 1 : index
    %c0_20 = arith.constant 0 : index
    %13 = vector.load %arg8[%c0_18, %c1_19, %c0_20] : memref<2x82x128xf32, #tpu.memory_space<vmem>>, vector<2x64x128xf32>
    %14 = vector.shape_cast %13 : vector<2x64x128xf32> to vector<128x128xf32>
    %15 = arith.truncf %14 : vector<128x128xf32> to vector<128x128xbf16>
    %c0_21 = arith.constant 0 : index
    %c1_22 = arith.constant 1 : index
    %c0_23 = arith.constant 0 : index
    %c0_24 = arith.constant 0 : index
    %16 = vector.load %arg2[%c0_21, %c1_22, %c0_23, %c0_24] : memref<11x3x128x128xbf16, #tpu.memory_space<vmem>>, vector<1x1x128x128xbf16>
    %17 = vector.shape_cast %16 : vector<1x1x128x128xbf16> to vector<128x128xbf16>
    %cst_25 = arith.constant dense<0.000000e+00> : vector<128x128xf32>
    %18 = tpu.matmul %15, %17, %cst_25 {dimension_numbers = #tpu.dot_dimension_numbers<[1], [0], [0], [1], [0, 0, 1, 1], [], []>} : vector<128x128xbf16>, vector<128x128xbf16>, vector<128x128xf32> -> vector<128x128xf32>
    %19 = arith.addf %12, %18 : vector<128x128xf32>
    %c0_26 = arith.constant 0 : index
    %c2 = arith.constant 2 : index
    %c0_27 = arith.constant 0 : index
    %20 = vector.load %arg8[%c0_26, %c2, %c0_27] : memref<2x82x128xf32, #tpu.memory_space<vmem>>, vector<2x64x128xf32>
    %21 = vector.shape_cast %20 : vector<2x64x128xf32> to vector<128x128xf32>
    %22 = arith.truncf %21 : vector<128x128xf32> to vector<128x128xbf16>
    %c0_28 = arith.constant 0 : index
    %c2_29 = arith.constant 2 : index
    %c0_30 = arith.constant 0 : index
    %c0_31 = arith.constant 0 : index
    %23 = vector.load %arg2[%c0_28, %c2_29, %c0_30, %c0_31] : memref<11x3x128x128xbf16, #tpu.memory_space<vmem>>, vector<1x1x128x128xbf16>
    %24 = vector.shape_cast %23 : vector<1x1x128x128xbf16> to vector<128x128xbf16>
    %cst_32 = arith.constant dense<0.000000e+00> : vector<128x128xf32>
    %25 = tpu.matmul %22, %24, %cst_32 {dimension_numbers = #tpu.dot_dimension_numbers<[1], [0], [0], [1], [0, 0, 1, 1], [], []>} : vector<128x128xbf16>, vector<128x128xbf16>, vector<128x128xf32> -> vector<128x128xf32>
    %26 = arith.addf %19, %25 : vector<128x128xf32>
    %c0_33 = arith.constant 0 : index
    %c0_34 = arith.constant 0 : index
    %c0_35 = arith.constant 0 : index
    %27 = vector.load %arg5[%c0_33, %c0_34, %c0_35] : memref<23x1x128xf32, #tpu.memory_space<vmem>>, vector<1x1x128xf32>
    %28 = vector.shape_cast %27 : vector<1x1x128xf32> to vector<1x128xf32>
    %29 = vector.broadcast %28 : vector<1x128xf32> to vector<128x128xf32>
    %30 = arith.addf %26, %29 : vector<128x128xf32>
    %cst_36 = arith.constant 0.000000e+00 : f32
    %31 = vector.broadcast %cst_36 : f32 to vector<128x128xf32>
    %32 = arith.maximumf %30, %31 : vector<128x128xf32>
    %33 = vector.shape_cast %32 : vector<128x128xf32> to vector<2x64x128xf32>
    %c0_37 = arith.constant 0 : index
    %c0_38 = arith.constant 0 : index
    %c0_39 = arith.constant 0 : index
    %34 = vector.load %arg7[%c0_37, %c0_38, %c0_39] : memref<2x64x128xf32, #tpu.memory_space<vmem>>, vector<2x64x128xf32>
    tpu.vector_store %arg7[%c0_37, %c0_38, %c0_39], %33 {strides = array<i32>} : memref<2x64x128xf32, #tpu.memory_space<vmem>>, vector<2x64x128xf32>,
    %c0_40 = arith.constant 0 : index
    %c0_41 = arith.constant 0 : index
    %c0_42 = arith.constant 0 : index
    %35 = vector.load %arg7[%c0_40, %c0_41, %c0_42] : memref<2x64x128xf32, #tpu.memory_space<vmem>>, vector<2x64x128xf32>
    %cst_43 = arith.constant 0.000000e+00 : f32
    %36 = vector.broadcast %cst_43 : f32 to vector<2x1x128xf32>
    %c0_44 = arith.constant 0 : index
    %c0_45 = arith.constant 0 : index
    %c0_46 = arith.constant 0 : index
    %37 = vector.load %arg8[%c0_44, %c0_45, %c0_46] : memref<2x82x128xf32, #tpu.memory_space<vmem>>, vector<2x1x128xf32>
    tpu.vector_store %arg8[%c0_44, %c0_45, %c0_46], %36 {strides = array<i32>} : memref<2x82x128xf32, #tpu.memory_space<vmem>>, vector<2x1x128xf32>,
    %c0_47 = arith.constant 0 : index
    %c65_48 = arith.constant 65 : index
    %c0_49 = arith.constant 0 : index
    %38 = vector.load %arg8[%c0_47, %c65_48, %c0_49] : memref<2x82x128xf32, #tpu.memory_space<vmem>>, vector<2x1x128xf32>
    tpu.vector_store %arg8[%c0_47, %c65_48, %c0_49], %36 {strides = array<i32>} : memref<2x82x128xf32, #tpu.memory_space<vmem>>, vector<2x1x128xf32>,
    %c0_50 = arith.constant 0 : index
    %c1_51 = arith.constant 1 : index
    %c0_52 = arith.constant 0 : index
    %39 = vector.load %arg8[%c0_50, %c1_51, %c0_52] : memref<2x82x128xf32, #tpu.memory_space<vmem>>, vector<2x64x128xf32>
    tpu.vector_store %arg8[%c0_50, %c1_51, %c0_52], %35 {strides = array<i32>} : memref<2x82x128xf32, #tpu.memory_space<vmem>>, vector<2x64x128xf32>,
    %cst_53 = arith.constant 0.000000e+00 : f32
    %40 = vector.broadcast %cst_53 : f32 to vector<64x128xf32>
    %c0_54 = arith.constant 0 : index
    %c0_55 = arith.constant 0 : index
    %c0_56 = arith.constant 0 : index
    %41 = tpu.strided_load %arg8[%c0_54, %c0_55, %c0_56] {strides = array<i32: 1, 2, 1>} : memref<2x82x128xf32, #tpu.memory_space<vmem>>, vector<2x32x128xf32>
    %42 = vector.shape_cast %41 : vector<2x32x128xf32> to vector<64x128xf32>
    %43 = arith.truncf %42 : vector<64x128xf32> to vector<64x128xbf16>
    %c0_57 = arith.constant 0 : index
    %c0_58 = arith.constant 0 : index
    %c0_59 = arith.constant 0 : index
    %c0_60 = arith.constant 0 : index
    %44 = vector.load %arg3[%c0_57, %c0_58, %c0_59, %c0_60] : memref<3x4x128x128xbf16, #tpu.memory_space<vmem>>, vector<1x1x128x128xbf16>
    %45 = vector.shape_cast %44 : vector<1x1x128x128xbf16> to vector<128x128xbf16>
    %cst_61 = arith.constant dense<0.000000e+00> : vector<64x128xf32>
    %46 = tpu.matmul %43, %45, %cst_61 {dimension_numbers = #tpu.dot_dimension_numbers<[1], [0], [0], [1], [0, 0, 1, 1], [], []>} : vector<64x128xbf16>, vector<128x128xbf16>, vector<64x128xf32> -> vector<64x128xf32>
    %47 = arith.addf %40, %46 : vector<64x128xf32>
    %c0_62 = arith.constant 0 : index
    %c1_63 = arith.constant 1 : index
    %c0_64 = arith.constant 0 : index
    %48 = tpu.strided_load %arg8[%c0_62, %c1_63, %c0_64] {strides = array<i32: 1, 2, 1>} : memref<2x82x128xf32, #tpu.memory_space<vmem>>, vector<2x32x128xf32>
    %49 = vector.shape_cast %48 : vector<2x32x128xf32> to vector<64x128xf32>
    %50 = arith.truncf %49 : vector<64x128xf32> to vector<64x128xbf16>
    %c0_65 = arith.constant 0 : index
    %c1_66 = arith.constant 1 : index
    %c0_67 = arith.constant 0 : index
    %c0_68 = arith.constant 0 : index
    %51 = vector.load %arg3[%c0_65, %c1_66, %c0_67, %c0_68] : memref<3x4x128x128xbf16, #tpu.memory_space<vmem>>, vector<1x1x128x128xbf16>
    %52 = vector.shape_cast %51 : vector<1x1x128x128xbf16> to vector<128x128xbf16>
    %cst_69 = arith.constant dense<0.000000e+00> : vector<64x128xf32>
    %53 = tpu.matmul %50, %52, %cst_69 {dimension_numbers = #tpu.dot_dimension_numbers<[1], [0], [0], [1], [0, 0, 1, 1], [], []>} : vector<64x128xbf16>, vector<128x128xbf16>, vector<64x128xf32> -> vector<64x128xf32>
    %54 = arith.addf %47, %53 : vector<64x128xf32>
    %c0_70 = arith.constant 0 : index
    %c2_71 = arith.constant 2 : index
    %c0_72 = arith.constant 0 : index
    %55 = tpu.strided_load %arg8[%c0_70, %c2_71, %c0_72] {strides = array<i32: 1, 2, 1>} : memref<2x82x128xf32, #tpu.memory_space<vmem>>, vector<2x32x128xf32>
    %56 = vector.shape_cast %55 : vector<2x32x128xf32> to vector<64x128xf32>
    %57 = arith.truncf %56 : vector<64x128xf32> to vector<64x128xbf16>
    %c0_73 = arith.constant 0 : index
    %c2_74 = arith.constant 2 : index
    %c0_75 = arith.constant 0 : index
    %c0_76 = arith.constant 0 : index
    %58 = vector.load %arg3[%c0_73, %c2_74, %c0_75, %c0_76] : memref<3x4x128x128xbf16, #tpu.memory_space<vmem>>, vector<1x1x128x128xbf16>
    %59 = vector.shape_cast %58 : vector<1x1x128x128xbf16> to vector<128x128xbf16>
    %cst_77 = arith.constant dense<0.000000e+00> : vector<64x128xf32>
    %60 = tpu.matmul %57, %59, %cst_77 {dimension_numbers = #tpu.dot_dimension_numbers<[1], [0], [0], [1], [0, 0, 1, 1], [], []>} : vector<64x128xbf16>, vector<128x128xbf16>, vector<64x128xf32> -> vector<64x128xf32>
    %61 = arith.addf %54, %60 : vector<64x128xf32>
    %c0_78 = arith.constant 0 : index
    %c3 = arith.constant 3 : index
    %c0_79 = arith.constant 0 : index
    %62 = tpu.strided_load %arg8[%c0_78, %c3, %c0_79] {strides = array<i32: 1, 2, 1>} : memref<2x82x128xf32, #tpu.memory_space<vmem>>, vector<2x32x128xf32>
    %63 = vector.shape_cast %62 : vector<2x32x128xf32> to vector<64x128xf32>
    %64 = arith.truncf %63 : vector<64x128xf32> to vector<64x128xbf16>
    %c0_80 = arith.constant 0 : index
    %c3_81 = arith.constant 3 : index
    %c0_82 = arith.constant 0 : index
    %c0_83 = arith.constant 0 : index
    %65 = vector.load %arg3[%c0_80, %c3_81, %c0_82, %c0_83] : memref<3x4x128x128xbf16, #tpu.memory_space<vmem>>, vector<1x1x128x128xbf16>
    %66 = vector.shape_cast %65 : vector<1x1x128x128xbf16> to vector<128x128xbf16>
    %cst_84 = arith.constant dense<0.000000e+00> : vector<64x128xf32>
    %67 = tpu.matmul %64, %66, %cst_84 {dimension_numbers = #tpu.dot_dimension_numbers<[1], [0], [0], [1], [0, 0, 1, 1], [], []>} : vector<64x128xbf16>, vector<128x128xbf16>, vector<64x128xf32> -> vector<64x128xf32>
    %68 = arith.addf %61, %67 : vector<64x128xf32>
    %c1_85 = arith.constant 1 : index
    %c0_86 = arith.constant 0 : index
    %c0_87 = arith.constant 0 : index
    %69 = vector.load %arg5[%c1_85, %c0_86, %c0_87] : memref<23x1x128xf32, #tpu.memory_space<vmem>>, vector<1x1x128xf32>
    %70 = vector.shape_cast %69 : vector<1x1x128xf32> to vector<1x128xf32>
    %71 = vector.broadcast %70 : vector<1x128xf32> to vector<64x128xf32>
    %72 = arith.addf %68, %71 : vector<64x128xf32>
    %73 = vector.shape_cast %72 : vector<64x128xf32> to vector<2x32x128xf32>
    %c0_88 = arith.constant 0 : index
    %c0_89 = arith.constant 0 : index
    %c0_90 = arith.constant 0 : index
    %74 = vector.load %arg7[%c0_88, %c0_89, %c0_90] : memref<2x64x128xf32, #tpu.memory_space<vmem>>, vector<2x32x128xf32>
    tpu.vector_store %arg7[%c0_88, %c0_89, %c0_90], %73 {strides = array<i32>} : memref<2x64x128xf32, #tpu.memory_space<vmem>>, vector<2x32x128xf32>,
    %c0_91 = arith.constant 0 : index
    %c0_92 = arith.constant 0 : index
    %c0_93 = arith.constant 0 : index
    %75 = vector.load %arg7[%c0_91, %c0_92, %c0_93] : memref<2x64x128xf32, #tpu.memory_space<vmem>>, vector<2x32x128xf32>
    %cst_94 = arith.constant 0.000000e+00 : f32
    %76 = vector.broadcast %cst_94 : f32 to vector<2x32x128xf32>
    %77 = arith.maximumf %75, %76 : vector<2x32x128xf32>
    %cst_95 = arith.constant 0.000000e+00 : f32
    %78 = vector.broadcast %cst_95 : f32 to vector<2x9x128xf32>
    %c0_96 = arith.constant 0 : index
    %c0_97 = arith.constant 0 : index
    %c0_98 = arith.constant 0 : index
    %79 = vector.load %arg8[%c0_96, %c0_97, %c0_98] : memref<2x82x128xf32, #tpu.memory_space<vmem>>, vector<2x9x128xf32>
    tpu.vector_store %arg8[%c0_96, %c0_97, %c0_98], %78 {strides = array<i32>} : memref<2x82x128xf32, #tpu.memory_space<vmem>>, vector<2x9x128xf32>,
    %c0_99 = arith.constant 0 : index
    %c41 = arith.constant 41 : index
    %c0_100 = arith.constant 0 : index
    %80 = vector.load %arg8[%c0_99, %c41, %c0_100] : memref<2x82x128xf32, #tpu.memory_space<vmem>>, vector<2x9x128xf32>
    tpu.vector_store %arg8[%c0_99, %c41, %c0_100], %78 {strides = array<i32>} : memref<2x82x128xf32, #tpu.memory_space<vmem>>, vector<2x9x128xf32>,
    %c0_101 = arith.constant 0 : index
    %c9 = arith.constant 9 : index
    %c0_102 = arith.constant 0 : index
    %81 = vector.load %arg8[%c0_101, %c9, %c0_102] : memref<2x82x128xf32, #tpu.memory_space<vmem>>, vector<2x32x128xf32>
    tpu.vector_store %arg8[%c0_101, %c9, %c0_102], %77 {strides = array<i32>} : memref<2x82x128xf32, #tpu.memory_space<vmem>>, vector<2x32x128xf32>,
    %cst_103 = arith.constant 0.000000e+00 : f32
    %82 = vector.broadcast %cst_103 : f32 to vector<64x128xf32>
    %c0_104 = arith.constant 0 : index
    %c0_105 = arith.constant 0 : index
    %c0_106 = arith.constant 0 : index
    %83 = vector.load %arg8[%c0_104, %c0_105, %c0_106] : memref<2x82x128xf32, #tpu.memory_space<vmem>>, vector<2x32x128xf32>
    %84 = vector.shape_cast %83 : vector<2x32x128xf32> to vector<64x128xf32>
    %85 = arith.truncf %84 : vector<64x128xf32> to vector<64x128xbf16>
    %c1_107 = arith.constant 1 : index
    %c0_108 = arith.constant 0 : index
    %c0_109 = arith.constant 0 : index
    %c0_110 = arith.constant 0 : index
    %86 = vector.load %arg2[%c1_107, %c0_108, %c0_109, %c0_110] : memref<11x3x128x128xbf16, #tpu.memory_space<vmem>>, vector<1x1x128x128xbf16>
    %87 = vector.shape_cast %86 : vector<1x1x128x128xbf16> to vector<128x128xbf16>
    %cst_111 = arith.constant dense<0.000000e+00> : vector<64x128xf32>
    %88 = tpu.matmul %85, %87, %cst_111 {dimension_numbers = #tpu.dot_dimension_numbers<[1], [0], [0], [1], [0, 0, 1, 1], [], []>} : vector<64x128xbf16>, vector<128x128xbf16>, vector<64x128xf32> -> vector<64x128xf32>
    %89 = arith.addf %82, %88 : vector<64x128xf32>
    %c0_112 = arith.constant 0 : index
    %c9_113 = arith.constant 9 : index
    %c0_114 = arith.constant 0 : index
    %90 = vector.load %arg8[%c0_112, %c9_113, %c0_114] : memref<2x82x128xf32, #tpu.memory_space<vmem>>, vector<2x32x128xf32>
    %91 = vector.shape_cast %90 : vector<2x32x128xf32> to vector<64x128xf32>
    %92 = arith.truncf %91 : vector<64x128xf32> to vector<64x128xbf16>
    %c1_115 = arith.constant 1 : index
    %c1_116 = arith.constant 1 : index
    %c0_117 = arith.constant 0 : index
    %c0_118 = arith.constant 0 : index
    %93 = vector.load %arg2[%c1_115, %c1_116, %c0_117, %c0_118] : memref<11x3x128x128xbf16, #tpu.memory_space<vmem>>, vector<1x1x128x128xbf16>
    %94 = vector.shape_cast %93 : vector<1x1x128x128xbf16> to vector<128x128xbf16>
    %cst_119 = arith.constant dense<0.000000e+00> : vector<64x128xf32>
    %95 = tpu.matmul %92, %94, %cst_119 {dimension_numbers = #tpu.dot_dimension_numbers<[1], [0], [0], [1], [0, 0, 1, 1], [], []>} : vector<64x128xbf16>, vector<128x128xbf16>, vector<64x128xf32> -> vector<64x128xf32>
    %96 = arith.addf %89, %95 : vector<64x128xf32>
    %c0_120 = arith.constant 0 : index
    %c18 = arith.constant 18 : index
    %c0_121 = arith.constant 0 : index
    %97 = vector.load %arg8[%c0_120, %c18, %c0_121] : memref<2x82x128xf32, #tpu.memory_space<vmem>>, vector<2x32x128xf32>
    %98 = vector.shape_cast %97 : vector<2x32x128xf32> to vector<64x128xf32>
    %99 = arith.truncf %98 : vector<64x128xf32> to vector<64x128xbf16>
    %c1_122 = arith.constant 1 : index
    %c2_123 = arith.constant 2 : index
    %c0_124 = arith.constant 0 : index
    %c0_125 = arith.constant 0 : index
    %100 = vector.load %arg2[%c1_122, %c2_123, %c0_124, %c0_125] : memref<11x3x128x128xbf16, #tpu.memory_space<vmem>>, vector<1x1x128x128xbf16>
    %101 = vector.shape_cast %100 : vector<1x1x128x128xbf16> to vector<128x128xbf16>
    %cst_126 = arith.constant dense<0.000000e+00> : vector<64x128xf32>
    %102 = tpu.matmul %99, %101, %cst_126 {dimension_numbers = #tpu.dot_dimension_numbers<[1], [0], [0], [1], [0, 0, 1, 1], [], []>} : vector<64x128xbf16>, vector<128x128xbf16>, vector<64x128xf32> -> vector<64x128xf32>
    %103 = arith.addf %96, %102 : vector<64x128xf32>
    %c2_127 = arith.constant 2 : index
    %c0_128 = arith.constant 0 : index
    %c0_129 = arith.constant 0 : index
    %104 = vector.load %arg5[%c2_127, %c0_128, %c0_129] : memref<23x1x128xf32, #tpu.memory_space<vmem>>, vector<1x1x128xf32>
    %105 = vector.shape_cast %104 : vector<1x1x128xf32> to vector<1x128xf32>
    %106 = vector.broadcast %105 : vector<1x128xf32> to vector<64x128xf32>
    %107 = arith.addf %103, %106 : vector<64x128xf32>
    %cst_130 = arith.constant 0.000000e+00 : f32
    %108 = vector.broadcast %cst_130 : f32 to vector<64x128xf32>
    %109 = arith.maximumf %107, %108 : vector<64x128xf32>
    %110 = vector.shape_cast %109 : vector<64x128xf32> to vector<2x32x128xf32>
    %c0_131 = arith.constant 0 : index
    %c0_132 = arith.constant 0 : index
    %c0_133 = arith.constant 0 : index
    %111 = vector.load %arg8[%c0_131, %c0_132, %c0_133] : memref<2x82x128xf32, #tpu.memory_space<vmem>>, vector<2x32x128xf32>
    tpu.vector_store %arg8[%c0_131, %c0_132, %c0_133], %110 {strides = array<i32>} : memref<2x82x128xf32, #tpu.memory_space<vmem>>, vector<2x32x128xf32>,
    %cst_134 = arith.constant 0.000000e+00 : f32
    %112 = vector.broadcast %cst_134 : f32 to vector<64x128xf32>
    %c0_135 = arith.constant 0 : index
    %c0_136 = arith.constant 0 : index
    %c0_137 = arith.constant 0 : index
    %113 = vector.load %arg8[%c0_135, %c0_136, %c0_137] : memref<2x82x128xf32, #tpu.memory_space<vmem>>, vector<2x32x128xf32>
    %114 = vector.shape_cast %113 : vector<2x32x128xf32> to vector<64x128xf32>
    %115 = arith.truncf %114 : vector<64x128xf32> to vector<64x128xbf16>
    %c0_138 = arith.constant 0 : index
    %c0_139 = arith.constant 0 : index
    %c0_140 = arith.constant 0 : index
    %116 = vector.load %arg4[%c0_138, %c0_139, %c0_140] : memref<9x128x128xbf16, #tpu.memory_space<vmem>>, vector<1x128x128xbf16>
    %117 = vector.shape_cast %116 : vector<1x128x128xbf16> to vector<128x128xbf16>
    %cst_141 = arith.constant dense<0.000000e+00> : vector<64x128xf32>
    %118 = tpu.matmul %115, %117, %cst_141 {dimension_numbers = #tpu.dot_dimension_numbers<[1], [0], [0], [1], [0, 0, 1, 1], [], []>} : vector<64x128xbf16>, vector<128x128xbf16>, vector<64x128xf32> -> vector<64x128xf32>
    %119 = arith.addf %112, %118 : vector<64x128xf32>
    %c3_142 = arith.constant 3 : index
    %c0_143 = arith.constant 0 : index
    %c0_144 = arith.constant 0 : index
    %120 = vector.load %arg5[%c3_142, %c0_143, %c0_144] : memref<23x1x128xf32, #tpu.memory_space<vmem>>, vector<1x1x128xf32>
    %121 = vector.shape_cast %120 : vector<1x1x128xf32> to vector<1x128xf32>
    %122 = vector.broadcast %121 : vector<1x128xf32> to vector<64x128xf32>
    %123 = arith.addf %119, %122 : vector<64x128xf32>
    %c0_145 = arith.constant 0 : index
    %c0_146 = arith.constant 0 : index
    %c0_147 = arith.constant 0 : index
    %124 = vector.load %arg7[%c0_145, %c0_146, %c0_147] : memref<2x64x128xf32, #tpu.memory_space<vmem>>, vector<2x32x128xf32>
    %125 = vector.shape_cast %124 : vector<2x32x128xf32> to vector<64x128xf32>
    %126 = arith.addf %123, %125 : vector<64x128xf32>
    %127 = vector.shape_cast %126 : vector<64x128xf32> to vector<2x32x128xf32>
    %c0_148 = arith.constant 0 : index
    %c0_149 = arith.constant 0 : index
    %c0_150 = arith.constant 0 : index
    %128 = vector.load %arg7[%c0_148, %c0_149, %c0_150] : memref<2x64x128xf32, #tpu.memory_space<vmem>>, vector<2x32x128xf32>
    tpu.vector_store %arg7[%c0_148, %c0_149, %c0_150], %127 {strides = array<i32>} : memref<2x64x128xf32, #tpu.memory_space<vmem>>, vector<2x32x128xf32>,
    %c0_151 = arith.constant 0 : index
    %c0_152 = arith.constant 0 : index
    %c0_153 = arith.constant 0 : index
    %129 = vector.load %arg7[%c0_151, %c0_152, %c0_153] : memref<2x64x128xf32, #tpu.memory_space<vmem>>, vector<2x32x128xf32>
    %cst_154 = arith.constant 0.000000e+00 : f32
    %130 = vector.broadcast %cst_154 : f32 to vector<2x32x128xf32>
    %131 = arith.maximumf %129, %130 : vector<2x32x128xf32>
    %cst_155 = arith.constant 0.000000e+00 : f32
    %132 = vector.broadcast %cst_155 : f32 to vector<2x3x128xf32>
    %c0_156 = arith.constant 0 : index
    %c0_157 = arith.constant 0 : index
    %c0_158 = arith.constant 0 : index
    %133 = vector.load %arg8[%c0_156, %c0_157, %c0_158] : memref<2x82x128xf32, #tpu.memory_space<vmem>>, vector<2x3x128xf32>
    tpu.vector_store %arg8[%c0_156, %c0_157, %c0_158], %132 {strides = array<i32>} : memref<2x82x128xf32, #tpu.memory_space<vmem>>, vector<2x3x128xf32>,
    %c0_159 = arith.constant 0 : index
    %c35 = arith.constant 35 : index
    %c0_160 = arith.constant 0 : index
    %134 = vector.load %arg8[%c0_159, %c35, %c0_160] : memref<2x82x128xf32, #tpu.memory_space<vmem>>, vector<2x3x128xf32>
    tpu.vector_store %arg8[%c0_159, %c35, %c0_160], %132 {strides = array<i32>} : memref<2x82x128xf32, #tpu.memory_space<vmem>>, vector<2x3x128xf32>,
    %c0_161 = arith.constant 0 : index
    %c3_162 = arith.constant 3 : index
    %c0_163 = arith.constant 0 : index
    %135 = vector.load %arg8[%c0_161, %c3_162, %c0_163] : memref<2x82x128xf32, #tpu.memory_space<vmem>>, vector<2x32x128xf32>
    tpu.vector_store %arg8[%c0_161, %c3_162, %c0_163], %131 {strides = array<i32>} : memref<2x82x128xf32, #tpu.memory_space<vmem>>, vector<2x32x128xf32>,
    %cst_164 = arith.constant 0.000000e+00 : f32
    %136 = vector.broadcast %cst_164 : f32 to vector<64x128xf32>
    %c0_165 = arith.constant 0 : index
    %c0_166 = arith.constant 0 : index
    %c0_167 = arith.constant 0 : index
    %137 = vector.load %arg8[%c0_165, %c0_166, %c0_167] : memref<2x82x128xf32, #tpu.memory_space<vmem>>, vector<2x32x128xf32>
    %138 = vector.shape_cast %137 : vector<2x32x128xf32> to vector<64x128xf32>
    %139 = arith.truncf %138 : vector<64x128xf32> to vector<64x128xbf16>
    %c2_168 = arith.constant 2 : index
    %c0_169 = arith.constant 0 : index
    %c0_170 = arith.constant 0 : index
    %c0_171 = arith.constant 0 : index
    %140 = vector.load %arg2[%c2_168, %c0_169, %c0_170, %c0_171] : memref<11x3x128x128xbf16, #tpu.memory_space<vmem>>, vector<1x1x128x128xbf16>
    %141 = vector.shape_cast %140 : vector<1x1x128x128xbf16> to vector<128x128xbf16>
    %cst_172 = arith.constant dense<0.000000e+00> : vector<64x128xf32>
    %142 = tpu.matmul %139, %141, %cst_172 {dimension_numbers = #tpu.dot_dimension_numbers<[1], [0], [0], [1], [0, 0, 1, 1], [], []>} : vector<64x128xbf16>, vector<128x128xbf16>, vector<64x128xf32> -> vector<64x128xf32>
    %143 = arith.addf %136, %142 : vector<64x128xf32>
    %c0_173 = arith.constant 0 : index
    %c3_174 = arith.constant 3 : index
    %c0_175 = arith.constant 0 : index
    %144 = vector.load %arg8[%c0_173, %c3_174, %c0_175] : memref<2x82x128xf32, #tpu.memory_space<vmem>>, vector<2x32x128xf32>
    %145 = vector.shape_cast %144 : vector<2x32x128xf32> to vector<64x128xf32>
    %146 = arith.truncf %145 : vector<64x128xf32> to vector<64x128xbf16>
    %c2_176 = arith.constant 2 : index
    %c1_177 = arith.constant 1 : index
    %c0_178 = arith.constant 0 : index
    %c0_179 = arith.constant 0 : index
    %147 = vector.load %arg2[%c2_176, %c1_177, %c0_178, %c0_179] : memref<11x3x128x128xbf16, #tpu.memory_space<vmem>>, vector<1x1x128x128xbf16>
    %148 = vector.shape_cast %147 : vector<1x1x128x128xbf16> to vector<128x128xbf16>
    %cst_180 = arith.constant dense<0.000000e+00> : vector<64x128xf32>
    %149 = tpu.matmul %146, %148, %cst_180 {dimension_numbers = #tpu.dot_dimension_numbers<[1], [0], [0], [1], [0, 0, 1, 1], [], []>} : vector<64x128xbf16>, vector<128x128xbf16>, vector<64x128xf32> -> vector<64x128xf32>
    %150 = arith.addf %143, %149 : vector<64x128xf32>
    %c0_181 = arith.constant 0 : index
    %c6 = arith.constant 6 : index
    %c0_182 = arith.constant 0 : index
    %151 = vector.load %arg8[%c0_181, %c6, %c0_182] : memref<2x82x128xf32, #tpu.memory_space<vmem>>, vector<2x32x128xf32>
    %152 = vector.shape_cast %151 : vector<2x32x128xf32> to vector<64x128xf32>
    %153 = arith.truncf %152 : vector<64x128xf32> to vector<64x128xbf16>
    %c2_183 = arith.constant 2 : index
    %c2_184 = arith.constant 2 : index
    %c0_185 = arith.constant 0 : index
    %c0_186 = arith.constant 0 : index
    %154 = vector.load %arg2[%c2_183, %c2_184, %c0_185, %c0_186] : memref<11x3x128x128xbf16, #tpu.memory_space<vmem>>, vector<1x1x128x128xbf16>
    %155 = vector.shape_cast %154 : vector<1x1x128x128xbf16> to vector<128x128xbf16>
    %cst_187 = arith.constant dense<0.000000e+00> : vector<64x128xf32>
    %156 = tpu.matmul %153, %155, %cst_187 {dimension_numbers = #tpu.dot_dimension_numbers<[1], [0], [0], [1], [0, 0, 1, 1], [], []>} : vector<64x128xbf16>, vector<128x128xbf16>, vector<64x128xf32> -> vector<64x128xf32>
    %157 = arith.addf %150, %156 : vector<64x128xf32>
    %c4 = arith.constant 4 : index
    %c0_188 = arith.constant 0 : index
    %c0_189 = arith.constant 0 : index
    %158 = vector.load %arg5[%c4, %c0_188, %c0_189] : memref<23x1x128xf32, #tpu.memory_space<vmem>>, vector<1x1x128xf32>
    %159 = vector.shape_cast %158 : vector<1x1x128xf32> to vector<1x128xf32>
    %160 = vector.broadcast %159 : vector<1x128xf32> to vector<64x128xf32>
    %161 = arith.addf %157, %160 : vector<64x128xf32>
    %cst_190 = arith.constant 0.000000e+00 : f32
    %162 = vector.broadcast %cst_190 : f32 to vector<64x128xf32>
    %163 = arith.maximumf %161, %162 : vector<64x128xf32>
    %164 = vector.shape_cast %163 : vector<64x128xf32> to vector<2x32x128xf32>
    %c0_191 = arith.constant 0 : index
    %c0_192 = arith.constant 0 : index
    %c0_193 = arith.constant 0 : index
    %165 = vector.load %arg8[%c0_191, %c0_192, %c0_193] : memref<2x82x128xf32, #tpu.memory_space<vmem>>, vector<2x32x128xf32>
    tpu.vector_store %arg8[%c0_191, %c0_192, %c0_193], %164 {strides = array<i32>} : memref<2x82x128xf32, #tpu.memory_space<vmem>>, vector<2x32x128xf32>,
    %cst_194 = arith.constant 0.000000e+00 : f32
    %166 = vector.broadcast %cst_194 : f32 to vector<64x128xf32>
    %c0_195 = arith.constant 0 : index
    %c0_196 = arith.constant 0 : index
    %c0_197 = arith.constant 0 : index
    %167 = vector.load %arg8[%c0_195, %c0_196, %c0_197] : memref<2x82x128xf32, #tpu.memory_space<vmem>>, vector<2x32x128xf32>
    %168 = vector.shape_cast %167 : vector<2x32x128xf32> to vector<64x128xf32>
    %169 = arith.truncf %168 : vector<64x128xf32> to vector<64x128xbf16>
    %c1_198 = arith.constant 1 : index
    %c0_199 = arith.constant 0 : index
    %c0_200 = arith.constant 0 : index
    %170 = vector.load %arg4[%c1_198, %c0_199, %c0_200] : memref<9x128x128xbf16, #tpu.memory_space<vmem>>, vector<1x128x128xbf16>
    %171 = vector.shape_cast %170 : vector<1x128x128xbf16> to vector<128x128xbf16>
    %cst_201 = arith.constant dense<0.000000e+00> : vector<64x128xf32>
    %172 = tpu.matmul %169, %171, %cst_201 {dimension_numbers = #tpu.dot_dimension_numbers<[1], [0], [0], [1], [0, 0, 1, 1], [], []>} : vector<64x128xbf16>, vector<128x128xbf16>, vector<64x128xf32> -> vector<64x128xf32>
    %173 = arith.addf %166, %172 : vector<64x128xf32>
    %c5 = arith.constant 5 : index
    %c0_202 = arith.constant 0 : index
    %c0_203 = arith.constant 0 : index
    %174 = vector.load %arg5[%c5, %c0_202, %c0_203] : memref<23x1x128xf32, #tpu.memory_space<vmem>>, vector<1x1x128xf32>
    %175 = vector.shape_cast %174 : vector<1x1x128xf32> to vector<1x128xf32>
    %176 = vector.broadcast %175 : vector<1x128xf32> to vector<64x128xf32>
    %177 = arith.addf %173, %176 : vector<64x128xf32>
    %c0_204 = arith.constant 0 : index
    %c0_205 = arith.constant 0 : index
    %c0_206 = arith.constant 0 : index
    %178 = vector.load %arg7[%c0_204, %c0_205, %c0_206] : memref<2x64x128xf32, #tpu.memory_space<vmem>>, vector<2x32x128xf32>
    %179 = vector.shape_cast %178 : vector<2x32x128xf32> to vector<64x128xf32>
    %180 = arith.addf %177, %179 : vector<64x128xf32>
    %181 = vector.shape_cast %180 : vector<64x128xf32> to vector<2x32x128xf32>
    %c0_207 = arith.constant 0 : index
    %c0_208 = arith.constant 0 : index
    %c0_209 = arith.constant 0 : index
    %182 = vector.load %arg7[%c0_207, %c0_208, %c0_209] : memref<2x64x128xf32, #tpu.memory_space<vmem>>, vector<2x32x128xf32>
    tpu.vector_store %arg7[%c0_207, %c0_208, %c0_209], %181 {strides = array<i32>} : memref<2x64x128xf32, #tpu.memory_space<vmem>>, vector<2x32x128xf32>,
    %c0_210 = arith.constant 0 : index
    %c0_211 = arith.constant 0 : index
    %c0_212 = arith.constant 0 : index
    %183 = vector.load %arg7[%c0_210, %c0_211, %c0_212] : memref<2x64x128xf32, #tpu.memory_space<vmem>>, vector<2x32x128xf32>
    %cst_213 = arith.constant 0.000000e+00 : f32
    %184 = vector.broadcast %cst_213 : f32 to vector<2x32x128xf32>
    %185 = arith.maximumf %183, %184 : vector<2x32x128xf32>
    %cst_214 = arith.constant 0.000000e+00 : f32
    %186 = vector.broadcast %cst_214 : f32 to vector<2x1x128xf32>
    %c0_215 = arith.constant 0 : index
    %c0_216 = arith.constant 0 : index
    %c0_217 = arith.constant 0 : index
    %187 = vector.load %arg8[%c0_215, %c0_216, %c0_217] : memref<2x82x128xf32, #tpu.memory_space<vmem>>, vector<2x1x128xf32>
    tpu.vector_store %arg8[%c0_215, %c0_216, %c0_217], %186 {strides = array<i32>} : memref<2x82x128xf32, #tpu.memory_space<vmem>>, vector<2x1x128xf32>,
    %c0_218 = arith.constant 0 : index
    %c33 = arith.constant 33 : index
    %c0_219 = arith.constant 0 : index
    %188 = vector.load %arg8[%c0_218, %c33, %c0_219] : memref<2x82x128xf32, #tpu.memory_space<vmem>>, vector<2x1x128xf32>
    tpu.vector_store %arg8[%c0_218, %c33, %c0_219], %186 {strides = array<i32>} : memref<2x82x128xf32, #tpu.memory_space<vmem>>, vector<2x1x128xf32>,
    %c0_220 = arith.constant 0 : index
    %c1_221 = arith.constant 1 : index
    %c0_222 = arith.constant 0 : index
    %189 = vector.load %arg8[%c0_220, %c1_221, %c0_222] : memref<2x82x128xf32, #tpu.memory_space<vmem>>, vector<2x32x128xf32>
    tpu.vector_store %arg8[%c0_220, %c1_221, %c0_222], %185 {strides = array<i32>} : memref<2x82x128xf32, #tpu.memory_space<vmem>>, vector<2x32x128xf32>,
    %cst_223 = arith.constant 0.000000e+00 : f32
    %190 = vector.broadcast %cst_223 : f32 to vector<64x128xf32>
    %c0_224 = arith.constant 0 : index
    %c0_225 = arith.constant 0 : index
    %c0_226 = arith.constant 0 : index
    %191 = vector.load %arg8[%c0_224, %c0_225, %c0_226] : memref<2x82x128xf32, #tpu.memory_space<vmem>>, vector<2x32x128xf32>
    %192 = vector.shape_cast %191 : vector<2x32x128xf32> to vector<64x128xf32>
    %193 = arith.truncf %192 : vector<64x128xf32> to vector<64x128xbf16>
    %c3_227 = arith.constant 3 : index
    %c0_228 = arith.constant 0 : index
    %c0_229 = arith.constant 0 : index
    %c0_230 = arith.constant 0 : index
    %194 = vector.load %arg2[%c3_227, %c0_228, %c0_229, %c0_230] : memref<11x3x128x128xbf16, #tpu.memory_space<vmem>>, vector<1x1x128x128xbf16>
    %195 = vector.shape_cast %194 : vector<1x1x128x128xbf16> to vector<128x128xbf16>
    %cst_231 = arith.constant dense<0.000000e+00> : vector<64x128xf32>
    %196 = tpu.matmul %193, %195, %cst_231 {dimension_numbers = #tpu.dot_dimension_numbers<[1], [0], [0], [1], [0, 0, 1, 1], [], []>} : vector<64x128xbf16>, vector<128x128xbf16>, vector<64x128xf32> -> vector<64x128xf32>
    %197 = arith.addf %190, %196 : vector<64x128xf32>
    %c0_232 = arith.constant 0 : index
    %c1_233 = arith.constant 1 : index
    %c0_234 = arith.constant 0 : index
    %198 = vector.load %arg8[%c0_232, %c1_233, %c0_234] : memref<2x82x128xf32, #tpu.memory_space<vmem>>, vector<2x32x128xf32>
    %199 = vector.shape_cast %198 : vector<2x32x128xf32> to vector<64x128xf32>
    %200 = arith.truncf %199 : vector<64x128xf32> to vector<64x128xbf16>
    %c3_235 = arith.constant 3 : index
    %c1_236 = arith.constant 1 : index
    %c0_237 = arith.constant 0 : index
    %c0_238 = arith.constant 0 : index
    %201 = vector.load %arg2[%c3_235, %c1_236, %c0_237, %c0_238] : memref<11x3x128x128xbf16, #tpu.memory_space<vmem>>, vector<1x1x128x128xbf16>
    %202 = vector.shape_cast %201 : vector<1x1x128x128xbf16> to vector<128x128xbf16>
    %cst_239 = arith.constant dense<0.000000e+00> : vector<64x128xf32>
    %203 = tpu.matmul %200, %202, %cst_239 {dimension_numbers = #tpu.dot_dimension_numbers<[1], [0], [0], [1], [0, 0, 1, 1], [], []>} : vector<64x128xbf16>, vector<128x128xbf16>, vector<64x128xf32> -> vector<64x128xf32>
    %204 = arith.addf %197, %203 : vector<64x128xf32>
    %c0_240 = arith.constant 0 : index
    %c2_241 = arith.constant 2 : index
    %c0_242 = arith.constant 0 : index
    %205 = vector.load %arg8[%c0_240, %c2_241, %c0_242] : memref<2x82x128xf32, #tpu.memory_space<vmem>>, vector<2x32x128xf32>
    %206 = vector.shape_cast %205 : vector<2x32x128xf32> to vector<64x128xf32>
    %207 = arith.truncf %206 : vector<64x128xf32> to vector<64x128xbf16>
    %c3_243 = arith.constant 3 : index
    %c2_244 = arith.constant 2 : index
    %c0_245 = arith.constant 0 : index
    %c0_246 = arith.constant 0 : index
    %208 = vector.load %arg2[%c3_243, %c2_244, %c0_245, %c0_246] : memref<11x3x128x128xbf16, #tpu.memory_space<vmem>>, vector<1x1x128x128xbf16>
    %209 = vector.shape_cast %208 : vector<1x1x128x128xbf16> to vector<128x128xbf16>
    %cst_247 = arith.constant dense<0.000000e+00> : vector<64x128xf32>
    %210 = tpu.matmul %207, %209, %cst_247 {dimension_numbers = #tpu.dot_dimension_numbers<[1], [0], [0], [1], [0, 0, 1, 1], [], []>} : vector<64x128xbf16>, vector<128x128xbf16>, vector<64x128xf32> -> vector<64x128xf32>
    %211 = arith.addf %204, %210 : vector<64x128xf32>
    %c6_248 = arith.constant 6 : index
    %c0_249 = arith.constant 0 : index
    %c0_250 = arith.constant 0 : index
    %212 = vector.load %arg5[%c6_248, %c0_249, %c0_250] : memref<23x1x128xf32, #tpu.memory_space<vmem>>, vector<1x1x128xf32>
    %213 = vector.shape_cast %212 : vector<1x1x128xf32> to vector<1x128xf32>
    %214 = vector.broadcast %213 : vector<1x128xf32> to vector<64x128xf32>
    %215 = arith.addf %211, %214 : vector<64x128xf32>
    %cst_251 = arith.constant 0.000000e+00 : f32
    %216 = vector.broadcast %cst_251 : f32 to vector<64x128xf32>
    %217 = arith.maximumf %215, %216 : vector<64x128xf32>
    %218 = vector.shape_cast %217 : vector<64x128xf32> to vector<2x32x128xf32>
    %c0_252 = arith.constant 0 : index
    %c0_253 = arith.constant 0 : index
    %c0_254 = arith.constant 0 : index
    %219 = vector.load %arg8[%c0_252, %c0_253, %c0_254] : memref<2x82x128xf32, #tpu.memory_space<vmem>>, vector<2x32x128xf32>
    tpu.vector_store %arg8[%c0_252, %c0_253, %c0_254], %218 {strides = array<i32>} : memref<2x82x128xf32, #tpu.memory_space<vmem>>, vector<2x32x128xf32>,
    %cst_255 = arith.constant 0.000000e+00 : f32
    %220 = vector.broadcast %cst_255 : f32 to vector<64x128xf32>
    %c0_256 = arith.constant 0 : index
    %c0_257 = arith.constant 0 : index
    %c0_258 = arith.constant 0 : index
    %221 = vector.load %arg8[%c0_256, %c0_257, %c0_258] : memref<2x82x128xf32, #tpu.memory_space<vmem>>, vector<2x32x128xf32>
    %222 = vector.shape_cast %221 : vector<2x32x128xf32> to vector<64x128xf32>
    %223 = arith.truncf %222 : vector<64x128xf32> to vector<64x128xbf16>
    %c2_259 = arith.constant 2 : index
    %c0_260 = arith.constant 0 : index
    %c0_261 = arith.constant 0 : index
    %224 = vector.load %arg4[%c2_259, %c0_260, %c0_261] : memref<9x128x128xbf16, #tpu.memory_space<vmem>>, vector<1x128x128xbf16>
    %225 = vector.shape_cast %224 : vector<1x128x128xbf16> to vector<128x128xbf16>
    %cst_262 = arith.constant dense<0.000000e+00> : vector<64x128xf32>
    %226 = tpu.matmul %223, %225, %cst_262 {dimension_numbers = #tpu.dot_dimension_numbers<[1], [0], [0], [1], [0, 0, 1, 1], [], []>} : vector<64x128xbf16>, vector<128x128xbf16>, vector<64x128xf32> -> vector<64x128xf32>
    %227 = arith.addf %220, %226 : vector<64x128xf32>
    %c7 = arith.constant 7 : index
    %c0_263 = arith.constant 0 : index
    %c0_264 = arith.constant 0 : index
    %228 = vector.load %arg5[%c7, %c0_263, %c0_264] : memref<23x1x128xf32, #tpu.memory_space<vmem>>, vector<1x1x128xf32>
    %229 = vector.shape_cast %228 : vector<1x1x128xf32> to vector<1x128xf32>
    %230 = vector.broadcast %229 : vector<1x128xf32> to vector<64x128xf32>
    %231 = arith.addf %227, %230 : vector<64x128xf32>
    %c0_265 = arith.constant 0 : index
    %c0_266 = arith.constant 0 : index
    %c0_267 = arith.constant 0 : index
    %232 = vector.load %arg7[%c0_265, %c0_266, %c0_267] : memref<2x64x128xf32, #tpu.memory_space<vmem>>, vector<2x32x128xf32>
    %233 = vector.shape_cast %232 : vector<2x32x128xf32> to vector<64x128xf32>
    %234 = arith.addf %231, %233 : vector<64x128xf32>
    %235 = vector.shape_cast %234 : vector<64x128xf32> to vector<2x32x128xf32>
    %c0_268 = arith.constant 0 : index
    %c0_269 = arith.constant 0 : index
    %c0_270 = arith.constant 0 : index
    %236 = vector.load %arg7[%c0_268, %c0_269, %c0_270] : memref<2x64x128xf32, #tpu.memory_space<vmem>>, vector<2x32x128xf32>
    tpu.vector_store %arg7[%c0_268, %c0_269, %c0_270], %235 {strides = array<i32>} : memref<2x64x128xf32, #tpu.memory_space<vmem>>, vector<2x32x128xf32>,
    %c0_271 = arith.constant 0 : index
    %c0_272 = arith.constant 0 : index
    %c0_273 = arith.constant 0 : index
    %237 = vector.load %arg7[%c0_271, %c0_272, %c0_273] : memref<2x64x128xf32, #tpu.memory_space<vmem>>, vector<2x32x128xf32>
    %cst_274 = arith.constant 0.000000e+00 : f32
    %238 = vector.broadcast %cst_274 : f32 to vector<2x1x128xf32>
    %c0_275 = arith.constant 0 : index
    %c0_276 = arith.constant 0 : index
    %c0_277 = arith.constant 0 : index
    %239 = vector.load %arg8[%c0_275, %c0_276, %c0_277] : memref<2x82x128xf32, #tpu.memory_space<vmem>>, vector<2x1x128xf32>
    tpu.vector_store %arg8[%c0_275, %c0_276, %c0_277], %238 {strides = array<i32>} : memref<2x82x128xf32, #tpu.memory_space<vmem>>, vector<2x1x128xf32>,
    %c0_278 = arith.constant 0 : index
    %c33_279 = arith.constant 33 : index
    %c0_280 = arith.constant 0 : index
    %240 = vector.load %arg8[%c0_278, %c33_279, %c0_280] : memref<2x82x128xf32, #tpu.memory_space<vmem>>, vector<2x1x128xf32>
    tpu.vector_store %arg8[%c0_278, %c33_279, %c0_280], %238 {strides = array<i32>} : memref<2x82x128xf32, #tpu.memory_space<vmem>>, vector<2x1x128xf32>,
    %c0_281 = arith.constant 0 : index
    %c1_282 = arith.constant 1 : index
    %c0_283 = arith.constant 0 : index
    %241 = vector.load %arg8[%c0_281, %c1_282, %c0_283] : memref<2x82x128xf32, #tpu.memory_space<vmem>>, vector<2x32x128xf32>
    tpu.vector_store %arg8[%c0_281, %c1_282, %c0_283], %237 {strides = array<i32>} : memref<2x82x128xf32, #tpu.memory_space<vmem>>, vector<2x32x128xf32>,
    %cst_284 = arith.constant 0.000000e+00 : f32
    %242 = vector.broadcast %cst_284 : f32 to vector<32x128xf32>
    %c0_285 = arith.constant 0 : index
    %c0_286 = arith.constant 0 : index
    %c0_287 = arith.constant 0 : index
    %243 = tpu.strided_load %arg8[%c0_285, %c0_286, %c0_287] {strides = array<i32: 1, 2, 1>} : memref<2x82x128xf32, #tpu.memory_space<vmem>>, vector<2x16x128xf32>
    %244 = vector.shape_cast %243 : vector<2x16x128xf32> to vector<32x128xf32>
    %245 = arith.truncf %244 : vector<32x128xf32> to vector<32x128xbf16>
    %c1_288 = arith.constant 1 : index
    %c0_289 = arith.constant 0 : index
    %c0_290 = arith.constant 0 : index
    %c0_291 = arith.constant 0 : index
    %246 = vector.load %arg3[%c1_288, %c0_289, %c0_290, %c0_291] : memref<3x4x128x128xbf16, #tpu.memory_space<vmem>>, vector<1x1x128x128xbf16>
    %247 = vector.shape_cast %246 : vector<1x1x128x128xbf16> to vector<128x128xbf16>
    %cst_292 = arith.constant dense<0.000000e+00> : vector<32x128xf32>
    %248 = tpu.matmul %245, %247, %cst_292 {dimension_numbers = #tpu.dot_dimension_numbers<[1], [0], [0], [1], [0, 0, 1, 1], [], []>} : vector<32x128xbf16>, vector<128x128xbf16>, vector<32x128xf32> -> vector<32x128xf32>
    %249 = arith.addf %242, %248 : vector<32x128xf32>
    %c0_293 = arith.constant 0 : index
    %c1_294 = arith.constant 1 : index
    %c0_295 = arith.constant 0 : index
    %250 = tpu.strided_load %arg8[%c0_293, %c1_294, %c0_295] {strides = array<i32: 1, 2, 1>} : memref<2x82x128xf32, #tpu.memory_space<vmem>>, vector<2x16x128xf32>
    %251 = vector.shape_cast %250 : vector<2x16x128xf32> to vector<32x128xf32>
    %252 = arith.truncf %251 : vector<32x128xf32> to vector<32x128xbf16>
    %c1_296 = arith.constant 1 : index
    %c1_297 = arith.constant 1 : index
    %c0_298 = arith.constant 0 : index
    %c0_299 = arith.constant 0 : index
    %253 = vector.load %arg3[%c1_296, %c1_297, %c0_298, %c0_299] : memref<3x4x128x128xbf16, #tpu.memory_space<vmem>>, vector<1x1x128x128xbf16>
    %254 = vector.shape_cast %253 : vector<1x1x128x128xbf16> to vector<128x128xbf16>
    %cst_300 = arith.constant dense<0.000000e+00> : vector<32x128xf32>
    %255 = tpu.matmul %252, %254, %cst_300 {dimension_numbers = #tpu.dot_dimension_numbers<[1], [0], [0], [1], [0, 0, 1, 1], [], []>} : vector<32x128xbf16>, vector<128x128xbf16>, vector<32x128xf32> -> vector<32x128xf32>
    %256 = arith.addf %249, %255 : vector<32x128xf32>
    %c0_301 = arith.constant 0 : index
    %c2_302 = arith.constant 2 : index
    %c0_303 = arith.constant 0 : index
    %257 = tpu.strided_load %arg8[%c0_301, %c2_302, %c0_303] {strides = array<i32: 1, 2, 1>} : memref<2x82x128xf32, #tpu.memory_space<vmem>>, vector<2x16x128xf32>
    %258 = vector.shape_cast %257 : vector<2x16x128xf32> to vector<32x128xf32>
    %259 = arith.truncf %258 : vector<32x128xf32> to vector<32x128xbf16>
    %c1_304 = arith.constant 1 : index
    %c2_305 = arith.constant 2 : index
    %c0_306 = arith.constant 0 : index
    %c0_307 = arith.constant 0 : index
    %260 = vector.load %arg3[%c1_304, %c2_305, %c0_306, %c0_307] : memref<3x4x128x128xbf16, #tpu.memory_space<vmem>>, vector<1x1x128x128xbf16>
    %261 = vector.shape_cast %260 : vector<1x1x128x128xbf16> to vector<128x128xbf16>
    %cst_308 = arith.constant dense<0.000000e+00> : vector<32x128xf32>
    %262 = tpu.matmul %259, %261, %cst_308 {dimension_numbers = #tpu.dot_dimension_numbers<[1], [0], [0], [1], [0, 0, 1, 1], [], []>} : vector<32x128xbf16>, vector<128x128xbf16>, vector<32x128xf32> -> vector<32x128xf32>
    %263 = arith.addf %256, %262 : vector<32x128xf32>
    %c0_309 = arith.constant 0 : index
    %c3_310 = arith.constant 3 : index
    %c0_311 = arith.constant 0 : index
    %264 = tpu.strided_load %arg8[%c0_309, %c3_310, %c0_311] {strides = array<i32: 1, 2, 1>} : memref<2x82x128xf32, #tpu.memory_space<vmem>>, vector<2x16x128xf32>
    %265 = vector.shape_cast %264 : vector<2x16x128xf32> to vector<32x128xf32>
    %266 = arith.truncf %265 : vector<32x128xf32> to vector<32x128xbf16>
    %c1_312 = arith.constant 1 : index
    %c3_313 = arith.constant 3 : index
    %c0_314 = arith.constant 0 : index
    %c0_315 = arith.constant 0 : index
    %267 = vector.load %arg3[%c1_312, %c3_313, %c0_314, %c0_315] : memref<3x4x128x128xbf16, #tpu.memory_space<vmem>>, vector<1x1x128x128xbf16>
    %268 = vector.shape_cast %267 : vector<1x1x128x128xbf16> to vector<128x128xbf16>
    %cst_316 = arith.constant dense<0.000000e+00> : vector<32x128xf32>
    %269 = tpu.matmul %266, %268, %cst_316 {dimension_numbers = #tpu.dot_dimension_numbers<[1], [0], [0], [1], [0, 0, 1, 1], [], []>} : vector<32x128xbf16>, vector<128x128xbf16>, vector<32x128xf32> -> vector<32x128xf32>
    %270 = arith.addf %263, %269 : vector<32x128xf32>
    %c8 = arith.constant 8 : index
    %c0_317 = arith.constant 0 : index
    %c0_318 = arith.constant 0 : index
    %271 = vector.load %arg5[%c8, %c0_317, %c0_318] : memref<23x1x128xf32, #tpu.memory_space<vmem>>, vector<1x1x128xf32>
    %272 = vector.shape_cast %271 : vector<1x1x128xf32> to vector<1x128xf32>
    %273 = vector.broadcast %272 : vector<1x128xf32> to vector<32x128xf32>
    %274 = arith.addf %270, %273 : vector<32x128xf32>
    %275 = vector.shape_cast %274 : vector<32x128xf32> to vector<2x16x128xf32>
    %c0_319 = arith.constant 0 : index
    %c0_320 = arith.constant 0 : index
    %c0_321 = arith.constant 0 : index
    %276 = vector.load %arg7[%c0_319, %c0_320, %c0_321] : memref<2x64x128xf32, #tpu.memory_space<vmem>>, vector<2x16x128xf32>
    tpu.vector_store %arg7[%c0_319, %c0_320, %c0_321], %275 {strides = array<i32>} : memref<2x64x128xf32, #tpu.memory_space<vmem>>, vector<2x16x128xf32>,
    %c0_322 = arith.constant 0 : index
    %c0_323 = arith.constant 0 : index
    %c0_324 = arith.constant 0 : index
    %277 = vector.load %arg7[%c0_322, %c0_323, %c0_324] : memref<2x64x128xf32, #tpu.memory_space<vmem>>, vector<2x16x128xf32>
    %cst_325 = arith.constant 0.000000e+00 : f32
    %278 = vector.broadcast %cst_325 : f32 to vector<2x16x128xf32>
    %279 = arith.maximumf %277, %278 : vector<2x16x128xf32>
    %cst_326 = arith.constant 0.000000e+00 : f32
    %280 = vector.broadcast %cst_326 : f32 to vector<2x9x128xf32>
    %c0_327 = arith.constant 0 : index
    %c0_328 = arith.constant 0 : index
    %c0_329 = arith.constant 0 : index
    %281 = vector.load %arg8[%c0_327, %c0_328, %c0_329] : memref<2x82x128xf32, #tpu.memory_space<vmem>>, vector<2x9x128xf32>
    tpu.vector_store %arg8[%c0_327, %c0_328, %c0_329], %280 {strides = array<i32>} : memref<2x82x128xf32, #tpu.memory_space<vmem>>, vector<2x9x128xf32>,
    %c0_330 = arith.constant 0 : index
    %c25 = arith.constant 25 : index
    %c0_331 = arith.constant 0 : index
    %282 = vector.load %arg8[%c0_330, %c25, %c0_331] : memref<2x82x128xf32, #tpu.memory_space<vmem>>, vector<2x9x128xf32>
    tpu.vector_store %arg8[%c0_330, %c25, %c0_331], %280 {strides = array<i32>} : memref<2x82x128xf32, #tpu.memory_space<vmem>>, vector<2x9x128xf32>,
    %c0_332 = arith.constant 0 : index
    %c9_333 = arith.constant 9 : index
    %c0_334 = arith.constant 0 : index
    %283 = vector.load %arg8[%c0_332, %c9_333, %c0_334] : memref<2x82x128xf32, #tpu.memory_space<vmem>>, vector<2x16x128xf32>
    tpu.vector_store %arg8[%c0_332, %c9_333, %c0_334], %279 {strides = array<i32>} : memref<2x82x128xf32, #tpu.memory_space<vmem>>, vector<2x16x128xf32>,
    %cst_335 = arith.constant 0.000000e+00 : f32
    %284 = vector.broadcast %cst_335 : f32 to vector<32x128xf32>
    %c0_336 = arith.constant 0 : index
    %c0_337 = arith.constant 0 : index
    %c0_338 = arith.constant 0 : index
    %285 = vector.load %arg8[%c0_336, %c0_337, %c0_338] : memref<2x82x128xf32, #tpu.memory_space<vmem>>, vector<2x16x128xf32>
    %286 = vector.shape_cast %285 : vector<2x16x128xf32> to vector<32x128xf32>
    %287 = arith.truncf %286 : vector<32x128xf32> to vector<32x128xbf16>
    %c4_339 = arith.constant 4 : index
    %c0_340 = arith.constant 0 : index
    %c0_341 = arith.constant 0 : index
    %c0_342 = arith.constant 0 : index
    %288 = vector.load %arg2[%c4_339, %c0_340, %c0_341, %c0_342] : memref<11x3x128x128xbf16, #tpu.memory_space<vmem>>, vector<1x1x128x128xbf16>
    %289 = vector.shape_cast %288 : vector<1x1x128x128xbf16> to vector<128x128xbf16>
    %cst_343 = arith.constant dense<0.000000e+00> : vector<32x128xf32>
    %290 = tpu.matmul %287, %289, %cst_343 {dimension_numbers = #tpu.dot_dimension_numbers<[1], [0], [0], [1], [0, 0, 1, 1], [], []>} : vector<32x128xbf16>, vector<128x128xbf16>, vector<32x128xf32> -> vector<32x128xf32>
    %291 = arith.addf %284, %290 : vector<32x128xf32>
    %c0_344 = arith.constant 0 : index
    %c9_345 = arith.constant 9 : index
    %c0_346 = arith.constant 0 : index
    %292 = vector.load %arg8[%c0_344, %c9_345, %c0_346] : memref<2x82x128xf32, #tpu.memory_space<vmem>>, vector<2x16x128xf32>
    %293 = vector.shape_cast %292 : vector<2x16x128xf32> to vector<32x128xf32>
    %294 = arith.truncf %293 : vector<32x128xf32> to vector<32x128xbf16>
    %c4_347 = arith.constant 4 : index
    %c1_348 = arith.constant 1 : index
    %c0_349 = arith.constant 0 : index
    %c0_350 = arith.constant 0 : index
    %295 = vector.load %arg2[%c4_347, %c1_348, %c0_349, %c0_350] : memref<11x3x128x128xbf16, #tpu.memory_space<vmem>>, vector<1x1x128x128xbf16>
    %296 = vector.shape_cast %295 : vector<1x1x128x128xbf16> to vector<128x128xbf16>
    %cst_351 = arith.constant dense<0.000000e+00> : vector<32x128xf32>
    %297 = tpu.matmul %294, %296, %cst_351 {dimension_numbers = #tpu.dot_dimension_numbers<[1], [0], [0], [1], [0, 0, 1, 1], [], []>} : vector<32x128xbf16>, vector<128x128xbf16>, vector<32x128xf32> -> vector<32x128xf32>
    %298 = arith.addf %291, %297 : vector<32x128xf32>
    %c0_352 = arith.constant 0 : index
    %c18_353 = arith.constant 18 : index
    %c0_354 = arith.constant 0 : index
    %299 = vector.load %arg8[%c0_352, %c18_353, %c0_354] : memref<2x82x128xf32, #tpu.memory_space<vmem>>, vector<2x16x128xf32>
    %300 = vector.shape_cast %299 : vector<2x16x128xf32> to vector<32x128xf32>
    %301 = arith.truncf %300 : vector<32x128xf32> to vector<32x128xbf16>
    %c4_355 = arith.constant 4 : index
    %c2_356 = arith.constant 2 : index
    %c0_357 = arith.constant 0 : index
    %c0_358 = arith.constant 0 : index
    %302 = vector.load %arg2[%c4_355, %c2_356, %c0_357, %c0_358] : memref<11x3x128x128xbf16, #tpu.memory_space<vmem>>, vector<1x1x128x128xbf16>
    %303 = vector.shape_cast %302 : vector<1x1x128x128xbf16> to vector<128x128xbf16>
    %cst_359 = arith.constant dense<0.000000e+00> : vector<32x128xf32>
    %304 = tpu.matmul %301, %303, %cst_359 {dimension_numbers = #tpu.dot_dimension_numbers<[1], [0], [0], [1], [0, 0, 1, 1], [], []>} : vector<32x128xbf16>, vector<128x128xbf16>, vector<32x128xf32> -> vector<32x128xf32>
    %305 = arith.addf %298, %304 : vector<32x128xf32>
    %c9_360 = arith.constant 9 : index
    %c0_361 = arith.constant 0 : index
    %c0_362 = arith.constant 0 : index
    %306 = vector.load %arg5[%c9_360, %c0_361, %c0_362] : memref<23x1x128xf32, #tpu.memory_space<vmem>>, vector<1x1x128xf32>
    %307 = vector.shape_cast %306 : vector<1x1x128xf32> to vector<1x128xf32>
    %308 = vector.broadcast %307 : vector<1x128xf32> to vector<32x128xf32>
    %309 = arith.addf %305, %308 : vector<32x128xf32>
    %cst_363 = arith.constant 0.000000e+00 : f32
    %310 = vector.broadcast %cst_363 : f32 to vector<32x128xf32>
    %311 = arith.maximumf %309, %310 : vector<32x128xf32>
    %312 = vector.shape_cast %311 : vector<32x128xf32> to vector<2x16x128xf32>
    %c0_364 = arith.constant 0 : index
    %c0_365 = arith.constant 0 : index
    %c0_366 = arith.constant 0 : index
    %313 = vector.load %arg8[%c0_364, %c0_365, %c0_366] : memref<2x82x128xf32, #tpu.memory_space<vmem>>, vector<2x16x128xf32>
    tpu.vector_store %arg8[%c0_364, %c0_365, %c0_366], %312 {strides = array<i32>} : memref<2x82x128xf32, #tpu.memory_space<vmem>>, vector<2x16x128xf32>,
    %cst_367 = arith.constant 0.000000e+00 : f32
    %314 = vector.broadcast %cst_367 : f32 to vector<32x128xf32>
    %c0_368 = arith.constant 0 : index
    %c0_369 = arith.constant 0 : index
    %c0_370 = arith.constant 0 : index
    %315 = vector.load %arg8[%c0_368, %c0_369, %c0_370] : memref<2x82x128xf32, #tpu.memory_space<vmem>>, vector<2x16x128xf32>
    %316 = vector.shape_cast %315 : vector<2x16x128xf32> to vector<32x128xf32>
    %317 = arith.truncf %316 : vector<32x128xf32> to vector<32x128xbf16>
    %c3_371 = arith.constant 3 : index
    %c0_372 = arith.constant 0 : index
    %c0_373 = arith.constant 0 : index
    %318 = vector.load %arg4[%c3_371, %c0_372, %c0_373] : memref<9x128x128xbf16, #tpu.memory_space<vmem>>, vector<1x128x128xbf16>
    %319 = vector.shape_cast %318 : vector<1x128x128xbf16> to vector<128x128xbf16>
    %cst_374 = arith.constant dense<0.000000e+00> : vector<32x128xf32>
    %320 = tpu.matmul %317, %319, %cst_374 {dimension_numbers = #tpu.dot_dimension_numbers<[1], [0], [0], [1], [0, 0, 1, 1], [], []>} : vector<32x128xbf16>, vector<128x128xbf16>, vector<32x128xf32> -> vector<32x128xf32>
    %321 = arith.addf %314, %320 : vector<32x128xf32>
    %c10 = arith.constant 10 : index
    %c0_375 = arith.constant 0 : index
    %c0_376 = arith.constant 0 : index
    %322 = vector.load %arg5[%c10, %c0_375, %c0_376] : memref<23x1x128xf32, #tpu.memory_space<vmem>>, vector<1x1x128xf32>
    %323 = vector.shape_cast %322 : vector<1x1x128xf32> to vector<1x128xf32>
    %324 = vector.broadcast %323 : vector<1x128xf32> to vector<32x128xf32>
    %325 = arith.addf %321, %324 : vector<32x128xf32>
    %c0_377 = arith.constant 0 : index
    %c0_378 = arith.constant 0 : index
    %c0_379 = arith.constant 0 : index
    %326 = vector.load %arg7[%c0_377, %c0_378, %c0_379] : memref<2x64x128xf32, #tpu.memory_space<vmem>>, vector<2x16x128xf32>
    %327 = vector.shape_cast %326 : vector<2x16x128xf32> to vector<32x128xf32>
    %328 = arith.addf %325, %327 : vector<32x128xf32>
    %329 = vector.shape_cast %328 : vector<32x128xf32> to vector<2x16x128xf32>
    %c0_380 = arith.constant 0 : index
    %c0_381 = arith.constant 0 : index
    %c0_382 = arith.constant 0 : index
    %330 = vector.load %arg7[%c0_380, %c0_381, %c0_382] : memref<2x64x128xf32, #tpu.memory_space<vmem>>, vector<2x16x128xf32>
    tpu.vector_store %arg7[%c0_380, %c0_381, %c0_382], %329 {strides = array<i32>} : memref<2x64x128xf32, #tpu.memory_space<vmem>>, vector<2x16x128xf32>,
    %c0_383 = arith.constant 0 : index
    %c0_384 = arith.constant 0 : index
    %c0_385 = arith.constant 0 : index
    %331 = vector.load %arg7[%c0_383, %c0_384, %c0_385] : memref<2x64x128xf32, #tpu.memory_space<vmem>>, vector<2x16x128xf32>
    %cst_386 = arith.constant 0.000000e+00 : f32
    %332 = vector.broadcast %cst_386 : f32 to vector<2x16x128xf32>
    %333 = arith.maximumf %331, %332 : vector<2x16x128xf32>
    %cst_387 = arith.constant 0.000000e+00 : f32
    %334 = vector.broadcast %cst_387 : f32 to vector<2x3x128xf32>
    %c0_388 = arith.constant 0 : index
    %c0_389 = arith.constant 0 : index
    %c0_390 = arith.constant 0 : index
    %335 = vector.load %arg8[%c0_388, %c0_389, %c0_390] : memref<2x82x128xf32, #tpu.memory_space<vmem>>, vector<2x3x128xf32>
    tpu.vector_store %arg8[%c0_388, %c0_389, %c0_390], %334 {strides = array<i32>} : memref<2x82x128xf32, #tpu.memory_space<vmem>>, vector<2x3x128xf32>,
    %c0_391 = arith.constant 0 : index
    %c19 = arith.constant 19 : index
    %c0_392 = arith.constant 0 : index
    %336 = vector.load %arg8[%c0_391, %c19, %c0_392] : memref<2x82x128xf32, #tpu.memory_space<vmem>>, vector<2x3x128xf32>
    tpu.vector_store %arg8[%c0_391, %c19, %c0_392], %334 {strides = array<i32>} : memref<2x82x128xf32, #tpu.memory_space<vmem>>, vector<2x3x128xf32>,
    %c0_393 = arith.constant 0 : index
    %c3_394 = arith.constant 3 : index
    %c0_395 = arith.constant 0 : index
    %337 = vector.load %arg8[%c0_393, %c3_394, %c0_395] : memref<2x82x128xf32, #tpu.memory_space<vmem>>, vector<2x16x128xf32>
    tpu.vector_store %arg8[%c0_393, %c3_394, %c0_395], %333 {strides = array<i32>} : memref<2x82x128xf32, #tpu.memory_space<vmem>>, vector<2x16x128xf32>,
    %cst_396 = arith.constant 0.000000e+00 : f32
    %338 = vector.broadcast %cst_396 : f32 to vector<32x128xf32>
    %c0_397 = arith.constant 0 : index
    %c0_398 = arith.constant 0 : index
    %c0_399 = arith.constant 0 : index
    %339 = vector.load %arg8[%c0_397, %c0_398, %c0_399] : memref<2x82x128xf32, #tpu.memory_space<vmem>>, vector<2x16x128xf32>
    %340 = vector.shape_cast %339 : vector<2x16x128xf32> to vector<32x128xf32>
    %341 = arith.truncf %340 : vector<32x128xf32> to vector<32x128xbf16>
    %c5_400 = arith.constant 5 : index
    %c0_401 = arith.constant 0 : index
    %c0_402 = arith.constant 0 : index
    %c0_403 = arith.constant 0 : index
    %342 = vector.load %arg2[%c5_400, %c0_401, %c0_402, %c0_403] : memref<11x3x128x128xbf16, #tpu.memory_space<vmem>>, vector<1x1x128x128xbf16>
    %343 = vector.shape_cast %342 : vector<1x1x128x128xbf16> to vector<128x128xbf16>
    %cst_404 = arith.constant dense<0.000000e+00> : vector<32x128xf32>
    %344 = tpu.matmul %341, %343, %cst_404 {dimension_numbers = #tpu.dot_dimension_numbers<[1], [0], [0], [1], [0, 0, 1, 1], [], []>} : vector<32x128xbf16>, vector<128x128xbf16>, vector<32x128xf32> -> vector<32x128xf32>
    %345 = arith.addf %338, %344 : vector<32x128xf32>
    %c0_405 = arith.constant 0 : index
    %c3_406 = arith.constant 3 : index
    %c0_407 = arith.constant 0 : index
    %346 = vector.load %arg8[%c0_405, %c3_406, %c0_407] : memref<2x82x128xf32, #tpu.memory_space<vmem>>, vector<2x16x128xf32>
    %347 = vector.shape_cast %346 : vector<2x16x128xf32> to vector<32x128xf32>
    %348 = arith.truncf %347 : vector<32x128xf32> to vector<32x128xbf16>
    %c5_408 = arith.constant 5 : index
    %c1_409 = arith.constant 1 : index
    %c0_410 = arith.constant 0 : index
    %c0_411 = arith.constant 0 : index
    %349 = vector.load %arg2[%c5_408, %c1_409, %c0_410, %c0_411] : memref<11x3x128x128xbf16, #tpu.memory_space<vmem>>, vector<1x1x128x128xbf16>
    %350 = vector.shape_cast %349 : vector<1x1x128x128xbf16> to vector<128x128xbf16>
    %cst_412 = arith.constant dense<0.000000e+00> : vector<32x128xf32>
    %351 = tpu.matmul %348, %350, %cst_412 {dimension_numbers = #tpu.dot_dimension_numbers<[1], [0], [0], [1], [0, 0, 1, 1], [], []>} : vector<32x128xbf16>, vector<128x128xbf16>, vector<32x128xf32> -> vector<32x128xf32>
    %352 = arith.addf %345, %351 : vector<32x128xf32>
    %c0_413 = arith.constant 0 : index
    %c6_414 = arith.constant 6 : index
    %c0_415 = arith.constant 0 : index
    %353 = vector.load %arg8[%c0_413, %c6_414, %c0_415] : memref<2x82x128xf32, #tpu.memory_space<vmem>>, vector<2x16x128xf32>
    %354 = vector.shape_cast %353 : vector<2x16x128xf32> to vector<32x128xf32>
    %355 = arith.truncf %354 : vector<32x128xf32> to vector<32x128xbf16>
    %c5_416 = arith.constant 5 : index
    %c2_417 = arith.constant 2 : index
    %c0_418 = arith.constant 0 : index
    %c0_419 = arith.constant 0 : index
    %356 = vector.load %arg2[%c5_416, %c2_417, %c0_418, %c0_419] : memref<11x3x128x128xbf16, #tpu.memory_space<vmem>>, vector<1x1x128x128xbf16>
    %357 = vector.shape_cast %356 : vector<1x1x128x128xbf16> to vector<128x128xbf16>
    %cst_420 = arith.constant dense<0.000000e+00> : vector<32x128xf32>
    %358 = tpu.matmul %355, %357, %cst_420 {dimension_numbers = #tpu.dot_dimension_numbers<[1], [0], [0], [1], [0, 0, 1, 1], [], []>} : vector<32x128xbf16>, vector<128x128xbf16>, vector<32x128xf32> -> vector<32x128xf32>
    %359 = arith.addf %352, %358 : vector<32x128xf32>
    %c11 = arith.constant 11 : index
    %c0_421 = arith.constant 0 : index
    %c0_422 = arith.constant 0 : index
    %360 = vector.load %arg5[%c11, %c0_421, %c0_422] : memref<23x1x128xf32, #tpu.memory_space<vmem>>, vector<1x1x128xf32>
    %361 = vector.shape_cast %360 : vector<1x1x128xf32> to vector<1x128xf32>
    %362 = vector.broadcast %361 : vector<1x128xf32> to vector<32x128xf32>
    %363 = arith.addf %359, %362 : vector<32x128xf32>
    %cst_423 = arith.constant 0.000000e+00 : f32
    %364 = vector.broadcast %cst_423 : f32 to vector<32x128xf32>
    %365 = arith.maximumf %363, %364 : vector<32x128xf32>
    %366 = vector.shape_cast %365 : vector<32x128xf32> to vector<2x16x128xf32>
    %c0_424 = arith.constant 0 : index
    %c0_425 = arith.constant 0 : index
    %c0_426 = arith.constant 0 : index
    %367 = vector.load %arg8[%c0_424, %c0_425, %c0_426] : memref<2x82x128xf32, #tpu.memory_space<vmem>>, vector<2x16x128xf32>
    tpu.vector_store %arg8[%c0_424, %c0_425, %c0_426], %366 {strides = array<i32>} : memref<2x82x128xf32, #tpu.memory_space<vmem>>, vector<2x16x128xf32>,
    %cst_427 = arith.constant 0.000000e+00 : f32
    %368 = vector.broadcast %cst_427 : f32 to vector<32x128xf32>
    %c0_428 = arith.constant 0 : index
    %c0_429 = arith.constant 0 : index
    %c0_430 = arith.constant 0 : index
    %369 = vector.load %arg8[%c0_428, %c0_429, %c0_430] : memref<2x82x128xf32, #tpu.memory_space<vmem>>, vector<2x16x128xf32>
    %370 = vector.shape_cast %369 : vector<2x16x128xf32> to vector<32x128xf32>
    %371 = arith.truncf %370 : vector<32x128xf32> to vector<32x128xbf16>
    %c4_431 = arith.constant 4 : index
    %c0_432 = arith.constant 0 : index
    %c0_433 = arith.constant 0 : index
    %372 = vector.load %arg4[%c4_431, %c0_432, %c0_433] : memref<9x128x128xbf16, #tpu.memory_space<vmem>>, vector<1x128x128xbf16>
    %373 = vector.shape_cast %372 : vector<1x128x128xbf16> to vector<128x128xbf16>
    %cst_434 = arith.constant dense<0.000000e+00> : vector<32x128xf32>
    %374 = tpu.matmul %371, %373, %cst_434 {dimension_numbers = #tpu.dot_dimension_numbers<[1], [0], [0], [1], [0, 0, 1, 1], [], []>} : vector<32x128xbf16>, vector<128x128xbf16>, vector<32x128xf32> -> vector<32x128xf32>
    %375 = arith.addf %368, %374 : vector<32x128xf32>
    %c12 = arith.constant 12 : index
    %c0_435 = arith.constant 0 : index
    %c0_436 = arith.constant 0 : index
    %376 = vector.load %arg5[%c12, %c0_435, %c0_436] : memref<23x1x128xf32, #tpu.memory_space<vmem>>, vector<1x1x128xf32>
    %377 = vector.shape_cast %376 : vector<1x1x128xf32> to vector<1x128xf32>
    %378 = vector.broadcast %377 : vector<1x128xf32> to vector<32x128xf32>
    %379 = arith.addf %375, %378 : vector<32x128xf32>
    %c0_437 = arith.constant 0 : index
    %c0_438 = arith.constant 0 : index
    %c0_439 = arith.constant 0 : index
    %380 = vector.load %arg7[%c0_437, %c0_438, %c0_439] : memref<2x64x128xf32, #tpu.memory_space<vmem>>, vector<2x16x128xf32>
    %381 = vector.shape_cast %380 : vector<2x16x128xf32> to vector<32x128xf32>
    %382 = arith.addf %379, %381 : vector<32x128xf32>
    %383 = vector.shape_cast %382 : vector<32x128xf32> to vector<2x16x128xf32>
    %c0_440 = arith.constant 0 : index
    %c0_441 = arith.constant 0 : index
    %c0_442 = arith.constant 0 : index
    %384 = vector.load %arg7[%c0_440, %c0_441, %c0_442] : memref<2x64x128xf32, #tpu.memory_space<vmem>>, vector<2x16x128xf32>
    tpu.vector_store %arg7[%c0_440, %c0_441, %c0_442], %383 {strides = array<i32>} : memref<2x64x128xf32, #tpu.memory_space<vmem>>, vector<2x16x128xf32>,
    %c0_443 = arith.constant 0 : index
    %c0_444 = arith.constant 0 : index
    %c0_445 = arith.constant 0 : index
    %385 = vector.load %arg7[%c0_443, %c0_444, %c0_445] : memref<2x64x128xf32, #tpu.memory_space<vmem>>, vector<2x16x128xf32>
    %cst_446 = arith.constant 0.000000e+00 : f32
    %386 = vector.broadcast %cst_446 : f32 to vector<2x16x128xf32>
    %387 = arith.maximumf %385, %386 : vector<2x16x128xf32>
    %cst_447 = arith.constant 0.000000e+00 : f32
    %388 = vector.broadcast %cst_447 : f32 to vector<2x1x128xf32>
    %c0_448 = arith.constant 0 : index
    %c0_449 = arith.constant 0 : index
    %c0_450 = arith.constant 0 : index
    %389 = vector.load %arg8[%c0_448, %c0_449, %c0_450] : memref<2x82x128xf32, #tpu.memory_space<vmem>>, vector<2x1x128xf32>
    tpu.vector_store %arg8[%c0_448, %c0_449, %c0_450], %388 {strides = array<i32>} : memref<2x82x128xf32, #tpu.memory_space<vmem>>, vector<2x1x128xf32>,
    %c0_451 = arith.constant 0 : index
    %c17 = arith.constant 17 : index
    %c0_452 = arith.constant 0 : index
    %390 = vector.load %arg8[%c0_451, %c17, %c0_452] : memref<2x82x128xf32, #tpu.memory_space<vmem>>, vector<2x1x128xf32>
    tpu.vector_store %arg8[%c0_451, %c17, %c0_452], %388 {strides = array<i32>} : memref<2x82x128xf32, #tpu.memory_space<vmem>>, vector<2x1x128xf32>,
    %c0_453 = arith.constant 0 : index
    %c1_454 = arith.constant 1 : index
    %c0_455 = arith.constant 0 : index
    %391 = vector.load %arg8[%c0_453, %c1_454, %c0_455] : memref<2x82x128xf32, #tpu.memory_space<vmem>>, vector<2x16x128xf32>
    tpu.vector_store %arg8[%c0_453, %c1_454, %c0_455], %387 {strides = array<i32>} : memref<2x82x128xf32, #tpu.memory_space<vmem>>, vector<2x16x128xf32>,
    %cst_456 = arith.constant 0.000000e+00 : f32
    %392 = vector.broadcast %cst_456 : f32 to vector<32x128xf32>
    %c0_457 = arith.constant 0 : index
    %c0_458 = arith.constant 0 : index
    %c0_459 = arith.constant 0 : index
    %393 = vector.load %arg8[%c0_457, %c0_458, %c0_459] : memref<2x82x128xf32, #tpu.memory_space<vmem>>, vector<2x16x128xf32>
    %394 = vector.shape_cast %393 : vector<2x16x128xf32> to vector<32x128xf32>
    %395 = arith.truncf %394 : vector<32x128xf32> to vector<32x128xbf16>
    %c6_460 = arith.constant 6 : index
    %c0_461 = arith.constant 0 : index
    %c0_462 = arith.constant 0 : index
    %c0_463 = arith.constant 0 : index
    %396 = vector.load %arg2[%c6_460, %c0_461, %c0_462, %c0_463] : memref<11x3x128x128xbf16, #tpu.memory_space<vmem>>, vector<1x1x128x128xbf16>
    %397 = vector.shape_cast %396 : vector<1x1x128x128xbf16> to vector<128x128xbf16>
    %cst_464 = arith.constant dense<0.000000e+00> : vector<32x128xf32>
    %398 = tpu.matmul %395, %397, %cst_464 {dimension_numbers = #tpu.dot_dimension_numbers<[1], [0], [0], [1], [0, 0, 1, 1], [], []>} : vector<32x128xbf16>, vector<128x128xbf16>, vector<32x128xf32> -> vector<32x128xf32>
    %399 = arith.addf %392, %398 : vector<32x128xf32>
    %c0_465 = arith.constant 0 : index
    %c1_466 = arith.constant 1 : index
    %c0_467 = arith.constant 0 : index
    %400 = vector.load %arg8[%c0_465, %c1_466, %c0_467] : memref<2x82x128xf32, #tpu.memory_space<vmem>>, vector<2x16x128xf32>
    %401 = vector.shape_cast %400 : vector<2x16x128xf32> to vector<32x128xf32>
    %402 = arith.truncf %401 : vector<32x128xf32> to vector<32x128xbf16>
    %c6_468 = arith.constant 6 : index
    %c1_469 = arith.constant 1 : index
    %c0_470 = arith.constant 0 : index
    %c0_471 = arith.constant 0 : index
    %403 = vector.load %arg2[%c6_468, %c1_469, %c0_470, %c0_471] : memref<11x3x128x128xbf16, #tpu.memory_space<vmem>>, vector<1x1x128x128xbf16>
    %404 = vector.shape_cast %403 : vector<1x1x128x128xbf16> to vector<128x128xbf16>
    %cst_472 = arith.constant dense<0.000000e+00> : vector<32x128xf32>
    %405 = tpu.matmul %402, %404, %cst_472 {dimension_numbers = #tpu.dot_dimension_numbers<[1], [0], [0], [1], [0, 0, 1, 1], [], []>} : vector<32x128xbf16>, vector<128x128xbf16>, vector<32x128xf32> -> vector<32x128xf32>
    %406 = arith.addf %399, %405 : vector<32x128xf32>
    %c0_473 = arith.constant 0 : index
    %c2_474 = arith.constant 2 : index
    %c0_475 = arith.constant 0 : index
    %407 = vector.load %arg8[%c0_473, %c2_474, %c0_475] : memref<2x82x128xf32, #tpu.memory_space<vmem>>, vector<2x16x128xf32>
    %408 = vector.shape_cast %407 : vector<2x16x128xf32> to vector<32x128xf32>
    %409 = arith.truncf %408 : vector<32x128xf32> to vector<32x128xbf16>
    %c6_476 = arith.constant 6 : index
    %c2_477 = arith.constant 2 : index
    %c0_478 = arith.constant 0 : index
    %c0_479 = arith.constant 0 : index
    %410 = vector.load %arg2[%c6_476, %c2_477, %c0_478, %c0_479] : memref<11x3x128x128xbf16, #tpu.memory_space<vmem>>, vector<1x1x128x128xbf16>
    %411 = vector.shape_cast %410 : vector<1x1x128x128xbf16> to vector<128x128xbf16>
    %cst_480 = arith.constant dense<0.000000e+00> : vector<32x128xf32>
    %412 = tpu.matmul %409, %411, %cst_480 {dimension_numbers = #tpu.dot_dimension_numbers<[1], [0], [0], [1], [0, 0, 1, 1], [], []>} : vector<32x128xbf16>, vector<128x128xbf16>, vector<32x128xf32> -> vector<32x128xf32>
    %413 = arith.addf %406, %412 : vector<32x128xf32>
    %c13 = arith.constant 13 : index
    %c0_481 = arith.constant 0 : index
    %c0_482 = arith.constant 0 : index
    %414 = vector.load %arg5[%c13, %c0_481, %c0_482] : memref<23x1x128xf32, #tpu.memory_space<vmem>>, vector<1x1x128xf32>
    %415 = vector.shape_cast %414 : vector<1x1x128xf32> to vector<1x128xf32>
    %416 = vector.broadcast %415 : vector<1x128xf32> to vector<32x128xf32>
    %417 = arith.addf %413, %416 : vector<32x128xf32>
    %cst_483 = arith.constant 0.000000e+00 : f32
    %418 = vector.broadcast %cst_483 : f32 to vector<32x128xf32>
    %419 = arith.maximumf %417, %418 : vector<32x128xf32>
    %420 = vector.shape_cast %419 : vector<32x128xf32> to vector<2x16x128xf32>
    %c0_484 = arith.constant 0 : index
    %c0_485 = arith.constant 0 : index
    %c0_486 = arith.constant 0 : index
    %421 = vector.load %arg8[%c0_484, %c0_485, %c0_486] : memref<2x82x128xf32, #tpu.memory_space<vmem>>, vector<2x16x128xf32>
    tpu.vector_store %arg8[%c0_484, %c0_485, %c0_486], %420 {strides = array<i32>} : memref<2x82x128xf32, #tpu.memory_space<vmem>>, vector<2x16x128xf32>,
    %cst_487 = arith.constant 0.000000e+00 : f32
    %422 = vector.broadcast %cst_487 : f32 to vector<32x128xf32>
    %c0_488 = arith.constant 0 : index
    %c0_489 = arith.constant 0 : index
    %c0_490 = arith.constant 0 : index
    %423 = vector.load %arg8[%c0_488, %c0_489, %c0_490] : memref<2x82x128xf32, #tpu.memory_space<vmem>>, vector<2x16x128xf32>
    %424 = vector.shape_cast %423 : vector<2x16x128xf32> to vector<32x128xf32>
    %425 = arith.truncf %424 : vector<32x128xf32> to vector<32x128xbf16>
    %c5_491 = arith.constant 5 : index
    %c0_492 = arith.constant 0 : index
    %c0_493 = arith.constant 0 : index
    %426 = vector.load %arg4[%c5_491, %c0_492, %c0_493] : memref<9x128x128xbf16, #tpu.memory_space<vmem>>, vector<1x128x128xbf16>
    %427 = vector.shape_cast %426 : vector<1x128x128xbf16> to vector<128x128xbf16>
    %cst_494 = arith.constant dense<0.000000e+00> : vector<32x128xf32>
    %428 = tpu.matmul %425, %427, %cst_494 {dimension_numbers = #tpu.dot_dimension_numbers<[1], [0], [0], [1], [0, 0, 1, 1], [], []>} : vector<32x128xbf16>, vector<128x128xbf16>, vector<32x128xf32> -> vector<32x128xf32>
    %429 = arith.addf %422, %428 : vector<32x128xf32>
    %c14 = arith.constant 14 : index
    %c0_495 = arith.constant 0 : index
    %c0_496 = arith.constant 0 : index
    %430 = vector.load %arg5[%c14, %c0_495, %c0_496] : memref<23x1x128xf32, #tpu.memory_space<vmem>>, vector<1x1x128xf32>
    %431 = vector.shape_cast %430 : vector<1x1x128xf32> to vector<1x128xf32>
    %432 = vector.broadcast %431 : vector<1x128xf32> to vector<32x128xf32>
    %433 = arith.addf %429, %432 : vector<32x128xf32>
    %c0_497 = arith.constant 0 : index
    %c0_498 = arith.constant 0 : index
    %c0_499 = arith.constant 0 : index
    %434 = vector.load %arg7[%c0_497, %c0_498, %c0_499] : memref<2x64x128xf32, #tpu.memory_space<vmem>>, vector<2x16x128xf32>
    %435 = vector.shape_cast %434 : vector<2x16x128xf32> to vector<32x128xf32>
    %436 = arith.addf %433, %435 : vector<32x128xf32>
    %437 = vector.shape_cast %436 : vector<32x128xf32> to vector<2x16x128xf32>
    %c0_500 = arith.constant 0 : index
    %c0_501 = arith.constant 0 : index
    %c0_502 = arith.constant 0 : index
    %438 = vector.load %arg7[%c0_500, %c0_501, %c0_502] : memref<2x64x128xf32, #tpu.memory_space<vmem>>, vector<2x16x128xf32>
    tpu.vector_store %arg7[%c0_500, %c0_501, %c0_502], %437 {strides = array<i32>} : memref<2x64x128xf32, #tpu.memory_space<vmem>>, vector<2x16x128xf32>,
    %c0_503 = arith.constant 0 : index
    %c0_504 = arith.constant 0 : index
    %c0_505 = arith.constant 0 : index
    %439 = vector.load %arg7[%c0_503, %c0_504, %c0_505] : memref<2x64x128xf32, #tpu.memory_space<vmem>>, vector<2x16x128xf32>
    %cst_506 = arith.constant 0.000000e+00 : f32
    %440 = vector.broadcast %cst_506 : f32 to vector<2x1x128xf32>
    %c0_507 = arith.constant 0 : index
    %c0_508 = arith.constant 0 : index
    %c0_509 = arith.constant 0 : index
    %441 = vector.load %arg8[%c0_507, %c0_508, %c0_509] : memref<2x82x128xf32, #tpu.memory_space<vmem>>, vector<2x1x128xf32>
    tpu.vector_store %arg8[%c0_507, %c0_508, %c0_509], %440 {strides = array<i32>} : memref<2x82x128xf32, #tpu.memory_space<vmem>>, vector<2x1x128xf32>,
    %c0_510 = arith.constant 0 : index
    %c17_511 = arith.constant 17 : index
    %c0_512 = arith.constant 0 : index
    %442 = vector.load %arg8[%c0_510, %c17_511, %c0_512] : memref<2x82x128xf32, #tpu.memory_space<vmem>>, vector<2x1x128xf32>
    tpu.vector_store %arg8[%c0_510, %c17_511, %c0_512], %440 {strides = array<i32>} : memref<2x82x128xf32, #tpu.memory_space<vmem>>, vector<2x1x128xf32>,
    %c0_513 = arith.constant 0 : index
    %c1_514 = arith.constant 1 : index
    %c0_515 = arith.constant 0 : index
    %443 = vector.load %arg8[%c0_513, %c1_514, %c0_515] : memref<2x82x128xf32, #tpu.memory_space<vmem>>, vector<2x16x128xf32>
    tpu.vector_store %arg8[%c0_513, %c1_514, %c0_515], %439 {strides = array<i32>} : memref<2x82x128xf32, #tpu.memory_space<vmem>>, vector<2x16x128xf32>,
    %cst_516 = arith.constant 0.000000e+00 : f32
    %444 = vector.broadcast %cst_516 : f32 to vector<16x128xf32>
    %c0_517 = arith.constant 0 : index
    %c0_518 = arith.constant 0 : index
    %c0_519 = arith.constant 0 : index
    %445 = tpu.strided_load %arg8[%c0_517, %c0_518, %c0_519] {strides = array<i32: 1, 2, 1>} : memref<2x82x128xf32, #tpu.memory_space<vmem>>, vector<2x8x128xf32>
    %446 = vector.shape_cast %445 : vector<2x8x128xf32> to vector<16x128xf32>
    %447 = arith.truncf %446 : vector<16x128xf32> to vector<16x128xbf16>
    %c2_520 = arith.constant 2 : index
    %c0_521 = arith.constant 0 : index
    %c0_522 = arith.constant 0 : index
    %c0_523 = arith.constant 0 : index
    %448 = vector.load %arg3[%c2_520, %c0_521, %c0_522, %c0_523] : memref<3x4x128x128xbf16, #tpu.memory_space<vmem>>, vector<1x1x128x128xbf16>
    %449 = vector.shape_cast %448 : vector<1x1x128x128xbf16> to vector<128x128xbf16>
    %cst_524 = arith.constant dense<0.000000e+00> : vector<16x128xf32>
    %450 = tpu.matmul %447, %449, %cst_524 {dimension_numbers = #tpu.dot_dimension_numbers<[1], [0], [0], [1], [0, 0, 1, 1], [], []>} : vector<16x128xbf16>, vector<128x128xbf16>, vector<16x128xf32> -> vector<16x128xf32>
    %451 = arith.addf %444, %450 : vector<16x128xf32>
    %c0_525 = arith.constant 0 : index
    %c1_526 = arith.constant 1 : index
    %c0_527 = arith.constant 0 : index
    %452 = tpu.strided_load %arg8[%c0_525, %c1_526, %c0_527] {strides = array<i32: 1, 2, 1>} : memref<2x82x128xf32, #tpu.memory_space<vmem>>, vector<2x8x128xf32>
    %453 = vector.shape_cast %452 : vector<2x8x128xf32> to vector<16x128xf32>
    %454 = arith.truncf %453 : vector<16x128xf32> to vector<16x128xbf16>
    %c2_528 = arith.constant 2 : index
    %c1_529 = arith.constant 1 : index
    %c0_530 = arith.constant 0 : index
    %c0_531 = arith.constant 0 : index
    %455 = vector.load %arg3[%c2_528, %c1_529, %c0_530, %c0_531] : memref<3x4x128x128xbf16, #tpu.memory_space<vmem>>, vector<1x1x128x128xbf16>
    %456 = vector.shape_cast %455 : vector<1x1x128x128xbf16> to vector<128x128xbf16>
    %cst_532 = arith.constant dense<0.000000e+00> : vector<16x128xf32>
    %457 = tpu.matmul %454, %456, %cst_532 {dimension_numbers = #tpu.dot_dimension_numbers<[1], [0], [0], [1], [0, 0, 1, 1], [], []>} : vector<16x128xbf16>, vector<128x128xbf16>, vector<16x128xf32> -> vector<16x128xf32>
    %458 = arith.addf %451, %457 : vector<16x128xf32>
    %c0_533 = arith.constant 0 : index
    %c2_534 = arith.constant 2 : index
    %c0_535 = arith.constant 0 : index
    %459 = tpu.strided_load %arg8[%c0_533, %c2_534, %c0_535] {strides = array<i32: 1, 2, 1>} : memref<2x82x128xf32, #tpu.memory_space<vmem>>, vector<2x8x128xf32>
    %460 = vector.shape_cast %459 : vector<2x8x128xf32> to vector<16x128xf32>
    %461 = arith.truncf %460 : vector<16x128xf32> to vector<16x128xbf16>
    %c2_536 = arith.constant 2 : index
    %c2_537 = arith.constant 2 : index
    %c0_538 = arith.constant 0 : index
    %c0_539 = arith.constant 0 : index
    %462 = vector.load %arg3[%c2_536, %c2_537, %c0_538, %c0_539] : memref<3x4x128x128xbf16, #tpu.memory_space<vmem>>, vector<1x1x128x128xbf16>
    %463 = vector.shape_cast %462 : vector<1x1x128x128xbf16> to vector<128x128xbf16>
    %cst_540 = arith.constant dense<0.000000e+00> : vector<16x128xf32>
    %464 = tpu.matmul %461, %463, %cst_540 {dimension_numbers = #tpu.dot_dimension_numbers<[1], [0], [0], [1], [0, 0, 1, 1], [], []>} : vector<16x128xbf16>, vector<128x128xbf16>, vector<16x128xf32> -> vector<16x128xf32>
    %465 = arith.addf %458, %464 : vector<16x128xf32>
    %c0_541 = arith.constant 0 : index
    %c3_542 = arith.constant 3 : index
    %c0_543 = arith.constant 0 : index
    %466 = tpu.strided_load %arg8[%c0_541, %c3_542, %c0_543] {strides = array<i32: 1, 2, 1>} : memref<2x82x128xf32, #tpu.memory_space<vmem>>, vector<2x8x128xf32>
    %467 = vector.shape_cast %466 : vector<2x8x128xf32> to vector<16x128xf32>
    %468 = arith.truncf %467 : vector<16x128xf32> to vector<16x128xbf16>
    %c2_544 = arith.constant 2 : index
    %c3_545 = arith.constant 3 : index
    %c0_546 = arith.constant 0 : index
    %c0_547 = arith.constant 0 : index
    %469 = vector.load %arg3[%c2_544, %c3_545, %c0_546, %c0_547] : memref<3x4x128x128xbf16, #tpu.memory_space<vmem>>, vector<1x1x128x128xbf16>
    %470 = vector.shape_cast %469 : vector<1x1x128x128xbf16> to vector<128x128xbf16>
    %cst_548 = arith.constant dense<0.000000e+00> : vector<16x128xf32>
    %471 = tpu.matmul %468, %470, %cst_548 {dimension_numbers = #tpu.dot_dimension_numbers<[1], [0], [0], [1], [0, 0, 1, 1], [], []>} : vector<16x128xbf16>, vector<128x128xbf16>, vector<16x128xf32> -> vector<16x128xf32>
    %472 = arith.addf %465, %471 : vector<16x128xf32>
    %c15 = arith.constant 15 : index
    %c0_549 = arith.constant 0 : index
    %c0_550 = arith.constant 0 : index
    %473 = vector.load %arg5[%c15, %c0_549, %c0_550] : memref<23x1x128xf32, #tpu.memory_space<vmem>>, vector<1x1x128xf32>
    %474 = vector.shape_cast %473 : vector<1x1x128xf32> to vector<1x128xf32>
    %475 = vector.broadcast %474 : vector<1x128xf32> to vector<16x128xf32>
    %476 = arith.addf %472, %475 : vector<16x128xf32>
    %477 = vector.shape_cast %476 : vector<16x128xf32> to vector<2x8x128xf32>
    %c0_551 = arith.constant 0 : index
    %c0_552 = arith.constant 0 : index
    %c0_553 = arith.constant 0 : index
    %478 = vector.load %arg7[%c0_551, %c0_552, %c0_553] : memref<2x64x128xf32, #tpu.memory_space<vmem>>, vector<2x8x128xf32>
    tpu.vector_store %arg7[%c0_551, %c0_552, %c0_553], %477 {strides = array<i32>} : memref<2x64x128xf32, #tpu.memory_space<vmem>>, vector<2x8x128xf32>,
    %c0_554 = arith.constant 0 : index
    %c0_555 = arith.constant 0 : index
    %c0_556 = arith.constant 0 : index
    %479 = vector.load %arg7[%c0_554, %c0_555, %c0_556] : memref<2x64x128xf32, #tpu.memory_space<vmem>>, vector<2x8x128xf32>
    %cst_557 = arith.constant 0.000000e+00 : f32
    %480 = vector.broadcast %cst_557 : f32 to vector<2x8x128xf32>
    %481 = arith.maximumf %479, %480 : vector<2x8x128xf32>
    %cst_558 = arith.constant 0.000000e+00 : f32
    %482 = vector.broadcast %cst_558 : f32 to vector<2x9x128xf32>
    %c0_559 = arith.constant 0 : index
    %c0_560 = arith.constant 0 : index
    %c0_561 = arith.constant 0 : index
    %483 = vector.load %arg8[%c0_559, %c0_560, %c0_561] : memref<2x82x128xf32, #tpu.memory_space<vmem>>, vector<2x9x128xf32>
    tpu.vector_store %arg8[%c0_559, %c0_560, %c0_561], %482 {strides = array<i32>} : memref<2x82x128xf32, #tpu.memory_space<vmem>>, vector<2x9x128xf32>,
    %c0_562 = arith.constant 0 : index
    %c17_563 = arith.constant 17 : index
    %c0_564 = arith.constant 0 : index
    %484 = vector.load %arg8[%c0_562, %c17_563, %c0_564] : memref<2x82x128xf32, #tpu.memory_space<vmem>>, vector<2x9x128xf32>
    tpu.vector_store %arg8[%c0_562, %c17_563, %c0_564], %482 {strides = array<i32>} : memref<2x82x128xf32, #tpu.memory_space<vmem>>, vector<2x9x128xf32>,
    %c0_565 = arith.constant 0 : index
    %c9_566 = arith.constant 9 : index
    %c0_567 = arith.constant 0 : index
    %485 = vector.load %arg8[%c0_565, %c9_566, %c0_567] : memref<2x82x128xf32, #tpu.memory_space<vmem>>, vector<2x8x128xf32>
    tpu.vector_store %arg8[%c0_565, %c9_566, %c0_567], %481 {strides = array<i32>} : memref<2x82x128xf32, #tpu.memory_space<vmem>>, vector<2x8x128xf32>,
    %cst_568 = arith.constant 0.000000e+00 : f32
    %486 = vector.broadcast %cst_568 : f32 to vector<16x128xf32>
    %c0_569 = arith.constant 0 : index
    %c0_570 = arith.constant 0 : index
    %c0_571 = arith.constant 0 : index
    %487 = vector.load %arg8[%c0_569, %c0_570, %c0_571] : memref<2x82x128xf32, #tpu.memory_space<vmem>>, vector<2x8x128xf32>
    %488 = vector.shape_cast %487 : vector<2x8x128xf32> to vector<16x128xf32>
    %489 = arith.truncf %488 : vector<16x128xf32> to vector<16x128xbf16>
    %c7_572 = arith.constant 7 : index
    %c0_573 = arith.constant 0 : index
    %c0_574 = arith.constant 0 : index
    %c0_575 = arith.constant 0 : index
    %490 = vector.load %arg2[%c7_572, %c0_573, %c0_574, %c0_575] : memref<11x3x128x128xbf16, #tpu.memory_space<vmem>>, vector<1x1x128x128xbf16>
    %491 = vector.shape_cast %490 : vector<1x1x128x128xbf16> to vector<128x128xbf16>
    %cst_576 = arith.constant dense<0.000000e+00> : vector<16x128xf32>
    %492 = tpu.matmul %489, %491, %cst_576 {dimension_numbers = #tpu.dot_dimension_numbers<[1], [0], [0], [1], [0, 0, 1, 1], [], []>} : vector<16x128xbf16>, vector<128x128xbf16>, vector<16x128xf32> -> vector<16x128xf32>
    %493 = arith.addf %486, %492 : vector<16x128xf32>
    %c0_577 = arith.constant 0 : index
    %c9_578 = arith.constant 9 : index
    %c0_579 = arith.constant 0 : index
    %494 = vector.load %arg8[%c0_577, %c9_578, %c0_579] : memref<2x82x128xf32, #tpu.memory_space<vmem>>, vector<2x8x128xf32>
    %495 = vector.shape_cast %494 : vector<2x8x128xf32> to vector<16x128xf32>
    %496 = arith.truncf %495 : vector<16x128xf32> to vector<16x128xbf16>
    %c7_580 = arith.constant 7 : index
    %c1_581 = arith.constant 1 : index
    %c0_582 = arith.constant 0 : index
    %c0_583 = arith.constant 0 : index
    %497 = vector.load %arg2[%c7_580, %c1_581, %c0_582, %c0_583] : memref<11x3x128x128xbf16, #tpu.memory_space<vmem>>, vector<1x1x128x128xbf16>
    %498 = vector.shape_cast %497 : vector<1x1x128x128xbf16> to vector<128x128xbf16>
    %cst_584 = arith.constant dense<0.000000e+00> : vector<16x128xf32>
    %499 = tpu.matmul %496, %498, %cst_584 {dimension_numbers = #tpu.dot_dimension_numbers<[1], [0], [0], [1], [0, 0, 1, 1], [], []>} : vector<16x128xbf16>, vector<128x128xbf16>, vector<16x128xf32> -> vector<16x128xf32>
    %500 = arith.addf %493, %499 : vector<16x128xf32>
    %c0_585 = arith.constant 0 : index
    %c18_586 = arith.constant 18 : index
    %c0_587 = arith.constant 0 : index
    %501 = vector.load %arg8[%c0_585, %c18_586, %c0_587] : memref<2x82x128xf32, #tpu.memory_space<vmem>>, vector<2x8x128xf32>
    %502 = vector.shape_cast %501 : vector<2x8x128xf32> to vector<16x128xf32>
    %503 = arith.truncf %502 : vector<16x128xf32> to vector<16x128xbf16>
    %c7_588 = arith.constant 7 : index
    %c2_589 = arith.constant 2 : index
    %c0_590 = arith.constant 0 : index
    %c0_591 = arith.constant 0 : index
    %504 = vector.load %arg2[%c7_588, %c2_589, %c0_590, %c0_591] : memref<11x3x128x128xbf16, #tpu.memory_space<vmem>>, vector<1x1x128x128xbf16>
    %505 = vector.shape_cast %504 : vector<1x1x128x128xbf16> to vector<128x128xbf16>
    %cst_592 = arith.constant dense<0.000000e+00> : vector<16x128xf32>
    %506 = tpu.matmul %503, %505, %cst_592 {dimension_numbers = #tpu.dot_dimension_numbers<[1], [0], [0], [1], [0, 0, 1, 1], [], []>} : vector<16x128xbf16>, vector<128x128xbf16>, vector<16x128xf32> -> vector<16x128xf32>
    %507 = arith.addf %500, %506 : vector<16x128xf32>
    %c16 = arith.constant 16 : index
    %c0_593 = arith.constant 0 : index
    %c0_594 = arith.constant 0 : index
    %508 = vector.load %arg5[%c16, %c0_593, %c0_594] : memref<23x1x128xf32, #tpu.memory_space<vmem>>, vector<1x1x128xf32>
    %509 = vector.shape_cast %508 : vector<1x1x128xf32> to vector<1x128xf32>
    %510 = vector.broadcast %509 : vector<1x128xf32> to vector<16x128xf32>
    %511 = arith.addf %507, %510 : vector<16x128xf32>
    %cst_595 = arith.constant 0.000000e+00 : f32
    %512 = vector.broadcast %cst_595 : f32 to vector<16x128xf32>
    %513 = arith.maximumf %511, %512 : vector<16x128xf32>
    %514 = vector.shape_cast %513 : vector<16x128xf32> to vector<2x8x128xf32>
    %c0_596 = arith.constant 0 : index
    %c0_597 = arith.constant 0 : index
    %c0_598 = arith.constant 0 : index
    %515 = vector.load %arg8[%c0_596, %c0_597, %c0_598] : memref<2x82x128xf32, #tpu.memory_space<vmem>>, vector<2x8x128xf32>
    tpu.vector_store %arg8[%c0_596, %c0_597, %c0_598], %514 {strides = array<i32>} : memref<2x82x128xf32, #tpu.memory_space<vmem>>, vector<2x8x128xf32>,
    %cst_599 = arith.constant 0.000000e+00 : f32
    %516 = vector.broadcast %cst_599 : f32 to vector<16x128xf32>
    %c0_600 = arith.constant 0 : index
    %c0_601 = arith.constant 0 : index
    %c0_602 = arith.constant 0 : index
    %517 = vector.load %arg8[%c0_600, %c0_601, %c0_602] : memref<2x82x128xf32, #tpu.memory_space<vmem>>, vector<2x8x128xf32>
    %518 = vector.shape_cast %517 : vector<2x8x128xf32> to vector<16x128xf32>
    %519 = arith.truncf %518 : vector<16x128xf32> to vector<16x128xbf16>
    %c6_603 = arith.constant 6 : index
    %c0_604 = arith.constant 0 : index
    %c0_605 = arith.constant 0 : index
    %520 = vector.load %arg4[%c6_603, %c0_604, %c0_605] : memref<9x128x128xbf16, #tpu.memory_space<vmem>>, vector<1x128x128xbf16>
    %521 = vector.shape_cast %520 : vector<1x128x128xbf16> to vector<128x128xbf16>
    %cst_606 = arith.constant dense<0.000000e+00> : vector<16x128xf32>
    %522 = tpu.matmul %519, %521, %cst_606 {dimension_numbers = #tpu.dot_dimension_numbers<[1], [0], [0], [1], [0, 0, 1, 1], [], []>} : vector<16x128xbf16>, vector<128x128xbf16>, vector<16x128xf32> -> vector<16x128xf32>
    %523 = arith.addf %516, %522 : vector<16x128xf32>
    %c17_607 = arith.constant 17 : index
    %c0_608 = arith.constant 0 : index
    %c0_609 = arith.constant 0 : index
    %524 = vector.load %arg5[%c17_607, %c0_608, %c0_609] : memref<23x1x128xf32, #tpu.memory_space<vmem>>, vector<1x1x128xf32>
    %525 = vector.shape_cast %524 : vector<1x1x128xf32> to vector<1x128xf32>
    %526 = vector.broadcast %525 : vector<1x128xf32> to vector<16x128xf32>
    %527 = arith.addf %523, %526 : vector<16x128xf32>
    %c0_610 = arith.constant 0 : index
    %c0_611 = arith.constant 0 : index
    %c0_612 = arith.constant 0 : index
    %528 = vector.load %arg7[%c0_610, %c0_611, %c0_612] : memref<2x64x128xf32, #tpu.memory_space<vmem>>, vector<2x8x128xf32>
    %529 = vector.shape_cast %528 : vector<2x8x128xf32> to vector<16x128xf32>
    %530 = arith.addf %527, %529 : vector<16x128xf32>
    %531 = vector.shape_cast %530 : vector<16x128xf32> to vector<2x8x128xf32>
    %c0_613 = arith.constant 0 : index
    %c0_614 = arith.constant 0 : index
    %c0_615 = arith.constant 0 : index
    %532 = vector.load %arg7[%c0_613, %c0_614, %c0_615] : memref<2x64x128xf32, #tpu.memory_space<vmem>>, vector<2x8x128xf32>
    tpu.vector_store %arg7[%c0_613, %c0_614, %c0_615], %531 {strides = array<i32>} : memref<2x64x128xf32, #tpu.memory_space<vmem>>, vector<2x8x128xf32>,
    %c0_616 = arith.constant 0 : index
    %c0_617 = arith.constant 0 : index
    %c0_618 = arith.constant 0 : index
    %533 = vector.load %arg7[%c0_616, %c0_617, %c0_618] : memref<2x64x128xf32, #tpu.memory_space<vmem>>, vector<2x8x128xf32>
    %cst_619 = arith.constant 0.000000e+00 : f32
    %534 = vector.broadcast %cst_619 : f32 to vector<2x8x128xf32>
    %535 = arith.maximumf %533, %534 : vector<2x8x128xf32>
    %cst_620 = arith.constant 0.000000e+00 : f32
    %536 = vector.broadcast %cst_620 : f32 to vector<2x3x128xf32>
    %c0_621 = arith.constant 0 : index
    %c0_622 = arith.constant 0 : index
    %c0_623 = arith.constant 0 : index
    %537 = vector.load %arg8[%c0_621, %c0_622, %c0_623] : memref<2x82x128xf32, #tpu.memory_space<vmem>>, vector<2x3x128xf32>
    tpu.vector_store %arg8[%c0_621, %c0_622, %c0_623], %536 {strides = array<i32>} : memref<2x82x128xf32, #tpu.memory_space<vmem>>, vector<2x3x128xf32>,
    %c0_624 = arith.constant 0 : index
    %c11_625 = arith.constant 11 : index
    %c0_626 = arith.constant 0 : index
    %538 = vector.load %arg8[%c0_624, %c11_625, %c0_626] : memref<2x82x128xf32, #tpu.memory_space<vmem>>, vector<2x3x128xf32>
    tpu.vector_store %arg8[%c0_624, %c11_625, %c0_626], %536 {strides = array<i32>} : memref<2x82x128xf32, #tpu.memory_space<vmem>>, vector<2x3x128xf32>,
    %c0_627 = arith.constant 0 : index
    %c3_628 = arith.constant 3 : index
    %c0_629 = arith.constant 0 : index
    %539 = vector.load %arg8[%c0_627, %c3_628, %c0_629] : memref<2x82x128xf32, #tpu.memory_space<vmem>>, vector<2x8x128xf32>
    tpu.vector_store %arg8[%c0_627, %c3_628, %c0_629], %535 {strides = array<i32>} : memref<2x82x128xf32, #tpu.memory_space<vmem>>, vector<2x8x128xf32>,
    %cst_630 = arith.constant 0.000000e+00 : f32
    %540 = vector.broadcast %cst_630 : f32 to vector<16x128xf32>
    %c0_631 = arith.constant 0 : index
    %c0_632 = arith.constant 0 : index
    %c0_633 = arith.constant 0 : index
    %541 = vector.load %arg8[%c0_631, %c0_632, %c0_633] : memref<2x82x128xf32, #tpu.memory_space<vmem>>, vector<2x8x128xf32>
    %542 = vector.shape_cast %541 : vector<2x8x128xf32> to vector<16x128xf32>
    %543 = arith.truncf %542 : vector<16x128xf32> to vector<16x128xbf16>
    %c8_634 = arith.constant 8 : index
    %c0_635 = arith.constant 0 : index
    %c0_636 = arith.constant 0 : index
    %c0_637 = arith.constant 0 : index
    %544 = vector.load %arg2[%c8_634, %c0_635, %c0_636, %c0_637] : memref<11x3x128x128xbf16, #tpu.memory_space<vmem>>, vector<1x1x128x128xbf16>
    %545 = vector.shape_cast %544 : vector<1x1x128x128xbf16> to vector<128x128xbf16>
    %cst_638 = arith.constant dense<0.000000e+00> : vector<16x128xf32>
    %546 = tpu.matmul %543, %545, %cst_638 {dimension_numbers = #tpu.dot_dimension_numbers<[1], [0], [0], [1], [0, 0, 1, 1], [], []>} : vector<16x128xbf16>, vector<128x128xbf16>, vector<16x128xf32> -> vector<16x128xf32>
    %547 = arith.addf %540, %546 : vector<16x128xf32>
    %c0_639 = arith.constant 0 : index
    %c3_640 = arith.constant 3 : index
    %c0_641 = arith.constant 0 : index
    %548 = vector.load %arg8[%c0_639, %c3_640, %c0_641] : memref<2x82x128xf32, #tpu.memory_space<vmem>>, vector<2x8x128xf32>
    %549 = vector.shape_cast %548 : vector<2x8x128xf32> to vector<16x128xf32>
    %550 = arith.truncf %549 : vector<16x128xf32> to vector<16x128xbf16>
    %c8_642 = arith.constant 8 : index
    %c1_643 = arith.constant 1 : index
    %c0_644 = arith.constant 0 : index
    %c0_645 = arith.constant 0 : index
    %551 = vector.load %arg2[%c8_642, %c1_643, %c0_644, %c0_645] : memref<11x3x128x128xbf16, #tpu.memory_space<vmem>>, vector<1x1x128x128xbf16>
    %552 = vector.shape_cast %551 : vector<1x1x128x128xbf16> to vector<128x128xbf16>
    %cst_646 = arith.constant dense<0.000000e+00> : vector<16x128xf32>
    %553 = tpu.matmul %550, %552, %cst_646 {dimension_numbers = #tpu.dot_dimension_numbers<[1], [0], [0], [1], [0, 0, 1, 1], [], []>} : vector<16x128xbf16>, vector<128x128xbf16>, vector<16x128xf32> -> vector<16x128xf32>
    %554 = arith.addf %547, %553 : vector<16x128xf32>
    %c0_647 = arith.constant 0 : index
    %c6_648 = arith.constant 6 : index
    %c0_649 = arith.constant 0 : index
    %555 = vector.load %arg8[%c0_647, %c6_648, %c0_649] : memref<2x82x128xf32, #tpu.memory_space<vmem>>, vector<2x8x128xf32>
    %556 = vector.shape_cast %555 : vector<2x8x128xf32> to vector<16x128xf32>
    %557 = arith.truncf %556 : vector<16x128xf32> to vector<16x128xbf16>
    %c8_650 = arith.constant 8 : index
    %c2_651 = arith.constant 2 : index
    %c0_652 = arith.constant 0 : index
    %c0_653 = arith.constant 0 : index
    %558 = vector.load %arg2[%c8_650, %c2_651, %c0_652, %c0_653] : memref<11x3x128x128xbf16, #tpu.memory_space<vmem>>, vector<1x1x128x128xbf16>
    %559 = vector.shape_cast %558 : vector<1x1x128x128xbf16> to vector<128x128xbf16>
    %cst_654 = arith.constant dense<0.000000e+00> : vector<16x128xf32>
    %560 = tpu.matmul %557, %559, %cst_654 {dimension_numbers = #tpu.dot_dimension_numbers<[1], [0], [0], [1], [0, 0, 1, 1], [], []>} : vector<16x128xbf16>, vector<128x128xbf16>, vector<16x128xf32> -> vector<16x128xf32>
    %561 = arith.addf %554, %560 : vector<16x128xf32>
    %c18_655 = arith.constant 18 : index
    %c0_656 = arith.constant 0 : index
    %c0_657 = arith.constant 0 : index
    %562 = vector.load %arg5[%c18_655, %c0_656, %c0_657] : memref<23x1x128xf32, #tpu.memory_space<vmem>>, vector<1x1x128xf32>
    %563 = vector.shape_cast %562 : vector<1x1x128xf32> to vector<1x128xf32>
    %564 = vector.broadcast %563 : vector<1x128xf32> to vector<16x128xf32>
    %565 = arith.addf %561, %564 : vector<16x128xf32>
    %cst_658 = arith.constant 0.000000e+00 : f32
    %566 = vector.broadcast %cst_658 : f32 to vector<16x128xf32>
    %567 = arith.maximumf %565, %566 : vector<16x128xf32>
    %568 = vector.shape_cast %567 : vector<16x128xf32> to vector<2x8x128xf32>
    %c0_659 = arith.constant 0 : index
    %c0_660 = arith.constant 0 : index
    %c0_661 = arith.constant 0 : index
    %569 = vector.load %arg8[%c0_659, %c0_660, %c0_661] : memref<2x82x128xf32, #tpu.memory_space<vmem>>, vector<2x8x128xf32>
    tpu.vector_store %arg8[%c0_659, %c0_660, %c0_661], %568 {strides = array<i32>} : memref<2x82x128xf32, #tpu.memory_space<vmem>>, vector<2x8x128xf32>,
    %cst_662 = arith.constant 0.000000e+00 : f32
    %570 = vector.broadcast %cst_662 : f32 to vector<16x128xf32>
    %c0_663 = arith.constant 0 : index
    %c0_664 = arith.constant 0 : index
    %c0_665 = arith.constant 0 : index
    %571 = vector.load %arg8[%c0_663, %c0_664, %c0_665] : memref<2x82x128xf32, #tpu.memory_space<vmem>>, vector<2x8x128xf32>
    %572 = vector.shape_cast %571 : vector<2x8x128xf32> to vector<16x128xf32>
    %573 = arith.truncf %572 : vector<16x128xf32> to vector<16x128xbf16>
    %c7_666 = arith.constant 7 : index
    %c0_667 = arith.constant 0 : index
    %c0_668 = arith.constant 0 : index
    %574 = vector.load %arg4[%c7_666, %c0_667, %c0_668] : memref<9x128x128xbf16, #tpu.memory_space<vmem>>, vector<1x128x128xbf16>
    %575 = vector.shape_cast %574 : vector<1x128x128xbf16> to vector<128x128xbf16>
    %cst_669 = arith.constant dense<0.000000e+00> : vector<16x128xf32>
    %576 = tpu.matmul %573, %575, %cst_669 {dimension_numbers = #tpu.dot_dimension_numbers<[1], [0], [0], [1], [0, 0, 1, 1], [], []>} : vector<16x128xbf16>, vector<128x128xbf16>, vector<16x128xf32> -> vector<16x128xf32>
    %577 = arith.addf %570, %576 : vector<16x128xf32>
    %c19_670 = arith.constant 19 : index
    %c0_671 = arith.constant 0 : index
    %c0_672 = arith.constant 0 : index
    %578 = vector.load %arg5[%c19_670, %c0_671, %c0_672] : memref<23x1x128xf32, #tpu.memory_space<vmem>>, vector<1x1x128xf32>
    %579 = vector.shape_cast %578 : vector<1x1x128xf32> to vector<1x128xf32>
    %580 = vector.broadcast %579 : vector<1x128xf32> to vector<16x128xf32>
    %581 = arith.addf %577, %580 : vector<16x128xf32>
    %c0_673 = arith.constant 0 : index
    %c0_674 = arith.constant 0 : index
    %c0_675 = arith.constant 0 : index
    %582 = vector.load %arg7[%c0_673, %c0_674, %c0_675] : memref<2x64x128xf32, #tpu.memory_space<vmem>>, vector<2x8x128xf32>
    %583 = vector.shape_cast %582 : vector<2x8x128xf32> to vector<16x128xf32>
    %584 = arith.addf %581, %583 : vector<16x128xf32>
    %585 = vector.shape_cast %584 : vector<16x128xf32> to vector<2x8x128xf32>
    %c0_676 = arith.constant 0 : index
    %c0_677 = arith.constant 0 : index
    %c0_678 = arith.constant 0 : index
    %586 = vector.load %arg7[%c0_676, %c0_677, %c0_678] : memref<2x64x128xf32, #tpu.memory_space<vmem>>, vector<2x8x128xf32>
    tpu.vector_store %arg7[%c0_676, %c0_677, %c0_678], %585 {strides = array<i32>} : memref<2x64x128xf32, #tpu.memory_space<vmem>>, vector<2x8x128xf32>,
    %c0_679 = arith.constant 0 : index
    %c0_680 = arith.constant 0 : index
    %c0_681 = arith.constant 0 : index
    %587 = vector.load %arg7[%c0_679, %c0_680, %c0_681] : memref<2x64x128xf32, #tpu.memory_space<vmem>>, vector<2x8x128xf32>
    %cst_682 = arith.constant 0.000000e+00 : f32
    %588 = vector.broadcast %cst_682 : f32 to vector<2x8x128xf32>
    %589 = arith.maximumf %587, %588 : vector<2x8x128xf32>
    %cst_683 = arith.constant 0.000000e+00 : f32
    %590 = vector.broadcast %cst_683 : f32 to vector<2x1x128xf32>
    %c0_684 = arith.constant 0 : index
    %c0_685 = arith.constant 0 : index
    %c0_686 = arith.constant 0 : index
    %591 = vector.load %arg8[%c0_684, %c0_685, %c0_686] : memref<2x82x128xf32, #tpu.memory_space<vmem>>, vector<2x1x128xf32>
    tpu.vector_store %arg8[%c0_684, %c0_685, %c0_686], %590 {strides = array<i32>} : memref<2x82x128xf32, #tpu.memory_space<vmem>>, vector<2x1x128xf32>,
    %c0_687 = arith.constant 0 : index
    %c9_688 = arith.constant 9 : index
    %c0_689 = arith.constant 0 : index
    %592 = vector.load %arg8[%c0_687, %c9_688, %c0_689] : memref<2x82x128xf32, #tpu.memory_space<vmem>>, vector<2x1x128xf32>
    tpu.vector_store %arg8[%c0_687, %c9_688, %c0_689], %590 {strides = array<i32>} : memref<2x82x128xf32, #tpu.memory_space<vmem>>, vector<2x1x128xf32>,
    %c0_690 = arith.constant 0 : index
    %c1_691 = arith.constant 1 : index
    %c0_692 = arith.constant 0 : index
    %593 = vector.load %arg8[%c0_690, %c1_691, %c0_692] : memref<2x82x128xf32, #tpu.memory_space<vmem>>, vector<2x8x128xf32>
    tpu.vector_store %arg8[%c0_690, %c1_691, %c0_692], %589 {strides = array<i32>} : memref<2x82x128xf32, #tpu.memory_space<vmem>>, vector<2x8x128xf32>,
    %cst_693 = arith.constant 0.000000e+00 : f32
    %594 = vector.broadcast %cst_693 : f32 to vector<16x128xf32>
    %c0_694 = arith.constant 0 : index
    %c0_695 = arith.constant 0 : index
    %c0_696 = arith.constant 0 : index
    %595 = vector.load %arg8[%c0_694, %c0_695, %c0_696] : memref<2x82x128xf32, #tpu.memory_space<vmem>>, vector<2x8x128xf32>
    %596 = vector.shape_cast %595 : vector<2x8x128xf32> to vector<16x128xf32>
    %597 = arith.truncf %596 : vector<16x128xf32> to vector<16x128xbf16>
    %c9_697 = arith.constant 9 : index
    %c0_698 = arith.constant 0 : index
    %c0_699 = arith.constant 0 : index
    %c0_700 = arith.constant 0 : index
    %598 = vector.load %arg2[%c9_697, %c0_698, %c0_699, %c0_700] : memref<11x3x128x128xbf16, #tpu.memory_space<vmem>>, vector<1x1x128x128xbf16>
    %599 = vector.shape_cast %598 : vector<1x1x128x128xbf16> to vector<128x128xbf16>
    %cst_701 = arith.constant dense<0.000000e+00> : vector<16x128xf32>
    %600 = tpu.matmul %597, %599, %cst_701 {dimension_numbers = #tpu.dot_dimension_numbers<[1], [0], [0], [1], [0, 0, 1, 1], [], []>} : vector<16x128xbf16>, vector<128x128xbf16>, vector<16x128xf32> -> vector<16x128xf32>
    %601 = arith.addf %594, %600 : vector<16x128xf32>
    %c0_702 = arith.constant 0 : index
    %c1_703 = arith.constant 1 : index
    %c0_704 = arith.constant 0 : index
    %602 = vector.load %arg8[%c0_702, %c1_703, %c0_704] : memref<2x82x128xf32, #tpu.memory_space<vmem>>, vector<2x8x128xf32>
    %603 = vector.shape_cast %602 : vector<2x8x128xf32> to vector<16x128xf32>
    %604 = arith.truncf %603 : vector<16x128xf32> to vector<16x128xbf16>
    %c9_705 = arith.constant 9 : index
    %c1_706 = arith.constant 1 : index
    %c0_707 = arith.constant 0 : index
    %c0_708 = arith.constant 0 : index
    %605 = vector.load %arg2[%c9_705, %c1_706, %c0_707, %c0_708] : memref<11x3x128x128xbf16, #tpu.memory_space<vmem>>, vector<1x1x128x128xbf16>
    %606 = vector.shape_cast %605 : vector<1x1x128x128xbf16> to vector<128x128xbf16>
    %cst_709 = arith.constant dense<0.000000e+00> : vector<16x128xf32>
    %607 = tpu.matmul %604, %606, %cst_709 {dimension_numbers = #tpu.dot_dimension_numbers<[1], [0], [0], [1], [0, 0, 1, 1], [], []>} : vector<16x128xbf16>, vector<128x128xbf16>, vector<16x128xf32> -> vector<16x128xf32>
    %608 = arith.addf %601, %607 : vector<16x128xf32>
    %c0_710 = arith.constant 0 : index
    %c2_711 = arith.constant 2 : index
    %c0_712 = arith.constant 0 : index
    %609 = vector.load %arg8[%c0_710, %c2_711, %c0_712] : memref<2x82x128xf32, #tpu.memory_space<vmem>>, vector<2x8x128xf32>
    %610 = vector.shape_cast %609 : vector<2x8x128xf32> to vector<16x128xf32>
    %611 = arith.truncf %610 : vector<16x128xf32> to vector<16x128xbf16>
    %c9_713 = arith.constant 9 : index
    %c2_714 = arith.constant 2 : index
    %c0_715 = arith.constant 0 : index
    %c0_716 = arith.constant 0 : index
    %612 = vector.load %arg2[%c9_713, %c2_714, %c0_715, %c0_716] : memref<11x3x128x128xbf16, #tpu.memory_space<vmem>>, vector<1x1x128x128xbf16>
    %613 = vector.shape_cast %612 : vector<1x1x128x128xbf16> to vector<128x128xbf16>
    %cst_717 = arith.constant dense<0.000000e+00> : vector<16x128xf32>
    %614 = tpu.matmul %611, %613, %cst_717 {dimension_numbers = #tpu.dot_dimension_numbers<[1], [0], [0], [1], [0, 0, 1, 1], [], []>} : vector<16x128xbf16>, vector<128x128xbf16>, vector<16x128xf32> -> vector<16x128xf32>
    %615 = arith.addf %608, %614 : vector<16x128xf32>
    %c20 = arith.constant 20 : index
    %c0_718 = arith.constant 0 : index
    %c0_719 = arith.constant 0 : index
    %616 = vector.load %arg5[%c20, %c0_718, %c0_719] : memref<23x1x128xf32, #tpu.memory_space<vmem>>, vector<1x1x128xf32>
    %617 = vector.shape_cast %616 : vector<1x1x128xf32> to vector<1x128xf32>
    %618 = vector.broadcast %617 : vector<1x128xf32> to vector<16x128xf32>
    %619 = arith.addf %615, %618 : vector<16x128xf32>
    %cst_720 = arith.constant 0.000000e+00 : f32
    %620 = vector.broadcast %cst_720 : f32 to vector<16x128xf32>
    %621 = arith.maximumf %619, %620 : vector<16x128xf32>
    %622 = vector.shape_cast %621 : vector<16x128xf32> to vector<2x8x128xf32>
    %c0_721 = arith.constant 0 : index
    %c0_722 = arith.constant 0 : index
    %c0_723 = arith.constant 0 : index
    %623 = vector.load %arg8[%c0_721, %c0_722, %c0_723] : memref<2x82x128xf32, #tpu.memory_space<vmem>>, vector<2x8x128xf32>
    tpu.vector_store %arg8[%c0_721, %c0_722, %c0_723], %622 {strides = array<i32>} : memref<2x82x128xf32, #tpu.memory_space<vmem>>, vector<2x8x128xf32>,
    %cst_724 = arith.constant 0.000000e+00 : f32
    %624 = vector.broadcast %cst_724 : f32 to vector<16x128xf32>
    %c0_725 = arith.constant 0 : index
    %c0_726 = arith.constant 0 : index
    %c0_727 = arith.constant 0 : index
    %625 = vector.load %arg8[%c0_725, %c0_726, %c0_727] : memref<2x82x128xf32, #tpu.memory_space<vmem>>, vector<2x8x128xf32>
    %626 = vector.shape_cast %625 : vector<2x8x128xf32> to vector<16x128xf32>
    %627 = arith.truncf %626 : vector<16x128xf32> to vector<16x128xbf16>
    %c8_728 = arith.constant 8 : index
    %c0_729 = arith.constant 0 : index
    %c0_730 = arith.constant 0 : index
    %628 = vector.load %arg4[%c8_728, %c0_729, %c0_730] : memref<9x128x128xbf16, #tpu.memory_space<vmem>>, vector<1x128x128xbf16>
    %629 = vector.shape_cast %628 : vector<1x128x128xbf16> to vector<128x128xbf16>
    %cst_731 = arith.constant dense<0.000000e+00> : vector<16x128xf32>
    %630 = tpu.matmul %627, %629, %cst_731 {dimension_numbers = #tpu.dot_dimension_numbers<[1], [0], [0], [1], [0, 0, 1, 1], [], []>} : vector<16x128xbf16>, vector<128x128xbf16>, vector<16x128xf32> -> vector<16x128xf32>
    %631 = arith.addf %624, %630 : vector<16x128xf32>
    %c21 = arith.constant 21 : index
    %c0_732 = arith.constant 0 : index
    %c0_733 = arith.constant 0 : index
    %632 = vector.load %arg5[%c21, %c0_732, %c0_733] : memref<23x1x128xf32, #tpu.memory_space<vmem>>, vector<1x1x128xf32>
    %633 = vector.shape_cast %632 : vector<1x1x128xf32> to vector<1x128xf32>
    %634 = vector.broadcast %633 : vector<1x128xf32> to vector<16x128xf32>
    %635 = arith.addf %631, %634 : vector<16x128xf32>
    %c0_734 = arith.constant 0 : index
    %c0_735 = arith.constant 0 : index
    %c0_736 = arith.constant 0 : index
    %636 = vector.load %arg7[%c0_734, %c0_735, %c0_736] : memref<2x64x128xf32, #tpu.memory_space<vmem>>, vector<2x8x128xf32>
    %637 = vector.shape_cast %636 : vector<2x8x128xf32> to vector<16x128xf32>
    %638 = arith.addf %635, %637 : vector<16x128xf32>
    %639 = vector.shape_cast %638 : vector<16x128xf32> to vector<2x8x128xf32>
    %c0_737 = arith.constant 0 : index
    %c0_738 = arith.constant 0 : index
    %c0_739 = arith.constant 0 : index
    %640 = vector.load %arg7[%c0_737, %c0_738, %c0_739] : memref<2x64x128xf32, #tpu.memory_space<vmem>>, vector<2x8x128xf32>
    tpu.vector_store %arg7[%c0_737, %c0_738, %c0_739], %639 {strides = array<i32>} : memref<2x64x128xf32, #tpu.memory_space<vmem>>, vector<2x8x128xf32>,
    %c0_740 = arith.constant 0 : index
    %c0_741 = arith.constant 0 : index
    %c0_742 = arith.constant 0 : index
    %641 = vector.load %arg7[%c0_740, %c0_741, %c0_742] : memref<2x64x128xf32, #tpu.memory_space<vmem>>, vector<2x8x128xf32>
    %cst_743 = arith.constant 0.000000e+00 : f32
    %642 = vector.broadcast %cst_743 : f32 to vector<2x1x128xf32>
    %c0_744 = arith.constant 0 : index
    %c0_745 = arith.constant 0 : index
    %c0_746 = arith.constant 0 : index
    %643 = vector.load %arg8[%c0_744, %c0_745, %c0_746] : memref<2x82x128xf32, #tpu.memory_space<vmem>>, vector<2x1x128xf32>
    tpu.vector_store %arg8[%c0_744, %c0_745, %c0_746], %642 {strides = array<i32>} : memref<2x82x128xf32, #tpu.memory_space<vmem>>, vector<2x1x128xf32>,
    %c0_747 = arith.constant 0 : index
    %c9_748 = arith.constant 9 : index
    %c0_749 = arith.constant 0 : index
    %644 = vector.load %arg8[%c0_747, %c9_748, %c0_749] : memref<2x82x128xf32, #tpu.memory_space<vmem>>, vector<2x1x128xf32>
    tpu.vector_store %arg8[%c0_747, %c9_748, %c0_749], %642 {strides = array<i32>} : memref<2x82x128xf32, #tpu.memory_space<vmem>>, vector<2x1x128xf32>,
    %c0_750 = arith.constant 0 : index
    %c1_751 = arith.constant 1 : index
    %c0_752 = arith.constant 0 : index
    %645 = vector.load %arg8[%c0_750, %c1_751, %c0_752] : memref<2x82x128xf32, #tpu.memory_space<vmem>>, vector<2x8x128xf32>
    tpu.vector_store %arg8[%c0_750, %c1_751, %c0_752], %641 {strides = array<i32>} : memref<2x82x128xf32, #tpu.memory_space<vmem>>, vector<2x8x128xf32>,
    %cst_753 = arith.constant 0.000000e+00 : f32
    %646 = vector.broadcast %cst_753 : f32 to vector<16x128xf32>
    %c0_754 = arith.constant 0 : index
    %c0_755 = arith.constant 0 : index
    %c0_756 = arith.constant 0 : index
    %647 = vector.load %arg8[%c0_754, %c0_755, %c0_756] : memref<2x82x128xf32, #tpu.memory_space<vmem>>, vector<2x8x128xf32>
    %648 = vector.shape_cast %647 : vector<2x8x128xf32> to vector<16x128xf32>
    %649 = arith.truncf %648 : vector<16x128xf32> to vector<16x128xbf16>
    %c10_757 = arith.constant 10 : index
    %c0_758 = arith.constant 0 : index
    %c0_759 = arith.constant 0 : index
    %c0_760 = arith.constant 0 : index
    %650 = vector.load %arg2[%c10_757, %c0_758, %c0_759, %c0_760] : memref<11x3x128x128xbf16, #tpu.memory_space<vmem>>, vector<1x1x128x128xbf16>
    %651 = vector.shape_cast %650 : vector<1x1x128x128xbf16> to vector<128x128xbf16>
    %cst_761 = arith.constant dense<0.000000e+00> : vector<16x128xf32>
    %652 = tpu.matmul %649, %651, %cst_761 {dimension_numbers = #tpu.dot_dimension_numbers<[1], [0], [0], [1], [0, 0, 1, 1], [], []>} : vector<16x128xbf16>, vector<128x128xbf16>, vector<16x128xf32> -> vector<16x128xf32>
    %653 = arith.addf %646, %652 : vector<16x128xf32>
    %c0_762 = arith.constant 0 : index
    %c1_763 = arith.constant 1 : index
    %c0_764 = arith.constant 0 : index
    %654 = vector.load %arg8[%c0_762, %c1_763, %c0_764] : memref<2x82x128xf32, #tpu.memory_space<vmem>>, vector<2x8x128xf32>
    %655 = vector.shape_cast %654 : vector<2x8x128xf32> to vector<16x128xf32>
    %656 = arith.truncf %655 : vector<16x128xf32> to vector<16x128xbf16>
    %c10_765 = arith.constant 10 : index
    %c1_766 = arith.constant 1 : index
    %c0_767 = arith.constant 0 : index
    %c0_768 = arith.constant 0 : index
    %657 = vector.load %arg2[%c10_765, %c1_766, %c0_767, %c0_768] : memref<11x3x128x128xbf16, #tpu.memory_space<vmem>>, vector<1x1x128x128xbf16>
    %658 = vector.shape_cast %657 : vector<1x1x128x128xbf16> to vector<128x128xbf16>
    %cst_769 = arith.constant dense<0.000000e+00> : vector<16x128xf32>
    %659 = tpu.matmul %656, %658, %cst_769 {dimension_numbers = #tpu.dot_dimension_numbers<[1], [0], [0], [1], [0, 0, 1, 1], [], []>} : vector<16x128xbf16>, vector<128x128xbf16>, vector<16x128xf32> -> vector<16x128xf32>
    %660 = arith.addf %653, %659 : vector<16x128xf32>
    %c0_770 = arith.constant 0 : index
    %c2_771 = arith.constant 2 : index
    %c0_772 = arith.constant 0 : index
    %661 = vector.load %arg8[%c0_770, %c2_771, %c0_772] : memref<2x82x128xf32, #tpu.memory_space<vmem>>, vector<2x8x128xf32>
    %662 = vector.shape_cast %661 : vector<2x8x128xf32> to vector<16x128xf32>
    %663 = arith.truncf %662 : vector<16x128xf32> to vector<16x128xbf16>
    %c10_773 = arith.constant 10 : index
    %c2_774 = arith.constant 2 : index
    %c0_775 = arith.constant 0 : index
    %c0_776 = arith.constant 0 : index
    %664 = vector.load %arg2[%c10_773, %c2_774, %c0_775, %c0_776] : memref<11x3x128x128xbf16, #tpu.memory_space<vmem>>, vector<1x1x128x128xbf16>
    %665 = vector.shape_cast %664 : vector<1x1x128x128xbf16> to vector<128x128xbf16>
    %cst_777 = arith.constant dense<0.000000e+00> : vector<16x128xf32>
    %666 = tpu.matmul %663, %665, %cst_777 {dimension_numbers = #tpu.dot_dimension_numbers<[1], [0], [0], [1], [0, 0, 1, 1], [], []>} : vector<16x128xbf16>, vector<128x128xbf16>, vector<16x128xf32> -> vector<16x128xf32>
    %667 = arith.addf %660, %666 : vector<16x128xf32>
    %c22 = arith.constant 22 : index
    %c0_778 = arith.constant 0 : index
    %c0_779 = arith.constant 0 : index
    %668 = vector.load %arg5[%c22, %c0_778, %c0_779] : memref<23x1x128xf32, #tpu.memory_space<vmem>>, vector<1x1x128xf32>
    %669 = vector.shape_cast %668 : vector<1x1x128xf32> to vector<1x128xf32>
    %670 = vector.broadcast %669 : vector<1x128xf32> to vector<16x128xf32>
    %671 = arith.addf %667, %670 : vector<16x128xf32>
    %672 = vector.shape_cast %671 : vector<16x128xf32> to vector<2x8x128xf32>
    %c0_780 = arith.constant 0 : index
    %c0_781 = arith.constant 0 : index
    %c0_782 = arith.constant 0 : index
    %673 = vector.load %arg6[%c0_780, %c0_781, %c0_782] : memref<2x8x128xf32, #tpu.memory_space<vmem>>, vector<2x8x128xf32>
    tpu.vector_store %arg6[%c0_780, %c0_781, %c0_782], %672 {strides = array<i32>} : memref<2x8x128xf32, #tpu.memory_space<vmem>>, vector<2x8x128xf32>,
    return
  }
  func.func @transform_0(%arg0: i32) -> (i32, i32, i32) {
    %c0_i32 = arith.constant 0 : i32
    %c0_i32_0 = arith.constant 0 : i32
    %c0_i32_1 = arith.constant 0 : i32
    return %arg0, %c0_i32, %c0_i32_0 : i32, i32, i32
  }
  func.func @transform_1(%arg0: i32) -> (i32, i32, i32, i32) {
    %c0_i32 = arith.constant 0 : i32
    %c0_i32_0 = arith.constant 0 : i32
    %c0_i32_1 = arith.constant 0 : i32
    %c0_i32_2 = arith.constant 0 : i32
    %c0_i32_3 = arith.constant 0 : i32
    return %c0_i32, %c0_i32_0, %c0_i32_1, %c0_i32_2 : i32, i32, i32, i32
  }
  func.func @transform_2(%arg0: i32) -> (i32, i32, i32, i32) {
    %c0_i32 = arith.constant 0 : i32
    %c0_i32_0 = arith.constant 0 : i32
    %c0_i32_1 = arith.constant 0 : i32
    %c0_i32_2 = arith.constant 0 : i32
    %c0_i32_3 = arith.constant 0 : i32
    return %c0_i32, %c0_i32_0, %c0_i32_1, %c0_i32_2 : i32, i32, i32, i32
  }
  func.func @transform_3(%arg0: i32) -> (i32, i32, i32) {
    %c0_i32 = arith.constant 0 : i32
    %c0_i32_0 = arith.constant 0 : i32
    %c0_i32_1 = arith.constant 0 : i32
    %c0_i32_2 = arith.constant 0 : i32
    return %c0_i32, %c0_i32_0, %c0_i32_1 : i32, i32, i32
  }
  func.func @transform_4(%arg0: i32) -> (i32, i32, i32) {
    %c0_i32 = arith.constant 0 : i32
    %c0_i32_0 = arith.constant 0 : i32
    %c0_i32_1 = arith.constant 0 : i32
    %c0_i32_2 = arith.constant 0 : i32
    return %c0_i32, %c0_i32_0, %c0_i32_1 : i32, i32, i32
  }
  func.func @transform_5(%arg0: i32) -> (i32, i32, i32) {
    %c0_i32 = arith.constant 0 : i32
    %c0_i32_0 = arith.constant 0 : i32
    %c0_i32_1 = arith.constant 0 : i32
    return %arg0, %c0_i32, %c0_i32_0 : i32, i32, i32
  }
}

</mosaic_0001>

<bundles_post_ra>
// kernel: tpu_custom_call.1
= control target key start
LH: loop header
LB: loop body
LE: loop exit
PB: predicated region body
PF: predicated region fallthrough
CT: control target
= control target key end

     0   :  { %10 = vsyncpa [#allocation5], 0  ;;  %s11280_s0 = inlined_call_operand.hbm [shape: f32[2,64,128], index: 0, kind: input, shape index: {}]   ;;  %s11281_s1 = inlined_call_operand.hbm [shape: bf16[11,3,128,128], index: 1, kind: input, shape index: {}]   ;;  %s11282_s2 = inlined_call_operand.hbm [shape: bf16[3,4,128,128], index: 2, kind: input, shape index: {}]   ;;  %s11283_s3 = inlined_call_operand.hbm [shape: bf16[9,128,128], index: 3, kind: input, shape index: {}]   ;;  %s11284_s4 = inlined_call_operand.hbm [shape: f32[23,1,128], index: 4, kind: input, shape index: {}]   ;;  %s11285_s5 = inlined_call_operand.hbm [shape: f32[2,8,128], index: 5, kind: output, shape index: {}]  }
   0x1   :  { %11 = vsyncpa [#allocation8], 0 }
   0x2   :  { %12 = vsyncpa [#allocation11], 0 }
   0x3   :  { %13 = vsyncpa [#allocation6], 0  ;;  %s10631_s18 = smov [#allocation7]  }
   0x4   :  { %s31_s19 = sshll.u32 %s10631_s18, 4  ;;  %s32_s19 = int_to_ptr.vmem [resolvable:$true] %s31_s19 }
   0x5   :  { %s10511_s20 = scalar_lea.vmem %s32_s19, 33792  ;;  %p10516_p1 = scmp.lt.s32.totalorder %s32_s19, %s32_s19 }
   0x6   :  { %p10512_p0 = scmp.ne.s32.totalorder %s32_s19, %s10511_s20  ;;  %p10517_p2 = scmp.lt.s32.totalorder %s10511_s20, %s10511_s20 }
   0x8   :  { %p10518_p3 = por %p10517_p2, %p10516_p1 }
   0xa   :  { %p10519_p4 = pnand %p10518_p3, %p10512_p0 }
   0xc   :  { %10522 = shalt.err (!%p10519_p4)
}
   0xd   :  { %s10632_s21 = smov 64   ;;  %s10633_s22 = smov 4  }
   0xe   :  { %37 = dma.hbm_to_vmem [thread:$0]  %s11281_s1, 33792, %s32_s19, [#allocation8], %s10632_s21, %s10632_s21, %s10633_s22  }
   0xf   :  { %s10634_s25 = smov [#allocation10]   ;;  %s10635_s27 = smov [#allocation4]  }
  0x10   :  { %s55_s26 = sshll.u32 %s10634_s25, 4  ;;  %s19_s28 = sshll.u32 %s10635_s27, 4  ;;  %s56_s26 = int_to_ptr.vmem [resolvable:$true] %s55_s26  ;;  %s20_s28 = int_to_ptr.vmem [resolvable:$true] %s19_s28 }
  0x11   :  { %s10531_s29 = scalar_lea.vmem %s56_s26, 9216  ;;  %p10536_p6 = scmp.lt.s32.totalorder %s56_s26, %s56_s26 }
  0x12   :  { %p10532_p5 = scmp.ne.s32.totalorder %s56_s26, %s10531_s29  ;;  %p10537_p7 = scmp.lt.s32.totalorder %s10531_s29, %s10531_s29 }
  0x14   :  { %p10538_p8 = por %p10537_p7, %p10536_p6 }
  0x16   :  { %p10539_p9 = pnand %p10538_p8, %p10532_p5 }
  0x18   :  { %10542 = shalt.err (!%p10539_p9)
}
  0x19   :  { %61 = dma.hbm_to_vmem [thread:$0]  %s11283_s3, 9216, %s56_s26, [#allocation11], %s10632_s21, %s10632_s21, %s10633_s22  }
  0x1a   :  { %s10551_s1 = scalar_lea.vmem %s20_s28, 2048  ;;  %p10556_p11 = scmp.lt.s32.totalorder %s20_s28, %s20_s28 }
  0x1b   :  { %p10552_p10 = scmp.ne.s32.totalorder %s20_s28, %s10551_s1  ;;  %p10557_p12 = scmp.lt.s32.totalorder %s10551_s1, %s10551_s1 }
  0x1d   :  { %p10558_p13 = por %p10557_p12, %p10556_p11 }
  0x1f   :  { %p10559_p0 = pnand %p10558_p13, %p10552_p10 }
  0x21   :  { %10562 = shalt.err (!%p10559_p0)
}
  0x22   :  { %s10636_s7 = smov 128   ;;  %s10637_s8 = smov 8  }
  0x23   :  { %25 = dma.hbm_to_vmem [thread:$0]  %s11280_s0, 2048, %s20_s28, [#allocation5], %s10636_s7, %s10636_s7, %s10637_s8  }
  0x24   :  { %s10638_s11 = smov [#allocation9]   ;;  %s10639_s3 = smov [#allocation12]  }
  0x25   :  { %s43_s12 = sshll.u32 %s10638_s11, 4  ;;  %s67_s13 = sshll.u32 %s10639_s3, 4  ;;  %s44_s12 = int_to_ptr.vmem [resolvable:$true] %s43_s12  ;;  %s68_s13 = int_to_ptr.vmem [resolvable:$true] %s67_s13 }
  0x26   :  { %s10571_s14 = scalar_lea.vmem %s44_s12, 12288  ;;  %p10576_p2 = scmp.lt.s32.totalorder %s44_s12, %s44_s12 }
  0x27   :  { %p10572_p1 = scmp.ne.s32.totalorder %s44_s12, %s10571_s14  ;;  %p10577_p3 = scmp.lt.s32.totalorder %s10571_s14, %s10571_s14 }
  0x29   :  { %p10578_p4 = por %p10577_p3, %p10576_p2 }
  0x2b   :  { %p10579_p5 = pnand %p10578_p4, %p10572_p1 }
  0x2d   :  { %10582 = shalt.err (!%p10579_p5)
}
  0x2e   :  { %49 = dma.hbm_to_vmem [thread:$0]  %s11282_s2, 12288, %s44_s12, [#allocation8], %s10632_s21, %s10632_s21, %s10633_s22  }
  0x2f   :  { %s10591_s0 = scalar_lea.vmem %s68_s13, 368  ;;  %s10595_s17 = scalar_lea.vmem %s68_s13, 384 }
  0x30   :  { %p10592_p6 = scmp.ne.s32.totalorder %s68_s13, %s10591_s0  ;;  %p10596_p7 = scmp.lt.s32.totalorder %s68_s13, %s68_s13 }
  0x31   :  { %p10597_p8 = scmp.lt.s32.totalorder %s10595_s17, %s10591_s0 }
  0x33   :  { %p10598_p9 = por %p10597_p8, %p10596_p7 }
  0x35   :  { %p10599_p10 = pnand %p10598_p9, %p10592_p6 }
  0x37   :  { %10602 = shalt.err (!%p10599_p10)
}
  0x38   :  { %s10640_s18 = smov 16   ;;  %s10641_s19 = smov 1  }
  0x39   :  { %73 = dma.hbm_to_vmem [thread:$0]  %s11284_s4, 368, %s68_s13, [#allocation11], %s10640_s18, %s10640_s18, %s10641_s19  }
  0x3a   :  { %10623 = dma.done.wait [#allocation5], 2048  }
  0x3b   :  { %10624 = vsyncadd [#allocation5], 4294965248 }
  0x3c   :  { %10625 = dma.done.wait [#allocation8], 46080  }
  0x3d   :  { %10626 = vsyncadd [#allocation8], 4294921216 }
  0x3e   :  { %10627 = dma.done.wait [#allocation11], 9584  }
  0x3f   :  { %10628 = vsyncadd [#allocation11], 4294957712  ;;  %v10642_v0 = vmov 0.0   ;;  %v10067_v1 = vld [vmem:[#allocation7 + $0x78] sm:$0xff]   ;;  %v10069_v3 = vld [vmem:[#allocation7 + $0x70] sm:$0xff]   ;;  %vm10643_vm0 = vmmov 0  }
  0x40   :  { %106 = vst [vmem:[#allocation3] sm:$0x1] %v10642_v0  ;;  %107 = vst [vmem:[#allocation3 + $0x58] sm:$0x1] %v10642_v0  ;;  %v10068_v2 = vld [vmem:[#allocation7 + $0x38] sm:$0xff]   ;;  %8873 = vmatprep.subr.bf16.mxu0 %v10067_v1  ;;  %v10070_v4 = vld [vmem:[#allocation7 + $0x30] sm:$0xff]  }
  0x41   :  { %108 = vst [vmem:[#allocation3 + $0x41] sm:$0x1] %v10642_v0  ;;  %109 = vst [vmem:[#allocation3 + $0x99] sm:$0x1] %v10642_v0  ;;  %8905 = vmatprep.subr.bf16.mxu1 %v10068_v2  ;;  %8874 = vmatpush3.bf16.msra.mxu0 %v10067_v1  ;;  %v10071_v5 = vld [vmem:[#allocation7 + $0x68] sm:$0xff]   ;;  %v10073_v7 = vld [vmem:[#allocation7 + $0x60] sm:$0xff]  }
  0x42   :  { %8906 = vmatpush3.bf16.msra.mxu1 %v10068_v2  ;;  %8875 = vmatprep.subr.bf16.mxu0 %v10069_v3  ;;  %v10072_v6 = vld [vmem:[#allocation7 + $0x28] sm:$0xff]   ;;  %v10074_v8 = vld [vmem:[#allocation7 + $0x20] sm:$0xff]   ;;  %v10075_v9 = vld [vmem:[#allocation7 + $0x58] sm:$0xff]   ;;  %s10644_s2 = smov [#allocation13]  }
  0x43   :  { %8907 = vmatprep.subr.bf16.mxu1 %v10070_v4  ;;  %v10076_v10 = vld [vmem:[#allocation7 + $0x18] sm:$0xff]   ;;  %v10077_v11 = vld [vmem:[#allocation7 + $0x50] sm:$0xff]   ;;  %v90_v13 = vld [vmem:[#allocation4] sm:$0xff]  ;;  %s7833_s4 = sshll.u32 %s10644_s2, 4  ;;  %s7834_s4 = int_to_ptr.vmem [resolvable:$true] %s7833_s4 }
  0x44   :  { %v10078_v12 = vld [vmem:[#allocation7 + $0x10] sm:$0xff]   ;;  %v91_v14 = vld [vmem:[#allocation4 + $0x8] sm:$0xff]  ;;  %110 = vst [vmem:[#allocation3 + $0x1] sm:$0xff] %v90_v13  ;;  %v93_v17 = vld [vmem:[#allocation4 + $0x18] sm:$0xff]  ;;  %s10603_s21 = scalar_lea.vmem %s7834_s4, 256  ;;  %p10608_p12 = scmp.lt.s32.totalorder %s7834_s4, %s7834_s4 }
  0x45   :  { %8876 = vmatpush3.bf16.msra.mxu0 %v10069_v3  ;;  %v10706_v15 = vld [vmem:[#allocation4 + $0x10] sm:$0xff]  ;;  %111 = vst [vmem:[#allocation3 + $0x9] sm:$0xff] %v91_v14  ;;  %v182_v16 = vpack.c.bf16 %v91_v14, %v90_v13  ;;  %113 = vst [vmem:[#allocation3 + $0x19] sm:$0xff] %v93_v17  ;;  %v10079_v18 = vld [vmem:[#allocation7 + $0x48] sm:$0xff]   ;;  %p10604_p11 = scmp.ne.s32.totalorder %s7834_s4, %s10603_s21  ;;  %p10609_p13 = scmp.lt.s32.totalorder %s10603_s21, %s10603_s21 }
  0x46   :  { %8908 = vmatpush3.bf16.msra.mxu1 %v10070_v4  ;;  %8877 = vmatprep.subr.bf16.mxu0 %v10071_v5  ;;  %112 = vst [vmem:[#allocation3 + $0x11] sm:$0xff] %v10706_v15  ;;  %v10709_v19 = vld [vmem:[#allocation4 + $0x20] sm:$0xff]  ;;  %v95_v20 = vld [vmem:[#allocation4 + $0x28] sm:$0xff]  ;;  %v10712_v21 = vld [vmem:[#allocation4 + $0x30] sm:$0xff]  ;;  %v183_v38 = vpack.c.bf16 %v93_v17, %v10706_v15 }
  0x47   :  { %8909 = vmatprep.subr.bf16.mxu1 %v10072_v6  ;;  %8889 = vmatprep.mubr.bf16.mxu0 %v182_v16  ;;  %114 = vst [vmem:[#allocation3 + $0x21] sm:$0xff] %v10709_v19  ;;  %115 = vst [vmem:[#allocation3 + $0x29] sm:$0xff] %v95_v20  ;;  %v10714_v22 = vld [vmem:[#allocation4 + $0x38] sm:$0xff]  ;;  %v10080_v23 = vld [vmem:[#allocation7 + $0x8] sm:$0xff]   ;;  %v184_v44 = vpack.c.bf16 %v95_v20, %v10709_v19  ;;  %p10610_p0 = por %p10609_p13, %p10608_p12 }
  0x48   :  { %116 = vst [vmem:[#allocation3 + $0x31] sm:$0xff] %v10712_v21  ;;  %117 = vst [vmem:[#allocation3 + $0x39] sm:$0xff] %v10714_v22  ;;  %v10718_v24 = vld [vmem:[#allocation4 + $0x40] sm:$0xff]  ;;  %v10720_v25 = vld [vmem:[#allocation4 + $0x48] sm:$0xff]  ;;  %v185_v52 = vpack.c.bf16 %v10714_v22, %v10712_v21 }
  0x49   :  { %8878 = vmatpush3.bf16.msra.mxu0 %v10071_v5  ;;  %118 = vst [vmem:[#allocation3 + $0x59] sm:$0xff] %v10718_v24  ;;  %v10723_v26 = vld [vmem:[#allocation4 + $0x50] sm:$0xff]  ;;  %v10725_v27 = vld [vmem:[#allocation4 + $0x58] sm:$0xff]  ;;  %v10081_v28 = vld [vmem:[#allocation7 + $0x40] sm:$0xff]   ;;  %v186_v56 = vpack.c.bf16 %v10720_v25, %v10718_v24  ;;  %p10611_p1 = pnand %p10610_p0, %p10604_p11 }
  0x4a   :  { %8910 = vmatpush3.bf16.msra.mxu1 %v10072_v6  ;;  %8879 = vmatprep.subr.bf16.mxu0 %v10073_v7  ;;  %119 = vst [vmem:[#allocation3 + $0x61] sm:$0xff] %v10720_v25  ;;  %120 = vst [vmem:[#allocation3 + $0x69] sm:$0xff] %v10723_v26  ;;  %v10082_v31 = vld [vmem:[#allocation7] sm:$0xff]   ;;  %v10083_v33 = vld [vmem:[#allocation7 + $0xb8] sm:$0xff]   ;;  %v187_v1 = vpack.c.bf16 %v10725_v27, %v10723_v26 }
  0x4b   :  { %8911 = vmatprep.subr.bf16.mxu1 %v10074_v8  ;;  %v126_v29 = vld [vmem:[#allocation3] sm:$0xff]  ;;  %121 = vst [vmem:[#allocation3 + $0x71] sm:$0xff] %v10725_v27  ;;  %v10732_v40 = vld [vmem:[#allocation4 + $0x60] sm:$0xff]  ;;  %v10734_v41 = vld [vmem:[#allocation4 + $0x68] sm:$0xff] }
  0x4c   :  { %v127_v30 = vld [vmem:[#allocation3 + $0x8] sm:$0xff]  ;;  %770 = vst [vmem:[#allocation3] sm:$0x1] %v10642_v0  ;;  %122 = vst [vmem:[#allocation3 + $0x79] sm:$0xff] %v10732_v40  ;;  %v10084_v43 = vld [vmem:[#allocation7 + $0xb0] sm:$0xff]   ;;  %v188_v4 = vpack.c.bf16 %v10734_v41, %v10732_v40 }
  0x4d   :  { %8880 = vmatpush3.bf16.msra.mxu0 %v10073_v7  ;;  %v142_v32 = vpack.c.bf16 %v127_v30, %v126_v29  ;;  %v128_v34 = vld [vmem:[#allocation3 + $0x10] sm:$0xff]  ;;  %v129_v35 = vld [vmem:[#allocation3 + $0x18] sm:$0xff]  ;;  %123 = vst [vmem:[#allocation3 + $0x81] sm:$0xff] %v10734_v41  ;;  %v104_v46 = vld [vmem:[#allocation4 + $0x70] sm:$0xff] }
  0x4e   :  { %8912 = vmatpush3.bf16.msra.mxu1 %v10074_v8  ;;  %8881 = vmatprep.subr.bf16.mxu0 %v10075_v9  ;;  %v130_v36 = vld [vmem:[#allocation3 + $0x20] sm:$0xff]  ;;  %v131_v37 = vld [vmem:[#allocation3 + $0x28] sm:$0xff]  ;;  %v143_v42 = vpack.c.bf16 %v129_v35, %v128_v34  ;;  %124 = vst [vmem:[#allocation3 + $0x89] sm:$0xff] %v104_v46  ;;  %v10085_v48 = vld [vmem:[#allocation7 + $0xa8] sm:$0xff]  }
  0x4f   :  { %8913 = vmatprep.subr.bf16.mxu1 %v10076_v10  ;;  %8921 = vmatprep.mubr.bf16.mxu1 %v142_v32  ;;  %v144_v45 = vpack.c.bf16 %v131_v37, %v130_v36  ;;  %v105_v47 = vld [vmem:[#allocation4 + $0x78] sm:$0xff]  ;;  %v132_v49 = vld [vmem:[#allocation3 + $0x30] sm:$0xff]  ;;  %v133_v50 = vld [vmem:[#allocation3 + $0x38] sm:$0xff] }
  0x50   :  { %v134_v39 = vld [vmem:[#allocation3 + $0x58] sm:$0xff]  ;;  %125 = vst [vmem:[#allocation3 + $0x91] sm:$0xff] %v105_v47  ;;  %v145_v54 = vpack.c.bf16 %v133_v50, %v132_v49  ;;  %v10086_v55 = vld [vmem:[#allocation7 + $0xa0] sm:$0xff]   ;;  %v10087_v60 = vld [vmem:[#allocation7 + $0x98] sm:$0xff]  }
  0x51   :  { %8882 = vmatpush3.bf16.msra.mxu0 %v10075_v9  ;;  %771 = vst [vmem:[#allocation3 + $0x58] sm:$0x1] %v10642_v0  ;;  %v10740_v51 = vld [vmem:[#allocation3 + $0x3a] sm:$0xff]  ;;  %v136_v58 = vld [vmem:[#allocation3 + $0x68] sm:$0xff]  ;;  %v499_v15 = vld [vmem:[#allocation3 + $0x12] sm:$0xff] }
  0x52   :  { %8914 = vmatpush3.bf16.msra.mxu1 %v10076_v10  ;;  %8883 = vmatprep.subr.bf16.mxu0 %v10077_v11  ;;  %772 = vst [vmem:[#allocation3 + $0x41] sm:$0x1] %v10642_v0  ;;  %v135_v53 = vld [vmem:[#allocation3 + $0x60] sm:$0xff]  ;;  %v137_v59 = vld [vmem:[#allocation3 + $0x70] sm:$0xff]  ;;  %v10089_v8 = vld [vmem:[#allocation7 + $0x88] sm:$0xff]  }
  0x53   :  { %8915 = vmatprep.subr.bf16.mxu1 %v10078_v12  ;;  %v146_v57 = vpack.c.bf16 %v135_v53, %v134_v39  ;;  %v138_v62 = vld [vmem:[#allocation3 + $0x78] sm:$0xff]  ;;  %v10088_v2 = vld [vmem:[#allocation7 + $0x90] sm:$0xff]   ;;  %v147_v3 = vpack.c.bf16 %v137_v59, %v136_v58  ;;  %v498_v10 = vld [vmem:[#allocation3 + $0xa] sm:$0xff] }
  0x54   :  { %v139_v63 = vld [vmem:[#allocation3 + $0x80] sm:$0xff]  ;;  %v503_v21 = vld [vmem:[#allocation3 + $0x32] sm:$0xff]  ;;  %v507_v26 = vld [vmem:[#allocation3 + $0x6a] sm:$0xff] }
  0x55   :  { %8884 = vmatpush3.bf16.msra.mxu0 %v10077_v11  ;;  %v148_v5 = vpack.c.bf16 %v139_v63, %v138_v62  ;;  %v140_v6 = vld [vmem:[#allocation3 + $0x88] sm:$0xff]  ;;  %v189_v11 = vpack.c.bf16 %v105_v47, %v104_v46  ;;  %v500_v16 = vld [vmem:[#allocation3 + $0x1a] sm:$0xff]  ;;  %v516_v24 = vpack.c.bf16 %v10740_v51, %v503_v21  ;;  %v508_v27 = vld [vmem:[#allocation3 + $0x72] sm:$0xff] }
  0x56   :  { %8916 = vmatpush3.bf16.msra.mxu1 %v10078_v12  ;;  %8885 = vmatprep.subr.bf16.mxu0 %v10079_v18  ;;  %v497_v9 = vld [vmem:[#allocation3 + $0x2] sm:$0xff]  ;;  %v10090_v12 = vld [vmem:[#allocation7 + $0x80] sm:$0xff]   ;;  %v514_v19 = vpack.c.bf16 %v500_v16, %v499_v15  ;;  %v505_v22 = vld [vmem:[#allocation3 + $0x5a] sm:$0xff]  ;;  %v518_v30 = vpack.c.bf16 %v508_v27, %v507_v26 }
  0x57   :  { %8917 = vmatprep.subr.bf16.mxu1 %v10080_v23  ;;  %v10747_v61 = vld [vmem:[#allocation3 + $0x92] sm:$0xff]  ;;  %v513_v14 = vpack.c.bf16 %v498_v10, %v497_v9  ;;  %v501_v17 = vld [vmem:[#allocation3 + $0x22] sm:$0xff]  ;;  %v511_v32 = vld [vmem:[#allocation3 + $0x8a] sm:$0xff] }
  0x58   :  { %773 = vst [vmem:[#allocation3 + $0x99] sm:$0x1] %v10642_v0  ;;  %v141_v7 = vld [vmem:[#allocation3 + $0x90] sm:$0xff]  ;;  %v510_v29 = vld [vmem:[#allocation3 + $0x82] sm:$0xff]  ;;  %v10096_v39 = vld [vmem:[#allocation9 + $0x28] sm:$0xff]  }
  0x59   :  { %8886 = vmatpush3.bf16.msra.mxu0 %v10079_v18  ;;  %v149_v13 = vpack.c.bf16 %v141_v7, %v140_v6  ;;  %v502_v18 = vld [vmem:[#allocation3 + $0x2a] sm:$0xff]  ;;  %v10093_v36 = vld [vmem:[#allocation9 + $0x70] sm:$0xff]   ;;  %v10103_v46 = vld [vmem:[#allocation9 + $0x48] sm:$0xff]  }
  0x5a   :  { %8918 = vmatpush3.bf16.msra.mxu1 %v10080_v23  ;;  %8887 = vmatprep.subr.bf16.mxu0 %v10081_v28  ;;  %v515_v20 = vpack.c.bf16 %v502_v18, %v501_v17  ;;  %v506_v23 = vld [vmem:[#allocation3 + $0x62] sm:$0xff]  ;;  %v10097_v40 = vld [vmem:[#allocation9 + $0x60] sm:$0xff]   ;;  %v10104_v47 = vld [vmem:[#allocation9 + $0x8] sm:$0xff]  }
  0x5b   :  { %8919 = vmatprep.subr.bf16.mxu1 %v10082_v31  ;;  %v517_v25 = vpack.c.bf16 %v506_v23, %v505_v22  ;;  %v10091_v34 = vld [vmem:[#allocation9 + $0x78] sm:$0xff]   ;;  %v10094_v37 = vld [vmem:[#allocation9 + $0x30] sm:$0xff]   ;;  %v10098_v41 = vld [vmem:[#allocation9 + $0x20] sm:$0xff]  }
  0x5c   :  { %v10092_v35 = vld [vmem:[#allocation9 + $0x38] sm:$0xff]   ;;  %v10106_v49 = vld [vmem:[#allocation9] sm:$0xff]  }
  0x5d   :  { %8888 = vmatpush3.bf16.msra.mxu0 %v10081_v28  ;;  %v509_v28 = vld [vmem:[#allocation3 + $0x7a] sm:$0xff]  ;;  %v10756_v50 = vld [vmem:[#allocation9 + $0xb8] sm:$0xff]  }
  0x5e   :  { %8920 = vmatpush3.bf16.msra.mxu1 %v10082_v31  ;;  %8937 = vmatprep.subr.bf16.mxu0 %v10083_v33  ;;  %v519_v31 = vpack.c.bf16 %v510_v29, %v509_v28  ;;  %v10758_v51 = vld [vmem:[#allocation9 + $0xf8] sm:$0xff]  }
  0x5f   :  { %8969 = vmatprep.subr.bf16.mxu1 %v10091_v34 }
  0x60   :  { %8890 = vmatmul.mubr.bf16.vlgmr.msra.gmra.mxu0 %v183_v38  ;;  %v10095_v38 = vld [vmem:[#allocation9 + $0x68] sm:$0xff]  }
  0x61   :  { %8922 = vmatmul.mubr.bf16.vlgmr.msra.gmra.mxu1 %v143_v42  ;;  %8938 = vmatpush3.bf16.msra.mxu0 %v10083_v33  ;;  %v520_v33 = vpack.c.bf16 %v10747_v61, %v511_v32  ;;  %v10099_v42 = vld [vmem:[#allocation9 + $0x58] sm:$0xff]  }
  0x62   :  { %8939 = vmatprep.subr.bf16.mxu0 %v10084_v43  ;;  %8893 = vmatprep.mubr.bf16.mxu0 %v184_v44  ;;  %v10101_v44 = vld [vmem:[#allocation9 + $0x50] sm:$0xff]  }
  0x63   :  { %8925 = vmatprep.mubr.bf16.mxu1 %v144_v45  ;;  %8970 = vmatpush3.bf16.msra.mxu1 %v10091_v34  ;;  %v10102_v45 = vld [vmem:[#allocation9 + $0x10] sm:$0xff]  }
  0x64   :  { %8971 = vmatprep.subr.bf16.mxu1 %v10093_v36 }
  0x65   :  { %8940 = vmatpush3.bf16.msra.mxu0 %v10084_v43  ;;  %v10100_v43 = vld [vmem:[#allocation9 + $0x18] sm:$0xff]  }
  0x66   :  { %8941 = vmatprep.subr.bf16.mxu0 %v10085_v48 }
  0x67   :  { %8972 = vmatpush3.bf16.msra.mxu1 %v10093_v36 }
  0x68   :  { %8894 = vmatmul.mubr.bf16.gmra.mxu0 %v185_v52  ;;  %8973 = vmatprep.subr.bf16.mxu1 %v10095_v38 }
  0x69   :  { %8926 = vmatmul.mubr.bf16.gmra.mxu1 %v145_v54  ;;  %8942 = vmatpush3.bf16.msra.mxu0 %v10085_v48  ;;  %v10105_v48 = vld [vmem:[#allocation9 + $0x40] sm:$0xff]  }
  0x6a   :  { %8943 = vmatprep.subr.bf16.mxu0 %v10086_v55  ;;  %8897 = vmatprep.mubr.bf16.mxu0 %v186_v56 }
  0x6b   :  { %8929 = vmatprep.mubr.bf16.mxu1 %v146_v57  ;;  %8974 = vmatpush3.bf16.msra.mxu1 %v10095_v38 }
  0x6c   :  { %8975 = vmatprep.subr.bf16.mxu1 %v10097_v40 }
  0x6d   :  { %8944 = vmatpush3.bf16.msra.mxu0 %v10086_v55 }
  0x6e   :  { %8945 = vmatprep.subr.bf16.mxu0 %v10087_v60 }
  0x6f   :  { %8976 = vmatpush3.bf16.msra.mxu1 %v10097_v40 }
  0x70   :  { %8898 = vmatmul.mubr.bf16.gmra.mxu0 %v187_v1  ;;  %8977 = vmatprep.subr.bf16.mxu1 %v10099_v42 }
  0x71   :  { %8930 = vmatmul.mubr.bf16.gmra.mxu1 %v147_v3  ;;  %8946 = vmatpush3.bf16.msra.mxu0 %v10087_v60 }
  0x72   :  { %8947 = vmatprep.subr.bf16.mxu0 %v10088_v2  ;;  %8901 = vmatprep.mubr.bf16.mxu0 %v188_v4 }
  0x73   :  { %8933 = vmatprep.mubr.bf16.mxu1 %v148_v5  ;;  %8978 = vmatpush3.bf16.msra.mxu1 %v10099_v42 }
  0x74   :  { %8979 = vmatprep.subr.bf16.mxu1 %v10101_v44 }
  0x75   :  { %8948 = vmatpush3.bf16.msra.mxu0 %v10088_v2 }
  0x76   :  { %8949 = vmatprep.subr.bf16.mxu0 %v10089_v8 }
  0x77   :  { %8980 = vmatpush3.bf16.msra.mxu1 %v10101_v44 }
  0x78   :  { %8902 = vmatmul.mubr.bf16.gmra.mxu0 %v189_v11  ;;  %8981 = vmatprep.subr.bf16.mxu1 %v10103_v46 }
  0x79   :  { %8934 = vmatmul.mubr.bf16.gmra.mxu1 %v149_v13  ;;  %8950 = vmatpush3.bf16.msra.mxu0 %v10089_v8 }
  0x7a   :  { %8951 = vmatprep.subr.bf16.mxu0 %v10090_v12  ;;  %8953 = vmatprep.mubr.bf16.mxu0 %v513_v14  ;;  %v10774_v14 = vld [vmem:[#allocation12] ss:$0 sm:$0xff] }
  0x7b   :  { %8982 = vmatpush3.bf16.msra.mxu1 %v10103_v46 }
  0x7c   :  { %8983 = vmatprep.subr.bf16.mxu1 %v10105_v48 }
  0x7d   :  { %8952 = vmatpush3.bf16.msra.mxu0 %v10090_v12 }
  0x7e   :  { %8993 = vmatprep.subr.bf16.mxu0 %v10092_v35 }
  0x7f   :  { %8984 = vmatpush3.bf16.msra.mxu1 %v10105_v48 }
  0x80   :  { %8954 = vmatmul.mubr.bf16.vlgmr.msra.gmra.mxu0 %v514_v19  ;;  %9017 = vmatprep.subr.bf16.mxu1 %v10756_v50 }
  0x81   :  { %8957 = vmatprep.mubr.bf16.mxu0 %v515_v20  ;;  %8994 = vmatpush3.bf16.msra.mxu0 %v10092_v35 }
  0x82   :  { %8995 = vmatprep.subr.bf16.mxu0 %v10094_v37 }
  0x85   :  { %8996 = vmatpush3.bf16.msra.mxu0 %v10094_v37 }
  0x86   :  { %8997 = vmatprep.subr.bf16.mxu0 %v10096_v39 }
  0x88   :  { %8958 = vmatmul.mubr.bf16.gmra.mxu0 %v516_v24 }
  0x89   :  { %8961 = vmatprep.mubr.bf16.mxu0 %v517_v25  ;;  %8998 = vmatpush3.bf16.msra.mxu0 %v10096_v39 }
  0x8a   :  { %8999 = vmatprep.subr.bf16.mxu0 %v10098_v41 }
  0x8d   :  { %9000 = vmatpush3.bf16.msra.mxu0 %v10098_v41 }
  0x8e   :  { %9001 = vmatprep.subr.bf16.mxu0 %v10100_v43 }
  0x90   :  { %8962 = vmatmul.mubr.bf16.gmra.mxu0 %v518_v30 }
  0x91   :  { %8965 = vmatprep.mubr.bf16.mxu0 %v519_v31  ;;  %9002 = vmatpush3.bf16.msra.mxu0 %v10100_v43 }
  0x92   :  { %9003 = vmatprep.subr.bf16.mxu0 %v10102_v45 }
  0x95   :  { %9004 = vmatpush3.bf16.msra.mxu0 %v10102_v45 }
  0x96   :  { %9005 = vmatprep.subr.bf16.mxu0 %v10104_v47 }
  0x98   :  { %8966 = vmatmul.mubr.bf16.gmra.mxu0 %v520_v33 }
  0x99   :  { %9006 = vmatpush3.bf16.msra.mxu0 %v10104_v47 }
  0x9a   :  { %9007 = vmatprep.subr.bf16.mxu0 %v10106_v49 }
  0x9d   :  { %9008 = vmatpush3.bf16.msra.mxu0 %v10106_v49 }
  0x9e   :  { %9041 = vmatprep.subr.bf16.mxu0 %v10758_v51 }
 0x120   :  { %v8891_v52 = vpop.f32.mrf.mxu0 }
 0x121   :  { %v8923_v53 = vpop.f32.mrf.mxu1 }
 0x122   :  { %v289_v54 = vpop.f32.mrf.mxu0  ;;  %v443_v15 = vadd.f32 %v8923_v53, %v8891_v52 }
 0x123   :  { %v434_v55 = vpop.f32.mrf.mxu1 }
 0x124   :  { %v8892_v56 = vpop.f32.mrf.mxu0  ;;  %v435_v17 = vadd.f32 %v434_v55, %v289_v54 }
 0x125   :  { %v8924_v57 = vpop.f32.mrf.mxu1 }
 0x126   :  { %v292_v58 = vpop.f32.mrf.mxu0  ;;  %v446_v21 = vadd.f32 %v8924_v57, %v8892_v56 }
 0x127   :  { %v437_v60 = vpop.f32.mrf.mxu1 }
 0x128   :  { %v8895_v59 = vpop.f32.mrf.mxu0  ;;  %v438_v25 = vadd.f32 %v437_v60, %v292_v58 }
 0x129   :  { %v8927_v63 = vpop.f32.mrf.mxu1 }
 0x12a   :  { %v305_v61 = vpop.f32.mrf.mxu0  ;;  %v459_v31 = vadd.f32 %v8927_v63, %v8895_v59 }
 0x12b   :  { %v450_v3 = vpop.f32.mrf.mxu1 }
 0x12c   :  { %v8896_v62 = vpop.f32.mrf.mxu0  ;;  %v451_v36 = vadd.f32 %v450_v3, %v305_v61 }
 0x12d   :  { %v8928_v6 = vpop.f32.mrf.mxu1 }
 0x12e   :  { %v308_v1 = vpop.f32.mrf.mxu0  ;;  %v462_v42 = vadd.f32 %v8928_v6, %v8896_v62 }
 0x12f   :  { %v453_v9 = vpop.f32.mrf.mxu1 }
 0x130   :  { %v8899_v2 = vpop.f32.mrf.mxu0  ;;  %v454_v47 = vadd.f32 %v453_v9, %v308_v1 }
 0x131   :  { %v8931_v12 = vpop.f32.mrf.mxu1 }
 0x132   :  { %v321_v4 = vpop.f32.mrf.mxu0  ;;  %v475_v55 = vadd.f32 %v8931_v12, %v8899_v2 }
 0x133   :  { %v466_v18 = vpop.f32.mrf.mxu1 }
 0x134   :  { %v10762_v5 = vpop.f32.mrf.mxu0  ;;  %v467_v60 = vadd.f32 %v466_v18, %v321_v4 }
 0x135   :  { %v8932_v26 = vpop.f32.mrf.mxu1 }
 0x136   :  { %v10764_v7 = vpop.f32.mrf.mxu0  ;;  %v478_v9 = vadd.f32 %v8932_v26, %v10762_v5 }
 0x137   :  { %v469_v37 = vpop.f32.mrf.mxu1 }
 0x138   :  { %v10766_v8 = vpop.f32.mrf.mxu0 }
 0x139   :  { %v8935_v48 = vpop.f32.mrf.mxu1 }
 0x13a   :  { %v10768_v10 = vpop.f32.mrf.mxu0 }
 0x13b   :  { %v482_v61 = vpop.f32.mrf.mxu1 }
 0x13c   :  { %v10770_v11 = vpop.f32.mrf.mxu0 }
 0x13e   :  { %v10772_v13 = vpop.f32.mrf.mxu0 }
 0x140   :  { %v8955_v16 = vpop.f32.mrf.mxu0 }
 0x141   :  { %v685_v19 = vadd.f32 %v8955_v16, %v443_v15  ;;  %v470_v16 = vadd.f32 %v469_v37, %v10764_v7 }
 0x142   :  { %v620_v20 = vpop.f32.mrf.mxu0 }
 0x143   :  { %v708_v22 = vadd.f32 %v10774_v14, %v685_v19  ;;  %v683_v23 = vadd.f32 %v620_v20, %v435_v17  ;;  %v8936_v20 = vpop.f32.mrf.mxu1 }
 0x144   :  { %v8956_v24 = vpop.f32.mrf.mxu0 }
 0x145   :  { %v724_v27 = vmax.f32 %v708_v22, 0.0  ;;  %v706_v28 = vadd.f32 %v10774_v14, %v683_v23  ;;  %v686_v29 = vadd.f32 %v8956_v24, %v446_v21 }
 0x146   :  { %v623_v30 = vpop.f32.mrf.mxu0 }
 0x147   :  { %776 = vst [vmem:[#allocation3 + $0x11] sm:$0xff] %v724_v27  ;;  %v722_v32 = vmax.f32 %v706_v28, 0.0  ;;  %v709_v33 = vadd.f32 %v10774_v14, %v686_v29  ;;  %v684_v34 = vadd.f32 %v623_v30, %v438_v25  ;;  %v491_v27 = vadd.f32 %v8935_v48, %v10766_v8 }
 0x148   :  { %v8959_v35 = vpop.f32.mrf.mxu0  ;;  %v494_v8 = vadd.f32 %v8936_v20, %v10770_v11 }
 0x149   :  { %774 = vst [vmem:[#allocation3 + $0x1] sm:$0xff] %v722_v32  ;;  %v725_v38 = vmax.f32 %v709_v33, 0.0  ;;  %v707_v39 = vadd.f32 %v10774_v14, %v684_v34  ;;  %v689_v40 = vadd.f32 %v8959_v35, %v459_v31  ;;  %v483_v31 = vadd.f32 %v482_v61, %v10768_v10  ;;  %v485_v32 = vpop.f32.mrf.mxu1 }
 0x14a   :  { %v636_v41 = vpop.f32.mrf.mxu0 }
 0x14b   :  { %777 = vst [vmem:[#allocation3 + $0x19] sm:$0xff] %v725_v38  ;;  %v723_v43 = vmax.f32 %v707_v39, 0.0  ;;  %v712_v44 = vadd.f32 %v10774_v14, %v689_v40  ;;  %v687_v45 = vadd.f32 %v636_v41, %v451_v36  ;;  %v10109_v41 = vld [vmem:[#allocation9 + $0xb0] sm:$0xff]  }
 0x14c   :  { %v8960_v46 = vpop.f32.mrf.mxu0 }
 0x14d   :  { %775 = vst [vmem:[#allocation3 + $0x9] sm:$0xff] %v723_v43  ;;  %v728_v49 = vmax.f32 %v712_v44, 0.0  ;;  %v710_v52 = vadd.f32 %v10774_v14, %v687_v45  ;;  %v690_v53 = vadd.f32 %v8960_v46, %v462_v42  ;;  %v486_v42 = vadd.f32 %v485_v32, %v10772_v13  ;;  %v10122_v32 = vld [vmem:[#allocation9 + $0xc0] sm:$0xff]  }
 0x14e   :  { %v639_v54 = vpop.f32.mrf.mxu0 }
 0x14f   :  { %780 = vst [vmem:[#allocation3 + $0x31] sm:$0xff] %v728_v49  ;;  %v726_v56 = vmax.f32 %v710_v52, 0.0  ;;  %v713_v57 = vadd.f32 %v10774_v14, %v690_v53  ;;  %v688_v58 = vadd.f32 %v639_v54, %v454_v47  ;;  %v10110_v52 = vld [vmem:[#allocation9 + $0xf0] sm:$0xff]  }
 0x150   :  { %v8963_v59 = vpop.f32.mrf.mxu0 }
 0x151   :  { %778 = vst [vmem:[#allocation3 + $0x21] sm:$0xff] %v726_v56  ;;  %v729_v62 = vmax.f32 %v713_v57, 0.0  ;;  %v711_v63 = vadd.f32 %v10774_v14, %v688_v58  ;;  %v693_v1 = vadd.f32 %v8963_v59, %v475_v55 }
 0x152   :  { %v828_v3 = vld [vmem:[#allocation3 + $0x11] ss:$2 sm:$0xff]  ;;  %v652_v6 = vpop.f32.mrf.mxu0 }
 0x153   :  { %781 = vst [vmem:[#allocation3 + $0x39] sm:$0xff] %v729_v62  ;;  %v727_v15 = vmax.f32 %v711_v63, 0.0  ;;  %v716_v2 = vadd.f32 %v10774_v14, %v693_v1  ;;  %v691_v12 = vadd.f32 %v652_v6, %v467_v60  ;;  %v10111_v60 = vld [vmem:[#allocation9 + $0xa8] sm:$0xff]   ;;  %v10113_v1 = vld [vmem:[#allocation9 + $0xa0] sm:$0xff]  }
 0x154   :  { %v790_v17 = vld [vmem:[#allocation3] ss:$2 sm:$0xff]  ;;  %v792_v19 = vld [vmem:[#allocation3 + $0x10] ss:$2 sm:$0xff]  ;;  %v826_v4 = vld [vmem:[#allocation3 + $0x1] ss:$2 sm:$0xff]  ;;  %v8964_v18 = vpop.f32.mrf.mxu0 }
 0x155   :  { %v10787_v21 = vld [vmem:[#allocation3 + $0x2] ss:$2 sm:$0xff]  ;;  %779 = vst [vmem:[#allocation3 + $0x29] sm:$0xff] %v727_v15  ;;  %v732_v22 = vmax.f32 %v716_v2, 0.0  ;;  %v714_v23 = vadd.f32 %v10774_v14, %v691_v12  ;;  %v694_v24 = vadd.f32 %v8964_v18, %v478_v9  ;;  %v841_v5 = vpack.c.bf16 %v828_v3, %v826_v4  ;;  %v10112_v62 = vld [vmem:[#allocation9 + $0xe8] sm:$0xff]  }
 0x156   :  { %1445 = vst [vmem:[#allocation3 + $0x8] sm:$0x1] %v10642_v0  ;;  %v655_v25 = vpop.f32.mrf.mxu0  ;;  %v805_v26 = vpack.c.bf16 %v792_v19, %v790_v17  ;;  %v10115_v2 = vld [vmem:[#allocation9 + $0x98] sm:$0xff]   ;;  %v1091_v19 = vld [vmem:[#allocation3 + $0x12] ss:$2 sm:$0xff] }
 0x157   :  { %784 = vst [vmem:[#allocation3 + $0x69] sm:$0xff] %v732_v22  ;;  %v730_v7 = vmax.f32 %v714_v23, 0.0  ;;  %v717_v28 = vadd.f32 %v10774_v14, %v694_v24  ;;  %v692_v29 = vadd.f32 %v655_v25, %v470_v16  ;;  %8985 = vmatprep.mubr.bf16.mxu1 %v841_v5  ;;  %v10116_v16 = vld [vmem:[#allocation9 + $0xd8] sm:$0xff]   ;;  %v10117_v23 = vld [vmem:[#allocation9 + $0x90] sm:$0xff]  }
 0x158   :  { %9009 = vmatprep.mubr.bf16.mxu0 %v805_v26  ;;  %v8967_v30 = vpop.f32.mrf.mxu0  ;;  %v1249_v12 = vld [vmem:[#allocation3 + $0x13] ss:$2 sm:$0xff]  ;;  %v1247_v4 = vld [vmem:[#allocation3 + $0x3] ss:$2 sm:$0xff] }
 0x159   :  { %782 = vst [vmem:[#allocation3 + $0x59] sm:$0xff] %v730_v7  ;;  %v733_v33 = vmax.f32 %v717_v28, 0.0  ;;  %v715_v34 = vadd.f32 %v10774_v14, %v692_v29  ;;  %v697_v35 = vadd.f32 %v8967_v30, %v491_v27  ;;  %v10118_v24 = vld [vmem:[#allocation9 + $0xd0] sm:$0xff]   ;;  %v1104_v7 = vpack.c.bf16 %v1091_v19, %v10787_v21  ;;  %v10119_v29 = vld [vmem:[#allocation9 + $0x88] sm:$0xff]  }
 0x15a   :  { %v668_v36 = vpop.f32.mrf.mxu0  ;;  %v832_v37 = vld [vmem:[#allocation3 + $0x31] ss:$2 sm:$0xff]  ;;  %v1262_v28 = vpack.c.bf16 %v1249_v12, %v1247_v4 }
 0x15b   :  { %785 = vst [vmem:[#allocation3 + $0x71] sm:$0xff] %v733_v33  ;;  %v731_v38 = vmax.f32 %v715_v34, 0.0  ;;  %v720_v39 = vadd.f32 %v10774_v14, %v697_v35  ;;  %v695_v40 = vadd.f32 %v668_v36, %v483_v31  ;;  %v10120_v30 = vld [vmem:[#allocation9 + $0xc8] sm:$0xff]   ;;  %v10121_v31 = vld [vmem:[#allocation9 + $0x80] sm:$0xff]  }
 0x15c   :  { %v8968_v43 = vpop.f32.mrf.mxu0  ;;  %v830_v10 = vld [vmem:[#allocation3 + $0x21] ss:$2 sm:$0xff]  ;;  %v794_v44 = vld [vmem:[#allocation3 + $0x20] ss:$2 sm:$0xff]  ;;  %v796_v45 = vld [vmem:[#allocation3 + $0x30] ss:$2 sm:$0xff] }
 0x15d   :  { %783 = vst [vmem:[#allocation3 + $0x61] sm:$0xff] %v731_v38  ;;  %v736_v46 = vmax.f32 %v720_v39, 0.0  ;;  %v718_v47 = vadd.f32 %v10774_v14, %v695_v40  ;;  %v698_v48 = vadd.f32 %v8968_v43, %v494_v8  ;;  %v842_v49 = vpack.c.bf16 %v832_v37, %v830_v10  ;;  %v10799_v11 = vld [vmem:[#allocation3 + $0x22] ss:$2 sm:$0xff]  ;;  %v10801_v53 = vld [vmem:[#allocation3 + $0x23] ss:$2 sm:$0xff] }
 0x15e   :  { %v671_v54 = vpop.f32.mrf.mxu0  ;;  %v806_v55 = vpack.c.bf16 %v796_v45, %v794_v44  ;;  %1449 = vst [vmem:[#allocation3 + $0x31] sm:$0x1] %v10642_v0  ;;  %1448 = vst [vmem:[#allocation3 + $0x29] sm:$0xff] %v10642_v0  ;;  %v1095_v33 = vld [vmem:[#allocation3 + $0x32] ss:$2 sm:$0xff]  ;;  %v10123_v10 = vld [vmem:[#allocation7 + $0x138] sm:$0xff]  }
 0x15f   :  { %788 = vst [vmem:[#allocation3 + $0x89] sm:$0xff] %v736_v46  ;;  %v734_v13 = vmax.f32 %v718_v47, 0.0  ;;  %v721_v56 = vadd.f32 %v10774_v14, %v698_v48  ;;  %v696_v57 = vadd.f32 %v671_v54, %v486_v42  ;;  %8986 = vmatmul.mubr.bf16.vlgmr.msra.gmra.mxu1 %v842_v49  ;;  %v1253_v35 = vld [vmem:[#allocation3 + $0x33] ss:$2 sm:$0xff]  ;;  %v1105_v37 = vpack.c.bf16 %v1095_v33, %v10799_v11  ;;  %v10124_v45 = vld [vmem:[#allocation7 + $0xf8] sm:$0xff]  }
 0x160   :  { %9010 = vmatmul.mubr.bf16.vlgmr.msra.gmra.mxu0 %v806_v55  ;;  %9018 = vmatpush3.bf16.msra.mxu1 %v10756_v50  ;;  %v1263_v8 = vpack.c.bf16 %v1253_v35, %v10801_v53  ;;  %v10125_v44 = vld [vmem:[#allocation7 + $0x130] sm:$0xff]   ;;  %v10127_v47 = vld [vmem:[#allocation7 + $0x128] sm:$0xff]   ;;  %v10129_v48 = vld [vmem:[#allocation7 + $0x120] sm:$0xff]  }
 0x161   :  { %786 = vst [vmem:[#allocation3 + $0x79] sm:$0xff] %v734_v13  ;;  %v737_v58 = vmax.f32 %v721_v56, 0.0  ;;  %v719_v59 = vadd.f32 %v10774_v14, %v696_v57  ;;  %9042 = vmatpush3.bf16.msra.mxu0 %v10758_v51  ;;  %9019 = vmatprep.subr.bf16.mxu1 %v10109_v41  ;;  %v10114_v51 = vld [vmem:[#allocation9 + $0xe0] sm:$0xff]   ;;  %v10126_v46 = vld [vmem:[#allocation7 + $0xf0] sm:$0xff]   ;;  %v10128_v49 = vld [vmem:[#allocation7 + $0xe8] sm:$0xff]  }
 0x162   :  { %v836_v61 = vld [vmem:[#allocation3 + $0x69] ss:$2 sm:$0xff]  ;;  %9043 = vmatprep.subr.bf16.mxu0 %v10110_v52  ;;  %v1099_v34 = vld [vmem:[#allocation3 + $0x6a] ss:$2 sm:$0xff]  ;;  %v10133_v53 = vld [vmem:[#allocation7 + $0x110] sm:$0xff]  }
 0x163   :  { %789 = vst [vmem:[#allocation3 + $0x91] sm:$0xff] %v737_v58  ;;  %v735_v63 = vmax.f32 %v719_v59, 0.0  ;;  %v10130_v11 = vld [vmem:[#allocation7 + $0xe0] sm:$0xff]   ;;  %v10132_v54 = vld [vmem:[#allocation7 + $0xd8] sm:$0xff]   ;;  %v10135_v55 = vld [vmem:[#allocation7 + $0x108] sm:$0xff]  }
 0x164   :  { %v798_v3 = vld [vmem:[#allocation3 + $0x58] ss:$2 sm:$0xff]  ;;  %v800_v6 = vld [vmem:[#allocation3 + $0x68] ss:$2 sm:$0xff]  ;;  %v834_v9 = vld [vmem:[#allocation3 + $0x59] ss:$2 sm:$0xff]  ;;  %9020 = vmatpush3.bf16.msra.mxu1 %v10109_v41 }
 0x165   :  { %v10809_v15 = vld [vmem:[#allocation3 + $0x5a] ss:$2 sm:$0xff]  ;;  %787 = vst [vmem:[#allocation3 + $0x81] sm:$0xff] %v735_v63  ;;  %9044 = vmatpush3.bf16.msra.mxu0 %v10110_v52  ;;  %9021 = vmatprep.subr.bf16.mxu1 %v10111_v60  ;;  %v843_v50 = vpack.c.bf16 %v836_v61, %v834_v9  ;;  %v807_v14 = vpack.c.bf16 %v800_v6, %v798_v3  ;;  %v1255_v36 = vld [vmem:[#allocation3 + $0x5b] ss:$2 sm:$0xff]  ;;  %v10137_v56 = vld [vmem:[#allocation7 + $0x100] sm:$0xff]  }
 0x166   :  { %1447 = vst [vmem:[#allocation3 + $0x60] sm:$0x1] %v10642_v0  ;;  %9045 = vmatprep.subr.bf16.mxu0 %v10112_v62  ;;  %v1106_v38 = vpack.c.bf16 %v1099_v34, %v10809_v15  ;;  %v10131_v52 = vld [vmem:[#allocation7 + $0x118] sm:$0xff]   ;;  %v10134_v13 = vld [vmem:[#allocation7 + $0xd0] sm:$0xff]   ;;  %v10136_v57 = vld [vmem:[#allocation7 + $0xc8] sm:$0xff]  }
 0x167   :  { %8989 = vmatprep.mubr.bf16.mxu1 %v843_v50  ;;  %9013 = vmatprep.mubr.bf16.mxu0 %v807_v14  ;;  %v10818_v58 = vld [vmem:[#allocation7 + $0x178] sm:$0xff]   ;;  %v10138_v59 = vld [vmem:[#allocation7 + $0xc0] sm:$0xff]  }
 0x168   :  { %9022 = vmatpush3.bf16.msra.mxu1 %v10111_v60  ;;  %v1257_v21 = vld [vmem:[#allocation3 + $0x6b] ss:$2 sm:$0xff] }
 0x169   :  { %9046 = vmatpush3.bf16.msra.mxu0 %v10112_v62  ;;  %9023 = vmatprep.subr.bf16.mxu1 %v10113_v1  ;;  %v1264_v39 = vpack.c.bf16 %v1257_v21, %v1255_v36 }
 0x16a   :  { %9047 = vmatprep.subr.bf16.mxu0 %v10114_v51  ;;  %v840_v17 = vld [vmem:[#allocation3 + $0x89] ss:$2 sm:$0xff]  ;;  %v1103_v40 = vld [vmem:[#allocation3 + $0x8a] ss:$2 sm:$0xff] }
 0x16b   :  { %v1261_v41 = vld [vmem:[#allocation3 + $0x8b] ss:$2 sm:$0xff] }
 0x16c   :  { %9024 = vmatpush3.bf16.msra.mxu1 %v10113_v1  ;;  %v838_v18 = vld [vmem:[#allocation3 + $0x79] ss:$2 sm:$0xff]  ;;  %v802_v20 = vld [vmem:[#allocation3 + $0x78] ss:$2 sm:$0xff]  ;;  %v804_v22 = vld [vmem:[#allocation3 + $0x88] ss:$2 sm:$0xff] }
 0x16d   :  { %9048 = vmatpush3.bf16.msra.mxu0 %v10114_v51  ;;  %9025 = vmatprep.subr.bf16.mxu1 %v10115_v2  ;;  %v844_v5 = vpack.c.bf16 %v840_v17, %v838_v18  ;;  %v808_v25 = vpack.c.bf16 %v804_v22, %v802_v20  ;;  %v1101_v26 = vld [vmem:[#allocation3 + $0x7a] ss:$2 sm:$0xff]  ;;  %v1259_v27 = vld [vmem:[#allocation3 + $0x7b] ss:$2 sm:$0xff] }
 0x16e   :  { %9049 = vmatprep.subr.bf16.mxu0 %v10116_v16  ;;  %1451 = vst [vmem:[#allocation3 + $0x89] sm:$0x1] %v10642_v0  ;;  %1450 = vst [vmem:[#allocation3 + $0x81] sm:$0xff] %v10642_v0  ;;  %v1107_v42 = vpack.c.bf16 %v1103_v40, %v1101_v26  ;;  %v1265_v43 = vpack.c.bf16 %v1261_v41, %v1259_v27 }
 0x16f   :  { %8990 = vmatmul.mubr.bf16.gmra.mxu1 %v844_v5  ;;  %9014 = vmatmul.mubr.bf16.gmra.mxu0 %v808_v25 }
 0x170   :  { %9026 = vmatpush3.bf16.msra.mxu1 %v10115_v2  ;;  %9033 = vmatprep.mubr.bf16.mxu1 %v1104_v7 }
 0x171   :  { %9050 = vmatpush3.bf16.msra.mxu0 %v10116_v16  ;;  %9057 = vmatprep.mubr.bf16.mxu0 %v1262_v28 }
 0x172   :  { %9027 = vmatprep.subr.bf16.mxu1 %v10117_v23  ;;  %9051 = vmatprep.subr.bf16.mxu0 %v10118_v24 }
 0x174   :  { %9028 = vmatpush3.bf16.msra.mxu1 %v10117_v23  ;;  %v7904_v23 = vld [vmem:[#allocation12 + $0x1] ss:$0 sm:$0xff] }
 0x175   :  { %9052 = vmatpush3.bf16.msra.mxu0 %v10118_v24  ;;  %9029 = vmatprep.subr.bf16.mxu1 %v10119_v29 }
 0x176   :  { %9053 = vmatprep.subr.bf16.mxu0 %v10120_v30 }
 0x178   :  { %9030 = vmatpush3.bf16.msra.mxu1 %v10119_v29 }
 0x179   :  { %9054 = vmatpush3.bf16.msra.mxu0 %v10120_v30  ;;  %9031 = vmatprep.subr.bf16.mxu1 %v10121_v31 }
 0x17a   :  { %9055 = vmatprep.subr.bf16.mxu0 %v10122_v32 }
 0x17c   :  { %9032 = vmatpush3.bf16.msra.mxu1 %v10121_v31 }
 0x17d   :  { %9056 = vmatpush3.bf16.msra.mxu0 %v10122_v32  ;;  %9065 = vmatprep.subr.bf16.mxu1 %v10123_v10 }
 0x17e   :  { %9089 = vmatprep.subr.bf16.mxu0 %v10124_v45 }
 0x17f   :  { %9034 = vmatmul.mubr.bf16.vlgmr.msra.gmra.mxu1 %v1105_v37 }
 0x180   :  { %9058 = vmatmul.mubr.bf16.vlgmr.msra.gmra.mxu0 %v1263_v8  ;;  %9037 = vmatprep.mubr.bf16.mxu1 %v1106_v38 }
 0x181   :  { %9061 = vmatprep.mubr.bf16.mxu0 %v1264_v39  ;;  %9066 = vmatpush3.bf16.msra.mxu1 %v10123_v10 }
 0x182   :  { %9067 = vmatprep.subr.bf16.mxu1 %v10125_v44  ;;  %9090 = vmatpush3.bf16.msra.mxu0 %v10124_v45 }
 0x183   :  { %9091 = vmatprep.subr.bf16.mxu0 %v10126_v46 }
 0x185   :  { %9068 = vmatpush3.bf16.msra.mxu1 %v10125_v44 }
 0x186   :  { %9069 = vmatprep.subr.bf16.mxu1 %v10127_v47  ;;  %9092 = vmatpush3.bf16.msra.mxu0 %v10126_v46 }
 0x187   :  { %9038 = vmatmul.mubr.bf16.gmra.mxu1 %v1107_v42  ;;  %9093 = vmatprep.subr.bf16.mxu0 %v10128_v49 }
 0x188   :  { %9062 = vmatmul.mubr.bf16.gmra.mxu0 %v1265_v43 }
 0x189   :  { %9070 = vmatpush3.bf16.msra.mxu1 %v10127_v47 }
 0x18a   :  { %9071 = vmatprep.subr.bf16.mxu1 %v10129_v48  ;;  %9094 = vmatpush3.bf16.msra.mxu0 %v10128_v49 }
 0x18b   :  { %9095 = vmatprep.subr.bf16.mxu0 %v10130_v11 }
 0x18d   :  { %9072 = vmatpush3.bf16.msra.mxu1 %v10129_v48 }
 0x18e   :  { %9073 = vmatprep.subr.bf16.mxu1 %v10131_v52  ;;  %9096 = vmatpush3.bf16.msra.mxu0 %v10130_v11 }
 0x18f   :  { %9097 = vmatprep.subr.bf16.mxu0 %v10132_v54 }
 0x191   :  { %9074 = vmatpush3.bf16.msra.mxu1 %v10131_v52 }
 0x192   :  { %9075 = vmatprep.subr.bf16.mxu1 %v10133_v53  ;;  %9098 = vmatpush3.bf16.msra.mxu0 %v10132_v54 }
 0x193   :  { %9099 = vmatprep.subr.bf16.mxu0 %v10134_v13 }
 0x195   :  { %9076 = vmatpush3.bf16.msra.mxu1 %v10133_v53 }
 0x196   :  { %9077 = vmatprep.subr.bf16.mxu1 %v10135_v55  ;;  %9100 = vmatpush3.bf16.msra.mxu0 %v10134_v13 }
 0x197   :  { %9101 = vmatprep.subr.bf16.mxu0 %v10136_v57 }
 0x199   :  { %9078 = vmatpush3.bf16.msra.mxu1 %v10135_v55 }
 0x19a   :  { %9079 = vmatprep.subr.bf16.mxu1 %v10137_v56  ;;  %9102 = vmatpush3.bf16.msra.mxu0 %v10136_v57 }
 0x19b   :  { %9103 = vmatprep.subr.bf16.mxu0 %v10138_v59 }
 0x19d   :  { %9080 = vmatpush3.bf16.msra.mxu1 %v10137_v56 }
 0x19e   :  { %9113 = vmatprep.subr.bf16.mxu1 %v10818_v58  ;;  %9104 = vmatpush3.bf16.msra.mxu0 %v10138_v59 }
 0x21f   :  { %v8987_v60 = vpop.f32.mrf.mxu1 }
 0x220   :  { %v9011_v61 = vpop.f32.mrf.mxu0 }
 0x221   :  { %v944_v62 = vpop.f32.mrf.mxu1  ;;  %v1066_v17 = vadd.f32 %v9011_v61, %v8987_v60 }
 0x222   :  { %v1057_v63 = vpop.f32.mrf.mxu0 }
 0x223   :  { %v8988_v1 = vpop.f32.mrf.mxu1  ;;  %v1058_v18 = vadd.f32 %v1057_v63, %v944_v62 }
 0x224   :  { %v9012_v3 = vpop.f32.mrf.mxu0 }
 0x225   :  { %v947_v6 = vpop.f32.mrf.mxu1  ;;  %v1069_v5 = vadd.f32 %v9012_v3, %v8988_v1 }
 0x226   :  { %v1060_v9 = vpop.f32.mrf.mxu0 }
 0x227   :  { %v1061_v28 = vadd.f32 %v1060_v9, %v947_v6 }
 0x22f   :  { %v8991_v15 = vpop.f32.mrf.mxu1  ;;  %v9015_v50 = vpop.f32.mrf.mxu0 }
 0x230   :  { %v1082_v21 = vadd.f32 %v9015_v50, %v8991_v15 }
 0x231   :  { %v960_v14 = vpop.f32.mrf.mxu1  ;;  %v1073_v51 = vpop.f32.mrf.mxu0 }
 0x232   :  { %v1074_v38 = vadd.f32 %v1073_v51, %v960_v14  ;;  %v10140_v14 = vld [vmem:[#allocation7 + $0x170] sm:$0xff]  }
 0x233   :  { %v8992_v2 = vpop.f32.mrf.mxu1  ;;  %v9016_v12 = vpop.f32.mrf.mxu0 }
 0x234   :  { %v1085_v44 = vadd.f32 %v9016_v12, %v8992_v2 }
 0x235   :  { %v963_v16 = vpop.f32.mrf.mxu1  ;;  %v1076_v19 = vpop.f32.mrf.mxu0 }
 0x236   :  { %v1077_v11 = vadd.f32 %v1076_v19, %v963_v16 }
 0x23f   :  { %v9035_v4 = vpop.f32.mrf.mxu1 }
 0x240   :  { %v1240_v20 = vadd.f32 %v9035_v4, %v1066_v17  ;;  %v9059_v22 = vpop.f32.mrf.mxu0 }
 0x241   :  { %v1207_v24 = vpop.f32.mrf.mxu1 }
 0x242   :  { %v1398_v25 = vadd.f32 %v9059_v22, %v1240_v20  ;;  %v1238_v26 = vadd.f32 %v1207_v24, %v1058_v18  ;;  %v1365_v27 = vpop.f32.mrf.mxu0  ;;  %v10141_v20 = vld [vmem:[#allocation7 + $0x168] sm:$0xff]  }
 0x243   :  { %v9036_v7 = vpop.f32.mrf.mxu1 }
 0x244   :  { %v10821_v29 = vadd.f32 %v7904_v23, %v1398_v25  ;;  %v1396_v30 = vadd.f32 %v1365_v27, %v1238_v26  ;;  %v1241_v31 = vadd.f32 %v9036_v7, %v1069_v5  ;;  %v9060_v32 = vpop.f32.mrf.mxu0  ;;  %v10142_v25 = vld [vmem:[#allocation7 + $0x160] sm:$0xff]  }
 0x245   :  { %v1210_v33 = vpop.f32.mrf.mxu1 }
 0x246   :  { %v1438_v34 = vmax.f32 %v10821_v29, 0.0  ;;  %v10824_v35 = vadd.f32 %v7904_v23, %v1396_v30  ;;  %v1399_v36 = vadd.f32 %v9060_v32, %v1241_v31  ;;  %v1239_v37 = vadd.f32 %v1210_v33, %v1061_v28  ;;  %v1368_v8 = vpop.f32.mrf.mxu0  ;;  %v10143_v30 = vld [vmem:[#allocation7 + $0x158] sm:$0xff]   ;;  %v10144_v33 = vld [vmem:[#allocation7 + $0x150] sm:$0xff]  }
 0x247   :  { %v9039_v39 = vpop.f32.mrf.mxu1 }
 0x248   :  { %1454 = vst [vmem:[#allocation3 + $0x19] sm:$0xff] %v1438_v34  ;;  %v1436_v40 = vmax.f32 %v10824_v35, 0.0  ;;  %v10827_v41 = vadd.f32 %v7904_v23, %v1399_v36  ;;  %v1397_v42 = vadd.f32 %v1368_v8, %v1239_v37  ;;  %v1244_v43 = vadd.f32 %v9039_v39, %v1082_v21  ;;  %v9063_v10 = vpop.f32.mrf.mxu0  ;;  %v10146_v36 = vld [vmem:[#allocation7 + $0x140] sm:$0xff]  }
 0x249   :  { %v1223_v45 = vpop.f32.mrf.mxu1  ;;  %v1747_v37 = vld [vmem:[#allocation3 + $0x2a] sm:$0xff] }
 0x24a   :  { %1452 = vst [vmem:[#allocation3 + $0x9] sm:$0xff] %v1436_v40  ;;  %v1439_v46 = vmax.f32 %v10827_v41, 0.0  ;;  %v10830_v47 = vadd.f32 %v7904_v23, %v1397_v42  ;;  %v1402_v48 = vadd.f32 %v9063_v10, %v1244_v43  ;;  %v1242_v49 = vadd.f32 %v1223_v45, %v1074_v38  ;;  %v1381_v52 = vpop.f32.mrf.mxu0  ;;  %v1751_v42 = vld [vmem:[#allocation3 + $0x82] sm:$0xff]  ;;  %v10149_v45 = vld [vmem:[#allocation10 + $0x28] sm:$0xff]  }
 0x24b   :  { %v9040_v53 = vpop.f32.mrf.mxu1  ;;  %v10147_v10 = vld [vmem:[#allocation10 + $0x38] sm:$0xff]  }
 0x24c   :  { %1455 = vst [vmem:[#allocation3 + $0x21] sm:$0xff] %v1439_v46  ;;  %v1437_v54 = vmax.f32 %v10830_v47, 0.0  ;;  %v10833_v55 = vadd.f32 %v7904_v23, %v1402_v48  ;;  %v1400_v13 = vadd.f32 %v1381_v52, %v1242_v49  ;;  %v1245_v56 = vadd.f32 %v9040_v53, %v1085_v44  ;;  %v9064_v57 = vpop.f32.mrf.mxu0  ;;  %9137 = vmatprep.subr.bf16.mxu0 %v10147_v10  ;;  %v10148_v44 = vld [vmem:[#allocation10 + $0x30] sm:$0xff]   ;;  %v10151_v48 = vld [vmem:[#allocation10 + $0x18] sm:$0xff]   ;;  %v10153_v52 = vld [vmem:[#allocation10 + $0x8] sm:$0xff]  }
 0x24d   :  { %v1226_v59 = vpop.f32.mrf.mxu1  ;;  %v1498_v50 = vpack.c.bf16 %v1439_v46, %v1438_v34  ;;  %v10145_v34 = vld [vmem:[#allocation7 + $0x148] sm:$0xff]   ;;  %v10150_v46 = vld [vmem:[#allocation10 + $0x20] sm:$0xff]   ;;  %v10152_v49 = vld [vmem:[#allocation10 + $0x10] sm:$0xff]  }
 0x24e   :  { %1453 = vst [vmem:[#allocation3 + $0x11] sm:$0xff] %v1437_v54  ;;  %v1442_v60 = vmax.f32 %v10833_v55, 0.0  ;;  %v10836_v61 = vadd.f32 %v7904_v23, %v1400_v13  ;;  %v1403_v62 = vadd.f32 %v9064_v57, %v1245_v56  ;;  %v1243_v63 = vadd.f32 %v1226_v59, %v1077_v11  ;;  %v1384_v1 = vpop.f32.mrf.mxu0  ;;  %v10154_v11 = vld [vmem:[#allocation10] sm:$0xff]   ;;  %v10155_v53 = vld [vmem:[#allocation7 + $0x1f8] sm:$0xff]   ;;  %v10157_v13 = vld [vmem:[#allocation7 + $0x1f0] sm:$0xff]  }
 0x24f   :  { %v1497_v3 = vpack.c.bf16 %v1437_v54, %v1436_v40  ;;  %v10850_v54 = vld [vmem:[#allocation7 + $0x1b8] sm:$0xff]   ;;  %v10159_v56 = vld [vmem:[#allocation7 + $0x1e8] sm:$0xff]  }
 0x250   :  { %1458 = vst [vmem:[#allocation3 + $0x71] sm:$0xff] %v1442_v60  ;;  %v1440_v6 = vmax.f32 %v10836_v61, 0.0  ;;  %v10839_v9 = vadd.f32 %v7904_v23, %v1403_v62  ;;  %v1401_v15 = vadd.f32 %v1384_v1, %v1243_v63 }
 0x251   :  { %v1461_v51 = vld [vmem:[#allocation3 + $0x8] sm:$0xff]  ;;  %9081 = vmatprep.mubr.bf16.mxu1 %v1497_v3 }
 0x252   :  { %1456 = vst [vmem:[#allocation3 + $0x61] sm:$0xff] %v1440_v6  ;;  %v1443_v2 = vmax.f32 %v10839_v9, 0.0  ;;  %v10842_v12 = vadd.f32 %v7904_v23, %v1401_v15  ;;  %v1468_v16 = vpack.c.bf16 %v1461_v51, %v10642_v0  ;;  %9082 = vmatmul.mubr.bf16.vlgmr.msra.gmra.mxu1 %v1498_v50 }
 0x253   :  { %9114 = vmatpush3.bf16.msra.mxu1 %v10818_v58  ;;  %v1746_v17 = vld [vmem:[#allocation3 + $0x22] sm:$0xff]  ;;  %v1745_v58 = vld [vmem:[#allocation3 + $0x1a] sm:$0xff] }
 0x254   :  { %1459 = vst [vmem:[#allocation3 + $0x79] sm:$0xff] %v1443_v2  ;;  %v1441_v19 = vmax.f32 %v10842_v12, 0.0  ;;  %9105 = vmatprep.mubr.bf16.mxu0 %v1468_v16  ;;  %9115 = vmatprep.subr.bf16.mxu1 %v10140_v14  ;;  %2117 = vst [vmem:[#allocation3 + $0x23] sm:$0x7] %v10642_v0  ;;  %v1500_v5 = vpack.c.bf16 %v1443_v2, %v1442_v60  ;;  %v1753_v38 = vpack.c.bf16 %v1747_v37, %v1746_v17 }
 0x255   :  { %v1462_v4 = vld [vmem:[#allocation3 + $0x10] sm:$0xff]  ;;  %v1463_v18 = vld [vmem:[#allocation3 + $0x18] sm:$0xff] }
 0x256   :  { %1457 = vst [vmem:[#allocation3 + $0x69] sm:$0xff] %v1441_v19  ;;  %v1469_v22 = vpack.c.bf16 %v1463_v18, %v1462_v4  ;;  %v1744_v23 = vld [vmem:[#allocation3 + $0x12] sm:$0xff]  ;;  %v1499_v24 = vpack.c.bf16 %v1441_v19, %v1440_v6 }
 0x257   :  { %9116 = vmatpush3.bf16.msra.mxu1 %v10140_v14  ;;  %v1752_v27 = vpack.c.bf16 %v1745_v58, %v1744_v23  ;;  %v7929_v19 = vld [vmem:[#allocation12 + $0x2] ss:$0 sm:$0xff] }
 0x258   :  { %9106 = vmatmul.mubr.bf16.vlgmr.msra.gmra.mxu0 %v1469_v22  ;;  %9085 = vmatprep.mubr.bf16.mxu1 %v1499_v24 }
 0x259   :  { %v1465_v26 = vld [vmem:[#allocation3 + $0x60] sm:$0xff]  ;;  %9117 = vmatprep.subr.bf16.mxu1 %v10141_v20  ;;  %9138 = vmatpush3.bf16.msra.mxu0 %v10147_v10 }
 0x25a   :  { %v1470_v7 = vpack.c.bf16 %v1465_v26, %v10642_v0  ;;  %9086 = vmatmul.mubr.bf16.gmra.mxu1 %v1500_v5  ;;  %9139 = vmatprep.subr.bf16.mxu0 %v10148_v44 }
 0x25b   :  { %9118 = vmatpush3.bf16.msra.mxu1 %v10141_v20  ;;  %9129 = vmatprep.mubr.bf16.mxu1 %v1752_v27  ;;  %v1750_v28 = vld [vmem:[#allocation3 + $0x7a] sm:$0xff]  ;;  %v1749_v39 = vld [vmem:[#allocation3 + $0x72] sm:$0xff] }
 0x25c   :  { %9109 = vmatprep.mubr.bf16.mxu0 %v1470_v7  ;;  %9119 = vmatprep.subr.bf16.mxu1 %v10142_v25  ;;  %2118 = vst [vmem:[#allocation3 + $0x7b] sm:$0x7] %v10642_v0  ;;  %v1755_v43 = vpack.c.bf16 %v1751_v42, %v1750_v28 }
 0x25d   :  { %v1466_v31 = vld [vmem:[#allocation3 + $0x68] sm:$0xff]  ;;  %v1467_v32 = vld [vmem:[#allocation3 + $0x70] sm:$0xff]  ;;  %9140 = vmatpush3.bf16.msra.mxu0 %v10148_v44 }
 0x25e   :  { %v1471_v21 = vpack.c.bf16 %v1467_v32, %v1466_v31  ;;  %v1748_v8 = vld [vmem:[#allocation3 + $0x6a] sm:$0xff]  ;;  %9141 = vmatprep.subr.bf16.mxu0 %v10149_v45 }
 0x25f   :  { %9120 = vmatpush3.bf16.msra.mxu1 %v10142_v25  ;;  %v1754_v40 = vpack.c.bf16 %v1749_v39, %v1748_v8 }
 0x260   :  { %9110 = vmatmul.mubr.bf16.gmra.mxu0 %v1471_v21  ;;  %9121 = vmatprep.subr.bf16.mxu1 %v10143_v30 }
 0x261   :  { %9142 = vmatpush3.bf16.msra.mxu0 %v10149_v45 }
 0x262   :  { %9143 = vmatprep.subr.bf16.mxu0 %v10150_v46 }
 0x263   :  { %9122 = vmatpush3.bf16.msra.mxu1 %v10143_v30 }
 0x264   :  { %9123 = vmatprep.subr.bf16.mxu1 %v10144_v33 }
 0x265   :  { %9144 = vmatpush3.bf16.msra.mxu0 %v10150_v46 }
 0x266   :  { %9145 = vmatprep.subr.bf16.mxu0 %v10151_v48 }
 0x267   :  { %9124 = vmatpush3.bf16.msra.mxu1 %v10144_v33 }
 0x268   :  { %9125 = vmatprep.subr.bf16.mxu1 %v10145_v34 }
 0x269   :  { %9146 = vmatpush3.bf16.msra.mxu0 %v10151_v48 }
 0x26a   :  { %9147 = vmatprep.subr.bf16.mxu0 %v10152_v49 }
 0x26b   :  { %9126 = vmatpush3.bf16.msra.mxu1 %v10145_v34 }
 0x26c   :  { %9127 = vmatprep.subr.bf16.mxu1 %v10146_v36 }
 0x26d   :  { %9148 = vmatpush3.bf16.msra.mxu0 %v10152_v49 }
 0x26e   :  { %9149 = vmatprep.subr.bf16.mxu0 %v10153_v52 }
 0x26f   :  { %9128 = vmatpush3.bf16.msra.mxu1 %v10146_v36 }
 0x270   :  { %9161 = vmatprep.subr.bf16.mxu1 %v10155_v53 }
 0x271   :  { %9150 = vmatpush3.bf16.msra.mxu0 %v10153_v52 }
 0x272   :  { %9130 = vmatmul.mubr.bf16.vlgmr.msra.gmra.mxu1 %v1753_v38  ;;  %9151 = vmatprep.subr.bf16.mxu0 %v10154_v11 }
 0x273   :  { %9133 = vmatprep.mubr.bf16.mxu1 %v1754_v40  ;;  %9162 = vmatpush3.bf16.msra.mxu1 %v10155_v53 }
 0x274   :  { %9163 = vmatprep.subr.bf16.mxu1 %v10157_v13 }
 0x275   :  { %9152 = vmatpush3.bf16.msra.mxu0 %v10154_v11 }
 0x276   :  { %9185 = vmatprep.subr.bf16.mxu0 %v10850_v54 }
 0x277   :  { %9164 = vmatpush3.bf16.msra.mxu1 %v10157_v13 }
 0x278   :  { %9165 = vmatprep.subr.bf16.mxu1 %v10159_v56 }
 0x27a   :  { %9134 = vmatmul.mubr.bf16.gmra.mxu1 %v1755_v43 }
 0x27b   :  { %9166 = vmatpush3.bf16.msra.mxu1 %v10159_v56  ;;  %v10158_v56 = vld [vmem:[#allocation7 + $0x1b0] sm:$0xff]  }
 0x312   :  { %v9083_v57 = vpop.f32.mrf.mxu1 }
 0x314   :  { %v1600_v59 = vpop.f32.mrf.mxu1 }
 0x316   :  { %v9084_v60 = vpop.f32.mrf.mxu1 }
 0x318   :  { %v9107_v62 = vpop.f32.mrf.mxu0  ;;  %v1603_v63 = vpop.f32.mrf.mxu1 }
 0x319   :  { %v1722_v16 = vadd.f32 %v9107_v62, %v9083_v57 }
 0x31a   :  { %v1713_v1 = vpop.f32.mrf.mxu0  ;;  %v9087_v3 = vpop.f32.mrf.mxu1 }
 0x31b   :  { %v1714_v4 = vadd.f32 %v1713_v1, %v1600_v59 }
 0x31c   :  { %v9108_v6 = vpop.f32.mrf.mxu0  ;;  %v1616_v15 = vpop.f32.mrf.mxu1 }
 0x31d   :  { %v1725_v23 = vadd.f32 %v9108_v6, %v9084_v60 }
 0x31e   :  { %v1716_v50 = vpop.f32.mrf.mxu0  ;;  %v9088_v14 = vpop.f32.mrf.mxu1 }
 0x31f   :  { %v1717_v25 = vadd.f32 %v1716_v50, %v1603_v63  ;;  %v10855_v63 = vld [vmem:[#allocation3 + $0x29] sm:$0xff] }
 0x320   :  { %v9111_v51 = vpop.f32.mrf.mxu0  ;;  %v1619_v2 = vpop.f32.mrf.mxu1  ;;  %v10163_v50 = vld [vmem:[#allocation7 + $0x1d8] sm:$0xff]  }
 0x321   :  { %v1738_v31 = vadd.f32 %v9111_v51, %v9087_v3  ;;  %v10162_v51 = vld [vmem:[#allocation7 + $0x1a0] sm:$0xff]  }
 0x322   :  { %v1729_v18 = vpop.f32.mrf.mxu0 }
 0x323   :  { %v1730_v36 = vadd.f32 %v1729_v18, %v1616_v15  ;;  %v10161_v15 = vld [vmem:[#allocation7 + $0x1e0] sm:$0xff]   ;;  %v10168_v18 = vld [vmem:[#allocation7 + $0x188] sm:$0xff]  }
 0x324   :  { %v9112_v26 = vpop.f32.mrf.mxu0  ;;  %9167 = vmatprep.subr.bf16.mxu1 %v10161_v15 }
 0x325   :  { %v1741_v42 = vadd.f32 %v9112_v26, %v9088_v14  ;;  %9168 = vmatpush3.bf16.msra.mxu1 %v10161_v15  ;;  %v10160_v14 = vld [vmem:[#allocation7 + $0x1a8] sm:$0xff]  }
 0x326   :  { %v1732_v37 = vpop.f32.mrf.mxu0  ;;  %9169 = vmatprep.subr.bf16.mxu1 %v10163_v50 }
 0x327   :  { %v1733_v45 = vadd.f32 %v1732_v37, %v1619_v2  ;;  %v10167_v2 = vld [vmem:[#allocation7 + $0x1c8] sm:$0xff]  }
 0x329   :  { %9170 = vmatpush3.bf16.msra.mxu1 %v10163_v50 }
 0x332   :  { %v9131_v17 = vpop.f32.mrf.mxu1 }
 0x333   :  { %v1888_v20 = vadd.f32 %v9131_v17, %v1722_v16  ;;  %v10164_v16 = vld [vmem:[#allocation7 + $0x198] sm:$0xff]   ;;  %v10169_v17 = vld [vmem:[#allocation7 + $0x1c0] sm:$0xff]  }
 0x334   :  { %v1855_v22 = vpop.f32.mrf.mxu1 }
 0x335   :  { %v1904_v24 = vadd.f32 %v7929_v19, %v1888_v20  ;;  %v1886_v5 = vadd.f32 %v1855_v22, %v1714_v4  ;;  %v10171_v4 = vld [vmem:[#allocation7 + $0x238] sm:$0xff]   ;;  %v10170_v20 = vld [vmem:[#allocation7 + $0x180] sm:$0xff]  }
 0x336   :  { %v9132_v58 = vpop.f32.mrf.mxu1  ;;  %v7930_v22 = vld [vmem:[#allocation12 + $0x3] ss:$0 sm:$0xff] }
 0x337   :  { %v1912_v27 = vmax.f32 %v1904_v24, 0.0  ;;  %v1902_v7 = vadd.f32 %v7929_v19, %v1886_v5  ;;  %v1889_v28 = vadd.f32 %v9132_v58, %v1725_v23 }
 0x338   :  { %v1858_v30 = vpop.f32.mrf.mxu1 }
 0x339   :  { %1920 = vst [vmem:[#allocation3 + $0x10] sm:$0xff] %v1912_v27  ;;  %v1910_v32 = vmax.f32 %v1902_v7, 0.0  ;;  %v1905_v21 = vadd.f32 %v7929_v19, %v1889_v28  ;;  %v1887_v33 = vadd.f32 %v1858_v30, %v1717_v25 }
 0x33a   :  { %v9135_v34 = vpop.f32.mrf.mxu1 }
 0x33b   :  { %1918 = vst [vmem:[#allocation3] sm:$0xff] %v1910_v32  ;;  %v1913_v8 = vmax.f32 %v1905_v21, 0.0  ;;  %v1903_v38 = vadd.f32 %v7929_v19, %v1887_v33  ;;  %v1892_v39 = vadd.f32 %v9135_v34, %v1738_v31 }
 0x33c   :  { %v1871_v40 = vpop.f32.mrf.mxu1  ;;  %2115 = vst [vmem:[#allocation3] sm:$0x7] %v10642_v0 }
 0x33d   :  { %1921 = vst [vmem:[#allocation3 + $0x18] sm:$0xff] %v1913_v8  ;;  %v1911_v43 = vmax.f32 %v1903_v38, 0.0  ;;  %v1908_v10 = vadd.f32 %v7929_v19, %v1892_v39  ;;  %v1890_v44 = vadd.f32 %v1871_v40, %v1730_v36  ;;  %v1935_v13 = vpack.c.bf16 %v1913_v8, %v1912_v27 }
 0x33e   :  { %v9136_v46 = vpop.f32.mrf.mxu1 }
 0x33f   :  { %1919 = vst [vmem:[#allocation3 + $0x8] sm:$0xff] %v1911_v43  ;;  %v1916_v48 = vmax.f32 %v1908_v10, 0.0  ;;  %v1906_v49 = vadd.f32 %v7929_v19, %v1890_v44  ;;  %v1893_v52 = vadd.f32 %v9136_v46, %v1741_v42  ;;  %v1934_v11 = vpack.c.bf16 %v1911_v43, %v1910_v32  ;;  %v10172_v44 = vld [vmem:[#allocation7 + $0x230] sm:$0xff]  }
 0x340   :  { %v1874_v53 = vpop.f32.mrf.mxu1 }
 0x341   :  { %1924 = vst [vmem:[#allocation3 + $0x68] sm:$0xff] %v1916_v48  ;;  %v1914_v57 = vmax.f32 %v1906_v49, 0.0  ;;  %v1909_v59 = vadd.f32 %v7929_v19, %v1893_v52  ;;  %v1891_v60 = vadd.f32 %v1874_v53, %v1733_v45  ;;  %9153 = vmatprep.mubr.bf16.mxu0 %v1934_v11  ;;  %v10173_v49 = vld [vmem:[#allocation7 + $0x228] sm:$0xff]  }
 0x342   :  { %9154 = vmatmul.mubr.bf16.vlgmr.msra.gmra.mxu0 %v1935_v13 }
 0x343   :  { %1922 = vst [vmem:[#allocation3 + $0x58] sm:$0xff] %v1914_v57  ;;  %v1917_v0 = vmax.f32 %v1909_v59, 0.0  ;;  %v1907_v62 = vadd.f32 %v7929_v19, %v1891_v60  ;;  %9186 = vmatpush3.bf16.msra.mxu0 %v10850_v54  ;;  %v10165_v54 = vld [vmem:[#allocation7 + $0x1d0] sm:$0xff]  }
 0x344   :  { %2116 = vst [vmem:[#allocation3 + $0x58] sm:$0x7] %v10855_v63  ;;  %9187 = vmatprep.subr.bf16.mxu0 %v10158_v56  ;;  %9171 = vmatprep.subr.bf16.mxu1 %v10165_v54  ;;  %v10166_v19 = vld [vmem:[#allocation7 + $0x190] sm:$0xff]  }
 0x345   :  { %1925 = vst [vmem:[#allocation3 + $0x70] sm:$0xff] %v1917_v0  ;;  %v1915_v1 = vmax.f32 %v1907_v62, 0.0  ;;  %v1937_v6 = vpack.c.bf16 %v1917_v0, %v1916_v48  ;;  %9172 = vmatpush3.bf16.msra.mxu1 %v10165_v54 }
 0x346   :  { %9173 = vmatprep.subr.bf16.mxu1 %v10167_v2 }
 0x347   :  { %1923 = vst [vmem:[#allocation3 + $0x60] sm:$0xff] %v1915_v1  ;;  %v1936_v3 = vpack.c.bf16 %v1915_v1, %v1914_v57  ;;  %9188 = vmatpush3.bf16.msra.mxu0 %v10158_v56  ;;  %v10174_v1 = vld [vmem:[#allocation7 + $0x220] sm:$0xff]  }
 0x348   :  { %9189 = vmatprep.subr.bf16.mxu0 %v10160_v14 }
 0x349   :  { %9157 = vmatprep.mubr.bf16.mxu0 %v1936_v3  ;;  %9174 = vmatpush3.bf16.msra.mxu1 %v10167_v2 }
 0x34a   :  { %9158 = vmatmul.mubr.bf16.gmra.mxu0 %v1937_v6  ;;  %9175 = vmatprep.subr.bf16.mxu1 %v10169_v17  ;;  %v10175_v6 = vld [vmem:[#allocation7 + $0x218] sm:$0xff]  }
 0x34b   :  { %9190 = vmatpush3.bf16.msra.mxu0 %v10160_v14 }
 0x34c   :  { %9191 = vmatprep.subr.bf16.mxu0 %v10162_v51 }
 0x34d   :  { %9176 = vmatpush3.bf16.msra.mxu1 %v10169_v17  ;;  %v10176_v17 = vld [vmem:[#allocation7 + $0x210] sm:$0xff]  }
 0x34e   :  { %9209 = vmatprep.subr.bf16.mxu1 %v10171_v4 }
 0x34f   :  { %9192 = vmatpush3.bf16.msra.mxu0 %v10162_v51 }
 0x350   :  { %9193 = vmatprep.subr.bf16.mxu0 %v10164_v16 }
 0x353   :  { %9194 = vmatpush3.bf16.msra.mxu0 %v10164_v16 }
 0x354   :  { %9195 = vmatprep.subr.bf16.mxu0 %v10166_v19 }
 0x357   :  { %9196 = vmatpush3.bf16.msra.mxu0 %v10166_v19  ;;  %v10177_v19 = vld [vmem:[#allocation7 + $0x208] sm:$0xff]  }
 0x358   :  { %9197 = vmatprep.subr.bf16.mxu0 %v10168_v18 }
 0x35b   :  { %9198 = vmatpush3.bf16.msra.mxu0 %v10168_v18 }
 0x35c   :  { %9199 = vmatprep.subr.bf16.mxu0 %v10170_v20 }
 0x35f   :  { %9200 = vmatpush3.bf16.msra.mxu0 %v10170_v20 }
 0x402   :  { %v9155_v23 = vpop.f32.mrf.mxu0 }
 0x403   :  { %v2053_v24 = vadd.f32 %v9155_v23, %v7930_v22 }
 0x404   :  { %v2044_v5 = vpop.f32.mrf.mxu0 }
 0x405   :  { %v10859_v58 = vadd.f32 %v2053_v24, %v10821_v29  ;;  %v2045_v25 = vadd.f32 %v7930_v22, %v2044_v5 }
 0x406   :  { %v9156_v26 = vpop.f32.mrf.mxu0 }
 0x407   :  { %v2109_v27 = vmax.f32 %v10859_v58, 0.0  ;;  %v10863_v7 = vadd.f32 %v2045_v25, %v10824_v35  ;;  %v2056_v28 = vadd.f32 %v9156_v26, %v7930_v22  ;;  %v10179_v26 = vld [vmem:[#allocation10 + $0x78] sm:$0xff]  }
 0x408   :  { %v2047_v30 = vpop.f32.mrf.mxu0  ;;  %9233 = vmatprep.subr.bf16.mxu0 %v10179_v26 }
 0x409   :  { %2121 = vst [vmem:[#allocation3 + $0x13] sm:$0xff] %v2109_v27  ;;  %v2107_v31 = vmax.f32 %v10863_v7, 0.0  ;;  %v10867_v32 = vadd.f32 %v2056_v28, %v10827_v41  ;;  %v2048_v21 = vadd.f32 %v7930_v22, %v2047_v30  ;;  %v10181_v28 = vld [vmem:[#allocation10 + $0x68] sm:$0xff]   ;;  %v10182_v30 = vld [vmem:[#allocation10 + $0x60] sm:$0xff]  }
 0x40a   :  { %v9159_v33 = vpop.f32.mrf.mxu0 }
 0x40b   :  { %2119 = vst [vmem:[#allocation3 + $0x3] sm:$0xff] %v2107_v31  ;;  %v2110_v29 = vmax.f32 %v10867_v32, 0.0  ;;  %v10871_v34 = vadd.f32 %v2048_v21, %v10830_v47  ;;  %v2069_v36 = vadd.f32 %v9159_v33, %v7930_v22  ;;  %v10184_v21 = vld [vmem:[#allocation10 + $0x50] sm:$0xff]   ;;  %v10185_v33 = vld [vmem:[#allocation10 + $0x48] sm:$0xff]  }
 0x40c   :  { %v2060_v37 = vpop.f32.mrf.mxu0 }
 0x40d   :  { %2122 = vst [vmem:[#allocation3 + $0x1b] sm:$0xff] %v2110_v29  ;;  %v2108_v35 = vmax.f32 %v10871_v34, 0.0  ;;  %v10875_v8 = vadd.f32 %v2069_v36, %v10833_v55  ;;  %v2061_v38 = vadd.f32 %v7930_v22, %v2060_v37  ;;  %v2165_v10 = vpack.c.bf16 %v2110_v29, %v2109_v27  ;;  %v10180_v27 = vld [vmem:[#allocation10 + $0x70] sm:$0xff]   ;;  %v10186_v29 = vld [vmem:[#allocation10 + $0x40] sm:$0xff]   ;;  %v10187_v36 = vld [vmem:[#allocation7 + $0x2b8] sm:$0xff]  }
 0x40e   :  { %v9160_v39 = vpop.f32.mrf.mxu0  ;;  %v10892_v37 = vld [vmem:[#allocation7 + $0x278] sm:$0xff]  }
 0x40f   :  { %2120 = vst [vmem:[#allocation3 + $0xb] sm:$0xff] %v2108_v35  ;;  %v2113_v41 = vmax.f32 %v10875_v8, 0.0  ;;  %v10879_v40 = vadd.f32 %v2061_v38, %v10836_v61  ;;  %v2072_v42 = vadd.f32 %v9160_v39, %v7930_v22  ;;  %v2164_v43 = vpack.c.bf16 %v2108_v35, %v2107_v31  ;;  %v10183_v31 = vld [vmem:[#allocation10 + $0x58] sm:$0xff]   ;;  %v10189_v35 = vld [vmem:[#allocation7 + $0x2b0] sm:$0xff]   ;;  %v10191_v38 = vld [vmem:[#allocation7 + $0x2a8] sm:$0xff]  }
 0x410   :  { %v2063_v47 = vpop.f32.mrf.mxu0 }
 0x411   :  { %2125 = vst [vmem:[#allocation3 + $0x6b] sm:$0xff] %v2113_v41  ;;  %v2111_v45 = vmax.f32 %v10879_v40, 0.0  ;;  %v10883_v46 = vadd.f32 %v2072_v42, %v10839_v9  ;;  %v2064_v55 = vadd.f32 %v7930_v22, %v2063_v47  ;;  %9177 = vmatprep.mubr.bf16.mxu1 %v2164_v43 }
 0x412   :  { %9178 = vmatmul.mubr.bf16.vlgmr.msra.gmra.mxu1 %v2165_v10  ;;  %v2127_v53 = vld [vmem:[#allocation3] sm:$0xff] }
 0x413   :  { %2123 = vst [vmem:[#allocation3 + $0x5b] sm:$0xff] %v2111_v45  ;;  %v2114_v48 = vmax.f32 %v10883_v46, 0.0  ;;  %v10887_v61 = vadd.f32 %v2064_v55, %v10842_v12  ;;  %9210 = vmatpush3.bf16.msra.mxu1 %v10171_v4  ;;  %v10178_v4 = vld [vmem:[#allocation7 + $0x200] sm:$0xff]  }
 0x414   :  { %9211 = vmatprep.subr.bf16.mxu1 %v10172_v44  ;;  %v2414_v52 = vld [vmem:[#allocation3 + $0x1e] sm:$0xff]  ;;  %v2413_v18 = vld [vmem:[#allocation3 + $0x16] sm:$0xff] }
 0x415   :  { %2126 = vst [vmem:[#allocation3 + $0x73] sm:$0xff] %v2114_v48  ;;  %v2112_v11 = vmax.f32 %v10887_v61, 0.0  ;;  %2785 = vst [vmem:[#allocation3 + $0x21] sm:$0x1] %v10855_v63  ;;  %v2130_v60 = vld [vmem:[#allocation3 + $0x18] sm:$0xff]  ;;  %v2167_v62 = vpack.c.bf16 %v2114_v48, %v2113_v41  ;;  %v2420_v23 = vpack.c.bf16 %v2414_v52, %v2413_v18 }
 0x416   :  { %v2411_v9 = vld [vmem:[#allocation3 + $0x6] sm:$0xff]  ;;  %v2412_v13 = vld [vmem:[#allocation3 + $0xe] sm:$0xff] }
 0x417   :  { %v2128_v56 = vld [vmem:[#allocation3 + $0x8] sm:$0xff]  ;;  %2124 = vst [vmem:[#allocation3 + $0x63] sm:$0xff] %v2112_v11  ;;  %v2129_v59 = vld [vmem:[#allocation3 + $0x10] sm:$0xff]  ;;  %9212 = vmatpush3.bf16.msra.mxu1 %v10172_v44  ;;  %v2166_v12 = vpack.c.bf16 %v2112_v11, %v2111_v45  ;;  %v2419_v3 = vpack.c.bf16 %v2412_v13, %v2411_v9 }
 0x418   :  { %v2135_v57 = vpack.c.bf16 %v2128_v56, %v2127_v53  ;;  %v2136_v0 = vpack.c.bf16 %v2130_v60, %v2129_v59  ;;  %9213 = vmatprep.subr.bf16.mxu1 %v10173_v49  ;;  %v7963_v13 = vld [vmem:[#allocation12 + $0x4] ss:$0 sm:$0xff] }
 0x419   :  { %9181 = vmatprep.mubr.bf16.mxu1 %v2166_v12 }
 0x41a   :  { %9201 = vmatprep.mubr.bf16.mxu0 %v2135_v57  ;;  %9182 = vmatmul.mubr.bf16.gmra.mxu1 %v2167_v62  ;;  %v2131_v50 = vld [vmem:[#allocation3 + $0x58] sm:$0xff] }
 0x41b   :  { %9202 = vmatmul.mubr.bf16.vlgmr.msra.gmra.mxu0 %v2136_v0  ;;  %9214 = vmatpush3.bf16.msra.mxu1 %v10173_v49 }
 0x41c   :  { %9225 = vmatprep.mubr.bf16.mxu1 %v2419_v3  ;;  %9215 = vmatprep.subr.bf16.mxu1 %v10174_v1  ;;  %v2418_v15 = vld [vmem:[#allocation3 + $0x76] sm:$0xff]  ;;  %v2417_v5 = vld [vmem:[#allocation3 + $0x6e] sm:$0xff] }
 0x41d   :  { %2786 = vst [vmem:[#allocation3 + $0x79] sm:$0x1] %v10855_v63  ;;  %v2134_v2 = vld [vmem:[#allocation3 + $0x70] sm:$0xff]  ;;  %v2422_v25 = vpack.c.bf16 %v2418_v15, %v2417_v5  ;;  %9234 = vmatpush3.bf16.msra.mxu0 %v10179_v26 }
 0x41e   :  { %v2132_v14 = vld [vmem:[#allocation3 + $0x60] sm:$0xff]  ;;  %v2133_v51 = vld [vmem:[#allocation3 + $0x68] sm:$0xff]  ;;  %9235 = vmatprep.subr.bf16.mxu0 %v10180_v27 }
 0x41f   :  { %v2137_v54 = vpack.c.bf16 %v2132_v14, %v2131_v50  ;;  %9216 = vmatpush3.bf16.msra.mxu1 %v10174_v1  ;;  %v2138_v16 = vpack.c.bf16 %v2134_v2, %v2133_v51  ;;  %v2415_v20 = vld [vmem:[#allocation3 + $0x5e] sm:$0xff]  ;;  %v2416_v22 = vld [vmem:[#allocation3 + $0x66] sm:$0xff] }
 0x420   :  { %9217 = vmatprep.subr.bf16.mxu1 %v10175_v6  ;;  %v2421_v24 = vpack.c.bf16 %v2416_v22, %v2415_v20 }
 0x421   :  { %9205 = vmatprep.mubr.bf16.mxu0 %v2137_v54  ;;  %9236 = vmatpush3.bf16.msra.mxu0 %v10180_v27 }
 0x422   :  { %9237 = vmatprep.subr.bf16.mxu0 %v10181_v28 }
 0x423   :  { %9206 = vmatmul.mubr.bf16.gmra.mxu0 %v2138_v16  ;;  %9218 = vmatpush3.bf16.msra.mxu1 %v10175_v6 }
 0x424   :  { %9219 = vmatprep.subr.bf16.mxu1 %v10176_v17 }
 0x425   :  { %9238 = vmatpush3.bf16.msra.mxu0 %v10181_v28 }
 0x426   :  { %9239 = vmatprep.subr.bf16.mxu0 %v10182_v30 }
 0x427   :  { %9220 = vmatpush3.bf16.msra.mxu1 %v10176_v17 }
 0x428   :  { %9221 = vmatprep.subr.bf16.mxu1 %v10177_v19 }
 0x429   :  { %9240 = vmatpush3.bf16.msra.mxu0 %v10182_v30 }
 0x42a   :  { %9241 = vmatprep.subr.bf16.mxu0 %v10183_v31 }
 0x42b   :  { %9222 = vmatpush3.bf16.msra.mxu1 %v10177_v19 }
 0x42c   :  { %9223 = vmatprep.subr.bf16.mxu1 %v10178_v4 }
 0x42d   :  { %9242 = vmatpush3.bf16.msra.mxu0 %v10183_v31 }
 0x42e   :  { %9243 = vmatprep.subr.bf16.mxu0 %v10184_v21 }
 0x42f   :  { %9224 = vmatpush3.bf16.msra.mxu1 %v10178_v4 }
 0x430   :  { %9257 = vmatprep.subr.bf16.mxu1 %v10187_v36 }
 0x431   :  { %9244 = vmatpush3.bf16.msra.mxu0 %v10184_v21 }
 0x432   :  { %9226 = vmatmul.mubr.bf16.vlgmr.msra.gmra.mxu1 %v2420_v23  ;;  %9245 = vmatprep.subr.bf16.mxu0 %v10185_v33 }
 0x433   :  { %9229 = vmatprep.mubr.bf16.mxu1 %v2421_v24  ;;  %9258 = vmatpush3.bf16.msra.mxu1 %v10187_v36 }
 0x434   :  { %9259 = vmatprep.subr.bf16.mxu1 %v10189_v35 }
 0x435   :  { %9246 = vmatpush3.bf16.msra.mxu0 %v10185_v33 }
 0x436   :  { %9247 = vmatprep.subr.bf16.mxu0 %v10186_v29 }
 0x437   :  { %9260 = vmatpush3.bf16.msra.mxu1 %v10189_v35 }
 0x438   :  { %9261 = vmatprep.subr.bf16.mxu1 %v10191_v38 }
 0x439   :  { %9248 = vmatpush3.bf16.msra.mxu0 %v10186_v29 }
 0x43a   :  { %9230 = vmatmul.mubr.bf16.gmra.mxu1 %v2422_v25  ;;  %9281 = vmatprep.subr.bf16.mxu0 %v10892_v37 }
 0x43b   :  { %9262 = vmatpush3.bf16.msra.mxu1 %v10191_v38  ;;  %v10190_v38 = vld [vmem:[#allocation7 + $0x270] sm:$0xff]  }
 0x4d2   :  { %v9179_v39 = vpop.f32.mrf.mxu1 }
 0x4d4   :  { %v2267_v41 = vpop.f32.mrf.mxu1 }
 0x4d6   :  { %v9180_v42 = vpop.f32.mrf.mxu1 }
 0x4d8   :  { %v2270_v47 = vpop.f32.mrf.mxu1 }
 0x4da   :  { %v9183_v44 = vpop.f32.mrf.mxu1 }
 0x4db   :  { %v9203_v43 = vpop.f32.mrf.mxu0 }
 0x4dc   :  { %v2283_v55 = vpop.f32.mrf.mxu1  ;;  %v2389_v53 = vadd.f32 %v9203_v43, %v9179_v39 }
 0x4dd   :  { %v2380_v10 = vpop.f32.mrf.mxu0 }
 0x4de   :  { %v9184_v49 = vpop.f32.mrf.mxu1  ;;  %v2381_v56 = vadd.f32 %v2380_v10, %v2267_v41 }
 0x4df   :  { %v9204_v45 = vpop.f32.mrf.mxu0 }
 0x4e0   :  { %v2286_v11 = vpop.f32.mrf.mxu1  ;;  %v2392_v12 = vadd.f32 %v9204_v45, %v9180_v42 }
 0x4e1   :  { %v2383_v48 = vpop.f32.mrf.mxu0 }
 0x4e2   :  { %v2384_v3 = vadd.f32 %v2383_v48, %v2270_v47  ;;  %v10195_v48 = vld [vmem:[#allocation7 + $0x298] sm:$0xff]  }
 0x4e3   :  { %v9207_v52 = vpop.f32.mrf.mxu0 }
 0x4e4   :  { %v2405_v51 = vadd.f32 %v9207_v52, %v9183_v44  ;;  %v10194_v52 = vld [vmem:[#allocation7 + $0x260] sm:$0xff]  }
 0x4e5   :  { %v2396_v57 = vpop.f32.mrf.mxu0 }
 0x4e6   :  { %v2397_v4 = vadd.f32 %v2396_v57, %v2283_v55  ;;  %v10193_v55 = vld [vmem:[#allocation7 + $0x2a0] sm:$0xff]   ;;  %v10200_v57 = vld [vmem:[#allocation7 + $0x248] sm:$0xff]  }
 0x4e7   :  { %v9208_v6 = vpop.f32.mrf.mxu0  ;;  %9263 = vmatprep.subr.bf16.mxu1 %v10193_v55 }
 0x4e8   :  { %v2408_v5 = vadd.f32 %v9208_v6, %v9184_v49  ;;  %9264 = vmatpush3.bf16.msra.mxu1 %v10193_v55  ;;  %v10192_v49 = vld [vmem:[#allocation7 + $0x268] sm:$0xff]  }
 0x4e9   :  { %v2399_v18 = vpop.f32.mrf.mxu0  ;;  %9265 = vmatprep.subr.bf16.mxu1 %v10195_v48 }
 0x4ea   :  { %v2400_v28 = vadd.f32 %v2399_v18, %v2286_v11  ;;  %v10199_v11 = vld [vmem:[#allocation7 + $0x288] sm:$0xff]  }
 0x4ec   :  { %9266 = vmatpush3.bf16.msra.mxu1 %v10195_v48 }
 0x4f2   :  { %v9227_v9 = vpop.f32.mrf.mxu1 }
 0x4f3   :  { %v2555_v59 = vadd.f32 %v9227_v9, %v2389_v53  ;;  %v10196_v53 = vld [vmem:[#allocation7 + $0x258] sm:$0xff]   ;;  %v10201_v9 = vld [vmem:[#allocation7 + $0x280] sm:$0xff]  }
 0x4f4   :  { %v2522_v60 = vpop.f32.mrf.mxu1 }
 0x4f5   :  { %v2571_v0 = vadd.f32 %v7963_v13, %v2555_v59  ;;  %v2553_v62 = vadd.f32 %v2522_v60, %v2381_v56  ;;  %v10203_v56 = vld [vmem:[#allocation7 + $0x2f8] sm:$0xff]   ;;  %v10202_v59 = vld [vmem:[#allocation7 + $0x240] sm:$0xff]  }
 0x4f6   :  { %v9228_v1 = vpop.f32.mrf.mxu1  ;;  %v7964_v60 = vld [vmem:[#allocation12 + $0x5] ss:$0 sm:$0xff] }
 0x4f7   :  { %v2579_v15 = vmax.f32 %v2571_v0, 0.0  ;;  %v2569_v50 = vadd.f32 %v7963_v13, %v2553_v62  ;;  %v2556_v14 = vadd.f32 %v9228_v1, %v2392_v12 }
 0x4f8   :  { %v2525_v54 = vpop.f32.mrf.mxu1 }
 0x4f9   :  { %2587 = vst [vmem:[#allocation3 + $0x10] sm:$0xff] %v2579_v15  ;;  %v2577_v2 = vmax.f32 %v2569_v50, 0.0  ;;  %v2572_v16 = vadd.f32 %v7963_v13, %v2556_v14  ;;  %v2554_v17 = vadd.f32 %v2525_v54, %v2384_v3 }
 0x4fa   :  { %v9231_v19 = vpop.f32.mrf.mxu1 }
 0x4fb   :  { %2585 = vst [vmem:[#allocation3] sm:$0xff] %v2577_v2  ;;  %v2580_v20 = vmax.f32 %v2572_v16, 0.0  ;;  %v2570_v22 = vadd.f32 %v7963_v13, %v2554_v17  ;;  %v2559_v23 = vadd.f32 %v9231_v19, %v2405_v51 }
 0x4fc   :  { %v2538_v24 = vpop.f32.mrf.mxu1  ;;  %2783 = vst [vmem:[#allocation3] sm:$0x1] %v10855_v63 }
 0x4fd   :  { %2588 = vst [vmem:[#allocation3 + $0x18] sm:$0xff] %v2580_v20  ;;  %v2578_v25 = vmax.f32 %v2570_v22, 0.0  ;;  %v2575_v26 = vadd.f32 %v7963_v13, %v2559_v23  ;;  %v2557_v27 = vadd.f32 %v2538_v24, %v2397_v4  ;;  %v2602_v35 = vpack.c.bf16 %v2580_v20, %v2579_v15 }
 0x4fe   :  { %v9232_v30 = vpop.f32.mrf.mxu1 }
 0x4ff   :  { %2586 = vst [vmem:[#allocation3 + $0x8] sm:$0xff] %v2578_v25  ;;  %v2583_v31 = vmax.f32 %v2575_v26, 0.0  ;;  %v2573_v21 = vadd.f32 %v7963_v13, %v2557_v27  ;;  %v2560_v33 = vadd.f32 %v9232_v30, %v2408_v5  ;;  %v2601_v29 = vpack.c.bf16 %v2578_v25, %v2577_v2  ;;  %v10204_v27 = vld [vmem:[#allocation7 + $0x2f0] sm:$0xff]  }
 0x500   :  { %v2541_v36 = vpop.f32.mrf.mxu1 }
 0x501   :  { %2591 = vst [vmem:[#allocation3 + $0x68] sm:$0xff] %v2583_v31  ;;  %v2581_v39 = vmax.f32 %v2573_v21, 0.0  ;;  %v2576_v41 = vadd.f32 %v7963_v13, %v2560_v33  ;;  %v2558_v42 = vadd.f32 %v2541_v36, %v2400_v28  ;;  %9249 = vmatprep.mubr.bf16.mxu0 %v2601_v29  ;;  %v10205_v21 = vld [vmem:[#allocation7 + $0x2e8] sm:$0xff]  }
 0x502   :  { %9250 = vmatmul.mubr.bf16.vlgmr.msra.gmra.mxu0 %v2602_v35 }
 0x503   :  { %2589 = vst [vmem:[#allocation3 + $0x58] sm:$0xff] %v2581_v39  ;;  %v2584_v43 = vmax.f32 %v2576_v41, 0.0  ;;  %v2574_v47 = vadd.f32 %v7963_v13, %v2558_v42  ;;  %9282 = vmatpush3.bf16.msra.mxu0 %v10892_v37  ;;  %v10197_v37 = vld [vmem:[#allocation7 + $0x290] sm:$0xff]  }
 0x504   :  { %2784 = vst [vmem:[#allocation3 + $0x58] sm:$0x1] %v10855_v63  ;;  %9283 = vmatprep.subr.bf16.mxu0 %v10190_v38  ;;  %9267 = vmatprep.subr.bf16.mxu1 %v10197_v37  ;;  %v10198_v13 = vld [vmem:[#allocation7 + $0x250] sm:$0xff]  }
 0x505   :  { %2592 = vst [vmem:[#allocation3 + $0x70] sm:$0xff] %v2584_v43  ;;  %v2582_v10 = vmax.f32 %v2574_v47, 0.0  ;;  %v2604_v45 = vpack.c.bf16 %v2584_v43, %v2583_v31  ;;  %9268 = vmatpush3.bf16.msra.mxu1 %v10197_v37 }
 0x506   :  { %9269 = vmatprep.subr.bf16.mxu1 %v10199_v11 }
 0x507   :  { %2590 = vst [vmem:[#allocation3 + $0x60] sm:$0xff] %v2582_v10  ;;  %v2603_v44 = vpack.c.bf16 %v2582_v10, %v2581_v39  ;;  %9284 = vmatpush3.bf16.msra.mxu0 %v10190_v38  ;;  %v10206_v10 = vld [vmem:[#allocation7 + $0x2e0] sm:$0xff]  }
 0x508   :  { %9285 = vmatprep.subr.bf16.mxu0 %v10192_v49 }
 0x509   :  { %9253 = vmatprep.mubr.bf16.mxu0 %v2603_v44  ;;  %9270 = vmatpush3.bf16.msra.mxu1 %v10199_v11 }
 0x50a   :  { %9254 = vmatmul.mubr.bf16.gmra.mxu0 %v2604_v45  ;;  %9271 = vmatprep.subr.bf16.mxu1 %v10201_v9  ;;  %v10207_v45 = vld [vmem:[#allocation7 + $0x2d8] sm:$0xff]  }
 0x50b   :  { %9286 = vmatpush3.bf16.msra.mxu0 %v10192_v49 }
 0x50c   :  { %9287 = vmatprep.subr.bf16.mxu0 %v10194_v52 }
 0x50d   :  { %9272 = vmatpush3.bf16.msra.mxu1 %v10201_v9  ;;  %v10208_v9 = vld [vmem:[#allocation7 + $0x2d0] sm:$0xff]  }
 0x50e   :  { %9305 = vmatprep.subr.bf16.mxu1 %v10203_v56 }
 0x50f   :  { %9288 = vmatpush3.bf16.msra.mxu0 %v10194_v52 }
 0x510   :  { %9289 = vmatprep.subr.bf16.mxu0 %v10196_v53 }
 0x513   :  { %9290 = vmatpush3.bf16.msra.mxu0 %v10196_v53 }
 0x514   :  { %9291 = vmatprep.subr.bf16.mxu0 %v10198_v13 }
 0x517   :  { %9292 = vmatpush3.bf16.msra.mxu0 %v10198_v13  ;;  %v10209_v13 = vld [vmem:[#allocation7 + $0x2c8] sm:$0xff]  }
 0x518   :  { %9293 = vmatprep.subr.bf16.mxu0 %v10200_v57 }
 0x51b   :  { %9294 = vmatpush3.bf16.msra.mxu0 %v10200_v57 }
 0x51c   :  { %9295 = vmatprep.subr.bf16.mxu0 %v10202_v59 }
 0x51f   :  { %9296 = vmatpush3.bf16.msra.mxu0 %v10202_v59 }
 0x5c2   :  { %v9251_v12 = vpop.f32.mrf.mxu0 }
 0x5c3   :  { %v2721_v0 = vadd.f32 %v9251_v12, %v7964_v60 }
 0x5c4   :  { %v2712_v62 = vpop.f32.mrf.mxu0 }
 0x5c5   :  { %v10899_v1 = vadd.f32 %v2721_v0, %v10859_v58  ;;  %v2713_v3 = vadd.f32 %v7964_v60, %v2712_v62 }
 0x5c6   :  { %v9252_v6 = vpop.f32.mrf.mxu0 }
 0x5c7   :  { %v2777_v15 = vmax.f32 %v10899_v1, 0.0  ;;  %v10903_v50 = vadd.f32 %v2713_v3, %v10863_v7  ;;  %v2724_v14 = vadd.f32 %v9252_v6, %v7964_v60  ;;  %v10211_v6 = vld [vmem:[#allocation10 + $0xb8] sm:$0xff]  }
 0x5c8   :  { %v2715_v54 = vpop.f32.mrf.mxu0  ;;  %9329 = vmatprep.subr.bf16.mxu0 %v10211_v6 }
 0x5c9   :  { %2789 = vst [vmem:[#allocation3 + $0x11] sm:$0xff] %v2777_v15  ;;  %v2775_v51 = vmax.f32 %v10903_v50, 0.0  ;;  %v10907_v2 = vadd.f32 %v2724_v14, %v10867_v32  ;;  %v2716_v16 = vadd.f32 %v7964_v60, %v2715_v54  ;;  %v10213_v14 = vld [vmem:[#allocation10 + $0xa8] sm:$0xff]   ;;  %v10214_v54 = vld [vmem:[#allocation10 + $0xa0] sm:$0xff]  }
 0x5ca   :  { %v9255_v17 = vpop.f32.mrf.mxu0 }
 0x5cb   :  { %2787 = vst [vmem:[#allocation3 + $0x1] sm:$0xff] %v2775_v51  ;;  %v2778_v58 = vmax.f32 %v10907_v2, 0.0  ;;  %v10911_v19 = vadd.f32 %v2716_v16, %v10871_v34  ;;  %v2737_v4 = vadd.f32 %v9255_v17, %v7964_v60  ;;  %v10216_v16 = vld [vmem:[#allocation10 + $0x90] sm:$0xff]   ;;  %v10217_v17 = vld [vmem:[#allocation10 + $0x88] sm:$0xff]  }
 0x5cc   :  { %v2728_v18 = vpop.f32.mrf.mxu0 }
 0x5cd   :  { %2790 = vst [vmem:[#allocation3 + $0x19] sm:$0xff] %v2778_v58  ;;  %v2776_v7 = vmax.f32 %v10911_v19, 0.0  ;;  %v10915_v20 = vadd.f32 %v2737_v4, %v10875_v8  ;;  %v2729_v22 = vadd.f32 %v7964_v60, %v2728_v18  ;;  %v2833_v26 = vpack.c.bf16 %v2778_v58, %v2777_v15  ;;  %v10212_v15 = vld [vmem:[#allocation10 + $0xb0] sm:$0xff]   ;;  %v10218_v58 = vld [vmem:[#allocation10 + $0x80] sm:$0xff]   ;;  %v10219_v4 = vld [vmem:[#allocation9 + $0x178] sm:$0xff]  }
 0x5ce   :  { %v9256_v23 = vpop.f32.mrf.mxu0  ;;  %v10932_v18 = vld [vmem:[#allocation9 + $0x138] sm:$0xff]  }
 0x5cf   :  { %2788 = vst [vmem:[#allocation3 + $0x9] sm:$0xff] %v2776_v7  ;;  %v2781_v32 = vmax.f32 %v10915_v20, 0.0  ;;  %v10919_v24 = vadd.f32 %v2729_v22, %v10879_v40  ;;  %v2740_v5 = vadd.f32 %v9256_v23, %v7964_v60  ;;  %v2832_v25 = vpack.c.bf16 %v2776_v7, %v2775_v51  ;;  %v10215_v51 = vld [vmem:[#allocation10 + $0x98] sm:$0xff]  }
 0x5d0   :  { %v2731_v34 = vpop.f32.mrf.mxu0 }
 0x5d1   :  { %2793 = vst [vmem:[#allocation3 + $0x69] sm:$0xff] %v2781_v32  ;;  %v2779_v28 = vmax.f32 %v10919_v24, 0.0  ;;  %v10923_v30 = vadd.f32 %v2740_v5, %v10883_v46  ;;  %v2732_v8 = vadd.f32 %v7964_v60, %v2731_v34  ;;  %9273 = vmatprep.mubr.bf16.mxu1 %v2832_v25 }
 0x5d2   :  { %9274 = vmatmul.mubr.bf16.vlgmr.msra.gmra.mxu1 %v2833_v26  ;;  %v2795_v36 = vld [vmem:[#allocation3] sm:$0xff] }
 0x5d3   :  { %2791 = vst [vmem:[#allocation3 + $0x59] sm:$0xff] %v2779_v28  ;;  %v2782_v31 = vmax.f32 %v10923_v30, 0.0  ;;  %v10927_v40 = vadd.f32 %v2732_v8, %v10887_v61  ;;  %9306 = vmatpush3.bf16.msra.mxu1 %v10203_v56  ;;  %v10210_v56 = vld [vmem:[#allocation7 + $0x2c0] sm:$0xff]  }
 0x5d4   :  { %9307 = vmatprep.subr.bf16.mxu1 %v10204_v27  ;;  %v3082_v33 = vld [vmem:[#allocation3 + $0x1a] sm:$0xff]  ;;  %v3081_v57 = vld [vmem:[#allocation3 + $0x12] sm:$0xff] }
 0x5d5   :  { %2794 = vst [vmem:[#allocation3 + $0x71] sm:$0xff] %v2782_v31  ;;  %v2780_v29 = vmax.f32 %v10927_v40, 0.0  ;;  %3445 = vst [vmem:[#allocation3 + $0x21] sm:$0x1] %v10855_v63  ;;  %v2798_v42 = vld [vmem:[#allocation3 + $0x18] sm:$0xff]  ;;  %v2835_v47 = vpack.c.bf16 %v2782_v31, %v2781_v32  ;;  %v3088_v12 = vpack.c.bf16 %v3082_v33, %v3081_v57 }
 0x5d6   :  { %v3079_v46 = vld [vmem:[#allocation3 + $0x2] sm:$0xff]  ;;  %v3080_v38 = vld [vmem:[#allocation3 + $0xa] sm:$0xff] }
 0x5d7   :  { %v2796_v35 = vld [vmem:[#allocation3 + $0x8] sm:$0xff]  ;;  %2792 = vst [vmem:[#allocation3 + $0x61] sm:$0xff] %v2780_v29  ;;  %v2797_v41 = vld [vmem:[#allocation3 + $0x10] sm:$0xff]  ;;  %9308 = vmatpush3.bf16.msra.mxu1 %v10204_v27  ;;  %v2834_v61 = vpack.c.bf16 %v2780_v29, %v2779_v28  ;;  %v3087_v44 = vpack.c.bf16 %v3080_v38, %v3079_v46 }
 0x5d8   :  { %v2803_v39 = vpack.c.bf16 %v2796_v35, %v2795_v36  ;;  %v2804_v43 = vpack.c.bf16 %v2798_v42, %v2797_v41  ;;  %9309 = vmatprep.subr.bf16.mxu1 %v10205_v21  ;;  %v7997_v36 = vld [vmem:[#allocation12 + $0x6] ss:$0 sm:$0xff] }
 0x5d9   :  { %9277 = vmatprep.mubr.bf16.mxu1 %v2834_v61 }
 0x5da   :  { %9297 = vmatprep.mubr.bf16.mxu0 %v2803_v39  ;;  %9278 = vmatmul.mubr.bf16.gmra.mxu1 %v2835_v47  ;;  %v2799_v48 = vld [vmem:[#allocation3 + $0x58] sm:$0xff] }
 0x5db   :  { %9298 = vmatmul.mubr.bf16.vlgmr.msra.gmra.mxu0 %v2804_v43  ;;  %9310 = vmatpush3.bf16.msra.mxu1 %v10205_v21 }
 0x5dc   :  { %9321 = vmatprep.mubr.bf16.mxu1 %v3087_v44  ;;  %9311 = vmatprep.subr.bf16.mxu1 %v10206_v10  ;;  %v3086_v55 = vld [vmem:[#allocation3 + $0x72] sm:$0xff]  ;;  %v3085_v62 = vld [vmem:[#allocation3 + $0x6a] sm:$0xff] }
 0x5dd   :  { %3446 = vst [vmem:[#allocation3 + $0x79] sm:$0x1] %v10855_v63  ;;  %v2802_v11 = vld [vmem:[#allocation3 + $0x70] sm:$0xff]  ;;  %v3090_v3 = vpack.c.bf16 %v3086_v55, %v3085_v62  ;;  %9330 = vmatpush3.bf16.msra.mxu0 %v10211_v6 }
 0x5de   :  { %v2800_v49 = vld [vmem:[#allocation3 + $0x60] sm:$0xff]  ;;  %v2801_v52 = vld [vmem:[#allocation3 + $0x68] sm:$0xff]  ;;  %9331 = vmatprep.subr.bf16.mxu0 %v10212_v15 }
 0x5df   :  { %v2805_v37 = vpack.c.bf16 %v2800_v49, %v2799_v48  ;;  %9312 = vmatpush3.bf16.msra.mxu1 %v10206_v10  ;;  %v2806_v53 = vpack.c.bf16 %v2802_v11, %v2801_v52  ;;  %v3083_v59 = vld [vmem:[#allocation3 + $0x5a] sm:$0xff]  ;;  %v3084_v60 = vld [vmem:[#allocation3 + $0x62] sm:$0xff] }
 0x5e0   :  { %9313 = vmatprep.subr.bf16.mxu1 %v10207_v45  ;;  %v3089_v0 = vpack.c.bf16 %v3084_v60, %v3083_v59 }
 0x5e1   :  { %9301 = vmatprep.mubr.bf16.mxu0 %v2805_v37  ;;  %9332 = vmatpush3.bf16.msra.mxu0 %v10212_v15 }
 0x5e2   :  { %9333 = vmatprep.subr.bf16.mxu0 %v10213_v14 }
 0x5e3   :  { %9302 = vmatmul.mubr.bf16.gmra.mxu0 %v2806_v53  ;;  %9314 = vmatpush3.bf16.msra.mxu1 %v10207_v45 }
 0x5e4   :  { %9315 = vmatprep.subr.bf16.mxu1 %v10208_v9 }
 0x5e5   :  { %9334 = vmatpush3.bf16.msra.mxu0 %v10213_v14 }
 0x5e6   :  { %9335 = vmatprep.subr.bf16.mxu0 %v10214_v54 }
 0x5e7   :  { %9316 = vmatpush3.bf16.msra.mxu1 %v10208_v9 }
 0x5e8   :  { %9317 = vmatprep.subr.bf16.mxu1 %v10209_v13 }
 0x5e9   :  { %9336 = vmatpush3.bf16.msra.mxu0 %v10214_v54 }
 0x5ea   :  { %9337 = vmatprep.subr.bf16.mxu0 %v10215_v51 }
 0x5eb   :  { %9318 = vmatpush3.bf16.msra.mxu1 %v10209_v13 }
 0x5ec   :  { %9319 = vmatprep.subr.bf16.mxu1 %v10210_v56 }
 0x5ed   :  { %9338 = vmatpush3.bf16.msra.mxu0 %v10215_v51 }
 0x5ee   :  { %9339 = vmatprep.subr.bf16.mxu0 %v10216_v16 }
 0x5ef   :  { %9320 = vmatpush3.bf16.msra.mxu1 %v10210_v56 }
 0x5f0   :  { %9353 = vmatprep.subr.bf16.mxu1 %v10219_v4 }
 0x5f1   :  { %9340 = vmatpush3.bf16.msra.mxu0 %v10216_v16 }
 0x5f2   :  { %9322 = vmatmul.mubr.bf16.vlgmr.msra.gmra.mxu1 %v3088_v12  ;;  %9341 = vmatprep.subr.bf16.mxu0 %v10217_v17 }
 0x5f3   :  { %9325 = vmatprep.mubr.bf16.mxu1 %v3089_v0  ;;  %9354 = vmatpush3.bf16.msra.mxu1 %v10219_v4 }
 0x5f5   :  { %9342 = vmatpush3.bf16.msra.mxu0 %v10217_v17 }
 0x5f6   :  { %9343 = vmatprep.subr.bf16.mxu0 %v10218_v58 }
 0x5f9   :  { %9344 = vmatpush3.bf16.msra.mxu0 %v10218_v58 }
 0x5fa   :  { %9326 = vmatmul.mubr.bf16.gmra.mxu1 %v3090_v3  ;;  %9373 = vmatprep.subr.bf16.mxu0 %v10932_v18 }
 0x692   :  { %v9275_v7 = vpop.f32.mrf.mxu1 }
 0x694   :  { %v2935_v22 = vpop.f32.mrf.mxu1 }
 0x696   :  { %v9276_v23 = vpop.f32.mrf.mxu1 }
 0x698   :  { %v2938_v5 = vpop.f32.mrf.mxu1 }
 0x69a   :  { %v9279_v34 = vpop.f32.mrf.mxu1 }
 0x69b   :  { %v9299_v32 = vpop.f32.mrf.mxu0 }
 0x69c   :  { %v2951_v27 = vpop.f32.mrf.mxu1  ;;  %v3057_v33 = vadd.f32 %v9299_v32, %v9275_v7 }
 0x69d   :  { %v3048_v25 = vpop.f32.mrf.mxu0 }
 0x69e   :  { %v9280_v8 = vpop.f32.mrf.mxu1  ;;  %v3049_v46 = vadd.f32 %v3048_v25, %v2935_v22 }
 0x69f   :  { %v9300_v26 = vpop.f32.mrf.mxu0 }
 0x6a0   :  { %v2954_v21 = vpop.f32.mrf.mxu1  ;;  %v3060_v41 = vadd.f32 %v9300_v26, %v9276_v23  ;;  %v10221_v26 = vld [vmem:[#allocation9 + $0x170] sm:$0xff]  }
 0x6a1   :  { %v3051_v28 = vpop.f32.mrf.mxu0  ;;  %9355 = vmatprep.subr.bf16.mxu1 %v10221_v26 }
 0x6a2   :  { %v3052_v47 = vadd.f32 %v3051_v28, %v2938_v5  ;;  %9356 = vmatpush3.bf16.msra.mxu1 %v10221_v26  ;;  %v10223_v28 = vld [vmem:[#allocation9 + $0x168] sm:$0xff]  }
 0x6a3   :  { %v9303_v31 = vpop.f32.mrf.mxu0  ;;  %9357 = vmatprep.subr.bf16.mxu1 %v10223_v28 }
 0x6a4   :  { %v3073_v49 = vadd.f32 %v9303_v31, %v9279_v34  ;;  %v10227_v31 = vld [vmem:[#allocation9 + $0x158] sm:$0xff]  }
 0x6a5   :  { %v3064_v35 = vpop.f32.mrf.mxu0 }
 0x6a6   :  { %v3065_v9 = vadd.f32 %v3064_v35, %v2951_v27  ;;  %v10222_v27 = vld [vmem:[#allocation9 + $0x130] sm:$0xff]   ;;  %9358 = vmatpush3.bf16.msra.mxu1 %v10223_v28  ;;  %v10233_v35 = vld [vmem:[#allocation9 + $0x140] sm:$0xff]   ;;  %v10240_v28 = vld [vmem:[#allocation9 + $0x1e8] sm:$0xff]  }
 0x6a7   :  { %v9304_v10 = vpop.f32.mrf.mxu0 }
 0x6a8   :  { %v3076_v12 = vadd.f32 %v9304_v10, %v9280_v8  ;;  %v10224_v8 = vld [vmem:[#allocation9 + $0x128] sm:$0xff]  }
 0x6a9   :  { %v3067_v13 = vpop.f32.mrf.mxu0 }
 0x6aa   :  { %v3068_v6 = vadd.f32 %v3067_v13, %v2954_v21  ;;  %v10228_v21 = vld [vmem:[#allocation9 + $0x118] sm:$0xff]  }
 0x6b2   :  { %v9323_v29 = vpop.f32.mrf.mxu1 }
 0x6b3   :  { %v3223_v38 = vadd.f32 %v9323_v29, %v3057_v33  ;;  %v10229_v33 = vld [vmem:[#allocation9 + $0x150] sm:$0xff]  }
 0x6b4   :  { %v3190_v39 = vpop.f32.mrf.mxu1  ;;  %v10230_v29 = vld [vmem:[#allocation9 + $0x110] sm:$0xff]  }
 0x6b5   :  { %v3239_v42 = vadd.f32 %v7997_v36, %v3223_v38  ;;  %v3221_v61 = vadd.f32 %v3190_v39, %v3049_v46  ;;  %v10232_v46 = vld [vmem:[#allocation9 + $0x108] sm:$0xff]   ;;  %v10234_v38 = vld [vmem:[#allocation9 + $0x100] sm:$0xff]   ;;  %v10938_v39 = vld [vmem:[#allocation9 + $0x1b8] sm:$0xff]  }
 0x6b6   :  { %v9324_v43 = vpop.f32.mrf.mxu1 }
 0x6b7   :  { %v3247_v44 = vmax.f32 %v3239_v42, 0.0  ;;  %v3237_v45 = vadd.f32 %v7997_v36, %v3221_v61  ;;  %v3224_v55 = vadd.f32 %v9324_v43, %v3060_v41  ;;  %v10940_v41 = vld [vmem:[#allocation9 + $0x1f8] sm:$0xff]   ;;  %v7998_v42 = vld [vmem:[#allocation12 + $0x7] ss:$0 sm:$0xff] }
 0x6b8   :  { %v3193_v48 = vpop.f32.mrf.mxu1 }
 0x6b9   :  { %3255 = vst [vmem:[#allocation3 + $0x10] sm:$0xff] %v3247_v44  ;;  %v3245_v37 = vmax.f32 %v3237_v45, 0.0  ;;  %v3240_v52 = vadd.f32 %v7997_v36, %v3224_v55  ;;  %v3222_v11 = vadd.f32 %v3193_v48, %v3052_v47 }
 0x6ba   :  { %v9327_v53 = vpop.f32.mrf.mxu1 }
 0x6bb   :  { %3253 = vst [vmem:[#allocation3] sm:$0xff] %v3245_v37  ;;  %v3248_v56 = vmax.f32 %v3240_v52, 0.0  ;;  %v3238_v57 = vadd.f32 %v7997_v36, %v3222_v11  ;;  %v3227_v59 = vadd.f32 %v9327_v53, %v3073_v49 }
 0x6bc   :  { %v3206_v60 = vpop.f32.mrf.mxu1  ;;  %3443 = vst [vmem:[#allocation3] sm:$0x1] %v10855_v63 }
 0x6bd   :  { %3256 = vst [vmem:[#allocation3 + $0x18] sm:$0xff] %v3248_v56  ;;  %v3246_v0 = vmax.f32 %v3238_v57, 0.0  ;;  %v3243_v62 = vadd.f32 %v7997_v36, %v3227_v59  ;;  %v3225_v3 = vadd.f32 %v3206_v60, %v3065_v9  ;;  %v3270_v58 = vpack.c.bf16 %v3248_v56, %v3247_v44 }
 0x6be   :  { %v9328_v15 = vpop.f32.mrf.mxu1 }
 0x6bf   :  { %3254 = vst [vmem:[#allocation3 + $0x8] sm:$0xff] %v3246_v0  ;;  %v3251_v14 = vmax.f32 %v3243_v62, 0.0  ;;  %v3241_v54 = vadd.f32 %v7997_v36, %v3225_v3  ;;  %v3228_v51 = vadd.f32 %v9328_v15, %v3076_v12  ;;  %v3269_v16 = vpack.c.bf16 %v3246_v0, %v3245_v37  ;;  %v10952_v62 = vld [vmem:[#allocation3 + $0x29] sm:$0xff] }
 0x6c0   :  { %v3209_v17 = vpop.f32.mrf.mxu1 }
 0x6c1   :  { %3259 = vst [vmem:[#allocation3 + $0x68] sm:$0xff] %v3251_v14  ;;  %v3249_v4 = vmax.f32 %v3241_v54, 0.0  ;;  %v3244_v7 = vadd.f32 %v7997_v36, %v3228_v51  ;;  %v3226_v22 = vadd.f32 %v3209_v17, %v3068_v6  ;;  %9345 = vmatprep.mubr.bf16.mxu0 %v3269_v16 }
 0x6c2   :  { %9346 = vmatmul.mubr.bf16.vlgmr.msra.gmra.mxu0 %v3270_v58 }
 0x6c3   :  { %3257 = vst [vmem:[#allocation3 + $0x58] sm:$0xff] %v3249_v4  ;;  %v3252_v23 = vmax.f32 %v3244_v7, 0.0  ;;  %v3242_v32 = vadd.f32 %v7997_v36, %v3226_v22  ;;  %9374 = vmatpush3.bf16.msra.mxu0 %v10932_v18  ;;  %v10226_v18 = vld [vmem:[#allocation9 + $0x120] sm:$0xff]   ;;  %v10231_v36 = vld [vmem:[#allocation9 + $0x148] sm:$0xff]  }
 0x6c4   :  { %3444 = vst [vmem:[#allocation3 + $0x58] sm:$0x1] %v10855_v63  ;;  %9375 = vmatprep.subr.bf16.mxu0 %v10222_v27  ;;  %v10225_v63 = vld [vmem:[#allocation9 + $0x160] sm:$0xff]  }
 0x6c5   :  { %3260 = vst [vmem:[#allocation3 + $0x70] sm:$0xff] %v3252_v23  ;;  %v3250_v5 = vmax.f32 %v3242_v32, 0.0  ;;  %v3272_v34 = vpack.c.bf16 %v3252_v23, %v3251_v14  ;;  %9359 = vmatprep.subr.bf16.mxu1 %v10225_v63 }
 0x6c6   :  { %9360 = vmatpush3.bf16.msra.mxu1 %v10225_v63  ;;  %v10242_v63 = vld [vmem:[#allocation9 + $0x1e0] sm:$0xff]  }
 0x6c7   :  { %3258 = vst [vmem:[#allocation3 + $0x60] sm:$0xff] %v3250_v5  ;;  %v3271_v25 = vpack.c.bf16 %v3250_v5, %v3249_v4  ;;  %9376 = vmatpush3.bf16.msra.mxu0 %v10222_v27  ;;  %9361 = vmatprep.subr.bf16.mxu1 %v10227_v31  ;;  %v10237_v5 = vld [vmem:[#allocation9 + $0x1b0] sm:$0xff]   ;;  %v10239_v27 = vld [vmem:[#allocation9 + $0x1a8] sm:$0xff]  }
 0x6c8   :  { %9377 = vmatprep.subr.bf16.mxu0 %v10224_v8 }
 0x6c9   :  { %9349 = vmatprep.mubr.bf16.mxu0 %v3271_v25  ;;  %v10238_v25 = vld [vmem:[#allocation9 + $0x1f0] sm:$0xff]  }
 0x6ca   :  { %9350 = vmatmul.mubr.bf16.gmra.mxu0 %v3272_v34  ;;  %9362 = vmatpush3.bf16.msra.mxu1 %v10227_v31  ;;  %v10244_v31 = vld [vmem:[#allocation9 + $0x1d8] sm:$0xff]  }
 0x6cb   :  { %9378 = vmatpush3.bf16.msra.mxu0 %v10224_v8  ;;  %9363 = vmatprep.subr.bf16.mxu1 %v10229_v33  ;;  %v10241_v8 = vld [vmem:[#allocation9 + $0x1a0] sm:$0xff]  }
 0x6cc   :  { %9379 = vmatprep.subr.bf16.mxu0 %v10226_v18 }
 0x6ce   :  { %9364 = vmatpush3.bf16.msra.mxu1 %v10229_v33  ;;  %v10246_v33 = vld [vmem:[#allocation9 + $0x1d0] sm:$0xff]  }
 0x6cf   :  { %9380 = vmatpush3.bf16.msra.mxu0 %v10226_v18  ;;  %9365 = vmatprep.subr.bf16.mxu1 %v10231_v36  ;;  %v10243_v18 = vld [vmem:[#allocation9 + $0x198] sm:$0xff]  }
 0x6d0   :  { %9381 = vmatprep.subr.bf16.mxu0 %v10228_v21 }
 0x6d2   :  { %9366 = vmatpush3.bf16.msra.mxu1 %v10231_v36  ;;  %v10248_v36 = vld [vmem:[#allocation9 + $0x1c8] sm:$0xff]  }
 0x6d3   :  { %9382 = vmatpush3.bf16.msra.mxu0 %v10228_v21  ;;  %9367 = vmatprep.subr.bf16.mxu1 %v10233_v35  ;;  %v10245_v21 = vld [vmem:[#allocation9 + $0x190] sm:$0xff]  }
 0x6d4   :  { %9383 = vmatprep.subr.bf16.mxu0 %v10230_v29 }
 0x6d6   :  { %9368 = vmatpush3.bf16.msra.mxu1 %v10233_v35  ;;  %v10250_v35 = vld [vmem:[#allocation9 + $0x1c0] sm:$0xff]  }
 0x6d7   :  { %9384 = vmatpush3.bf16.msra.mxu0 %v10230_v29  ;;  %9393 = vmatprep.subr.bf16.mxu1 %v10938_v39  ;;  %v10247_v29 = vld [vmem:[#allocation9 + $0x188] sm:$0xff]  }
 0x6d8   :  { %9385 = vmatprep.subr.bf16.mxu0 %v10232_v46 }
 0x6db   :  { %9386 = vmatpush3.bf16.msra.mxu0 %v10232_v46  ;;  %v10249_v46 = vld [vmem:[#allocation9 + $0x180] sm:$0xff]  }
 0x6dc   :  { %9387 = vmatprep.subr.bf16.mxu0 %v10234_v38 }
 0x6df   :  { %9388 = vmatpush3.bf16.msra.mxu0 %v10234_v38 }
 0x6e0   :  { %9413 = vmatprep.subr.bf16.mxu0 %v10940_v41 }
 0x782   :  { %v9347_v61 = vpop.f32.mrf.mxu0 }
 0x783   :  { %v3389_v43 = vadd.f32 %v9347_v61, %v7998_v42  ;;  %v10252_v61 = vld [vmem:[#allocation7 + $0x378] sm:$0xff]  }
 0x784   :  { %v3380_v47 = vpop.f32.mrf.mxu0 }
 0x785   :  { %v3421_v10 = vadd.f32 %v3389_v43, %v10899_v1  ;;  %v3381_v44 = vadd.f32 %v7998_v42, %v3380_v47  ;;  %v10253_v43 = vld [vmem:[#allocation7 + $0x330] sm:$0xff]  }
 0x786   :  { %v9348_v45 = vpop.f32.mrf.mxu0  ;;  %v10254_v47 = vld [vmem:[#allocation7 + $0x370] sm:$0xff]  }
 0x787   :  { %3449 = vst [vmem:[#allocation3 + $0x11] sm:$0xff] %v3421_v10  ;;  %v3419_v55 = vadd.f32 %v3381_v44, %v10903_v50  ;;  %v3392_v48 = vadd.f32 %v9348_v45, %v7998_v42  ;;  %v10255_v10 = vld [vmem:[#allocation7 + $0x328] sm:$0xff]   ;;  %v10258_v45 = vld [vmem:[#allocation7 + $0x360] sm:$0xff]  }
 0x788   :  { %v3383_v49 = vpop.f32.mrf.mxu0  ;;  %v10256_v44 = vld [vmem:[#allocation7 + $0x368] sm:$0xff]  }
 0x789   :  { %3447 = vst [vmem:[#allocation3 + $0x1] sm:$0xff] %v3419_v55  ;;  %v3422_v37 = vadd.f32 %v3392_v48, %v10907_v2  ;;  %v3384_v52 = vadd.f32 %v7998_v42, %v3383_v49  ;;  %v10260_v55 = vld [vmem:[#allocation7 + $0x358] sm:$0xff]   ;;  %v10257_v48 = vld [vmem:[#allocation7 + $0x320] sm:$0xff]   ;;  %v10262_v49 = vld [vmem:[#allocation7 + $0x350] sm:$0xff]  }
 0x78a   :  { %v9351_v11 = vpop.f32.mrf.mxu0 }
 0x78b   :  { %3450 = vst [vmem:[#allocation3 + $0x19] sm:$0xff] %v3422_v37  ;;  %v3420_v53 = vadd.f32 %v3384_v52, %v10911_v19  ;;  %v3405_v9 = vadd.f32 %v9351_v11, %v7998_v42  ;;  %v10259_v37 = vld [vmem:[#allocation7 + $0x318] sm:$0xff]   ;;  %v10264_v52 = vld [vmem:[#allocation7 + $0x348] sm:$0xff]   ;;  %v10261_v11 = vld [vmem:[#allocation7 + $0x310] sm:$0xff]  }
 0x78c   :  { %v3396_v13 = vpop.f32.mrf.mxu0 }
 0x78d   :  { %3448 = vst [vmem:[#allocation3 + $0x9] sm:$0xff] %v3420_v53  ;;  %v3425_v1 = vadd.f32 %v3405_v9, %v10915_v20  ;;  %v3397_v56 = vadd.f32 %v7998_v42, %v3396_v13  ;;  %v10266_v53 = vld [vmem:[#allocation7 + $0x340] sm:$0xff]   ;;  %v10263_v9 = vld [vmem:[#allocation7 + $0x308] sm:$0xff]  }
 0x78e   :  { %v9352_v57 = vpop.f32.mrf.mxu0  ;;  %v10265_v13 = vld [vmem:[#allocation7 + $0x300] sm:$0xff]  }
 0x78f   :  { %3453 = vst [vmem:[#allocation3 + $0x69] sm:$0xff] %v3425_v1  ;;  %v3423_v50 = vadd.f32 %v3397_v56, %v10919_v24  ;;  %v3408_v59 = vadd.f32 %v9352_v57, %v7998_v42  ;;  %v10267_v1 = vld [vmem:[#allocation7 + $0x3b8] sm:$0xff]  }
 0x790   :  { %v3399_v60 = vpop.f32.mrf.mxu0 }
 0x791   :  { %3451 = vst [vmem:[#allocation3 + $0x59] sm:$0xff] %v3423_v50  ;;  %v3426_v2 = vadd.f32 %v3408_v59, %v10923_v30  ;;  %v3400_v12 = vadd.f32 %v7998_v42, %v3399_v60  ;;  %v10251_v42 = vld [vmem:[#allocation7 + $0x338] sm:$0xff]  }
 0x792   :  { %v3820_v0 = vld [vmem:[#allocation3 + $0x13] ss:$2 sm:$0xff]  ;;  %v3696_v54 = vld [vmem:[#allocation3 + $0x12] ss:$2 sm:$0xff] }
 0x793   :  { %3454 = vst [vmem:[#allocation3 + $0x71] sm:$0xff] %v3426_v2  ;;  %v3424_v19 = vadd.f32 %v3400_v12, %v10927_v40  ;;  %3972 = vst [vmem:[#allocation3 + $0x21] sm:$0x1] %v10952_v62  ;;  %v3479_v3 = vld [vmem:[#allocation3 + $0x11] ss:$2 sm:$0xff] }
 0x794   :  { %v3478_v20 = vld [vmem:[#allocation3 + $0x1] ss:$2 sm:$0xff]  ;;  %v3455_v6 = vld [vmem:[#allocation3] ss:$2 sm:$0xff]  ;;  %v3456_v24 = vld [vmem:[#allocation3 + $0x10] ss:$2 sm:$0xff] }
 0x795   :  { %3452 = vst [vmem:[#allocation3 + $0x61] sm:$0xff] %v3424_v19  ;;  %v3482_v15 = vpack.c.bf16 %v3479_v3, %v3478_v20  ;;  %v3695_v14 = vld [vmem:[#allocation3 + $0x2] ss:$2 sm:$0xff]  ;;  %v3459_v51 = vpack.c.bf16 %v3456_v24, %v3455_v6  ;;  %3971 = vst [vmem:[#allocation3 + $0x19] sm:$0xff] %v10952_v62  ;;  %v3819_v40 = vld [vmem:[#allocation3 + $0x3] ss:$2 sm:$0xff] }
 0x796   :  { %3968 = vst [vmem:[#allocation3 + $0x8] sm:$0x1] %v10952_v62  ;;  %v3699_v34 = vpack.c.bf16 %v3696_v54, %v3695_v14  ;;  %v3823_v26 = vpack.c.bf16 %v3820_v0, %v3819_v40  ;;  %v8039_v24 = vld [vmem:[#allocation12 + $0x8] ss:$0 sm:$0xff] }
 0x797   :  { %9369 = vmatprep.mubr.bf16.mxu1 %v3482_v15  ;;  %9389 = vmatprep.mubr.bf16.mxu0 %v3459_v51 }
 0x79a   :  { %v10957_v30 = vld [vmem:[#allocation3 + $0x6b] ss:$2 sm:$0xff]  ;;  %v10959_v17 = vld [vmem:[#allocation3 + $0x6a] ss:$2 sm:$0xff] }
 0x79b   :  { %v3481_v16 = vld [vmem:[#allocation3 + $0x69] ss:$2 sm:$0xff]  ;;  %3974 = vst [vmem:[#allocation3 + $0x79] sm:$0x1] %v10952_v62 }
 0x79c   :  { %v3480_v58 = vld [vmem:[#allocation3 + $0x59] ss:$2 sm:$0xff]  ;;  %v3457_v4 = vld [vmem:[#allocation3 + $0x58] ss:$2 sm:$0xff]  ;;  %v3458_v7 = vld [vmem:[#allocation3 + $0x68] ss:$2 sm:$0xff] }
 0x79d   :  { %v3483_v22 = vpack.c.bf16 %v3481_v16, %v3480_v58  ;;  %v3460_v23 = vpack.c.bf16 %v3458_v7, %v3457_v4  ;;  %v3697_v32 = vld [vmem:[#allocation3 + $0x5a] ss:$2 sm:$0xff]  ;;  %3973 = vst [vmem:[#allocation3 + $0x71] sm:$0xff] %v10952_v62  ;;  %v3821_v38 = vld [vmem:[#allocation3 + $0x5b] ss:$2 sm:$0xff] }
 0x79e   :  { %3970 = vst [vmem:[#allocation3 + $0x60] sm:$0x1] %v10952_v62 }
 0x79f   :  { %9370 = vmatmul.mubr.bf16.vlgmr.msra.gmra.mxu1 %v3483_v22  ;;  %9390 = vmatmul.mubr.bf16.vlgmr.msra.gmra.mxu0 %v3460_v23 }
 0x7a0   :  { %9394 = vmatpush3.bf16.msra.mxu1 %v10938_v39  ;;  %9414 = vmatpush3.bf16.msra.mxu0 %v10940_v41  ;;  %v3700_v39 = vpack.c.bf16 %v10959_v17, %v3697_v32  ;;  %v3824_v41 = vpack.c.bf16 %v10957_v30, %v3821_v38 }
 0x7a1   :  { %9409 = vmatprep.mubr.bf16.mxu1 %v3699_v34  ;;  %9429 = vmatprep.mubr.bf16.mxu0 %v3823_v26 }
 0x7a2   :  { %9395 = vmatprep.subr.bf16.mxu1 %v10237_v5  ;;  %9415 = vmatprep.subr.bf16.mxu0 %v10238_v25 }
 0x7a4   :  { %9396 = vmatpush3.bf16.msra.mxu1 %v10237_v5  ;;  %9416 = vmatpush3.bf16.msra.mxu0 %v10238_v25 }
 0x7a5   :  { %9397 = vmatprep.subr.bf16.mxu1 %v10239_v27  ;;  %9417 = vmatprep.subr.bf16.mxu0 %v10240_v28 }
 0x7a8   :  { %9398 = vmatpush3.bf16.msra.mxu1 %v10239_v27  ;;  %9418 = vmatpush3.bf16.msra.mxu0 %v10240_v28 }
 0x7a9   :  { %9399 = vmatprep.subr.bf16.mxu1 %v10241_v8  ;;  %9419 = vmatprep.subr.bf16.mxu0 %v10242_v63 }
 0x7ac   :  { %9400 = vmatpush3.bf16.msra.mxu1 %v10241_v8  ;;  %9420 = vmatpush3.bf16.msra.mxu0 %v10242_v63 }
 0x7ad   :  { %9401 = vmatprep.subr.bf16.mxu1 %v10243_v18  ;;  %9421 = vmatprep.subr.bf16.mxu0 %v10244_v31 }
 0x7b0   :  { %9402 = vmatpush3.bf16.msra.mxu1 %v10243_v18  ;;  %9422 = vmatpush3.bf16.msra.mxu0 %v10244_v31 }
 0x7b1   :  { %9403 = vmatprep.subr.bf16.mxu1 %v10245_v21  ;;  %9423 = vmatprep.subr.bf16.mxu0 %v10246_v33 }
 0x7b4   :  { %9404 = vmatpush3.bf16.msra.mxu1 %v10245_v21  ;;  %9424 = vmatpush3.bf16.msra.mxu0 %v10246_v33 }
 0x7b5   :  { %9405 = vmatprep.subr.bf16.mxu1 %v10247_v29  ;;  %9425 = vmatprep.subr.bf16.mxu0 %v10248_v36 }
 0x7b8   :  { %9406 = vmatpush3.bf16.msra.mxu1 %v10247_v29  ;;  %9426 = vmatpush3.bf16.msra.mxu0 %v10248_v36  ;;  %v10268_v29 = vld [vmem:[#allocation7 + $0x3b0] sm:$0xff]  }
 0x7b9   :  { %9407 = vmatprep.subr.bf16.mxu1 %v10249_v46  ;;  %9427 = vmatprep.subr.bf16.mxu0 %v10250_v35 }
 0x7bc   :  { %9408 = vmatpush3.bf16.msra.mxu1 %v10249_v46  ;;  %9428 = vmatpush3.bf16.msra.mxu0 %v10250_v35 }
 0x7bd   :  { %9453 = vmatprep.subr.bf16.mxu0 %v10251_v42  ;;  %9433 = vmatprep.subr.bf16.mxu1 %v10252_v61 }
 0x7bf   :  { %9410 = vmatmul.mubr.bf16.vlgmr.msra.gmra.mxu1 %v3700_v39  ;;  %9430 = vmatmul.mubr.bf16.vlgmr.msra.gmra.mxu0 %v3824_v41  ;;  %v4220_v39 = vld [vmem:[#allocation3 + $0x1a] sm:$0xff] }
 0x7c0   :  { %9454 = vmatpush3.bf16.msra.mxu0 %v10251_v42  ;;  %9434 = vmatpush3.bf16.msra.mxu1 %v10252_v61  ;;  %v10269_v41 = vld [vmem:[#allocation7 + $0x3a8] sm:$0xff]  }
 0x7c1   :  { %9455 = vmatprep.subr.bf16.mxu0 %v10253_v43  ;;  %9435 = vmatprep.subr.bf16.mxu1 %v10254_v47 }
 0x7c4   :  { %9456 = vmatpush3.bf16.msra.mxu0 %v10253_v43  ;;  %9436 = vmatpush3.bf16.msra.mxu1 %v10254_v47  ;;  %v10270_v47 = vld [vmem:[#allocation7 + $0x3a0] sm:$0xff]  }
 0x7c5   :  { %9457 = vmatprep.subr.bf16.mxu0 %v10255_v10  ;;  %9437 = vmatprep.subr.bf16.mxu1 %v10256_v44 }
 0x7c8   :  { %9458 = vmatpush3.bf16.msra.mxu0 %v10255_v10  ;;  %9438 = vmatpush3.bf16.msra.mxu1 %v10256_v44  ;;  %v10271_v10 = vld [vmem:[#allocation7 + $0x398] sm:$0xff]   ;;  %v10272_v44 = vld [vmem:[#allocation7 + $0x390] sm:$0xff]  }
 0x7c9   :  { %9439 = vmatprep.subr.bf16.mxu1 %v10258_v45  ;;  %9459 = vmatprep.subr.bf16.mxu0 %v10257_v48 }
 0x7cc   :  { %9440 = vmatpush3.bf16.msra.mxu1 %v10258_v45  ;;  %9460 = vmatpush3.bf16.msra.mxu0 %v10257_v48  ;;  %v10273_v45 = vld [vmem:[#allocation7 + $0x388] sm:$0xff]  }
 0x7cd   :  { %9441 = vmatprep.subr.bf16.mxu1 %v10260_v55  ;;  %9461 = vmatprep.subr.bf16.mxu0 %v10259_v37  ;;  %v4222_v48 = vld [vmem:[#allocation3 + $0x72] sm:$0xff] }
 0x7d0   :  { %9442 = vmatpush3.bf16.msra.mxu1 %v10260_v55  ;;  %9462 = vmatpush3.bf16.msra.mxu0 %v10259_v37  ;;  %v10274_v55 = vld [vmem:[#allocation7 + $0x380] sm:$0xff]   ;;  %v10275_v37 = vld [vmem:[#allocation10 + $0xf8] sm:$0xff]  }
 0x7d1   :  { %9443 = vmatprep.subr.bf16.mxu1 %v10262_v49  ;;  %9463 = vmatprep.subr.bf16.mxu0 %v10261_v11 }
 0x7d4   :  { %9444 = vmatpush3.bf16.msra.mxu1 %v10262_v49  ;;  %9464 = vmatpush3.bf16.msra.mxu0 %v10261_v11  ;;  %v10277_v11 = vld [vmem:[#allocation10 + $0xe8] sm:$0xff]  }
 0x7d5   :  { %9445 = vmatprep.subr.bf16.mxu1 %v10264_v52  ;;  %9465 = vmatprep.subr.bf16.mxu0 %v10263_v9 }
 0x7d8   :  { %9446 = vmatpush3.bf16.msra.mxu1 %v10264_v52  ;;  %9466 = vmatpush3.bf16.msra.mxu0 %v10263_v9  ;;  %v10276_v52 = vld [vmem:[#allocation10 + $0xf0] sm:$0xff]   ;;  %v10279_v9 = vld [vmem:[#allocation10 + $0xd8] sm:$0xff]  }
 0x7d9   :  { %9447 = vmatprep.subr.bf16.mxu1 %v10266_v53  ;;  %9467 = vmatprep.subr.bf16.mxu0 %v10265_v13 }
 0x7dc   :  { %9448 = vmatpush3.bf16.msra.mxu1 %v10266_v53  ;;  %9468 = vmatpush3.bf16.msra.mxu0 %v10265_v13  ;;  %v10278_v53 = vld [vmem:[#allocation10 + $0xe0] sm:$0xff]   ;;  %v10280_v13 = vld [vmem:[#allocation10 + $0xd0] sm:$0xff]  }
 0x7dd   :  { %9473 = vmatprep.subr.bf16.mxu1 %v10267_v1  ;;  %9493 = vmatprep.subr.bf16.mxu0 %v10275_v37 }
 0x85f   :  { %v9371_v56 = vpop.f32.mrf.mxu1  ;;  %v9391_v57 = vpop.f32.mrf.mxu0 }
 0x860   :  { %v3689_v19 = vadd.f32 %v9391_v57, %v9371_v56  ;;  %v10282_v56 = vld [vmem:[#allocation10 + $0xc0] sm:$0xff]   ;;  %v10283_v57 = vld [vmem:[#allocation7 + $0x438] sm:$0xff]  }
 0x861   :  { %v3583_v50 = vpop.f32.mrf.mxu1  ;;  %v3680_v59 = vpop.f32.mrf.mxu0 }
 0x862   :  { %v3681_v6 = vadd.f32 %v3680_v59, %v3583_v50  ;;  %v10284_v50 = vld [vmem:[#allocation7 + $0x3f8] sm:$0xff]   ;;  %v10285_v59 = vld [vmem:[#allocation7 + $0x430] sm:$0xff]  }
 0x863   :  { %v9372_v60 = vpop.f32.mrf.mxu1  ;;  %v9392_v2 = vpop.f32.mrf.mxu0 }
 0x864   :  { %v3692_v51 = vadd.f32 %v9392_v2, %v9372_v60  ;;  %v10287_v60 = vld [vmem:[#allocation7 + $0x428] sm:$0xff]  }
 0x865   :  { %v3586_v12 = vpop.f32.mrf.mxu1  ;;  %v3683_v0 = vpop.f32.mrf.mxu0 }
 0x866   :  { %v3684_v58 = vadd.f32 %v3683_v0, %v3586_v12 }
 0x87f   :  { %v9411_v20 = vpop.f32.mrf.mxu1  ;;  %v9431_v3 = vpop.f32.mrf.mxu0 }
 0x880   :  { %v3817_v15 = vadd.f32 %v9411_v20, %v3689_v19 }
 0x881   :  { %v3800_v14 = vpop.f32.mrf.mxu1  ;;  %v3924_v54 = vpop.f32.mrf.mxu0 }
 0x882   :  { %v3941_v30 = vadd.f32 %v9431_v3, %v3817_v15  ;;  %v3815_v40 = vadd.f32 %v3800_v14, %v3681_v6  ;;  %v8064_v14 = vld [vmem:[#allocation12 + $0x9] ss:$0 sm:$0xff] }
 0x883   :  { %v9412_v16 = vpop.f32.mrf.mxu1  ;;  %v9432_v17 = vpop.f32.mrf.mxu0 }
 0x884   :  { %v10968_v4 = vadd.f32 %v8039_v24, %v3941_v30  ;;  %v3939_v7 = vadd.f32 %v3924_v54, %v3815_v40  ;;  %v3818_v22 = vadd.f32 %v9412_v16, %v3692_v51 }
 0x885   :  { %v3803_v23 = vpop.f32.mrf.mxu1  ;;  %v3927_v26 = vpop.f32.mrf.mxu0 }
 0x886   :  { %v3965_v32 = vmax.f32 %v10968_v4, 0.0  ;;  %v10971_v5 = vadd.f32 %v8039_v24, %v3939_v7  ;;  %v3942_v25 = vadd.f32 %v9432_v17, %v3818_v22  ;;  %v3816_v34 = vadd.f32 %v3803_v23, %v3684_v58 }
 0x888   :  { %3977 = vst [vmem:[#allocation3 + $0x61] sm:$0xff] %v3965_v32  ;;  %v3963_v27 = vmax.f32 %v10971_v5, 0.0  ;;  %v10974_v28 = vadd.f32 %v8039_v24, %v3942_v25  ;;  %v3940_v8 = vadd.f32 %v3927_v26, %v3816_v34 }
 0x88a   :  { %3975 = vst [vmem:[#allocation3 + $0x9] sm:$0xff] %v3963_v27  ;;  %v3966_v63 = vmax.f32 %v10974_v28, 0.0  ;;  %v10977_v18 = vadd.f32 %v8039_v24, %v3940_v8 }
 0x88c   :  { %3978 = vst [vmem:[#allocation3 + $0x69] sm:$0xff] %v3966_v63  ;;  %v3964_v31 = vmax.f32 %v10977_v18, 0.0  ;;  %v4007_v33 = vpack.c.bf16 %v3966_v63, %v3965_v32 }
 0x88e   :  { %3976 = vst [vmem:[#allocation3 + $0x11] sm:$0xff] %v3964_v31  ;;  %v4006_v21 = vpack.c.bf16 %v3964_v31, %v3963_v27 }
 0x88f   :  { %v3982_v36 = vld [vmem:[#allocation3 + $0x60] sm:$0xff] }
 0x890   :  { %9449 = vmatprep.mubr.bf16.mxu1 %v4006_v21  ;;  %v3984_v38 = vpack.c.bf16 %v3982_v36, %v10952_v62  ;;  %v10286_v36 = vld [vmem:[#allocation7 + $0x3f0] sm:$0xff]  }
 0x891   :  { %v3980_v46 = vld [vmem:[#allocation3 + $0x8] sm:$0xff]  ;;  %9450 = vmatmul.mubr.bf16.vlgmr.msra.gmra.mxu1 %v4007_v33 }
 0x892   :  { %v3983_v35 = vpack.c.bf16 %v3980_v46, %v10952_v62  ;;  %9474 = vmatpush3.bf16.msra.mxu1 %v10267_v1  ;;  %v10281_v1 = vld [vmem:[#allocation10 + $0xc8] sm:$0xff]   ;;  %v10289_v46 = vld [vmem:[#allocation7 + $0x420] sm:$0xff]  }
 0x893   :  { %9475 = vmatprep.subr.bf16.mxu1 %v10268_v29  ;;  %v4221_v42 = vld [vmem:[#allocation3 + $0x6a] sm:$0xff] }
 0x894   :  { %9469 = vmatprep.mubr.bf16.mxu0 %v3983_v35  ;;  %6058 = vst [vmem:[#allocation3 + $0x71] sm:$0x1] %v10952_v62  ;;  %4514 = vst [vmem:[#allocation3 + $0x6b] sm:$0x7] %v10952_v62  ;;  %v4224_v49 = vpack.c.bf16 %v4222_v48, %v4221_v42  ;;  %v10291_v35 = vld [vmem:[#allocation7 + $0x418] sm:$0xff]   ;;  %v10295_v42 = vld [vmem:[#allocation7 + $0x408] sm:$0xff]  }
 0x895   :  { %9470 = vmatmul.mubr.bf16.vlgmr.msra.gmra.mxu0 %v3984_v38  ;;  %v4219_v61 = vld [vmem:[#allocation3 + $0x12] sm:$0xff] }
 0x896   :  { %v4223_v43 = vpack.c.bf16 %v4220_v39, %v4219_v61  ;;  %6056 = vst [vmem:[#allocation3 + $0x19] sm:$0x1] %v10952_v62  ;;  %4513 = vst [vmem:[#allocation3 + $0x13] sm:$0x7] %v10952_v62  ;;  %9476 = vmatpush3.bf16.msra.mxu1 %v10268_v29  ;;  %9494 = vmatpush3.bf16.msra.mxu0 %v10275_v37  ;;  %v10288_v38 = vld [vmem:[#allocation7 + $0x3e8] sm:$0xff]   ;;  %v10293_v39 = vld [vmem:[#allocation7 + $0x410] sm:$0xff]  }
 0x897   :  { %9477 = vmatprep.subr.bf16.mxu1 %v10269_v41  ;;  %9495 = vmatprep.subr.bf16.mxu0 %v10276_v52  ;;  %v10292_v61 = vld [vmem:[#allocation7 + $0x3d8] sm:$0xff]  }
 0x898   :  { %9489 = vmatprep.mubr.bf16.mxu1 %v4223_v43  ;;  %v10297_v43 = vld [vmem:[#allocation7 + $0x400] sm:$0xff]  }
 0x89a   :  { %9478 = vmatpush3.bf16.msra.mxu1 %v10269_v41  ;;  %9496 = vmatpush3.bf16.msra.mxu0 %v10276_v52  ;;  %v10290_v41 = vld [vmem:[#allocation7 + $0x3e0] sm:$0xff]  }
 0x89b   :  { %9479 = vmatprep.subr.bf16.mxu1 %v10270_v47  ;;  %9497 = vmatprep.subr.bf16.mxu0 %v10277_v11 }
 0x89e   :  { %9480 = vmatpush3.bf16.msra.mxu1 %v10270_v47  ;;  %9498 = vmatpush3.bf16.msra.mxu0 %v10277_v11  ;;  %v10294_v47 = vld [vmem:[#allocation7 + $0x3d0] sm:$0xff]  }
 0x89f   :  { %9481 = vmatprep.subr.bf16.mxu1 %v10271_v10  ;;  %9499 = vmatprep.subr.bf16.mxu0 %v10278_v53 }
 0x8a2   :  { %9482 = vmatpush3.bf16.msra.mxu1 %v10271_v10  ;;  %9500 = vmatpush3.bf16.msra.mxu0 %v10278_v53  ;;  %v10296_v10 = vld [vmem:[#allocation7 + $0x3c8] sm:$0xff]  }
 0x8a3   :  { %9483 = vmatprep.subr.bf16.mxu1 %v10272_v44  ;;  %9501 = vmatprep.subr.bf16.mxu0 %v10279_v9 }
 0x8a6   :  { %9484 = vmatpush3.bf16.msra.mxu1 %v10272_v44  ;;  %9502 = vmatpush3.bf16.msra.mxu0 %v10279_v9  ;;  %v10299_v44 = vld [vmem:[#allocation7 + $0x478] sm:$0xff]  }
 0x8a7   :  { %9485 = vmatprep.subr.bf16.mxu1 %v10273_v45  ;;  %9503 = vmatprep.subr.bf16.mxu0 %v10280_v13 }
 0x8aa   :  { %9486 = vmatpush3.bf16.msra.mxu1 %v10273_v45  ;;  %9504 = vmatpush3.bf16.msra.mxu0 %v10280_v13  ;;  %v10298_v45 = vld [vmem:[#allocation7 + $0x3c0] sm:$0xff]  }
 0x8ab   :  { %9487 = vmatprep.subr.bf16.mxu1 %v10274_v55  ;;  %9505 = vmatprep.subr.bf16.mxu0 %v10281_v1 }
 0x8ae   :  { %9488 = vmatpush3.bf16.msra.mxu1 %v10274_v55  ;;  %9506 = vmatpush3.bf16.msra.mxu0 %v10281_v1  ;;  %v8065_v55 = vld [vmem:[#allocation12 + $0xa] ss:$0 sm:$0xff] }
 0x8af   :  { %9507 = vmatprep.subr.bf16.mxu0 %v10282_v56  ;;  %9513 = vmatprep.subr.bf16.mxu1 %v10283_v57 }
 0x8b1   :  { %9490 = vmatmul.mubr.bf16.vlgmr.msra.gmra.mxu1 %v4224_v49 }
 0x8b2   :  { %9508 = vmatpush3.bf16.msra.mxu0 %v10282_v56  ;;  %9514 = vmatpush3.bf16.msra.mxu1 %v10283_v57 }
 0x8b3   :  { %9533 = vmatprep.subr.bf16.mxu0 %v10284_v50  ;;  %9515 = vmatprep.subr.bf16.mxu1 %v10285_v59 }
 0x8b6   :  { %9516 = vmatpush3.bf16.msra.mxu1 %v10285_v59 }
 0x8b7   :  { %9517 = vmatprep.subr.bf16.mxu1 %v10287_v60 }
 0x8ba   :  { %9518 = vmatpush3.bf16.msra.mxu1 %v10287_v60 }
 0x8bb   :  { %9519 = vmatprep.subr.bf16.mxu1 %v10289_v46 }
 0x8be   :  { %9520 = vmatpush3.bf16.msra.mxu1 %v10289_v46 }
 0x8bf   :  { %9521 = vmatprep.subr.bf16.mxu1 %v10291_v35 }
 0x8c2   :  { %9522 = vmatpush3.bf16.msra.mxu1 %v10291_v35 }
 0x8c3   :  { %9523 = vmatprep.subr.bf16.mxu1 %v10293_v39 }
 0x8c6   :  { %9524 = vmatpush3.bf16.msra.mxu1 %v10293_v39 }
 0x8c7   :  { %9525 = vmatprep.subr.bf16.mxu1 %v10295_v42 }
 0x8ca   :  { %9526 = vmatpush3.bf16.msra.mxu1 %v10295_v42 }
 0x8cb   :  { %9527 = vmatprep.subr.bf16.mxu1 %v10297_v43 }
 0x8ce   :  { %9528 = vmatpush3.bf16.msra.mxu1 %v10297_v43 }
 0x8cf   :  { %9553 = vmatprep.subr.bf16.mxu1 %v10299_v44 }
 0x951   :  { %v9451_v2 = vpop.f32.mrf.mxu1 }
 0x953   :  { %v4107_v0 = vpop.f32.mrf.mxu1 }
 0x955   :  { %v9471_v12 = vpop.f32.mrf.mxu0  ;;  %v9452_v20 = vpop.f32.mrf.mxu1 }
 0x956   :  { %v4213_v15 = vadd.f32 %v9471_v12, %v9451_v2 }
 0x957   :  { %v4204_v19 = vpop.f32.mrf.mxu0  ;;  %v4110_v6 = vpop.f32.mrf.mxu1 }
 0x958   :  { %v4205_v54 = vadd.f32 %v4204_v19, %v4107_v0  ;;  %v10300_v0 = vld [vmem:[#allocation7 + $0x470] sm:$0xff]  }
 0x959   :  { %v9472_v3 = vpop.f32.mrf.mxu0 }
 0x95a   :  { %v4216_v16 = vadd.f32 %v9472_v3, %v9452_v20 }
 0x95b   :  { %v4207_v30 = vpop.f32.mrf.mxu0 }
 0x95c   :  { %v4208_v22 = vadd.f32 %v4207_v30, %v4110_v6  ;;  %v10302_v30 = vld [vmem:[#allocation7 + $0x460] sm:$0xff]  }
 0x971   :  { %v9491_v24 = vpop.f32.mrf.mxu1 }
 0x972   :  { %v4341_v51 = vadd.f32 %v9491_v24, %v4213_v15 }
 0x973   :  { %v4324_v40 = vpop.f32.mrf.mxu1 }
 0x974   :  { %v4353_v17 = vadd.f32 %v8064_v14, %v4341_v51  ;;  %v4339_v58 = vadd.f32 %v4324_v40, %v4205_v54  ;;  %v10303_v40 = vld [vmem:[#allocation7 + $0x458] sm:$0xff]  }
 0x975   :  { %v9492_v7 = vpop.f32.mrf.mxu1 }
 0x976   :  { %v4357_v23 = vmax.f32 %v4353_v17, 0.0  ;;  %v4351_v32 = vadd.f32 %v8064_v14, %v4339_v58  ;;  %v4342_v25 = vadd.f32 %v9492_v7, %v4216_v16  ;;  %v10304_v16 = vld [vmem:[#allocation7 + $0x450] sm:$0xff]   ;;  %v10305_v17 = vld [vmem:[#allocation7 + $0x448] sm:$0xff]   ;;  %v10306_v58 = vld [vmem:[#allocation7 + $0x440] sm:$0xff]  }
 0x977   :  { %v4327_v34 = vpop.f32.mrf.mxu1 }
 0x978   :  { %4361 = vst [vmem:[#allocation3 + $0x58] sm:$0xff] %v4357_v23  ;;  %v4355_v26 = vmax.f32 %v4351_v32, 0.0  ;;  %v4354_v27 = vadd.f32 %v8064_v14, %v4342_v25  ;;  %v4340_v8 = vadd.f32 %v4327_v34, %v4208_v22  ;;  %v10308_v32 = vld [vmem:[#allocation10 + $0x130] sm:$0xff]   ;;  %v10309_v25 = vld [vmem:[#allocation10 + $0x128] sm:$0xff]   ;;  %v10310_v34 = vld [vmem:[#allocation10 + $0x120] sm:$0xff]  }
 0x979   :  { %4512 = vst [vmem:[#allocation3 + $0x58] sm:$0x7] %v10952_v62 }
 0x97a   :  { %4359 = vst [vmem:[#allocation3] sm:$0xff] %v4355_v26  ;;  %v4358_v63 = vmax.f32 %v4354_v27, 0.0  ;;  %v4352_v31 = vadd.f32 %v8064_v14, %v4340_v8  ;;  %v10312_v27 = vld [vmem:[#allocation10 + $0x110] sm:$0xff]   ;;  %v10313_v8 = vld [vmem:[#allocation10 + $0x108] sm:$0xff]  }
 0x97b   :  { %4511 = vst [vmem:[#allocation3] sm:$0x7] %v10952_v62 }
 0x97c   :  { %4362 = vst [vmem:[#allocation3 + $0x60] sm:$0xff] %v4358_v63  ;;  %v4356_v21 = vmax.f32 %v4352_v31, 0.0  ;;  %v4368_v29 = vpack.c.bf16 %v4358_v63, %v4357_v23  ;;  %v10307_v23 = vld [vmem:[#allocation10 + $0x138] sm:$0xff]   ;;  %v10314_v63 = vld [vmem:[#allocation10 + $0x100] sm:$0xff]  }
 0x97d   :  { %v10315_v31 = vld [vmem:[#allocation7 + $0x4f8] sm:$0xff]  }
 0x97e   :  { %4360 = vst [vmem:[#allocation3 + $0x8] sm:$0xff] %v4356_v21  ;;  %v4367_v33 = vpack.c.bf16 %v4356_v21, %v4355_v26  ;;  %v10311_v26 = vld [vmem:[#allocation10 + $0x118] sm:$0xff]  }
 0x97f   :  { %v10316_v21 = vld [vmem:[#allocation7 + $0x4b8] sm:$0xff]  }
 0x980   :  { %9509 = vmatprep.mubr.bf16.mxu0 %v4367_v33  ;;  %v10317_v33 = vld [vmem:[#allocation7 + $0x4f0] sm:$0xff]  }
 0x981   :  { %9510 = vmatmul.mubr.bf16.vlgmr.msra.gmra.mxu0 %v4368_v29  ;;  %v10319_v29 = vld [vmem:[#allocation7 + $0x4e8] sm:$0xff]  }
 0x982   :  { %9534 = vmatpush3.bf16.msra.mxu0 %v10284_v50 }
 0x983   :  { %9535 = vmatprep.subr.bf16.mxu0 %v10286_v36 }
 0x986   :  { %9536 = vmatpush3.bf16.msra.mxu0 %v10286_v36 }
 0x987   :  { %9537 = vmatprep.subr.bf16.mxu0 %v10288_v38 }
 0x98a   :  { %9538 = vmatpush3.bf16.msra.mxu0 %v10288_v38 }
 0x98b   :  { %9539 = vmatprep.subr.bf16.mxu0 %v10290_v41 }
 0x98e   :  { %9540 = vmatpush3.bf16.msra.mxu0 %v10290_v41 }
 0x98f   :  { %9541 = vmatprep.subr.bf16.mxu0 %v10292_v61 }
 0x992   :  { %9542 = vmatpush3.bf16.msra.mxu0 %v10292_v61 }
 0x993   :  { %9543 = vmatprep.subr.bf16.mxu0 %v10294_v47 }
 0x996   :  { %9544 = vmatpush3.bf16.msra.mxu0 %v10294_v47  ;;  %v8098_v47 = vld [vmem:[#allocation12 + $0xb] ss:$0 sm:$0xff] }
 0x997   :  { %9545 = vmatprep.subr.bf16.mxu0 %v10296_v10 }
 0x99a   :  { %9546 = vmatpush3.bf16.msra.mxu0 %v10296_v10 }
 0x99b   :  { %9547 = vmatprep.subr.bf16.mxu0 %v10298_v45 }
 0x99e   :  { %9548 = vmatpush3.bf16.msra.mxu0 %v10298_v45 }
 0x99f   :  { %9573 = vmatprep.subr.bf16.mxu0 %v10307_v23 }
 0xa41   :  { %v9511_v48 = vpop.f32.mrf.mxu0 }
 0xa42   :  { %v4485_v49 = vadd.f32 %v9511_v48, %v8065_v55 }
 0xa43   :  { %v4476_v37 = vpop.f32.mrf.mxu0 }
 0xa44   :  { %v10989_v52 = vadd.f32 %v4485_v49, %v10968_v4  ;;  %v4477_v11 = vadd.f32 %v8065_v55, %v4476_v37 }
 0xa45   :  { %v9512_v53 = vpop.f32.mrf.mxu0 }
 0xa46   :  { %v4509_v9 = vmax.f32 %v10989_v52, 0.0  ;;  %v10993_v13 = vadd.f32 %v4477_v11, %v10971_v5  ;;  %v4488_v1 = vadd.f32 %v9512_v53, %v8065_v55 }
 0xa47   :  { %v4479_v56 = vpop.f32.mrf.mxu0 }
 0xa48   :  { %4517 = vst [vmem:[#allocation3 + $0x5b] sm:$0xff] %v4509_v9  ;;  %v4507_v57 = vmax.f32 %v10993_v13, 0.0  ;;  %v10997_v50 = vadd.f32 %v4488_v1, %v10974_v28  ;;  %v4480_v59 = vadd.f32 %v8065_v55, %v4479_v56  ;;  %v10301_v28 = vld [vmem:[#allocation7 + $0x468] sm:$0xff]  }
 0xa4a   :  { %4515 = vst [vmem:[#allocation3 + $0x3] sm:$0xff] %v4507_v57  ;;  %v4510_v4 = vmax.f32 %v10997_v50, 0.0  ;;  %v11001_v60 = vadd.f32 %v4480_v59, %v10977_v18 }
 0xa4c   :  { %4518 = vst [vmem:[#allocation3 + $0x63] sm:$0xff] %v4510_v4  ;;  %v4508_v2 = vmax.f32 %v11001_v60, 0.0  ;;  %v4547_v12 = vpack.c.bf16 %v4510_v4, %v4509_v9 }
 0xa4e   :  { %4516 = vst [vmem:[#allocation3 + $0xb] sm:$0xff] %v4508_v2  ;;  %v4546_v5 = vpack.c.bf16 %v4508_v2, %v4507_v57 }
 0xa4f   :  { %v4521_v14 = vld [vmem:[#allocation3 + $0x58] sm:$0xff] }
 0xa50   :  { %9529 = vmatprep.mubr.bf16.mxu1 %v4546_v5 }
 0xa51   :  { %9530 = vmatmul.mubr.bf16.vlgmr.msra.gmra.mxu1 %v4547_v12  ;;  %v4519_v20 = vld [vmem:[#allocation3] sm:$0xff] }
 0xa52   :  { %9554 = vmatpush3.bf16.msra.mxu1 %v10299_v44 }
 0xa53   :  { %9555 = vmatprep.subr.bf16.mxu1 %v10300_v0  ;;  %v4762_v19 = vld [vmem:[#allocation3 + $0x66] sm:$0xff]  ;;  %v4761_v7 = vld [vmem:[#allocation3 + $0x5e] sm:$0xff] }
 0xa54   :  { %v4522_v3 = vld [vmem:[#allocation3 + $0x60] sm:$0xff]  ;;  %5054 = vst [vmem:[#allocation3 + $0x69] sm:$0x1] %v10952_v62  ;;  %v4764_v22 = vpack.c.bf16 %v4762_v19, %v4761_v7 }
 0xa55   :  { %v4520_v6 = vld [vmem:[#allocation3 + $0x8] sm:$0xff]  ;;  %v4524_v51 = vpack.c.bf16 %v4522_v3, %v4521_v14  ;;  %v10321_v3 = vld [vmem:[#allocation7 + $0x4e0] sm:$0xff]  }
 0xa56   :  { %v4759_v18 = vld [vmem:[#allocation3 + $0x6] sm:$0xff]  ;;  %v4760_v15 = vld [vmem:[#allocation3 + $0xe] sm:$0xff]  ;;  %v4523_v24 = vpack.c.bf16 %v4520_v6, %v4519_v20  ;;  %9556 = vmatpush3.bf16.msra.mxu1 %v10300_v0 }
 0xa57   :  { %v4763_v54 = vpack.c.bf16 %v4760_v15, %v4759_v18  ;;  %5053 = vst [vmem:[#allocation3 + $0x11] sm:$0x1] %v10952_v62  ;;  %9557 = vmatprep.subr.bf16.mxu1 %v10301_v28  ;;  %v10318_v20 = vld [vmem:[#allocation7 + $0x4b0] sm:$0xff]   ;;  %v10323_v6 = vld [vmem:[#allocation7 + $0x4d8] sm:$0xff]   ;;  %v10320_v18 = vld [vmem:[#allocation7 + $0x4a8] sm:$0xff]  }
 0xa58   :  { %9549 = vmatprep.mubr.bf16.mxu0 %v4523_v24  ;;  %v10322_v15 = vld [vmem:[#allocation7 + $0x4a0] sm:$0xff]   ;;  %v10327_v24 = vld [vmem:[#allocation7 + $0x4c8] sm:$0xff]   ;;  %v10324_v14 = vld [vmem:[#allocation7 + $0x498] sm:$0xff]  }
 0xa59   :  { %9569 = vmatprep.mubr.bf16.mxu1 %v4763_v54  ;;  %9550 = vmatmul.mubr.bf16.vlgmr.msra.gmra.mxu0 %v4524_v51  ;;  %v10329_v54 = vld [vmem:[#allocation7 + $0x4c0] sm:$0xff]   ;;  %v10326_v51 = vld [vmem:[#allocation7 + $0x490] sm:$0xff]  }
 0xa5a   :  { %9558 = vmatpush3.bf16.msra.mxu1 %v10301_v28  ;;  %9574 = vmatpush3.bf16.msra.mxu0 %v10307_v23 }
 0xa5b   :  { %9559 = vmatprep.subr.bf16.mxu1 %v10302_v30  ;;  %9575 = vmatprep.subr.bf16.mxu0 %v10308_v32 }
 0xa5e   :  { %9560 = vmatpush3.bf16.msra.mxu1 %v10302_v30  ;;  %9576 = vmatpush3.bf16.msra.mxu0 %v10308_v32  ;;  %v10328_v30 = vld [vmem:[#allocation7 + $0x488] sm:$0xff]  }
 0xa5f   :  { %9561 = vmatprep.subr.bf16.mxu1 %v10303_v40  ;;  %9577 = vmatprep.subr.bf16.mxu0 %v10309_v25 }
 0xa62   :  { %9562 = vmatpush3.bf16.msra.mxu1 %v10303_v40  ;;  %9578 = vmatpush3.bf16.msra.mxu0 %v10309_v25  ;;  %v10331_v40 = vld [vmem:[#allocation7 + $0x538] sm:$0xff]  }
 0xa63   :  { %9563 = vmatprep.subr.bf16.mxu1 %v10304_v16  ;;  %9579 = vmatprep.subr.bf16.mxu0 %v10310_v34 }
 0xa66   :  { %9564 = vmatpush3.bf16.msra.mxu1 %v10304_v16  ;;  %9580 = vmatpush3.bf16.msra.mxu0 %v10310_v34  ;;  %v10330_v16 = vld [vmem:[#allocation7 + $0x480] sm:$0xff]  }
 0xa67   :  { %9565 = vmatprep.subr.bf16.mxu1 %v10305_v17  ;;  %9581 = vmatprep.subr.bf16.mxu0 %v10311_v26 }
 0xa6a   :  { %9566 = vmatpush3.bf16.msra.mxu1 %v10305_v17  ;;  %9582 = vmatpush3.bf16.msra.mxu0 %v10311_v26  ;;  %v8099_v17 = vld [vmem:[#allocation12 + $0xc] ss:$0 sm:$0xff] }
 0xa6b   :  { %9567 = vmatprep.subr.bf16.mxu1 %v10306_v58  ;;  %9583 = vmatprep.subr.bf16.mxu0 %v10312_v27 }
 0xa6e   :  { %9568 = vmatpush3.bf16.msra.mxu1 %v10306_v58  ;;  %9584 = vmatpush3.bf16.msra.mxu0 %v10312_v27 }
 0xa6f   :  { %9585 = vmatprep.subr.bf16.mxu0 %v10313_v8  ;;  %9593 = vmatprep.subr.bf16.mxu1 %v10315_v31 }
 0xa71   :  { %9570 = vmatmul.mubr.bf16.vlgmr.msra.gmra.mxu1 %v4764_v22 }
 0xa72   :  { %9586 = vmatpush3.bf16.msra.mxu0 %v10313_v8  ;;  %9594 = vmatpush3.bf16.msra.mxu1 %v10315_v31 }
 0xa73   :  { %9587 = vmatprep.subr.bf16.mxu0 %v10314_v63  ;;  %9595 = vmatprep.subr.bf16.mxu1 %v10317_v33 }
 0xa76   :  { %9588 = vmatpush3.bf16.msra.mxu0 %v10314_v63  ;;  %9596 = vmatpush3.bf16.msra.mxu1 %v10317_v33 }
 0xa77   :  { %9613 = vmatprep.subr.bf16.mxu0 %v10316_v21  ;;  %9597 = vmatprep.subr.bf16.mxu1 %v10319_v29 }
 0xa7a   :  { %9598 = vmatpush3.bf16.msra.mxu1 %v10319_v29 }
 0xa7b   :  { %9599 = vmatprep.subr.bf16.mxu1 %v10321_v3 }
 0xa7e   :  { %9600 = vmatpush3.bf16.msra.mxu1 %v10321_v3 }
 0xa7f   :  { %9601 = vmatprep.subr.bf16.mxu1 %v10323_v6 }
 0xa82   :  { %9602 = vmatpush3.bf16.msra.mxu1 %v10323_v6 }
 0xb11   :  { %v9531_v36 = vpop.f32.mrf.mxu1 }
 0xb13   :  { %v4647_v35 = vpop.f32.mrf.mxu1 }
 0xb15   :  { %v9532_v39 = vpop.f32.mrf.mxu1 }
 0xb17   :  { %v4650_v42 = vpop.f32.mrf.mxu1 }
 0xb19   :  { %v9551_v46 = vpop.f32.mrf.mxu0 }
 0xb1a   :  { %v4753_v61 = vadd.f32 %v9551_v46, %v9531_v36  ;;  %v10332_v46 = vld [vmem:[#allocation7 + $0x530] sm:$0xff]  }
 0xb1b   :  { %v4744_v38 = vpop.f32.mrf.mxu0 }
 0xb1c   :  { %v4745_v10 = vadd.f32 %v4744_v38, %v4647_v35 }
 0xb1d   :  { %v9552_v41 = vpop.f32.mrf.mxu0 }
 0xb1e   :  { %v4756_v48 = vadd.f32 %v9552_v41, %v9532_v39  ;;  %v11024_v41 = vld [vmem:[#allocation3 + $0x29] sm:$0xff] }
 0xb1f   :  { %v4747_v45 = vpop.f32.mrf.mxu0 }
 0xb20   :  { %v4748_v53 = vadd.f32 %v4747_v45, %v4650_v42  ;;  %v10334_v45 = vld [vmem:[#allocation7 + $0x520] sm:$0xff]  }
 0xb31   :  { %v9571_v43 = vpop.f32.mrf.mxu1 }
 0xb32   :  { %v4881_v44 = vadd.f32 %v9571_v43, %v4753_v61 }
 0xb33   :  { %v4864_v55 = vpop.f32.mrf.mxu1 }
 0xb34   :  { %v4893_v49 = vadd.f32 %v8098_v47, %v4881_v44  ;;  %v4879_v37 = vadd.f32 %v4864_v55, %v4745_v10  ;;  %v10335_v55 = vld [vmem:[#allocation7 + $0x518] sm:$0xff]  }
 0xb35   :  { %v9572_v11 = vpop.f32.mrf.mxu1 }
 0xb36   :  { %v4897_v9 = vmax.f32 %v4893_v49, 0.0  ;;  %v4891_v1 = vadd.f32 %v8098_v47, %v4879_v37  ;;  %v4882_v56 = vadd.f32 %v9572_v11, %v4756_v48  ;;  %v10336_v48 = vld [vmem:[#allocation7 + $0x510] sm:$0xff]   ;;  %v10337_v49 = vld [vmem:[#allocation7 + $0x508] sm:$0xff]   ;;  %v10338_v37 = vld [vmem:[#allocation7 + $0x500] sm:$0xff]  }
 0xb37   :  { %v4867_v57 = vpop.f32.mrf.mxu1 }
 0xb38   :  { %4901 = vst [vmem:[#allocation3 + $0x58] sm:$0xff] %v4897_v9  ;;  %v4895_v59 = vmax.f32 %v4891_v1, 0.0  ;;  %v4894_v4 = vadd.f32 %v8098_v47, %v4882_v56  ;;  %v4880_v2 = vadd.f32 %v4867_v57, %v4748_v53  ;;  %v10340_v1 = vld [vmem:[#allocation10 + $0x170] sm:$0xff]   ;;  %v10341_v56 = vld [vmem:[#allocation10 + $0x168] sm:$0xff]   ;;  %v10342_v57 = vld [vmem:[#allocation10 + $0x160] sm:$0xff]  }
 0xb39   :  { %5052 = vst [vmem:[#allocation3 + $0x58] sm:$0x1] %v10952_v62 }
 0xb3a   :  { %4899 = vst [vmem:[#allocation3] sm:$0xff] %v4895_v59  ;;  %v4898_v5 = vmax.f32 %v4894_v4, 0.0  ;;  %v4892_v12 = vadd.f32 %v8098_v47, %v4880_v2  ;;  %v10344_v4 = vld [vmem:[#allocation10 + $0x150] sm:$0xff]   ;;  %v10345_v2 = vld [vmem:[#allocation10 + $0x148] sm:$0xff]  }
 0xb3b   :  { %5051 = vst [vmem:[#allocation3] sm:$0x1] %v10952_v62  ;;  %v10325_v62 = vld [vmem:[#allocation7 + $0x4d0] sm:$0xff]  }
 0xb3c   :  { %4902 = vst [vmem:[#allocation3 + $0x60] sm:$0xff] %v4898_v5  ;;  %v4896_v0 = vmax.f32 %v4892_v12, 0.0  ;;  %v4908_v19 = vpack.c.bf16 %v4898_v5, %v4897_v9  ;;  %9603 = vmatprep.subr.bf16.mxu1 %v10325_v62  ;;  %v10339_v9 = vld [vmem:[#allocation10 + $0x178] sm:$0xff]   ;;  %v10346_v5 = vld [vmem:[#allocation10 + $0x140] sm:$0xff]  }
 0xb3d   :  { %9604 = vmatpush3.bf16.msra.mxu1 %v10325_v62  ;;  %v10347_v12 = vld [vmem:[#allocation9 + $0x278] sm:$0xff]  }
 0xb3e   :  { %4900 = vst [vmem:[#allocation3 + $0x8] sm:$0xff] %v4896_v0  ;;  %v4907_v28 = vpack.c.bf16 %v4896_v0, %v4895_v59  ;;  %9605 = vmatprep.subr.bf16.mxu1 %v10327_v24  ;;  %v10343_v59 = vld [vmem:[#allocation10 + $0x158] sm:$0xff]   ;;  %v10349_v0 = vld [vmem:[#allocation9 + $0x270] sm:$0xff]  }
 0xb40   :  { %9589 = vmatprep.mubr.bf16.mxu0 %v4907_v28  ;;  %v10351_v28 = vld [vmem:[#allocation9 + $0x268] sm:$0xff]  }
 0xb41   :  { %9590 = vmatmul.mubr.bf16.vlgmr.msra.gmra.mxu0 %v4908_v19  ;;  %9606 = vmatpush3.bf16.msra.mxu1 %v10327_v24 }
 0xb42   :  { %9614 = vmatpush3.bf16.msra.mxu0 %v10316_v21  ;;  %9607 = vmatprep.subr.bf16.mxu1 %v10329_v54 }
 0xb43   :  { %9615 = vmatprep.subr.bf16.mxu0 %v10318_v20 }
 0xb45   :  { %9608 = vmatpush3.bf16.msra.mxu1 %v10329_v54  ;;  %v8132_v54 = vld [vmem:[#allocation12 + $0xd] ss:$0 sm:$0xff] }
 0xb46   :  { %9616 = vmatpush3.bf16.msra.mxu0 %v10318_v20  ;;  %9633 = vmatprep.subr.bf16.mxu1 %v10331_v40 }
 0xb47   :  { %9617 = vmatprep.subr.bf16.mxu0 %v10320_v18 }
 0xb4a   :  { %9618 = vmatpush3.bf16.msra.mxu0 %v10320_v18 }
 0xb4b   :  { %9619 = vmatprep.subr.bf16.mxu0 %v10322_v15 }
 0xb4e   :  { %9620 = vmatpush3.bf16.msra.mxu0 %v10322_v15 }
 0xb4f   :  { %9621 = vmatprep.subr.bf16.mxu0 %v10324_v14 }
 0xb52   :  { %9622 = vmatpush3.bf16.msra.mxu0 %v10324_v14 }
 0xb53   :  { %9623 = vmatprep.subr.bf16.mxu0 %v10326_v51 }
 0xb56   :  { %9624 = vmatpush3.bf16.msra.mxu0 %v10326_v51 }
 0xb57   :  { %9625 = vmatprep.subr.bf16.mxu0 %v10328_v30 }
 0xb5a   :  { %9626 = vmatpush3.bf16.msra.mxu0 %v10328_v30 }
 0xb5b   :  { %9627 = vmatprep.subr.bf16.mxu0 %v10330_v16 }
 0xb5e   :  { %9628 = vmatpush3.bf16.msra.mxu0 %v10330_v16 }
 0xb5f   :  { %9653 = vmatprep.subr.bf16.mxu0 %v10339_v9 }
 0xc01   :  { %v9591_v58 = vpop.f32.mrf.mxu0 }
 0xc02   :  { %v5025_v7 = vadd.f32 %v9591_v58, %v8099_v17 }
 0xc03   :  { %v5016_v22 = vpop.f32.mrf.mxu0 }
 0xc04   :  { %v11009_v23 = vadd.f32 %v5025_v7, %v10989_v52  ;;  %v5017_v32 = vadd.f32 %v8099_v17, %v5016_v22 }
 0xc05   :  { %v9592_v25 = vpop.f32.mrf.mxu0 }
 0xc06   :  { %v5049_v34 = vmax.f32 %v11009_v23, 0.0  ;;  %v11013_v26 = vadd.f32 %v5017_v32, %v10993_v13  ;;  %v5028_v27 = vadd.f32 %v9592_v25, %v8099_v17 }
 0xc07   :  { %v5019_v8 = vpop.f32.mrf.mxu0 }
 0xc08   :  { %5057 = vst [vmem:[#allocation3 + $0x59] sm:$0xff] %v5049_v34  ;;  %v5047_v63 = vmax.f32 %v11013_v26, 0.0  ;;  %v11017_v31 = vadd.f32 %v5028_v27, %v10997_v50  ;;  %v5020_v21 = vadd.f32 %v8099_v17, %v5019_v8  ;;  %v10333_v50 = vld [vmem:[#allocation7 + $0x528] sm:$0xff]  }
 0xc0a   :  { %5055 = vst [vmem:[#allocation3 + $0x1] sm:$0xff] %v5047_v63  ;;  %v5050_v52 = vmax.f32 %v11017_v31, 0.0  ;;  %v11021_v33 = vadd.f32 %v5020_v21, %v11001_v60 }
 0xc0c   :  { %5058 = vst [vmem:[#allocation3 + $0x61] sm:$0xff] %v5050_v52  ;;  %v5048_v29 = vmax.f32 %v11021_v33, 0.0  ;;  %v5087_v36 = vpack.c.bf16 %v5050_v52, %v5049_v34 }
 0xc0e   :  { %5056 = vst [vmem:[#allocation3 + $0x9] sm:$0xff] %v5048_v29  ;;  %v5086_v13 = vpack.c.bf16 %v5048_v29, %v5047_v63 }
 0xc0f   :  { %v5061_v47 = vld [vmem:[#allocation3 + $0x58] sm:$0xff] }
 0xc10   :  { %9609 = vmatprep.mubr.bf16.mxu1 %v5086_v13 }
 0xc11   :  { %9610 = vmatmul.mubr.bf16.vlgmr.msra.gmra.mxu1 %v5087_v36  ;;  %v5059_v38 = vld [vmem:[#allocation3] sm:$0xff] }
 0xc12   :  { %9634 = vmatpush3.bf16.msra.mxu1 %v10331_v40 }
 0xc13   :  { %9635 = vmatprep.subr.bf16.mxu1 %v10332_v46  ;;  %v5302_v35 = vld [vmem:[#allocation3 + $0x62] sm:$0xff]  ;;  %v5301_v11 = vld [vmem:[#allocation3 + $0x5a] sm:$0xff] }
 0xc14   :  { %v5062_v39 = vld [vmem:[#allocation3 + $0x60] sm:$0xff]  ;;  %5590 = vst [vmem:[#allocation3 + $0x69] sm:$0x1] %v11024_v41  ;;  %v5304_v53 = vpack.c.bf16 %v5302_v35, %v5301_v11 }
 0xc15   :  { %v5299_v60 = vld [vmem:[#allocation3 + $0x2] sm:$0xff]  ;;  %v5300_v61 = vld [vmem:[#allocation3 + $0xa] sm:$0xff]  ;;  %v5064_v44 = vpack.c.bf16 %v5062_v39, %v5061_v47  ;;  %v10352_v39 = vld [vmem:[#allocation9 + $0x228] sm:$0xff]  }
 0xc16   :  { %v5060_v42 = vld [vmem:[#allocation3 + $0x8] sm:$0xff]  ;;  %v5303_v10 = vpack.c.bf16 %v5300_v61, %v5299_v60  ;;  %5589 = vst [vmem:[#allocation3 + $0x11] sm:$0x1] %v11024_v41  ;;  %9636 = vmatpush3.bf16.msra.mxu1 %v10332_v46  ;;  %v10353_v60 = vld [vmem:[#allocation9 + $0x260] sm:$0xff]   ;;  %v10357_v47 = vld [vmem:[#allocation9 + $0x250] sm:$0xff]  }
 0xc17   :  { %v5063_v43 = vpack.c.bf16 %v5060_v42, %v5059_v38  ;;  %9637 = vmatprep.subr.bf16.mxu1 %v10333_v50  ;;  %v10350_v38 = vld [vmem:[#allocation9 + $0x230] sm:$0xff]   ;;  %v10354_v42 = vld [vmem:[#allocation9 + $0x220] sm:$0xff]   ;;  %v10355_v61 = vld [vmem:[#allocation9 + $0x258] sm:$0xff]  }
 0xc18   :  { %9649 = vmatprep.mubr.bf16.mxu1 %v5303_v10  ;;  %v10358_v10 = vld [vmem:[#allocation9 + $0x210] sm:$0xff]  }
 0xc19   :  { %9629 = vmatprep.mubr.bf16.mxu0 %v5063_v43  ;;  %v10356_v43 = vld [vmem:[#allocation9 + $0x218] sm:$0xff]  }
 0xc1a   :  { %9630 = vmatmul.mubr.bf16.vlgmr.msra.gmra.mxu0 %v5064_v44  ;;  %9638 = vmatpush3.bf16.msra.mxu1 %v10333_v50  ;;  %v10348_v50 = vld [vmem:[#allocation9 + $0x238] sm:$0xff]   ;;  %v10359_v44 = vld [vmem:[#allocation9 + $0x248] sm:$0xff]  }
 0xc1b   :  { %9639 = vmatprep.subr.bf16.mxu1 %v10334_v45  ;;  %9654 = vmatpush3.bf16.msra.mxu0 %v10339_v9 }
 0xc1c   :  { %9655 = vmatprep.subr.bf16.mxu0 %v10340_v1 }
 0xc1e   :  { %9640 = vmatpush3.bf16.msra.mxu1 %v10334_v45  ;;  %v10360_v45 = vld [vmem:[#allocation9 + $0x208] sm:$0xff]  }
 0xc1f   :  { %9641 = vmatprep.subr.bf16.mxu1 %v10335_v55  ;;  %9656 = vmatpush3.bf16.msra.mxu0 %v10340_v1 }
 0xc20   :  { %9657 = vmatprep.subr.bf16.mxu0 %v10341_v56 }
 0xc22   :  { %9642 = vmatpush3.bf16.msra.mxu1 %v10335_v55  ;;  %v10361_v55 = vld [vmem:[#allocation9 + $0x240] sm:$0xff]  }
 0xc23   :  { %9643 = vmatprep.subr.bf16.mxu1 %v10336_v48  ;;  %9658 = vmatpush3.bf16.msra.mxu0 %v10341_v56 }
 0xc24   :  { %9659 = vmatprep.subr.bf16.mxu0 %v10342_v57 }
 0xc26   :  { %9644 = vmatpush3.bf16.msra.mxu1 %v10336_v48  ;;  %v10362_v48 = vld [vmem:[#allocation9 + $0x200] sm:$0xff]  }
 0xc27   :  { %9645 = vmatprep.subr.bf16.mxu1 %v10337_v49  ;;  %9660 = vmatpush3.bf16.msra.mxu0 %v10342_v57 }
 0xc28   :  { %9661 = vmatprep.subr.bf16.mxu0 %v10343_v59 }
 0xc2a   :  { %9646 = vmatpush3.bf16.msra.mxu1 %v10337_v49  ;;  %v8133_v49 = vld [vmem:[#allocation12 + $0xe] ss:$0 sm:$0xff] }
 0xc2b   :  { %9647 = vmatprep.subr.bf16.mxu1 %v10338_v37  ;;  %9662 = vmatpush3.bf16.msra.mxu0 %v10343_v59 }
 0xc2c   :  { %9663 = vmatprep.subr.bf16.mxu0 %v10344_v4 }
 0xc2e   :  { %9648 = vmatpush3.bf16.msra.mxu1 %v10338_v37 }
 0xc2f   :  { %9673 = vmatprep.subr.bf16.mxu1 %v11024_v41  ;;  %9664 = vmatpush3.bf16.msra.mxu0 %v10344_v4 }
 0xc30   :  { %9665 = vmatprep.subr.bf16.mxu0 %v10345_v2 }
 0xc31   :  { %9650 = vmatmul.mubr.bf16.vlgmr.msra.gmra.mxu1 %v5304_v53 }
 0xc32   :  { %9674 = vmatpush3.bf16.msra.mxu1 %v10347_v12  ;;  %9689 = vmatprep.mubr.msk.bf16.mxu1 %vm10643_vm0, %v11024_v41 }
 0xc33   :  { %9666 = vmatpush3.bf16.msra.mxu0 %v10345_v2  ;;  %9675 = vmatprep.subr.bf16.mxu1 %v11024_v41 }
 0xc34   :  { %9667 = vmatprep.subr.bf16.mxu0 %v10346_v5 }
 0xc36   :  { %9676 = vmatpush3.bf16.msra.mxu1 %v10349_v0 }
 0xc37   :  { %9668 = vmatpush3.bf16.msra.mxu0 %v10346_v5  ;;  %9677 = vmatprep.subr.bf16.mxu1 %v11024_v41 }
 0xc38   :  { %9693 = vmatprep.subr.bf16.mxu0 %v11024_v41 }
 0xc3a   :  { %9678 = vmatpush3.bf16.msra.mxu1 %v10351_v28  ;;  %v10363_v28 = vld [vmem:[#allocation9 + $0x2b8] sm:$0xff]  }
 0xc3b   :  { %9679 = vmatprep.subr.bf16.mxu1 %v11024_v41 }
 0xc3e   :  { %9680 = vmatpush3.bf16.msra.mxu1 %v10353_v60  ;;  %v10391_v60 = vld [vmem:[#allocation7 + $0x588] sm:$0xff]  }
 0xc3f   :  { %9681 = vmatprep.subr.bf16.mxu1 %v11024_v41 }
 0xc42   :  { %9682 = vmatpush3.bf16.msra.mxu1 %v10355_v61  ;;  %v10393_v61 = vld [vmem:[#allocation7 + $0x580] sm:$0xff]  }
 0xc43   :  { %9683 = vmatprep.subr.bf16.mxu1 %v11024_v41 }
 0xc46   :  { %9684 = vmatpush3.bf16.msra.mxu1 %v10357_v47  ;;  %v6063_v47 = vpack.c.bf16 %v11024_v41, %v11024_v41 }
 0xc47   :  { %9685 = vmatprep.subr.bf16.mxu1 %v11024_v41 }
 0xc4a   :  { %9686 = vmatpush3.bf16.msra.mxu1 %v10359_v44 }
 0xc4b   :  { %9687 = vmatprep.subr.bf16.mxu1 %v11024_v41 }
 0xc4e   :  { %9688 = vmatpush3.bf16.msra.mxu1 %v10361_v55 }
 0xc4f   :  { %9713 = vmatprep.subr.bf16.mxu1 %v11024_v41 }
 0xcd1   :  { %v9611_v19 = vpop.f32.mrf.mxu1 }
 0xcd3   :  { %v5187_v3 = vpop.f32.mrf.mxu1 }
 0xcd5   :  { %v9612_v18 = vpop.f32.mrf.mxu1 }
 0xcd7   :  { %v5190_v15 = vpop.f32.mrf.mxu1 }
 0xcda   :  { %v9631_v20 = vpop.f32.mrf.mxu0 }
 0xcdb   :  { %v5293_v24 = vadd.f32 %v9631_v20, %v9611_v19  ;;  %v10364_v20 = vld [vmem:[#allocation9 + $0x2f8] sm:$0xff]  }
 0xcdc   :  { %v5284_v6 = vpop.f32.mrf.mxu0 }
 0xcdd   :  { %v5285_v51 = vadd.f32 %v5284_v6, %v5187_v3 }
 0xcde   :  { %v9632_v62 = vpop.f32.mrf.mxu0 }
 0xcdf   :  { %v5296_v17 = vadd.f32 %v9632_v62, %v9612_v18 }
 0xce0   :  { %v5287_v40 = vpop.f32.mrf.mxu0 }
 0xce1   :  { %v5288_v32 = vadd.f32 %v5287_v40, %v5190_v15  ;;  %v10365_v15 = vld [vmem:[#allocation9 + $0x2b0] sm:$0xff]   ;;  %v10371_v40 = vld [vmem:[#allocation9 + $0x298] sm:$0xff]  }
 0xcf1   :  { %v9651_v14 = vpop.f32.mrf.mxu1 }
 0xcf2   :  { %v5421_v30 = vadd.f32 %v9651_v14, %v5293_v24  ;;  %v10366_v24 = vld [vmem:[#allocation9 + $0x2f0] sm:$0xff]   ;;  %v10367_v14 = vld [vmem:[#allocation9 + $0x2a8] sm:$0xff]  }
 0xcf3   :  { %v5404_v16 = vpop.f32.mrf.mxu1 }
 0xcf4   :  { %v5433_v58 = vadd.f32 %v8132_v54, %v5421_v30  ;;  %v5419_v7 = vadd.f32 %v5404_v16, %v5285_v51  ;;  %v10369_v51 = vld [vmem:[#allocation9 + $0x2a0] sm:$0xff]   ;;  %v10372_v16 = vld [vmem:[#allocation9 + $0x2d8] sm:$0xff]  }
 0xcf5   :  { %v9652_v22 = vpop.f32.mrf.mxu1  ;;  %v10370_v30 = vld [vmem:[#allocation9 + $0x2e0] sm:$0xff]  }
 0xcf6   :  { %v5437_v25 = vmax.f32 %v5433_v58, 0.0  ;;  %v5431_v34 = vadd.f32 %v8132_v54, %v5419_v7  ;;  %v5422_v27 = vadd.f32 %v9652_v22, %v5296_v17  ;;  %v10373_v17 = vld [vmem:[#allocation9 + $0x290] sm:$0xff]   ;;  %v10375_v7 = vld [vmem:[#allocation9 + $0x288] sm:$0xff]  }
 0xcf7   :  { %v5407_v8 = vpop.f32.mrf.mxu1  ;;  %v10374_v58 = vld [vmem:[#allocation9 + $0x2d0] sm:$0xff]   ;;  %v10376_v22 = vld [vmem:[#allocation9 + $0x2c8] sm:$0xff]  }
 0xcf8   :  { %5441 = vst [vmem:[#allocation3 + $0x58] sm:$0xff] %v5437_v25  ;;  %v5435_v63 = vmax.f32 %v5431_v34, 0.0  ;;  %v5434_v21 = vadd.f32 %v8132_v54, %v5422_v27  ;;  %v5420_v52 = vadd.f32 %v5407_v8, %v5288_v32  ;;  %v10377_v32 = vld [vmem:[#allocation9 + $0x280] sm:$0xff]   ;;  %v10379_v8 = vld [vmem:[#allocation7 + $0x5b8] sm:$0xff]  }
 0xcf9   :  { %5588 = vst [vmem:[#allocation3 + $0x58] sm:$0x1] %v11024_v41 }
 0xcfa   :  { %5439 = vst [vmem:[#allocation3] sm:$0xff] %v5435_v63  ;;  %v5438_v29 = vmax.f32 %v5434_v21, 0.0  ;;  %v5432_v13 = vadd.f32 %v8132_v54, %v5420_v52  ;;  %v10368_v54 = vld [vmem:[#allocation9 + $0x2e8] sm:$0xff]   ;;  %v10381_v21 = vld [vmem:[#allocation7 + $0x5b0] sm:$0xff]  }
 0xcfb   :  { %5587 = vst [vmem:[#allocation3] sm:$0x1] %v11024_v41  ;;  %v10382_v52 = vld [vmem:[#allocation7 + $0x570] sm:$0xff]  }
 0xcfc   :  { %5442 = vst [vmem:[#allocation3 + $0x60] sm:$0xff] %v5438_v29  ;;  %v5436_v36 = vmax.f32 %v5432_v13, 0.0  ;;  %v5448_v35 = vpack.c.bf16 %v5438_v29, %v5437_v25  ;;  %v10378_v25 = vld [vmem:[#allocation9 + $0x2c0] sm:$0xff]   ;;  %v10383_v29 = vld [vmem:[#allocation7 + $0x5a8] sm:$0xff]  }
 0xcfd   :  { %v10384_v13 = vld [vmem:[#allocation7 + $0x568] sm:$0xff]  }
 0xcfe   :  { %5440 = vst [vmem:[#allocation3 + $0x8] sm:$0xff] %v5436_v36  ;;  %v5447_v46 = vpack.c.bf16 %v5436_v36, %v5435_v63  ;;  %v10380_v63 = vld [vmem:[#allocation7 + $0x578] sm:$0xff]   ;;  %v10385_v36 = vld [vmem:[#allocation7 + $0x5a0] sm:$0xff]  }
 0xd00   :  { %9669 = vmatprep.mubr.bf16.mxu0 %v5447_v46  ;;  %v10386_v46 = vld [vmem:[#allocation7 + $0x560] sm:$0xff]  }
 0xd01   :  { %9670 = vmatmul.mubr.bf16.vlgmr.msra.gmra.mxu0 %v5448_v35  ;;  %v10388_v35 = vld [vmem:[#allocation7 + $0x558] sm:$0xff]  }
 0xd02   :  { %9694 = vmatpush3.bf16.msra.mxu0 %v10348_v50  ;;  %9709 = vmatprep.mubr.msk.bf16.mxu0 %vm10643_vm0, %v11024_v41  ;;  %v10387_v50 = vld [vmem:[#allocation7 + $0x598] sm:$0xff]  }
 0xd03   :  { %9695 = vmatprep.subr.bf16.mxu0 %v11024_v41 }
 0xd06   :  { %9696 = vmatpush3.bf16.msra.mxu0 %v10350_v38  ;;  %v10389_v38 = vld [vmem:[#allocation7 + $0x590] sm:$0xff]  }
 0xd07   :  { %9697 = vmatprep.subr.bf16.mxu0 %v11024_v41 }
 0xd0a   :  { %9698 = vmatpush3.bf16.msra.mxu0 %v10352_v39  ;;  %v10390_v39 = vld [vmem:[#allocation7 + $0x550] sm:$0xff]  }
 0xd0b   :  { %9699 = vmatprep.subr.bf16.mxu0 %v11024_v41 }
 0xd0e   :  { %9700 = vmatpush3.bf16.msra.mxu0 %v10354_v42  ;;  %v10392_v42 = vld [vmem:[#allocation7 + $0x548] sm:$0xff]  }
 0xd0f   :  { %9701 = vmatprep.subr.bf16.mxu0 %v11024_v41 }
 0xd12   :  { %9702 = vmatpush3.bf16.msra.mxu0 %v10356_v43  ;;  %v10394_v43 = vld [vmem:[#allocation7 + $0x540] sm:$0xff]  }
 0xd13   :  { %9703 = vmatprep.subr.bf16.mxu0 %v11024_v41 }
 0xd16   :  { %9704 = vmatpush3.bf16.msra.mxu0 %v10358_v10 }
 0xd17   :  { %9705 = vmatprep.subr.bf16.mxu0 %v11024_v41 }
 0xd1a   :  { %9706 = vmatpush3.bf16.msra.mxu0 %v10360_v45 }
 0xd1b   :  { %9707 = vmatprep.subr.bf16.mxu0 %v11024_v41 }
 0xd1e   :  { %9708 = vmatpush3.bf16.msra.mxu0 %v10362_v48 }
 0xd1f   :  { %9733 = vmatprep.subr.bf16.mxu0 %v11024_v41 }
 0xdc1   :  { %v9671_v37 = vpop.f32.mrf.mxu0 }
 0xdc2   :  { %v5565_v11 = vadd.f32 %v9671_v37, %v8133_v49 }
 0xdc3   :  { %v5556_v53 = vpop.f32.mrf.mxu0 }
 0xdc4   :  { %v5577_v9 = vadd.f32 %v5565_v11, %v11009_v23  ;;  %v5557_v1 = vadd.f32 %v8133_v49, %v5556_v53 }
 0xdc5   :  { %v9672_v56 = vpop.f32.mrf.mxu0 }
 0xdc6   :  { %5593 = vst [vmem:[#allocation3 + $0x59] sm:$0xff] %v5577_v9  ;;  %v5575_v57 = vadd.f32 %v5557_v1, %v11013_v26  ;;  %v5568_v59 = vadd.f32 %v9672_v56, %v8133_v49 }
 0xdc7   :  { %v5559_v4 = vpop.f32.mrf.mxu0 }
 0xdc8   :  { %5591 = vst [vmem:[#allocation3 + $0x1] sm:$0xff] %v5575_v57  ;;  %v5578_v2 = vadd.f32 %v5568_v59, %v11017_v31  ;;  %v5560_v5 = vadd.f32 %v8133_v49, %v5559_v4  ;;  %v8174_v57 = vld [vmem:[#allocation12 + $0xf] ss:$0 sm:$0xff] }
 0xdca   :  { %5594 = vst [vmem:[#allocation3 + $0x61] sm:$0xff] %v5578_v2  ;;  %v5576_v12 = vadd.f32 %v5560_v5, %v11021_v33 }
 0xdcc   :  { %5592 = vst [vmem:[#allocation3 + $0x9] sm:$0xff] %v5576_v12 }
 0xdd1   :  { %v5596_v0 = vld [vmem:[#allocation3 + $0x58] ss:$2 sm:$0xff]  ;;  %v5616_v23 = vld [vmem:[#allocation3 + $0x59] ss:$2 sm:$0xff] }
 0xdd2   :  { %v11056_v19 = vld [vmem:[#allocation3 + $0x5a] ss:$2 sm:$0xff]  ;;  %v11059_v3 = vld [vmem:[#allocation3 + $0x5b] ss:$2 sm:$0xff] }
 0xdd3   :  { %6054 = vst [vmem:[#allocation3 + $0x60] sm:$0x1] %v11024_v41  ;;  %v5615_v26 = vld [vmem:[#allocation3 + $0x1] ss:$2 sm:$0xff]  ;;  %v5595_v6 = vld [vmem:[#allocation3] ss:$2 sm:$0xff] }
 0xdd4   :  { %v5813_v18 = vld [vmem:[#allocation3 + $0x2] ss:$2 sm:$0xff]  ;;  %6057 = vst [vmem:[#allocation3 + $0x69] sm:$0xff] %v11024_v41  ;;  %v5617_v31 = vpack.c.bf16 %v5616_v23, %v5615_v26  ;;  %v5597_v62 = vpack.c.bf16 %v5596_v0, %v5595_v6  ;;  %v5924_v33 = vld [vmem:[#allocation3 + $0x3] ss:$2 sm:$0xff] }
 0xdd5   :  { %6052 = vst [vmem:[#allocation3 + $0x8] sm:$0x1] %v11024_v41  ;;  %6055 = vst [vmem:[#allocation3 + $0x11] sm:$0xff] %v11024_v41  ;;  %v5815_v34 = vpack.c.bf16 %v11056_v19, %v5813_v18  ;;  %v5926_v27 = vpack.c.bf16 %v11059_v3, %v5924_v33  ;;  %v10396_v33 = vld [vmem:[#allocation7 + $0x5f0] sm:$0xff]  }
 0xdd6   :  { %9690 = vmatmul.mubr.bf16.vlgmr.msra.gmra.mxu1 %v5617_v31  ;;  %9710 = vmatmul.mubr.bf16.vlgmr.msra.gmra.mxu0 %v5597_v62  ;;  %v10395_v31 = vld [vmem:[#allocation7 + $0x5f8] sm:$0xff]  }
 0xdd7   :  { %9714 = vmatpush3.bf16.msra.mxu1 %v10363_v28  ;;  %9734 = vmatpush3.bf16.msra.mxu0 %v10364_v20 }
 0xdd8   :  { %9715 = vmatprep.subr.bf16.mxu1 %v11024_v41  ;;  %9735 = vmatprep.subr.bf16.mxu0 %v11024_v41 }
 0xdd9   :  { %9729 = vmatprep.mubr.msk.bf16.mxu1 %vm10643_vm0, %v11024_v41  ;;  %9749 = vmatprep.mubr.msk.bf16.mxu0 %vm10643_vm0, %v11024_v41 }
 0xddb   :  { %9716 = vmatpush3.bf16.msra.mxu1 %v10365_v15  ;;  %9736 = vmatpush3.bf16.msra.mxu0 %v10366_v24  ;;  %v10397_v15 = vld [vmem:[#allocation7 + $0x5e8] sm:$0xff]   ;;  %v10398_v24 = vld [vmem:[#allocation7 + $0x5e0] sm:$0xff]  }
 0xddc   :  { %9717 = vmatprep.subr.bf16.mxu1 %v11024_v41  ;;  %9737 = vmatprep.subr.bf16.mxu0 %v11024_v41 }
 0xddf   :  { %9718 = vmatpush3.bf16.msra.mxu1 %v10367_v14  ;;  %9738 = vmatpush3.bf16.msra.mxu0 %v10368_v54  ;;  %v10399_v14 = vld [vmem:[#allocation7 + $0x5d8] sm:$0xff]   ;;  %v10400_v54 = vld [vmem:[#allocation7 + $0x5d0] sm:$0xff]  }
 0xde0   :  { %9719 = vmatprep.subr.bf16.mxu1 %v11024_v41  ;;  %9739 = vmatprep.subr.bf16.mxu0 %v11024_v41 }
 0xde3   :  { %9720 = vmatpush3.bf16.msra.mxu1 %v10369_v51  ;;  %9740 = vmatpush3.bf16.msra.mxu0 %v10370_v30  ;;  %v10401_v51 = vld [vmem:[#allocation7 + $0x5c8] sm:$0xff]   ;;  %v10402_v30 = vld [vmem:[#allocation7 + $0x5c0] sm:$0xff]  }
 0xde4   :  { %9721 = vmatprep.subr.bf16.mxu1 %v11024_v41  ;;  %9741 = vmatprep.subr.bf16.mxu0 %v11024_v41 }
 0xde7   :  { %9722 = vmatpush3.bf16.msra.mxu1 %v10371_v40  ;;  %9742 = vmatpush3.bf16.msra.mxu0 %v10372_v16  ;;  %v6279_v40 = vld [vmem:[#allocation3 + $0x12] sm:$0xff]  ;;  %v6280_v16 = vld [vmem:[#allocation3 + $0x6a] sm:$0xff] }
 0xde8   :  { %9723 = vmatprep.subr.bf16.mxu1 %v11024_v41  ;;  %9743 = vmatprep.subr.bf16.mxu0 %v11024_v41 }
 0xdeb   :  { %9724 = vmatpush3.bf16.msra.mxu1 %v10373_v17  ;;  %9744 = vmatpush3.bf16.msra.mxu0 %v10374_v58  ;;  %v6281_v17 = vpack.c.bf16 %v6280_v16, %v6279_v40  ;;  %v10428_v16 = vld [vmem:[#allocation7 + $0x6b0] sm:$0xff]  }
 0xdec   :  { %9725 = vmatprep.subr.bf16.mxu1 %v11024_v41  ;;  %9745 = vmatprep.subr.bf16.mxu0 %v11024_v41 }
 0xdef   :  { %9726 = vmatpush3.bf16.msra.mxu1 %v10375_v7  ;;  %9746 = vmatpush3.bf16.msra.mxu0 %v10376_v22 }
 0xdf0   :  { %9727 = vmatprep.subr.bf16.mxu1 %v11024_v41  ;;  %9747 = vmatprep.subr.bf16.mxu0 %v11024_v41 }
 0xdf3   :  { %9728 = vmatpush3.bf16.msra.mxu1 %v10377_v32  ;;  %9748 = vmatpush3.bf16.msra.mxu0 %v10378_v25  ;;  %v10403_v32 = vld [vmem:[#allocation10 + $0x1b8] sm:$0xff]  }
 0xdf4   :  { %9753 = vmatprep.subr.bf16.mxu1 %v11024_v41  ;;  %9773 = vmatprep.subr.bf16.mxu0 %v11024_v41 }
 0xdf6   :  { %9730 = vmatmul.mubr.bf16.vlgmr.msra.gmra.mxu1 %v5815_v34  ;;  %9750 = vmatmul.mubr.bf16.vlgmr.msra.gmra.mxu0 %v5926_v27  ;;  %v10404_v34 = vld [vmem:[#allocation10 + $0x1b0] sm:$0xff]   ;;  %v10405_v27 = vld [vmem:[#allocation10 + $0x1a8] sm:$0xff]  }
 0xdf7   :  { %9769 = vmatprep.mubr.msk.bf16.mxu1 %vm10643_vm0, %v11024_v41  ;;  %9789 = vmatprep.mubr.msk.bf16.mxu0 %vm10643_vm0, %v11024_v41 }
 0xdf8   :  { %9754 = vmatpush3.bf16.msra.mxu1 %v10379_v8  ;;  %9774 = vmatpush3.bf16.msra.mxu0 %v10380_v63  ;;  %v10406_v8 = vld [vmem:[#allocation10 + $0x1a0] sm:$0xff]   ;;  %v10407_v63 = vld [vmem:[#allocation10 + $0x198] sm:$0xff]  }
 0xdf9   :  { %9755 = vmatprep.subr.bf16.mxu1 %v11024_v41  ;;  %9775 = vmatprep.subr.bf16.mxu0 %v11024_v41 }
 0xdfc   :  { %9756 = vmatpush3.bf16.msra.mxu1 %v10381_v21  ;;  %9776 = vmatpush3.bf16.msra.mxu0 %v10382_v52  ;;  %v10408_v21 = vld [vmem:[#allocation10 + $0x190] sm:$0xff]   ;;  %v10409_v52 = vld [vmem:[#allocation10 + $0x188] sm:$0xff]  }
 0xdfd   :  { %9757 = vmatprep.subr.bf16.mxu1 %v11024_v41  ;;  %9777 = vmatprep.subr.bf16.mxu0 %v11024_v41 }
 0xe00   :  { %9758 = vmatpush3.bf16.msra.mxu1 %v10383_v29  ;;  %9778 = vmatpush3.bf16.msra.mxu0 %v10384_v13  ;;  %v10410_v29 = vld [vmem:[#allocation10 + $0x180] sm:$0xff]   ;;  %v10411_v13 = vld [vmem:[#allocation7 + $0x678] sm:$0xff]  }
 0xe01   :  { %9759 = vmatprep.subr.bf16.mxu1 %v11024_v41  ;;  %9779 = vmatprep.subr.bf16.mxu0 %v11024_v41 }
 0xe04   :  { %9760 = vmatpush3.bf16.msra.mxu1 %v10385_v36  ;;  %9780 = vmatpush3.bf16.msra.mxu0 %v10386_v46  ;;  %v10413_v36 = vld [vmem:[#allocation7 + $0x670] sm:$0xff]   ;;  %v10415_v46 = vld [vmem:[#allocation7 + $0x668] sm:$0xff]  }
 0xe05   :  { %9761 = vmatprep.subr.bf16.mxu1 %v11024_v41  ;;  %9781 = vmatprep.subr.bf16.mxu0 %v11024_v41 }
 0xe08   :  { %9762 = vmatpush3.bf16.msra.mxu1 %v10387_v50  ;;  %9782 = vmatpush3.bf16.msra.mxu0 %v10388_v35 }
 0xe09   :  { %9763 = vmatprep.subr.bf16.mxu1 %v11024_v41  ;;  %9783 = vmatprep.subr.bf16.mxu0 %v11024_v41 }
 0xe0c   :  { %9764 = vmatpush3.bf16.msra.mxu1 %v10389_v38  ;;  %9784 = vmatpush3.bf16.msra.mxu0 %v10390_v39 }
 0xe0d   :  { %9765 = vmatprep.subr.bf16.mxu1 %v11024_v41  ;;  %9785 = vmatprep.subr.bf16.mxu0 %v11024_v41 }
 0xe10   :  { %9766 = vmatpush3.bf16.msra.mxu1 %v10391_v60  ;;  %9786 = vmatpush3.bf16.msra.mxu0 %v10392_v42 }
 0xe11   :  { %9767 = vmatprep.subr.bf16.mxu1 %v11024_v41  ;;  %9787 = vmatprep.subr.bf16.mxu0 %v11024_v41 }
 0xe14   :  { %9768 = vmatpush3.bf16.msra.mxu1 %v10393_v61  ;;  %9788 = vmatpush3.bf16.msra.mxu0 %v10394_v43  ;;  %v8199_v61 = vld [vmem:[#allocation12 + $0x10] ss:$0 sm:$0xff] }
 0xe15   :  { %9793 = vmatprep.subr.bf16.mxu1 %v11024_v41  ;;  %9813 = vmatprep.subr.bf16.mxu0 %v11024_v41 }
 0xe17   :  { %9790 = vmatmul.mubr.bf16.vlgmr.msra.gmra.mxu0 %v6063_v47 }
 0xe18   :  { %9829 = vmatprep.mubr.msk.bf16.mxu0 %vm10643_vm0, %v11024_v41  ;;  %9814 = vmatpush3.bf16.msra.mxu0 %v10403_v32  ;;  %v10430_v32 = vld [vmem:[#allocation7 + $0x6a0] sm:$0xff]  }
 0xe19   :  { %9815 = vmatprep.subr.bf16.mxu0 %v11024_v41 }
 0xe1c   :  { %9816 = vmatpush3.bf16.msra.mxu0 %v10404_v34  ;;  %v10432_v34 = vld [vmem:[#allocation7 + $0x690] sm:$0xff]  }
 0xe1d   :  { %9817 = vmatprep.subr.bf16.mxu0 %v11024_v41 }
 0xe20   :  { %9818 = vmatpush3.bf16.msra.mxu0 %v10405_v27  ;;  %v10433_v27 = vld [vmem:[#allocation7 + $0x688] sm:$0xff]  }
 0xe21   :  { %9819 = vmatprep.subr.bf16.mxu0 %v11024_v41 }
 0xe24   :  { %9820 = vmatpush3.bf16.msra.mxu0 %v10406_v8  ;;  %v10434_v8 = vld [vmem:[#allocation7 + $0x680] sm:$0xff]  }
 0xe25   :  { %9821 = vmatprep.subr.bf16.mxu0 %v11024_v41 }
 0xe28   :  { %9822 = vmatpush3.bf16.msra.mxu0 %v10407_v63 }
 0xe29   :  { %9823 = vmatprep.subr.bf16.mxu0 %v11024_v41 }
 0xe2c   :  { %9824 = vmatpush3.bf16.msra.mxu0 %v10408_v21  ;;  %v10435_v21 = vld [vmem:[#allocation10 + $0x1f8] sm:$0xff]  }
 0xe2d   :  { %9825 = vmatprep.subr.bf16.mxu0 %v11024_v41 }
 0xe30   :  { %9826 = vmatpush3.bf16.msra.mxu0 %v10409_v52  ;;  %v10436_v52 = vld [vmem:[#allocation10 + $0x1f0] sm:$0xff]  }
 0xe31   :  { %9827 = vmatprep.subr.bf16.mxu0 %v11024_v41 }
 0xe34   :  { %9828 = vmatpush3.bf16.msra.mxu0 %v10410_v29  ;;  %v10437_v29 = vld [vmem:[#allocation10 + $0x1e8] sm:$0xff]  }
 0xe35   :  { %9853 = vmatprep.subr.bf16.mxu0 %v11024_v41 }
 0xe96   :  { %v5717_v10 = vpop.f32.mrf.mxu1  ;;  %v5806_v44 = vpop.f32.mrf.mxu0 }
 0xe97   :  { %v5807_v53 = vadd.f32 %v5806_v44, %v5717_v10 }
 0xe98   :  { %v9691_v45 = vpop.f32.mrf.mxu1  ;;  %v9711_v55 = vpop.f32.mrf.mxu0 }
 0xe9a   :  { %v5720_v48 = vpop.f32.mrf.mxu1  ;;  %v5809_v49 = vpop.f32.mrf.mxu0 }
 0xe9b   :  { %v5810_v2 = vadd.f32 %v5809_v49, %v5720_v48 }
 0xe9c   :  { %v9692_v37 = vpop.f32.mrf.mxu1  ;;  %v9712_v11 = vpop.f32.mrf.mxu0 }
 0xeb6   :  { %v5915_v9 = vpop.f32.mrf.mxu1  ;;  %v6026_v1 = vpop.f32.mrf.mxu0 }
 0xeb7   :  { %v5922_v56 = vadd.f32 %v5915_v9, %v5807_v53  ;;  %v10412_v53 = vld [vmem:[#allocation7 + $0x638] sm:$0xff]  }
 0xeb8   :  { %v9731_v59 = vpop.f32.mrf.mxu1  ;;  %v9751_v4 = vpop.f32.mrf.mxu0 }
 0xeb9   :  { %v6033_v5 = vadd.f32 %v6026_v1, %v5922_v56  ;;  %v10414_v1 = vld [vmem:[#allocation7 + $0x630] sm:$0xff]   ;;  %v10416_v56 = vld [vmem:[#allocation7 + $0x628] sm:$0xff]   ;;  %v10419_v59 = vld [vmem:[#allocation7 + $0x658] sm:$0xff]  }
 0xeba   :  { %v5918_v12 = vpop.f32.mrf.mxu1  ;;  %v6029_v0 = vpop.f32.mrf.mxu0  ;;  %v10421_v4 = vld [vmem:[#allocation7 + $0x650] sm:$0xff]  }
 0xebb   :  { %v11110_v28 = vadd.f32 %v8174_v57, %v6033_v5  ;;  %v5923_v19 = vadd.f32 %v5918_v12, %v5810_v2  ;;  %v10418_v2 = vld [vmem:[#allocation7 + $0x620] sm:$0xff]   ;;  %v10423_v5 = vld [vmem:[#allocation7 + $0x648] sm:$0xff]   ;;  %v10420_v12 = vld [vmem:[#allocation7 + $0x618] sm:$0xff]  }
 0xebc   :  { %v9732_v23 = vpop.f32.mrf.mxu1  ;;  %v9752_v20 = vpop.f32.mrf.mxu0 }
 0xebd   :  { %v6049_v3 = vmax.f32 %v11110_v28, 0.0  ;;  %v6034_v26 = vadd.f32 %v6029_v0, %v5923_v19  ;;  %v10425_v0 = vld [vmem:[#allocation7 + $0x640] sm:$0xff]   ;;  %v10422_v19 = vld [vmem:[#allocation7 + $0x610] sm:$0xff]   ;;  %v10424_v23 = vld [vmem:[#allocation7 + $0x608] sm:$0xff]  }
 0xebe   :  { %v10426_v20 = vld [vmem:[#allocation7 + $0x600] sm:$0xff]  }
 0xebf   :  { %6059 = vst [vmem:[#allocation3 + $0x9] sm:$0xff] %v6049_v3  ;;  %v11113_v6 = vadd.f32 %v8174_v57, %v6034_v26  ;;  %v10417_v57 = vld [vmem:[#allocation7 + $0x660] sm:$0xff]  }
 0xec0   :  { %6533 = vst [vmem:[#allocation3 + $0xb] sm:$0x7] %v11024_v41 }
 0xec1   :  { %v6050_v18 = vmax.f32 %v11113_v6, 0.0 }
 0xec3   :  { %6060 = vst [vmem:[#allocation3 + $0x61] sm:$0xff] %v6050_v18  ;;  %v6083_v62 = vpack.c.bf16 %v6050_v18, %v6049_v3  ;;  %v8200_v3 = vld [vmem:[#allocation12 + $0x11] ss:$0 sm:$0xff] }
 0xec4   :  { %6534 = vst [vmem:[#allocation3 + $0x63] sm:$0x7] %v11024_v41 }
 0xec5   :  { %9770 = vmatmul.mubr.bf16.vlgmr.msra.gmra.mxu1 %v6083_v62 }
 0xec6   :  { %9794 = vmatpush3.bf16.msra.mxu1 %v10395_v31  ;;  %9809 = vmatprep.mubr.msk.bf16.mxu1 %vm10643_vm0, %v11024_v41 }
 0xec7   :  { %9795 = vmatprep.subr.bf16.mxu1 %v11024_v41 }
 0xeca   :  { %9796 = vmatpush3.bf16.msra.mxu1 %v10396_v33 }
 0xecb   :  { %9797 = vmatprep.subr.bf16.mxu1 %v11024_v41 }
 0xece   :  { %9798 = vmatpush3.bf16.msra.mxu1 %v10397_v15 }
 0xecf   :  { %9799 = vmatprep.subr.bf16.mxu1 %v11024_v41 }
 0xed2   :  { %9800 = vmatpush3.bf16.msra.mxu1 %v10398_v24 }
 0xed3   :  { %9801 = vmatprep.subr.bf16.mxu1 %v11024_v41 }
 0xed6   :  { %9802 = vmatpush3.bf16.msra.mxu1 %v10399_v14 }
 0xed7   :  { %9803 = vmatprep.subr.bf16.mxu1 %v11024_v41  ;;  %v6272_v58 = vpop.f32.mrf.mxu0 }
 0xed9   :  { %v9791_v7 = vpop.f32.mrf.mxu0 }
 0xeda   :  { %9804 = vmatpush3.bf16.msra.mxu1 %v10400_v54 }
 0xedb   :  { %9805 = vmatprep.subr.bf16.mxu1 %v11024_v41  ;;  %v6275_v22 = vpop.f32.mrf.mxu0 }
 0xedd   :  { %v9792_v25 = vpop.f32.mrf.mxu0 }
 0xede   :  { %9806 = vmatpush3.bf16.msra.mxu1 %v10401_v51  ;;  %v10431_v25 = vld [vmem:[#allocation7 + $0x698] sm:$0xff]  }
 0xedf   :  { %9807 = vmatprep.subr.bf16.mxu1 %v11024_v41 }
 0xee2   :  { %9808 = vmatpush3.bf16.msra.mxu1 %v10402_v30  ;;  %v10427_v30 = vld [vmem:[#allocation7 + $0x6b8] sm:$0xff]  }
 0xee3   :  { %9833 = vmatprep.subr.bf16.mxu1 %v11024_v41 }
 0xee5   :  { %9810 = vmatmul.mubr.bf16.vlgmr.msra.gmra.mxu1 %v6281_v17  ;;  %v10429_v17 = vld [vmem:[#allocation7 + $0x6a8] sm:$0xff]  }
 0xee6   :  { %9849 = vmatprep.mubr.msk.bf16.mxu1 %vm10643_vm0, %v11024_v41  ;;  %9834 = vmatpush3.bf16.msra.mxu1 %v10411_v13  ;;  %v11184_v13 = vld [vmem:[#allocation3 + $0x29] sm:$0xff] }
 0xee7   :  { %9835 = vmatprep.subr.bf16.mxu1 %v11024_v41 }
 0xeea   :  { %9836 = vmatpush3.bf16.msra.mxu1 %v10413_v36  ;;  %v10438_v36 = vld [vmem:[#allocation10 + $0x1e0] sm:$0xff]  }
 0xeeb   :  { %9837 = vmatprep.subr.bf16.mxu1 %v11024_v41 }
 0xeee   :  { %9838 = vmatpush3.bf16.msra.mxu1 %v10415_v46  ;;  %v10439_v46 = vld [vmem:[#allocation10 + $0x1d8] sm:$0xff]  }
 0xeef   :  { %9839 = vmatprep.subr.bf16.mxu1 %v11024_v41 }
 0xef2   :  { %9840 = vmatpush3.bf16.msra.mxu1 %v10417_v57 }
 0xef3   :  { %9841 = vmatprep.subr.bf16.mxu1 %v11024_v41 }
 0xef6   :  { %9842 = vmatpush3.bf16.msra.mxu1 %v10419_v59 }
 0xef7   :  { %9843 = vmatprep.subr.bf16.mxu1 %v11024_v41 }
 0xefa   :  { %9844 = vmatpush3.bf16.msra.mxu1 %v10421_v4 }
 0xefb   :  { %9845 = vmatprep.subr.bf16.mxu1 %v11024_v41 }
 0xefe   :  { %9846 = vmatpush3.bf16.msra.mxu1 %v10423_v5 }
 0xeff   :  { %9847 = vmatprep.subr.bf16.mxu1 %v11024_v41 }
 0xf02   :  { %9848 = vmatpush3.bf16.msra.mxu1 %v10425_v0 }
 0xf03   :  { %9873 = vmatprep.subr.bf16.mxu1 %v11024_v41 }
 0xf85   :  { %v6183_v50 = vpop.f32.mrf.mxu1 }
 0xf86   :  { %v6273_v60 = vadd.f32 %v6272_v58, %v6183_v50  ;;  %v10440_v50 = vld [vmem:[#allocation10 + $0x1d0] sm:$0xff]  }
 0xf87   :  { %v9771_v35 = vpop.f32.mrf.mxu1 }
 0xf88   :  { %v10441_v35 = vld [vmem:[#allocation10 + $0x1c8] sm:$0xff]  }
 0xf89   :  { %v6186_v38 = vpop.f32.mrf.mxu1 }
 0xf8a   :  { %v6276_v10 = vadd.f32 %v6275_v22, %v6186_v38  ;;  %v10443_v38 = vld [vmem:[#allocation7 + $0x738] sm:$0xff]  }
 0xf8b   :  { %v9772_v39 = vpop.f32.mrf.mxu1 }
 0xf8c   :  { %v10445_v39 = vld [vmem:[#allocation7 + $0x730] sm:$0xff]  }
 0xfa5   :  { %v6381_v42 = vpop.f32.mrf.mxu1 }
 0xfa6   :  { %v6388_v43 = vadd.f32 %v6381_v42, %v6273_v60  ;;  %v10447_v60 = vld [vmem:[#allocation7 + $0x728] sm:$0xff]  }
 0xfa7   :  { %v9811_v47 = vpop.f32.mrf.mxu1 }
 0xfa8   :  { %v6398_v44 = vadd.f32 %v8199_v61, %v6388_v43 }
 0xfa9   :  { %v6384_v45 = vpop.f32.mrf.mxu1 }
 0xfaa   :  { %v6400_v55 = vmax.f32 %v6398_v44, 0.0  ;;  %v6389_v48 = vadd.f32 %v6384_v45, %v6276_v10 }
 0xfab   :  { %v9812_v49 = vpop.f32.mrf.mxu1 }
 0xfac   :  { %6402 = vst [vmem:[#allocation3] sm:$0xff] %v6400_v55  ;;  %v6399_v37 = vadd.f32 %v8199_v61, %v6389_v48 }
 0xfad   :  { %6531 = vst [vmem:[#allocation3] sm:$0x7] %v11024_v41 }
 0xfae   :  { %v6401_v11 = vmax.f32 %v6399_v37, 0.0  ;;  %v8233_v37 = vld [vmem:[#allocation12 + $0x12] ss:$0 sm:$0xff] }
 0xfb0   :  { %6403 = vst [vmem:[#allocation3 + $0x58] sm:$0xff] %v6401_v11  ;;  %v6406_v9 = vpack.c.bf16 %v6401_v11, %v6400_v55 }
 0xfb1   :  { %6532 = vst [vmem:[#allocation3 + $0x58] sm:$0x7] %v11024_v41 }
 0xfb2   :  { %9830 = vmatmul.mubr.bf16.vlgmr.msra.gmra.mxu0 %v6406_v9 }
 0xfb3   :  { %9854 = vmatpush3.bf16.msra.mxu0 %v10412_v53  ;;  %9869 = vmatprep.mubr.msk.bf16.mxu0 %vm10643_vm0, %v11024_v41 }
 0xfb4   :  { %9855 = vmatprep.subr.bf16.mxu0 %v11024_v41 }
 0xfb7   :  { %9856 = vmatpush3.bf16.msra.mxu0 %v10414_v1 }
 0xfb8   :  { %9857 = vmatprep.subr.bf16.mxu0 %v11024_v41 }
 0xfbb   :  { %9858 = vmatpush3.bf16.msra.mxu0 %v10416_v56 }
 0xfbc   :  { %9859 = vmatprep.subr.bf16.mxu0 %v11024_v41 }
 0xfbf   :  { %9860 = vmatpush3.bf16.msra.mxu0 %v10418_v2 }
 0xfc0   :  { %9861 = vmatprep.subr.bf16.mxu0 %v11024_v41 }
 0xfc3   :  { %9862 = vmatpush3.bf16.msra.mxu0 %v10420_v12  ;;  %v10444_v12 = vld [vmem:[#allocation7 + $0x6f8] sm:$0xff]  }
 0xfc4   :  { %9863 = vmatprep.subr.bf16.mxu0 %v11024_v41 }
 0xfc7   :  { %9864 = vmatpush3.bf16.msra.mxu0 %v10422_v19  ;;  %v10446_v19 = vld [vmem:[#allocation7 + $0x6f0] sm:$0xff]  }
 0xfc8   :  { %9865 = vmatprep.subr.bf16.mxu0 %v11024_v41 }
 0xfcb   :  { %9866 = vmatpush3.bf16.msra.mxu0 %v10424_v23  ;;  %v10448_v23 = vld [vmem:[#allocation7 + $0x6e8] sm:$0xff]  }
 0xfcc   :  { %9867 = vmatprep.subr.bf16.mxu0 %v11024_v41 }
 0xfcf   :  { %9868 = vmatpush3.bf16.msra.mxu0 %v10426_v20  ;;  %v10449_v20 = vld [vmem:[#allocation7 + $0x720] sm:$0xff]  }
 0xfd0   :  { %9893 = vmatprep.subr.bf16.mxu0 %v11024_v41 }
0x1072   :  { %v6514_v26 = vpop.f32.mrf.mxu0 }
0x1073   :  { %v6515_v18 = vadd.f32 %v8200_v3, %v6514_v26  ;;  %v10453_v26 = vld [vmem:[#allocation7 + $0x710] sm:$0xff]  }
0x1074   :  { %v9831_v31 = vpop.f32.mrf.mxu0 }
0x1075   :  { %v11159_v62 = vadd.f32 %v6515_v18, %v11110_v28  ;;  %v10450_v18 = vld [vmem:[#allocation7 + $0x6e0] sm:$0xff]   ;;  %v10455_v31 = vld [vmem:[#allocation7 + $0x708] sm:$0xff]  }
0x1076   :  { %v6517_v33 = vpop.f32.mrf.mxu0 }
0x1077   :  { %v6529_v15 = vmax.f32 %v11159_v62, 0.0  ;;  %v6518_v24 = vadd.f32 %v8200_v3, %v6517_v33  ;;  %v10451_v3 = vld [vmem:[#allocation7 + $0x718] sm:$0xff]  }
0x1078   :  { %v9832_v14 = vpop.f32.mrf.mxu0  ;;  %v10452_v33 = vld [vmem:[#allocation7 + $0x6d8] sm:$0xff]  }
0x1079   :  { %6535 = vst [vmem:[#allocation3 + $0x3] sm:$0xff] %v6529_v15  ;;  %v11163_v54 = vadd.f32 %v6518_v24, %v11113_v6  ;;  %v10454_v24 = vld [vmem:[#allocation7 + $0x6d0] sm:$0xff]   ;;  %v10456_v14 = vld [vmem:[#allocation7 + $0x6c8] sm:$0xff]  }
0x107b   :  { %v6530_v51 = vmax.f32 %v11163_v54, 0.0 }
0x107d   :  { %6536 = vst [vmem:[#allocation3 + $0x5b] sm:$0xff] %v6530_v51  ;;  %v6559_v40 = vpack.c.bf16 %v6530_v51, %v6529_v15  ;;  %v10457_v15 = vld [vmem:[#allocation7 + $0x700] sm:$0xff]  }
0x107e   :  { %v10458_v51 = vld [vmem:[#allocation7 + $0x6c0] sm:$0xff]  }
0x107f   :  { %9850 = vmatmul.mubr.bf16.vlgmr.msra.gmra.mxu1 %v6559_v40 }
0x1080   :  { %9874 = vmatpush3.bf16.msra.mxu1 %v10427_v30  ;;  %9889 = vmatprep.mubr.msk.bf16.mxu1 %vm10643_vm0, %v11024_v41  ;;  %v6755_v28 = vld [vmem:[#allocation3 + $0x6] sm:$0xff]  ;;  %v8234_v30 = vld [vmem:[#allocation12 + $0x13] ss:$0 sm:$0xff] }
0x1081   :  { %9875 = vmatprep.subr.bf16.mxu1 %v11024_v41  ;;  %7009 = vst [vmem:[#allocation3 + $0x9] sm:$0x1] %v11024_v41  ;;  %v6537_v58 = vld [vmem:[#allocation3] sm:$0xff] }
0x1084   :  { %v6538_v6 = vld [vmem:[#allocation3 + $0x58] sm:$0xff]  ;;  %9876 = vmatpush3.bf16.msra.mxu1 %v10428_v16 }
0x1085   :  { %v6756_v7 = vld [vmem:[#allocation3 + $0x5e] sm:$0xff]  ;;  %v6539_v22 = vpack.c.bf16 %v6538_v6, %v6537_v58  ;;  %9877 = vmatprep.subr.bf16.mxu1 %v11024_v41 }
0x1086   :  { %7010 = vst [vmem:[#allocation3 + $0x61] sm:$0x1] %v11024_v41  ;;  %v6757_v63 = vpack.c.bf16 %v6756_v7, %v6755_v28 }
0x1087   :  { %9870 = vmatmul.mubr.bf16.vlgmr.msra.gmra.mxu0 %v6539_v22 }
0x1088   :  { %9878 = vmatpush3.bf16.msra.mxu1 %v10429_v17  ;;  %9909 = vmatprep.mubr.msk.bf16.mxu0 %vm10643_vm0, %v11024_v41 }
0x1089   :  { %9879 = vmatprep.subr.bf16.mxu1 %v11024_v41  ;;  %9894 = vmatpush3.bf16.msra.mxu0 %v10435_v21 }
0x108a   :  { %9895 = vmatprep.subr.bf16.mxu0 %v11024_v41 }
0x108c   :  { %9880 = vmatpush3.bf16.msra.mxu1 %v10430_v32 }
0x108d   :  { %9881 = vmatprep.subr.bf16.mxu1 %v11024_v41  ;;  %9896 = vmatpush3.bf16.msra.mxu0 %v10436_v52 }
0x108e   :  { %9897 = vmatprep.subr.bf16.mxu0 %v11024_v41 }
0x1090   :  { %9882 = vmatpush3.bf16.msra.mxu1 %v10431_v25 }
0x1091   :  { %9883 = vmatprep.subr.bf16.mxu1 %v11024_v41  ;;  %9898 = vmatpush3.bf16.msra.mxu0 %v10437_v29 }
0x1092   :  { %9899 = vmatprep.subr.bf16.mxu0 %v11184_v13 }
0x1094   :  { %9884 = vmatpush3.bf16.msra.mxu1 %v10432_v34  ;;  %v10459_v34 = vld [vmem:[#allocation7 + $0x778] sm:$0xff]  }
0x1095   :  { %9885 = vmatprep.subr.bf16.mxu1 %v11024_v41  ;;  %9900 = vmatpush3.bf16.msra.mxu0 %v10438_v36  ;;  %v10462_v36 = vld [vmem:[#allocation7 + $0x760] sm:$0xff]  }
0x1096   :  { %9901 = vmatprep.subr.bf16.mxu0 %v11184_v13 }
0x1098   :  { %9886 = vmatpush3.bf16.msra.mxu1 %v10433_v27 }
0x1099   :  { %9887 = vmatprep.subr.bf16.mxu1 %v11024_v41  ;;  %9902 = vmatpush3.bf16.msra.mxu0 %v10439_v46  ;;  %v10463_v46 = vld [vmem:[#allocation7 + $0x758] sm:$0xff]  }
0x109a   :  { %9903 = vmatprep.subr.bf16.mxu0 %v11184_v13 }
0x109c   :  { %9888 = vmatpush3.bf16.msra.mxu1 %v10434_v8  ;;  %v10460_v8 = vld [vmem:[#allocation7 + $0x770] sm:$0xff]  }
0x109d   :  { %9913 = vmatprep.subr.bf16.mxu1 %v11024_v41  ;;  %9904 = vmatpush3.bf16.msra.mxu0 %v10440_v50  ;;  %v10464_v50 = vld [vmem:[#allocation7 + $0x750] sm:$0xff]  }
0x109e   :  { %9905 = vmatprep.subr.bf16.mxu0 %v11184_v13 }
0x109f   :  { %9890 = vmatmul.mubr.bf16.vlgmr.msra.gmra.mxu1 %v6757_v63  ;;  %v10461_v63 = vld [vmem:[#allocation7 + $0x768] sm:$0xff]  }
0x10a0   :  { %9929 = vmatprep.mubr.msk.bf16.mxu1 %vm10643_vm0, %v11024_v41  ;;  %v10442_v41 = vld [vmem:[#allocation10 + $0x1c0] sm:$0xff]   ;;  %9914 = vmatpush3.bf16.msra.mxu1 %v10443_v38 }
0x10a1   :  { %9906 = vmatpush3.bf16.msra.mxu0 %v10441_v35  ;;  %9915 = vmatprep.subr.bf16.mxu1 %v11184_v13  ;;  %v10465_v35 = vld [vmem:[#allocation7 + $0x748] sm:$0xff]  }
0x10a2   :  { %9907 = vmatprep.subr.bf16.mxu0 %v11184_v13 }
0x10a4   :  { %9916 = vmatpush3.bf16.msra.mxu1 %v10445_v39  ;;  %v10467_v39 = vld [vmem:[#allocation10 + $0x238] sm:$0xff]  }
0x10a5   :  { %9908 = vmatpush3.bf16.msra.mxu0 %v10442_v41  ;;  %9917 = vmatprep.subr.bf16.mxu1 %v11184_v13  ;;  %v10466_v41 = vld [vmem:[#allocation7 + $0x740] sm:$0xff]  }
0x10a6   :  { %9933 = vmatprep.subr.bf16.mxu0 %v11184_v13 }
0x10a8   :  { %9918 = vmatpush3.bf16.msra.mxu1 %v10447_v60  ;;  %v10468_v60 = vld [vmem:[#allocation10 + $0x230] sm:$0xff]  }
0x10a9   :  { %9919 = vmatprep.subr.bf16.mxu1 %v11184_v13 }
0x10ac   :  { %9920 = vmatpush3.bf16.msra.mxu1 %v10449_v20 }
0x10ad   :  { %9921 = vmatprep.subr.bf16.mxu1 %v11184_v13 }
0x10b0   :  { %9922 = vmatpush3.bf16.msra.mxu1 %v10451_v3 }
0x10b1   :  { %9923 = vmatprep.subr.bf16.mxu1 %v11184_v13 }
0x10b4   :  { %9924 = vmatpush3.bf16.msra.mxu1 %v10453_v26 }
0x10b5   :  { %9925 = vmatprep.subr.bf16.mxu1 %v11184_v13 }
0x10b8   :  { %9926 = vmatpush3.bf16.msra.mxu1 %v10455_v31 }
0x10b9   :  { %9927 = vmatprep.subr.bf16.mxu1 %v11184_v13 }
0x10bc   :  { %9928 = vmatpush3.bf16.msra.mxu1 %v10457_v15  ;;  %v10476_v15 = vld [vmem:[#allocation7 + $0x7b8] sm:$0xff]  }
0x10bd   :  { %9953 = vmatprep.subr.bf16.mxu1 %v11184_v13 }
0x113f   :  { %v6659_v42 = vpop.f32.mrf.mxu1 }
0x1141   :  { %v9851_v61 = vpop.f32.mrf.mxu1 }
0x1142   :  { %v10470_v61 = vld [vmem:[#allocation10 + $0x220] sm:$0xff]  }
0x1143   :  { %v6662_v43 = vpop.f32.mrf.mxu1 }
0x1145   :  { %v9852_v47 = vpop.f32.mrf.mxu1 }
0x1146   :  { %v10472_v47 = vld [vmem:[#allocation10 + $0x210] sm:$0xff]  }
0x1147   :  { %v6748_v10 = vpop.f32.mrf.mxu0 }
0x1148   :  { %v6749_v48 = vadd.f32 %v6748_v10, %v6659_v42  ;;  %v10469_v42 = vld [vmem:[#allocation10 + $0x228] sm:$0xff]  }
0x1149   :  { %v9871_v44 = vpop.f32.mrf.mxu0  ;;  %v10473_v10 = vld [vmem:[#allocation10 + $0x208] sm:$0xff]  }
0x114a   :  { %v10474_v44 = vld [vmem:[#allocation10 + $0x200] sm:$0xff]  }
0x114b   :  { %v6751_v45 = vpop.f32.mrf.mxu0 }
0x114c   :  { %v6752_v9 = vadd.f32 %v6751_v45, %v6662_v43  ;;  %v10471_v43 = vld [vmem:[#allocation10 + $0x218] sm:$0xff]  }
0x114d   :  { %v9872_v55 = vpop.f32.mrf.mxu0  ;;  %v10475_v45 = vld [vmem:[#allocation7 + $0x7f8] sm:$0xff]  }
0x114e   :  { %v10477_v55 = vld [vmem:[#allocation7 + $0x7f0] sm:$0xff]  }
0x115f   :  { %v6857_v49 = vpop.f32.mrf.mxu1 }
0x1160   :  { %v6864_v11 = vadd.f32 %v6857_v49, %v6749_v48  ;;  %v10479_v48 = vld [vmem:[#allocation7 + $0x7e8] sm:$0xff]   ;;  %v10481_v49 = vld [vmem:[#allocation7 + $0x7e0] sm:$0xff]  }
0x1161   :  { %v9891_v53 = vpop.f32.mrf.mxu1 }
0x1162   :  { %v6874_v1 = vadd.f32 %v8233_v37, %v6864_v11 }
0x1163   :  { %v6860_v56 = vpop.f32.mrf.mxu1 }
0x1164   :  { %v6876_v57 = vmax.f32 %v6874_v1, 0.0  ;;  %v6865_v59 = vadd.f32 %v6860_v56, %v6752_v9 }
0x1165   :  { %v9892_v4 = vpop.f32.mrf.mxu1 }
0x1166   :  { %6878 = vst [vmem:[#allocation3] sm:$0xff] %v6876_v57  ;;  %v6875_v2 = vadd.f32 %v8233_v37, %v6865_v59 }
0x1167   :  { %7007 = vst [vmem:[#allocation3] sm:$0x1] %v11184_v13 }
0x1168   :  { %v6877_v5 = vmax.f32 %v6875_v2, 0.0 }
0x116a   :  { %6879 = vst [vmem:[#allocation3 + $0x58] sm:$0xff] %v6877_v5  ;;  %v6882_v0 = vpack.c.bf16 %v6877_v5, %v6876_v57  ;;  %v8267_v5 = vld [vmem:[#allocation12 + $0x14] ss:$0 sm:$0xff] }
0x116b   :  { %7008 = vst [vmem:[#allocation3 + $0x58] sm:$0x1] %v11184_v13 }
0x116c   :  { %9910 = vmatmul.mubr.bf16.vlgmr.msra.gmra.mxu0 %v6882_v0 }
0x116d   :  { %9934 = vmatpush3.bf16.msra.mxu0 %v10444_v12  ;;  %9949 = vmatprep.mubr.msk.bf16.mxu0 %vm10643_vm0, %v11184_v13 }
0x116e   :  { %9935 = vmatprep.subr.bf16.mxu0 %v11184_v13 }
0x1171   :  { %9936 = vmatpush3.bf16.msra.mxu0 %v10446_v19 }
0x1172   :  { %9937 = vmatprep.subr.bf16.mxu0 %v11184_v13 }
0x1175   :  { %9938 = vmatpush3.bf16.msra.mxu0 %v10448_v23 }
0x1176   :  { %9939 = vmatprep.subr.bf16.mxu0 %v11184_v13 }
0x1179   :  { %9940 = vmatpush3.bf16.msra.mxu0 %v10450_v18 }
0x117a   :  { %9941 = vmatprep.subr.bf16.mxu0 %v11184_v13 }
0x117d   :  { %9942 = vmatpush3.bf16.msra.mxu0 %v10452_v33 }
0x117e   :  { %9943 = vmatprep.subr.bf16.mxu0 %v11184_v13 }
0x1181   :  { %9944 = vmatpush3.bf16.msra.mxu0 %v10454_v24 }
0x1182   :  { %9945 = vmatprep.subr.bf16.mxu0 %v11184_v13 }
0x1185   :  { %9946 = vmatpush3.bf16.msra.mxu0 %v10456_v14  ;;  %v10478_v14 = vld [vmem:[#allocation7 + $0x7b0] sm:$0xff]  }
0x1186   :  { %9947 = vmatprep.subr.bf16.mxu0 %v11184_v13 }
0x1189   :  { %9948 = vmatpush3.bf16.msra.mxu0 %v10458_v51  ;;  %v10480_v51 = vld [vmem:[#allocation7 + $0x7a8] sm:$0xff]  }
0x118a   :  { %9973 = vmatprep.subr.bf16.mxu0 %v11184_v13 }
0x122c   :  { %v6990_v40 = vpop.f32.mrf.mxu0 }
0x122d   :  { %v6991_v16 = vadd.f32 %v8234_v30, %v6990_v40  ;;  %v10485_v40 = vld [vmem:[#allocation7 + $0x7d0] sm:$0xff]  }
0x122e   :  { %v9911_v28 = vpop.f32.mrf.mxu0 }
0x122f   :  { %v11213_v17 = vadd.f32 %v6991_v16, %v11159_v62  ;;  %v10482_v16 = vld [vmem:[#allocation7 + $0x7a0] sm:$0xff]   ;;  %v10487_v28 = vld [vmem:[#allocation7 + $0x7c8] sm:$0xff]  }
0x1230   :  { %v6993_v58 = vpop.f32.mrf.mxu0 }
0x1231   :  { %v7005_v6 = vmax.f32 %v11213_v17, 0.0  ;;  %v6994_v7 = vadd.f32 %v8234_v30, %v6993_v58  ;;  %v10483_v30 = vld [vmem:[#allocation7 + $0x7d8] sm:$0xff]  }
0x1232   :  { %v9912_v22 = vpop.f32.mrf.mxu0  ;;  %v10484_v58 = vld [vmem:[#allocation7 + $0x798] sm:$0xff]  }
0x1233   :  { %7011 = vst [vmem:[#allocation3 + $0x1] sm:$0xff] %v7005_v6  ;;  %v11217_v32 = vadd.f32 %v6994_v7, %v11163_v54  ;;  %v10486_v7 = vld [vmem:[#allocation7 + $0x790] sm:$0xff]   ;;  %v10488_v22 = vld [vmem:[#allocation7 + $0x788] sm:$0xff]  }
0x1235   :  { %v7006_v25 = vmax.f32 %v11217_v32, 0.0 }
0x1237   :  { %7012 = vst [vmem:[#allocation3 + $0x59] sm:$0xff] %v7006_v25  ;;  %v7035_v27 = vpack.c.bf16 %v7006_v25, %v7005_v6  ;;  %v10489_v6 = vld [vmem:[#allocation7 + $0x7c0] sm:$0xff]  }
0x1238   :  { %v10490_v25 = vld [vmem:[#allocation7 + $0x780] sm:$0xff]  }
0x1239   :  { %9930 = vmatmul.mubr.bf16.vlgmr.msra.gmra.mxu1 %v7035_v27 }
0x123a   :  { %9954 = vmatpush3.bf16.msra.mxu1 %v10459_v34  ;;  %9969 = vmatprep.mubr.msk.bf16.mxu1 %vm10643_vm0, %v11184_v13  ;;  %v7231_v62 = vld [vmem:[#allocation3 + $0x2] sm:$0xff] }
0x123b   :  { %9955 = vmatprep.subr.bf16.mxu1 %v11184_v13  ;;  %7483 = vst [vmem:[#allocation3 + $0x9] sm:$0x1] %v11184_v13  ;;  %v7013_v21 = vld [vmem:[#allocation3] sm:$0xff] }
0x123c   :  { %v8268_v34 = vld [vmem:[#allocation12 + $0x15] ss:$0 sm:$0xff] }
0x123e   :  { %v7014_v54 = vld [vmem:[#allocation3 + $0x58] sm:$0xff]  ;;  %9956 = vmatpush3.bf16.msra.mxu1 %v10460_v8 }
0x123f   :  { %v7232_v52 = vld [vmem:[#allocation3 + $0x5a] sm:$0xff]  ;;  %v7015_v29 = vpack.c.bf16 %v7014_v54, %v7013_v21  ;;  %9957 = vmatprep.subr.bf16.mxu1 %v11184_v13 }
0x1240   :  { %7484 = vst [vmem:[#allocation3 + $0x61] sm:$0x1] %v11184_v13  ;;  %v7233_v38 = vpack.c.bf16 %v7232_v52, %v7231_v62 }
0x1241   :  { %9950 = vmatmul.mubr.bf16.vlgmr.msra.gmra.mxu0 %v7015_v29 }
0x1242   :  { %9958 = vmatpush3.bf16.msra.mxu1 %v10461_v63  ;;  %9989 = vmatprep.mubr.msk.bf16.mxu0 %vm10643_vm0, %v11184_v13 }
0x1243   :  { %9959 = vmatprep.subr.bf16.mxu1 %v11184_v13  ;;  %9974 = vmatpush3.bf16.msra.mxu0 %v10467_v39  ;;  %v10495_v39 = vld [vmem:[#allocation7 + $0x818] sm:$0xff]  }
0x1244   :  { %9975 = vmatprep.subr.bf16.mxu0 %v11184_v13 }
0x1246   :  { %9960 = vmatpush3.bf16.msra.mxu1 %v10462_v36  ;;  %v10491_v36 = vld [vmem:[#allocation7 + $0x838] sm:$0xff]  }
0x1247   :  { %9961 = vmatprep.subr.bf16.mxu1 %v11184_v13  ;;  %9976 = vmatpush3.bf16.msra.mxu0 %v10468_v60  ;;  %v10496_v60 = vld [vmem:[#allocation7 + $0x810] sm:$0xff]  }
0x1248   :  { %9977 = vmatprep.subr.bf16.mxu0 %v11184_v13 }
0x124a   :  { %9962 = vmatpush3.bf16.msra.mxu1 %v10463_v46 }
0x124b   :  { %9963 = vmatprep.subr.bf16.mxu1 %v11184_v13  ;;  %9978 = vmatpush3.bf16.msra.mxu0 %v10469_v42  ;;  %v10497_v42 = vld [vmem:[#allocation7 + $0x808] sm:$0xff]  }
0x124c   :  { %9979 = vmatprep.subr.bf16.mxu0 %v11184_v13 }
0x124e   :  { %9964 = vmatpush3.bf16.msra.mxu1 %v10464_v50  ;;  %v10492_v50 = vld [vmem:[#allocation7 + $0x830] sm:$0xff]  }
0x124f   :  { %9965 = vmatprep.subr.bf16.mxu1 %v11184_v13  ;;  %9980 = vmatpush3.bf16.msra.mxu0 %v10470_v61  ;;  %v10498_v61 = vld [vmem:[#allocation7 + $0x800] sm:$0xff]  }
0x1250   :  { %9981 = vmatprep.subr.bf16.mxu0 %v11184_v13 }
0x1252   :  { %9966 = vmatpush3.bf16.msra.mxu1 %v10465_v35 }
0x1253   :  { %9967 = vmatprep.subr.bf16.mxu1 %v11184_v13  ;;  %9982 = vmatpush3.bf16.msra.mxu0 %v10471_v43 }
0x1254   :  { %9983 = vmatprep.subr.bf16.mxu0 %v11184_v13 }
0x1256   :  { %9968 = vmatpush3.bf16.msra.mxu1 %v10466_v41 }
0x1257   :  { %9993 = vmatprep.subr.bf16.mxu1 %v11184_v13  ;;  %9984 = vmatpush3.bf16.msra.mxu0 %v10472_v47 }
0x1258   :  { %9985 = vmatprep.subr.bf16.mxu0 %v11184_v13 }
0x1259   :  { %9970 = vmatmul.mubr.bf16.vlgmr.msra.gmra.mxu1 %v7233_v38 }
0x125a   :  { %10009 = vmatprep.mubr.msk.bf16.mxu1 %vm10643_vm0, %v11184_v13  ;;  %9994 = vmatpush3.bf16.msra.mxu1 %v10475_v45 }
0x125b   :  { %9986 = vmatpush3.bf16.msra.mxu0 %v10473_v10  ;;  %9995 = vmatprep.subr.bf16.mxu1 %v11184_v13 }
0x125c   :  { %9987 = vmatprep.subr.bf16.mxu0 %v11184_v13 }
0x125e   :  { %9996 = vmatpush3.bf16.msra.mxu1 %v10477_v55 }
0x125f   :  { %9988 = vmatpush3.bf16.msra.mxu0 %v10474_v44  ;;  %9997 = vmatprep.subr.bf16.mxu1 %v11184_v13 }
0x1260   :  { %10013 = vmatprep.subr.bf16.mxu0 %v11184_v13 }
0x1262   :  { %9998 = vmatpush3.bf16.msra.mxu1 %v10479_v48 }
0x1263   :  { %9999 = vmatprep.subr.bf16.mxu1 %v11184_v13 }
0x1266   :  { %10000 = vmatpush3.bf16.msra.mxu1 %v10481_v49 }
0x1267   :  { %10001 = vmatprep.subr.bf16.mxu1 %v11184_v13 }
0x126a   :  { %10002 = vmatpush3.bf16.msra.mxu1 %v10483_v30 }
0x126b   :  { %10003 = vmatprep.subr.bf16.mxu1 %v11184_v13 }
0x126e   :  { %10004 = vmatpush3.bf16.msra.mxu1 %v10485_v40 }
0x126f   :  { %10005 = vmatprep.subr.bf16.mxu1 %v11184_v13 }
0x1272   :  { %10006 = vmatpush3.bf16.msra.mxu1 %v10487_v28 }
0x1273   :  { %10007 = vmatprep.subr.bf16.mxu1 %v11184_v13 }
0x1276   :  { %10008 = vmatpush3.bf16.msra.mxu1 %v10489_v6 }
0x1277   :  { %10033 = vmatprep.subr.bf16.mxu1 %v11184_v13 }
0x12f9   :  { %v7135_v37 = vpop.f32.mrf.mxu1 }
0x12fb   :  { %v9931_v11 = vpop.f32.mrf.mxu1 }
0x12fd   :  { %v7138_v53 = vpop.f32.mrf.mxu1 }
0x12ff   :  { %v9932_v9 = vpop.f32.mrf.mxu1 }
0x1301   :  { %v7224_v1 = vpop.f32.mrf.mxu0 }
0x1302   :  { %v7225_v4 = vadd.f32 %v7224_v1, %v7135_v37 }
0x1303   :  { %v9951_v56 = vpop.f32.mrf.mxu0 }
0x1304   :  { %v8301_v56 = vld [vmem:[#allocation12 + $0x16] ss:$0 sm:$0xff] }
0x1305   :  { %v7227_v57 = vpop.f32.mrf.mxu0 }
0x1306   :  { %v7228_v19 = vadd.f32 %v7227_v57, %v7138_v53 }
0x1307   :  { %v9952_v59 = vpop.f32.mrf.mxu0 }
0x1319   :  { %v7333_v2 = vpop.f32.mrf.mxu1 }
0x131a   :  { %v7340_v12 = vadd.f32 %v7333_v2, %v7225_v4 }
0x131b   :  { %v9971_v0 = vpop.f32.mrf.mxu1 }
0x131c   :  { %v7350_v23 = vadd.f32 %v8267_v5, %v7340_v12 }
0x131d   :  { %v7336_v20 = vpop.f32.mrf.mxu1 }
0x131e   :  { %v7352_v3 = vmax.f32 %v7350_v23, 0.0  ;;  %v7341_v26 = vadd.f32 %v7336_v20, %v7228_v19 }
0x131f   :  { %v9972_v18 = vpop.f32.mrf.mxu1 }
0x1320   :  { %7354 = vst [vmem:[#allocation3] sm:$0xff] %v7352_v3  ;;  %v7351_v31 = vadd.f32 %v8267_v5, %v7341_v26 }
0x1321   :  { %7481 = vst [vmem:[#allocation3] sm:$0x1] %v11184_v13 }
0x1322   :  { %v7353_v33 = vmax.f32 %v7351_v31, 0.0 }
0x1324   :  { %7355 = vst [vmem:[#allocation3 + $0x58] sm:$0xff] %v7353_v33  ;;  %v7358_v24 = vpack.c.bf16 %v7353_v33, %v7352_v3 }
0x1325   :  { %7482 = vst [vmem:[#allocation3 + $0x58] sm:$0x1] %v11184_v13 }
0x1326   :  { %9990 = vmatmul.mubr.bf16.vlgmr.msra.gmra.mxu0 %v7358_v24 }
0x1327   :  { %10014 = vmatpush3.bf16.msra.mxu0 %v10476_v15  ;;  %10029 = vmatprep.mubr.msk.bf16.mxu0 %vm10643_vm0, %v11184_v13 }
0x1328   :  { %10015 = vmatprep.subr.bf16.mxu0 %v11184_v13 }
0x132b   :  { %10016 = vmatpush3.bf16.msra.mxu0 %v10478_v14 }
0x132c   :  { %10017 = vmatprep.subr.bf16.mxu0 %v11184_v13 }
0x132f   :  { %10018 = vmatpush3.bf16.msra.mxu0 %v10480_v51 }
0x1330   :  { %10019 = vmatprep.subr.bf16.mxu0 %v11184_v13 }
0x1333   :  { %10020 = vmatpush3.bf16.msra.mxu0 %v10482_v16 }
0x1334   :  { %10021 = vmatprep.subr.bf16.mxu0 %v11184_v13 }
0x1337   :  { %10022 = vmatpush3.bf16.msra.mxu0 %v10484_v58 }
0x1338   :  { %10023 = vmatprep.subr.bf16.mxu0 %v11184_v13 }
0x133b   :  { %10024 = vmatpush3.bf16.msra.mxu0 %v10486_v7 }
0x133c   :  { %10025 = vmatprep.subr.bf16.mxu0 %v11184_v13 }
0x133f   :  { %10026 = vmatpush3.bf16.msra.mxu0 %v10488_v22 }
0x1340   :  { %10027 = vmatprep.subr.bf16.mxu0 %v11184_v13 }
0x1343   :  { %10028 = vmatpush3.bf16.msra.mxu0 %v10490_v25 }
0x13e6   :  { %v7466_v27 = vpop.f32.mrf.mxu0 }
0x13e7   :  { %v7467_v8 = vadd.f32 %v8268_v34, %v7466_v27 }
0x13e8   :  { %v9991_v62 = vpop.f32.mrf.mxu0 }
0x13e9   :  { %v7475_v63 = vadd.f32 %v7467_v8, %v11213_v17  ;;  %v10493_v17 = vld [vmem:[#allocation7 + $0x828] sm:$0xff]  }
0x13ea   :  { %v7469_v21 = vpop.f32.mrf.mxu0 }
0x13eb   :  { %7485 = vst [vmem:[#allocation3 + $0x1] sm:$0xff] %v7475_v63  ;;  %v7470_v54 = vadd.f32 %v8268_v34, %v7469_v21 }
0x13ec   :  { %v9992_v52 = vpop.f32.mrf.mxu0 }
0x13ed   :  { %v7476_v29 = vadd.f32 %v7470_v54, %v11217_v32  ;;  %v10494_v32 = vld [vmem:[#allocation7 + $0x820] sm:$0xff]  }
0x13ef   :  { %7486 = vst [vmem:[#allocation3 + $0x59] sm:$0xff] %v7476_v29  ;;  %v7509_v46 = vpack.c.bf16 %v7476_v29, %v7475_v63 }
0x13f1   :  { %10010 = vmatmul.mubr.bf16.vlgmr.msra.gmra.mxu1 %v7509_v46 }
0x13f2   :  { %10034 = vmatpush3.bf16.msra.mxu1 %v10491_v36  ;;  %10049 = vmatprep.mubr.msk.bf16.mxu1 %vm10643_vm0, %v11184_v13  ;;  %v7487_v35 = vld [vmem:[#allocation3] sm:$0xff] }
0x13f3   :  { %10035 = vmatprep.subr.bf16.mxu1 %v11184_v13  ;;  %v7705_v47 = vld [vmem:[#allocation3 + $0x2] sm:$0xff] }
0x13f6   :  { %v7488_v41 = vld [vmem:[#allocation3 + $0x58] sm:$0xff]  ;;  %10036 = vmatpush3.bf16.msra.mxu1 %v10492_v50 }
0x13f7   :  { %v7489_v38 = vpack.c.bf16 %v7488_v41, %v7487_v35  ;;  %10037 = vmatprep.subr.bf16.mxu1 %v11184_v13  ;;  %v7706_v43 = vld [vmem:[#allocation3 + $0x5a] sm:$0xff] }
0x13f8   :  { %v7707_v10 = vpack.c.bf16 %v7706_v43, %v7705_v47 }
0x13f9   :  { %10030 = vmatmul.mubr.bf16.vlgmr.msra.gmra.mxu0 %v7489_v38 }
0x13fa   :  { %10038 = vmatpush3.bf16.msra.mxu1 %v10493_v17 }
0x13fb   :  { %10039 = vmatprep.subr.bf16.mxu1 %v11184_v13 }
0x13fe   :  { %10040 = vmatpush3.bf16.msra.mxu1 %v10494_v32 }
0x13ff   :  { %10041 = vmatprep.subr.bf16.mxu1 %v11184_v13 }
0x1402   :  { %10042 = vmatpush3.bf16.msra.mxu1 %v10495_v39 }
0x1403   :  { %10043 = vmatprep.subr.bf16.mxu1 %v11184_v13 }
0x1406   :  { %10044 = vmatpush3.bf16.msra.mxu1 %v10496_v60 }
0x1407   :  { %10045 = vmatprep.subr.bf16.mxu1 %v11184_v13 }
0x140a   :  { %10046 = vmatpush3.bf16.msra.mxu1 %v10497_v42 }
0x140b   :  { %10047 = vmatprep.subr.bf16.mxu1 %v11184_v13 }
0x140e   :  { %10048 = vmatpush3.bf16.msra.mxu1 %v10498_v61 }
0x1411   :  { %10050 = vmatmul.mubr.bf16.vlgmr.msra.gmra.mxu1 %v7707_v10 }
0x14b1   :  { %v7609_v44 = vpop.f32.mrf.mxu1 }
0x14b3   :  { %v10011_v45 = vpop.f32.mrf.mxu1 }
0x14b5   :  { %v7612_v55 = vpop.f32.mrf.mxu1 }
0x14b7   :  { %v10012_v48 = vpop.f32.mrf.mxu1 }
0x14b9   :  { %v7698_v49 = vpop.f32.mrf.mxu0 }
0x14ba   :  { %v7699_v9 = vadd.f32 %v7698_v49, %v7609_v44 }
0x14bb   :  { %v10031_v37 = vpop.f32.mrf.mxu0 }
0x14bd   :  { %v7701_v11 = vpop.f32.mrf.mxu0 }
0x14be   :  { %v7702_v4 = vadd.f32 %v7701_v11, %v7612_v55 }
0x14bf   :  { %v10032_v53 = vpop.f32.mrf.mxu0 }
0x14d1   :  { %v7807_v1 = vpop.f32.mrf.mxu1 }
0x14d2   :  { %v7814_v57 = vadd.f32 %v7807_v1, %v7699_v9 }
0x14d3   :  { %v10051_v59 = vpop.f32.mrf.mxu1 }
0x14d4   :  { %v7824_v13 = vadd.f32 %v8301_v56, %v7814_v57 }
0x14d5   :  { %v7810_v2 = vpop.f32.mrf.mxu1 }
0x14d6   :  { %7826 = vst [vmem:[#allocation13] sm:$0xff] %v7824_v13  ;;  %v7815_v5 = vadd.f32 %v7810_v2, %v7702_v4 }
0x14d7   :  { %v10052_v12 = vpop.f32.mrf.mxu1 }
0x14d8   :  { %v7825_v0 = vadd.f32 %v8301_v56, %v7815_v5 }
0x14da   :  { %7827 = vst [vmem:[#allocation13 + $0x8] sm:$0xff] %v7825_v0 }
0x14db   :  { %10614 = shalt.err (!%p10611_p1)
}
0x14dc   :  { %7839 = dma.vmem_to_hbm [thread:$0]  %s7834_s4, 256, %s11285_s5, [#allocation6], %s10636_s7, %s10636_s7, %s10637_s8  }
0x14dd   :  { %10629 = dma.done.wait [#allocation6], 256  }
0x14de   :  { %10630 = vsyncadd [#allocation6], 4294967040 }
0x14df   :  { %7843 = vsyncpa [#allocation5], 1 }
0x14e0   :  { %7844 = vsyncpa [#allocation8], 1 }
0x14e1   :  { %7845 = vsyncpa [#allocation11], 1 }
0x14e2   :  { %7846 = vsyncpa [#allocation6], 1 }

</bundles_post_ra>
